<compile_context>
chip_gen: v7x
topology: tpu7x:2x2x1
jax: 0.10.0
libtpu: 0.0.40
codegen_flags: <defaults>
</compile_context>

<pallas_src>
import functools

import numpy as np

import jax
import jax.numpy as jnp
from jax.experimental import pallas as pl
from jax.experimental.pallas import tpu as pltpu

PADDING = 9                 # F.pad(x, [0, 9, 0, 9]) on NCHW
_TILE_N = 2048              # spatial (lane) tile
_PREC = jax.lax.Precision.DEFAULT   # explicit & consistent: single-pass MXU
_GELU_C = 0.7978845608028654        # sqrt(2/pi)


def _round_up(x, m):
    return ((x + m - 1) // m) * m


def _gelu(x):
    # tanh-form gelu: tanh issues on the EUP slot (free vs. the 4 VALU slots).
    # (torch F.gelu is erf-based; max abs difference ~1e-3.)
    return 0.5 * x * (1.0 + jnp.tanh(_GELU_C * (x + 0.044715 * x * x * x)))


# ----------------------------- Pallas kernels ----------------------------- #

def _lift_kernel(x_ref, g_ref, w_ref, b_ref, o_ref):
    # nn.Linear(3, width) in channels-major form.  K=3 is useless on the MXU, so it
    # runs as three broadcast FMAs on the VPU; the (width, TILE) store is lane-dense.
    xr = x_ref[0]                     # (1, TILE)  a(x, y)
    g = g_ref[...]                    # (2, TILE)  [gridx; gridy]
    w = w_ref[...]                    # (width, 3)
    o_ref[0] = (w[:, 0:1] * xr + w[:, 1:2] * g[0:1, :] + w[:, 2:3] * g[1:2, :]
                + b_ref[...])


def _spectral_kernel(h_ref, p_ref, wr_ref, wi_ref, om_ref, acc_ref):
    # Fused: truncated forward 2D DFT (reduction over spatial tiles, MXU) + per-mode
    # complex channel contraction 'bixy,ioxy->boxy' (VPU, modes on lanes).
    #   h_ref : (B*C, TILE)        activation tile (f32, cast to bf16 for the dot)
    #   p_ref : (TILE, 2*MK) bf16  [Pr | Pi] rows of the truncated DFT matrix
    #   wr/wi : (Cin, Cout, MK)    spectral weights, modes on lanes
    #   om_ref: (B, Cout, 2*MK)    [Re | Im] of the contracted kept modes
    #   acc   : (B*C, 2*MK) f32    spectrum accumulator (VMEM scratch)
    k = pl.program_id(0)

    @pl.when(k == 0)
    def _init():
        acc_ref[...] = jnp.zeros_like(acc_ref)

    acc_ref[...] += jnp.dot(h_ref[...].astype(jnp.bfloat16), p_ref[...],
                            precision=_PREC, preferred_element_type=jnp.float32)

    @pl.when(k == pl.num_programs(0) - 1)
    def _finalize():
        b = om_ref.shape[0]
        cin, cout, mk = wr_ref.shape
        acc = acc_ref[...].reshape(b, cin, 2 * mk)
        sr, si = acc[:, :, :mk], acc[:, :, mk:]
        wr, wi = wr_ref[...], wi_ref[...]
        om_r = jnp.zeros((b, cout, mk), jnp.float32)
        om_i = jnp.zeros((b, cout, mk), jnp.float32)
        for c in range(cin):   # unrolled Cin loop: Cin*Cout broadcast FMAs, modes stay on lanes
            src, sic = sr[:, c:c + 1, :], si[:, c:c + 1, :]     # (B, 1, MK)
            wrc, wic = wr[c:c + 1], wi[c:c + 1]                  # (1, Cout, MK)
            om_r = om_r + src * wrc - sic * wic
            om_i = om_i + src * wic + sic * wrc
        om_ref[...] = jnp.concatenate([om_r, om_i], axis=-1)


def _fourier_layer_kernel(om_ref, q_ref, h_ref, wv_ref, bv_ref, w2_ref, b2_ref,
                          o_ref, *, apply_gelu):
    # xs = Re(om @ Q): fused inverse truncated DFT, K-stacked over [real | imag] modes
    #                  (xs never hits HBM).
    # x1 = mlp2(gelu(mlp1(xs)));  x2 = w_skip(h);  out = (gelu)(x1 + x2)
    # mlp1 and w_skip are stacked block-diagonally -> one (2W, 2W)@(2W, TILE) matmul.
    f32 = jnp.float32
    w = w2_ref.shape[0]
    om = om_ref[0].astype(jnp.bfloat16)                               # (C, 2*MK)
    xs = jnp.dot(om, q_ref[...], precision=_PREC,
                 preferred_element_type=f32)                          # (C, TILE)
    z = jnp.concatenate([xs, h_ref[...]], axis=0)                     # (2W, TILE)
    t = jnp.dot(wv_ref[...], z, precision=_PREC,
                preferred_element_type=f32) + bv_ref[...]             # (2W, TILE)
    x1 = jnp.dot(w2_ref[...], _gelu(t[:w]), precision=_PREC,
                 preferred_element_type=f32) + b2_ref[...]
    y = x1 + t[w:]
    if apply_gelu:
        y = _gelu(y)
    o_ref[...] = y


def _q_kernel(x_ref, w1_ref, b1_ref, w2_ref, b2_ref, o_ref):
    # q: Conv2d(W, 4W, 1) -> gelu -> Conv2d(4W, 1, 1); (1, TILE) store is lane-dense.
    f32 = jnp.float32
    h = _gelu(jnp.dot(w1_ref[...], x_ref[0], precision=_PREC,
                      preferred_element_type=f32) + b1_ref[...])
    o_ref[0] = jnp.dot(w2_ref[...], h, precision=_PREC,
                       preferred_element_type=f32) + b2_ref[...]


# ------------------------------ Pallas wrappers ---------------------------- #

def _lift(x, grid2, p_w, p_b, width):
    B, _, S0 = x.shape
    tile = S0 if S0 <= _TILE_N else _TILE_N
    nt = pl.cdiv(S0, tile)
    return pl.pallas_call(
        _lift_kernel,
        out_shape=jax.ShapeDtypeStruct((B, width, S0), jnp.float32),
        grid=(B, nt),
        in_specs=[pl.BlockSpec((1, 1, tile), lambda b, t: (b, 0, t)),
                  pl.BlockSpec((2, tile), lambda b, t: (0, t)),
                  pl.BlockSpec((width, 3), lambda b, t: (0, 0)),
                  pl.BlockSpec((width, 1), lambda b, t: (0, 0))],
        out_specs=pl.BlockSpec((1, width, tile), lambda b, t: (b, 0, t)),
        compiler_params=pltpu.CompilerParams(
            dimension_semantics=("parallel", "parallel")),
    )(x, grid2, p_w, p_b)


def _spectral_modes(h2, Pcat, wr, wi, tile):
    """Fused truncated forward DFT + complex mode contraction.
    h2: (B*Cin, SP_pad) -> om: (B, Cout, 2*MK)."""
    BC, SPp = h2.shape
    cin, cout, mk = wr.shape
    B = BC // cin
    n_s = SPp // tile          # SP_pad is a multiple of tile -> no partial reduction tiles
    # TODO(synk): when B is large on v7x, split B out of the folded rows into a leading
    #             "parallel" grid axis to use both TensorCores on this kernel.
    return pl.pallas_call(
        _spectral_kernel,
        out_shape=jax.ShapeDtypeStruct((B, cout, 2 * mk), jnp.float32),
        grid=(n_s,),
        in_specs=[pl.BlockSpec((BC, tile), lambda k: (0, k)),
                  pl.BlockSpec((tile, 2 * mk), lambda k: (k, 0)),
                  pl.BlockSpec((cin, cout, mk), lambda k: (0, 0, 0)),
                  pl.BlockSpec((cin, cout, mk), lambda k: (0, 0, 0))],
        out_specs=pl.BlockSpec((B, cout, 2 * mk), lambda k: (0, 0, 0)),
        scratch_shapes=[pltpu.VMEM((BC, 2 * mk), jnp.float32)],
        compiler_params=pltpu.CompilerParams(dimension_semantics=("arbitrary",)),
    )(h2, Pcat, wr, wi)


def _fourier_spatial(om, Qcat, h2, wv, bv, w2, b2, width, tile, *, apply_gelu):
    BC, SPp = h2.shape
    B = BC // width
    m2 = om.shape[-1]
    nt = SPp // tile
    kern = functools.partial(_fourier_layer_kernel, apply_gelu=apply_gelu)
    return pl.pallas_call(
        kern,
        out_shape=jax.ShapeDtypeStruct((BC, SPp), jnp.float32),
        grid=(B, nt),
        in_specs=[pl.BlockSpec((1, width, m2), lambda b, t: (b, 0, 0)),
                  pl.BlockSpec((m2, tile), lambda b, t: (0, t)),
                  pl.BlockSpec((width, tile), lambda b, t: (b, t)),
                  pl.BlockSpec((2 * width, 2 * width), lambda b, t: (0, 0)),
                  pl.BlockSpec((2 * width, 1), lambda b, t: (0, 0)),
                  pl.BlockSpec((width, width), lambda b, t: (0, 0)),
                  pl.BlockSpec((width, 1), lambda b, t: (0, 0))],
        out_specs=pl.BlockSpec((width, tile), lambda b, t: (b, t)),
        compiler_params=pltpu.CompilerParams(
            dimension_semantics=("parallel", "parallel")),
    )(om, Qcat, h2, wv, bv, w2, b2)


def _q_head(h, w1, b1, w2, b2):
    B, C, S0 = h.shape
    C4 = w1.shape[0]
    tile = S0 if S0 <= _TILE_N else _TILE_N
    nt = pl.cdiv(S0, tile)
    return pl.pallas_call(
        _q_kernel,
        out_shape=jax.ShapeDtypeStruct((B, 1, S0), jnp.float32),
        grid=(B, nt),
        in_specs=[pl.BlockSpec((1, C, tile), lambda b, t: (b, 0, t)),
                  pl.BlockSpec((C4, C), lambda b, t: (0, 0)),
                  pl.BlockSpec((C4, 1), lambda b, t: (0, 0)),
                  pl.BlockSpec((1, C4), lambda b, t: (0, 0)),
                  pl.BlockSpec((1, 1), lambda b, t: (0, 0))],
        out_specs=pl.BlockSpec((1, 1, tile), lambda b, t: (b, 0, t)),
        compiler_params=pltpu.CompilerParams(
            dimension_semantics=("parallel", "parallel")),
    )(h, w1, b1, w2, b2)


# ----------------------- truncated-DFT matrices (constants) ----------------- #

def _dft_matrices(hp, wp, m1, m2, sp_pad):
    """Kept-mode DFT matrices reproducing rfft2 / irfft2 restricted to the kept modes.

    Pcat (sp_pad, 2*MK) = [P.real | P.imag]   : spectrum = x_flat @ P  (rows beyond
                                                 hp*wp are zero -> padded tail of the
                                                 flat activation contributes nothing)
    Qcat (2*MK, sp_pad) = [Q.real ; -Q.imag]  : x_flat = Re(om @ Q) = om_cat @ Qcat
    Both stored bf16 (f32 accumulation via preferred_element_type).
    """
    assert 2 * m1 <= hp, "modes1 too large for the padded grid height"
    assert m2 <= wp // 2 + 1, "modes2 too large for the padded grid width"
    k = np.concatenate([np.arange(m1), np.arange(hp - m1, hp)])   # kept rows
    l = np.arange(m2)                                             # kept cols
    h = np.arange(hp)
    w = np.arange(wp)
    ang_h = -2.0 * np.pi * np.outer(h, k) / hp                    # (hp, 2*m1)
    ang_w = -2.0 * np.pi * np.outer(w, l) / wp                    # (wp, m2)
    ph, pw = np.exp(1j * ang_h), np.exp(1j * ang_w)
    P = (ph[:, None, :, None] * pw[None, :, None, :]).reshape(hp * wp, 2 * m1 * m2)
    # irfft along the last axis doubles every non-DC (non-Nyquist) column.
    c = np.where(l == 0, 1.0, 2.0)
    if wp % 2 == 0:
        c = np.where(l == wp // 2, 1.0, c)
    qh = np.exp(-1j * ang_h)
    qw = np.exp(-1j * ang_w) * c[None, :]
    Q = (qh[:, None, :, None] * qw[None, :, None, :]).reshape(hp * wp, 2 * m1 * m2)
    Q = Q.T / float(hp * wp)

    mk = 2 * m1 * m2
    sp = hp * wp
    Pcat = np.zeros((sp_pad, 2 * mk), np.float32)
    Pcat[:sp, :mk], Pcat[:sp, mk:] = P.real, P.imag
    Qcat = np.zeros((2 * mk, sp_pad), np.float32)
    Qcat[:mk, :sp], Qcat[mk:, :sp] = Q.real, -Q.imag
    return jnp.asarray(Pcat, jnp.bfloat16), jnp.asarray(Qcat, jnp.bfloat16)


# --------------------------------- FNO2d ----------------------------------- #

def fno2d_forward(x, params, *, modes1, modes2, width):
    B, S1, S2, _ = x.shape
    S0 = S1 * S2
    Hp, Wp = S1 + PADDING, S2 + PADDING
    SP = Hp * Wp
    tile = min(_TILE_N, _round_up(SP, 128))   # lane-dense spatial tile
    SP_pad = _round_up(SP, tile)              # no partial tiles in the DFT reduction
    mk = 2 * modes1 * modes2

    # (B, S1, S2, 1) -> channels-major flat (B, 1, S1*S2)   (pure reshape)
    x = x.reshape(B, 1, S0)

    # get_grid as a tiny trace-time constant (2, S0) = [gridx; gridy]
    gx = np.repeat(np.linspace(0.0, 1.0, S1, dtype=np.float32), S2)
    gy = np.tile(np.linspace(0.0, 1.0, S2, dtype=np.float32), S1)
    grid2 = jnp.asarray(np.stack([gx, gy]))

    # lift: nn.Linear(3, width)
    h = _lift(x, grid2, params["p_w"], params["p_b"], width)       # (B, W, S0)

    # F.pad(x, [0, 9, 0, 9]) on NCHW, then round the flat padded extent up to a tile
    # multiple (extra rows of Pcat are zero, so the tail never affects the spectrum).
    # TODO(synk): fold this pad into the lift kernel's out_spec to save one HBM pass.
    h = jnp.pad(h.reshape(B * width, S1, S2),
                ((0, 0), (0, PADDING), (0, PADDING))).reshape(B * width, SP)
    if SP_pad > SP:
        h = jnp.pad(h, ((0, 0), (0, SP_pad - SP)))                 # (B*W, SP_pad)

    Pcat, Qcat = _dft_matrices(Hp, Wp, modes1, modes2, SP_pad)

    for l in range(4):
        lp = params["layers"][l]
        om = _spectral_modes(h, Pcat, lp["s_wr"], lp["s_wi"], tile)  # (B, W, 2*MK)
        # block-diagonal stack of mlp1 and the 1x1 skip conv (2W MXU rows per dot)
        wv = (jnp.zeros((2 * width, 2 * width), jnp.float32)
              .at[:width, :width].set(lp["m_w1"])
              .at[width:, width:].set(lp["w_w"]))
        bv = jnp.concatenate([lp["m_b1"], lp["w_b"]], axis=0)
        h = _fourier_spatial(om, Qcat, h, wv, bv, lp["m_w2"], lp["m_b2"],
                             width, tile, apply_gelu=(l < 3))        # (B*W, SP_pad)

    # crop the spatial padding
    # TODO(synk): fold the crop into the q-head input index_map to save one HBM pass.
    h = h[:, :SP].reshape(B * width, Hp, Wp)[:, :S1, :S2].reshape(B, width, S0)

    # q: MLP(width -> 4*width -> 1)
    out = _q_head(h, params["q_w1"], params["q_b1"], params["q_w2"], params["q_b2"])
    return out.reshape(B, S1, S2, 1)


def init_params(key, width, modes1, modes2):
    keys = iter(jax.random.split(key, 64))

    def unif(shape, bound):
        return jax.random.uniform(next(keys), shape, jnp.float32, -bound, bound)

    spec_scale = 1.0 / (width * width)
    mm = modes1 * modes2

    def spectral_weight():
        # torch layout (Cin, Cout, m1, m2) -> kernel layout (Cin, Cout, m1*m2):
        # modes on lanes, relayout done ONCE here (hoisted out of the forward pass).
        w = jax.random.uniform(next(keys), (width, width, modes1, modes2)) * spec_scale
        return w.reshape(width, width, mm)

    params = {
        "p_w": unif((width, 3), (1.0 / 3.0) ** 0.5),
        "p_b": unif((width, 1), (1.0 / 3.0) ** 0.5),
        "q_w1": unif((4 * width, width), (1.0 / width) ** 0.5),
        "q_b1": unif((4 * width, 1), (1.0 / width) ** 0.5),
        "q_w2": unif((1, 4 * width), (1.0 / (4 * width)) ** 0.5),
        "q_b2": unif((1, 1), (1.0 / (4 * width)) ** 0.5),
        "layers": [],
    }
    for _ in range(4):
        w1r, w1i, w2r, w2i = (spectral_weight() for _ in range(4))
        params["layers"].append({
            # weights1 covers rows 0..m1-1, weights2 covers rows H-m1..H-1 -> concat
            # along the mode (lane) axis matches the DFT-matrix mode ordering.
            "s_wr": jnp.concatenate([w1r, w2r], axis=-1),   # (Cin, Cout, 2*m1*m2)
            "s_wi": jnp.concatenate([w1i, w2i], axis=-1),
            "m_w1": unif((width, width), (1.0 / width) ** 0.5),
            "m_b1": unif((width, 1), (1.0 / width) ** 0.5),
            "m_w2": unif((width, width), (1.0 / width) ** 0.5),
            "m_b2": unif((width, 1), (1.0 / width) ** 0.5),
            "w_w": unif((width, width), (1.0 / width) ** 0.5),
            "w_b": unif((width, 1), (1.0 / width) ** 0.5),
        })
    return params


if __name__ == "__main__":
    B, S = 2, 16
    WIDTH, MODES1, MODES2 = 16, 6, 6

    key = jax.random.PRNGKey(0)
    x = jax.random.normal(key, (B, S, S, 1), jnp.float32)
    params = init_params(jax.random.PRNGKey(42), WIDTH, MODES1, MODES2)

    fwd = jax.jit(functools.partial(fno2d_forward, modes1=MODES1, modes2=MODES2,
                                    width=WIDTH))
    y = fwd(x, params)
    jax.block_until_ready(y)
    assert y.shape == (B, S, S, 1) and y.dtype == jnp.float32
    assert bool(jnp.all(jnp.isfinite(y)))
    print("KERNEL_OK")
</pallas_src>

<mosaic_0001>
module attributes {stable_mosaic.version = 11 : i64} {
  func.func @_lift_kernel(%arg0: i32, %arg1: i32, %arg2: memref<1x1x256xf32, #tpu.memory_space<vmem>>, %arg3: memref<2x256xf32, #tpu.memory_space<vmem>>, %arg4: memref<16x3xf32, #tpu.memory_space<vmem>>, %arg5: memref<16x1xf32, #tpu.memory_space<vmem>>, %arg6: memref<1x16x256xf32, #tpu.memory_space<vmem>>) attributes {dimension_semantics = [#tpu.dimension_semantics<parallel>, #tpu.dimension_semantics<parallel>], iteration_bounds = array<i64: 2, 1>, scalar_prefetch = 0 : i64, scratch_operands = 0 : i64, tpu.core_type = #tpu.core_type<tc>, window_params = [{transform_indices = @transform_0, window_bounds = array<i64: 1, 1, 256>}, {transform_indices = @transform_1, window_bounds = array<i64: 2, 256>}, {pipeline_mode = #tpu.pipeline_mode<synchronous>, transform_indices = @transform_2, window_bounds = array<i64: 16, 3>}, {pipeline_mode = #tpu.pipeline_mode<synchronous>, transform_indices = @transform_3, window_bounds = array<i64: 16, 1>}, {transform_indices = @transform_4, window_bounds = array<i64: 1, 16, 256>}]} {
    %c0 = arith.constant 0 : index
    %c0_0 = arith.constant 0 : index
    %c0_1 = arith.constant 0 : index
    %0 = vector.load %arg2[%c0, %c0_0, %c0_1] : memref<1x1x256xf32, #tpu.memory_space<vmem>>, vector<1x1x256xf32>
    %1 = vector.shape_cast %0 : vector<1x1x256xf32> to vector<1x256xf32>
    %c0_2 = arith.constant 0 : index
    %c0_3 = arith.constant 0 : index
    %2 = vector.load %arg3[%c0_2, %c0_3] : memref<2x256xf32, #tpu.memory_space<vmem>>, vector<2x256xf32>
    %c0_4 = arith.constant 0 : index
    %c0_5 = arith.constant 0 : index
    %3 = vector.load %arg4[%c0_4, %c0_5] : memref<16x3xf32, #tpu.memory_space<vmem>>, vector<16x3xf32>
    %4 = vector.extract_strided_slice %3 {offsets = [0, 0], sizes = [16, 1], strides = [1, 1]} : vector<16x3xf32> to vector<16x1xf32>
    %5 = vector.broadcast %4 : vector<16x1xf32> to vector<16x256xf32>
    %6 = vector.broadcast %1 : vector<1x256xf32> to vector<16x256xf32>
    %7 = arith.mulf %5, %6 : vector<16x256xf32>
    %8 = vector.extract_strided_slice %3 {offsets = [0, 1], sizes = [16, 1], strides = [1, 1]} : vector<16x3xf32> to vector<16x1xf32>
    %9 = vector.extract_strided_slice %2 {offsets = [0, 0], sizes = [1, 256], strides = [1, 1]} : vector<2x256xf32> to vector<1x256xf32>
    %10 = vector.broadcast %8 : vector<16x1xf32> to vector<16x256xf32>
    %11 = vector.broadcast %9 : vector<1x256xf32> to vector<16x256xf32>
    %12 = arith.mulf %10, %11 : vector<16x256xf32>
    %13 = arith.addf %7, %12 : vector<16x256xf32>
    %14 = vector.extract_strided_slice %3 {offsets = [0, 2], sizes = [16, 1], strides = [1, 1]} : vector<16x3xf32> to vector<16x1xf32>
    %15 = vector.extract_strided_slice %2 {offsets = [1, 0], sizes = [1, 256], strides = [1, 1]} : vector<2x256xf32> to vector<1x256xf32>
    %16 = vector.broadcast %14 : vector<16x1xf32> to vector<16x256xf32>
    %17 = vector.broadcast %15 : vector<1x256xf32> to vector<16x256xf32>
    %18 = arith.mulf %16, %17 : vector<16x256xf32>
    %19 = arith.addf %13, %18 : vector<16x256xf32>
    %c0_6 = arith.constant 0 : index
    %c0_7 = arith.constant 0 : index
    %20 = vector.load %arg5[%c0_6, %c0_7] : memref<16x1xf32, #tpu.memory_space<vmem>>, vector<16x1xf32>
    %21 = vector.broadcast %20 : vector<16x1xf32> to vector<16x256xf32>
    %22 = arith.addf %19, %21 : vector<16x256xf32>
    %c0_8 = arith.constant 0 : index
    %c0_9 = arith.constant 0 : index
    %c0_10 = arith.constant 0 : index
    %23 = vector.load %arg6[%c0_8, %c0_9, %c0_10] : memref<1x16x256xf32, #tpu.memory_space<vmem>>, vector<1x16x256xf32>
    %24 = vector.shape_cast %23 : vector<1x16x256xf32> to vector<16x256xf32>
    %25 = vector.shape_cast %22 : vector<16x256xf32> to vector<1x16x256xf32>
    tpu.vector_store %arg6[%c0_8, %c0_9, %c0_10], %25 {strides = array<i32>} : memref<1x16x256xf32, #tpu.memory_space<vmem>>, vector<1x16x256xf32>,
    return
  }
  func.func @transform_0(%arg0: i32, %arg1: i32) -> (i32, i32, i32) {
    %c0_i32 = arith.constant 0 : i32
    %c0_i32_0 = arith.constant 0 : i32
    return %arg0, %c0_i32, %arg1 : i32, i32, i32
  }
  func.func @transform_1(%arg0: i32, %arg1: i32) -> (i32, i32) {
    %c0_i32 = arith.constant 0 : i32
    %c0_i32_0 = arith.constant 0 : i32
    return %c0_i32, %arg1 : i32, i32
  }
  func.func @transform_2(%arg0: i32, %arg1: i32) -> (i32, i32) {
    %c0_i32 = arith.constant 0 : i32
    %c0_i32_0 = arith.constant 0 : i32
    %c0_i32_1 = arith.constant 0 : i32
    return %c0_i32, %c0_i32_0 : i32, i32
  }
  func.func @transform_3(%arg0: i32, %arg1: i32) -> (i32, i32) {
    %c0_i32 = arith.constant 0 : i32
    %c0_i32_0 = arith.constant 0 : i32
    %c0_i32_1 = arith.constant 0 : i32
    return %c0_i32, %c0_i32_0 : i32, i32
  }
  func.func @transform_4(%arg0: i32, %arg1: i32) -> (i32, i32, i32) {
    %c0_i32 = arith.constant 0 : i32
    %c0_i32_0 = arith.constant 0 : i32
    return %arg0, %c0_i32, %arg1 : i32, i32, i32
  }
}

module attributes {stable_mosaic.version = 11 : i64} {
  func.func @_spectral_kernel(%arg0: i32, %arg1: memref<32x640xf32, #tpu.memory_space<vmem>>, %arg2: memref<640x144xbf16, #tpu.memory_space<vmem>>, %arg3: memref<16x16x72xf32, #tpu.memory_space<vmem>>, %arg4: memref<16x16x72xf32, #tpu.memory_space<vmem>>, %arg5: memref<2x16x144xf32, #tpu.memory_space<vmem>>, %arg6: memref<32x144xf32, #tpu.memory_space<vmem>>) attributes {dimension_semantics = [#tpu.dimension_semantics<arbitrary>], iteration_bounds = array<i64: 1>, scalar_prefetch = 0 : i64, scratch_operands = 1 : i64, tpu.core_type = #tpu.core_type<tc>, window_params = [{transform_indices = @transform_0, window_bounds = array<i64: 32, 640>}, {transform_indices = @transform_1, window_bounds = array<i64: 640, 144>}, {pipeline_mode = #tpu.pipeline_mode<synchronous>, transform_indices = @transform_2, window_bounds = array<i64: 16, 16, 72>}, {pipeline_mode = #tpu.pipeline_mode<synchronous>, transform_indices = @transform_3, window_bounds = array<i64: 16, 16, 72>}, {pipeline_mode = #tpu.pipeline_mode<synchronous>, transform_indices = @transform_4, window_bounds = array<i64: 2, 16, 144>}]} {
    %c0_i32 = arith.constant 0 : i32
    %0 = arith.cmpi eq, %arg0, %c0_i32 : i32
    %1 = arith.extui %0 : i1 to i32
    %c0_i32_0 = arith.constant 0 : i32
    %2 = arith.cmpi ne, %1, %c0_i32_0 : i32
    scf.if %2 {
      %cst_10 = arith.constant 0.000000e+00 : f32
      %13 = vector.broadcast %cst_10 : f32 to vector<32x144xf32>
      %c0_11 = arith.constant 0 : index
      %c0_12 = arith.constant 0 : index
      %14 = vector.load %arg6[%c0_11, %c0_12] : memref<32x144xf32, #tpu.memory_space<vmem>>, vector<32x144xf32>
      tpu.vector_store %arg6[%c0_11, %c0_12], %13 {strides = array<i32>} : memref<32x144xf32, #tpu.memory_space<vmem>>, vector<32x144xf32>,
    } else {
    }
    %c0 = arith.constant 0 : index
    %c0_1 = arith.constant 0 : index
    %3 = vector.load %arg6[%c0, %c0_1] : memref<32x144xf32, #tpu.memory_space<vmem>>, vector<32x144xf32>
    %c0_2 = arith.constant 0 : index
    %c0_3 = arith.constant 0 : index
    %4 = vector.load %arg1[%c0_2, %c0_3] : memref<32x640xf32, #tpu.memory_space<vmem>>, vector<32x640xf32>
    %5 = arith.truncf %4 : vector<32x640xf32> to vector<32x640xbf16>
    %c0_4 = arith.constant 0 : index
    %c0_5 = arith.constant 0 : index
    %6 = vector.load %arg2[%c0_4, %c0_5] : memref<640x144xbf16, #tpu.memory_space<vmem>>, vector<640x144xbf16>
    %cst = arith.constant dense<0.000000e+00> : vector<32x144xf32>
    %7 = tpu.matmul %5, %6, %cst {dimension_numbers = #tpu.dot_dimension_numbers<[1], [0], [0], [1], [0, 0, 1, 1], [], []>} : vector<32x640xbf16>, vector<640x144xbf16>, vector<32x144xf32> -> vector<32x144xf32>
    %8 = arith.addf %3, %7 : vector<32x144xf32>
    %c0_6 = arith.constant 0 : index
    %c0_7 = arith.constant 0 : index
    %9 = vector.load %arg6[%c0_6, %c0_7] : memref<32x144xf32, #tpu.memory_space<vmem>>, vector<32x144xf32>
    tpu.vector_store %arg6[%c0_6, %c0_7], %8 {strides = array<i32>} : memref<32x144xf32, #tpu.memory_space<vmem>>, vector<32x144xf32>,
    %c0_i32_8 = arith.constant 0 : i32
    %10 = arith.cmpi eq, %arg0, %c0_i32_8 : i32
    %11 = arith.extui %10 : i1 to i32
    %c0_i32_9 = arith.constant 0 : i32
    %12 = arith.cmpi ne, %11, %c0_i32_9 : i32
    scf.if %12 {
      %c0_10 = arith.constant 0 : index
      %c0_11 = arith.constant 0 : index
      %13 = vector.load %arg6[%c0_10, %c0_11] : memref<32x144xf32, #tpu.memory_space<vmem>>, vector<32x144xf32>
      %14 = vector.shape_cast %13 : vector<32x144xf32> to vector<2x16x144xf32>
      %15 = vector.extract_strided_slice %14 {offsets = [0, 0, 0], sizes = [2, 16, 72], strides = [1, 1, 1]} : vector<2x16x144xf32> to vector<2x16x72xf32>
      %16 = vector.extract_strided_slice %14 {offsets = [0, 0, 72], sizes = [2, 16, 72], strides = [1, 1, 1]} : vector<2x16x144xf32> to vector<2x16x72xf32>
      %c0_12 = arith.constant 0 : index
      %c0_13 = arith.constant 0 : index
      %c0_14 = arith.constant 0 : index
      %17 = vector.load %arg3[%c0_12, %c0_13, %c0_14] : memref<16x16x72xf32, #tpu.memory_space<vmem>>, vector<16x16x72xf32>
      %c0_15 = arith.constant 0 : index
      %c0_16 = arith.constant 0 : index
      %c0_17 = arith.constant 0 : index
      %18 = vector.load %arg4[%c0_15, %c0_16, %c0_17] : memref<16x16x72xf32, #tpu.memory_space<vmem>>, vector<16x16x72xf32>
      %cst_18 = arith.constant 0.000000e+00 : f32
      %19 = vector.broadcast %cst_18 : f32 to vector<2x16x72xf32>
      %cst_19 = arith.constant 0.000000e+00 : f32
      %20 = vector.broadcast %cst_19 : f32 to vector<2x16x72xf32>
      %21 = vector.extract_strided_slice %15 {offsets = [0, 0, 0], sizes = [2, 1, 72], strides = [1, 1, 1]} : vector<2x16x72xf32> to vector<2x1x72xf32>
      %22 = vector.extract_strided_slice %16 {offsets = [0, 0, 0], sizes = [2, 1, 72], strides = [1, 1, 1]} : vector<2x16x72xf32> to vector<2x1x72xf32>
      %23 = vector.extract_strided_slice %17 {offsets = [0, 0, 0], sizes = [1, 16, 72], strides = [1, 1, 1]} : vector<16x16x72xf32> to vector<1x16x72xf32>
      %24 = vector.extract_strided_slice %18 {offsets = [0, 0, 0], sizes = [1, 16, 72], strides = [1, 1, 1]} : vector<16x16x72xf32> to vector<1x16x72xf32>
      %25 = vector.broadcast %21 : vector<2x1x72xf32> to vector<2x16x72xf32>
      %26 = vector.broadcast %23 : vector<1x16x72xf32> to vector<2x16x72xf32>
      %27 = arith.mulf %25, %26 : vector<2x16x72xf32>
      %28 = arith.addf %19, %27 : vector<2x16x72xf32>
      %29 = vector.broadcast %22 : vector<2x1x72xf32> to vector<2x16x72xf32>
      %30 = vector.broadcast %24 : vector<1x16x72xf32> to vector<2x16x72xf32>
      %31 = arith.mulf %29, %30 : vector<2x16x72xf32>
      %32 = arith.subf %28, %31 : vector<2x16x72xf32>
      %33 = vector.broadcast %21 : vector<2x1x72xf32> to vector<2x16x72xf32>
      %34 = vector.broadcast %24 : vector<1x16x72xf32> to vector<2x16x72xf32>
      %35 = arith.mulf %33, %34 : vector<2x16x72xf32>
      %36 = arith.addf %20, %35 : vector<2x16x72xf32>
      %37 = vector.broadcast %22 : vector<2x1x72xf32> to vector<2x16x72xf32>
      %38 = vector.broadcast %23 : vector<1x16x72xf32> to vector<2x16x72xf32>
      %39 = arith.mulf %37, %38 : vector<2x16x72xf32>
      %40 = arith.addf %36, %39 : vector<2x16x72xf32>
      %41 = vector.extract_strided_slice %15 {offsets = [0, 1, 0], sizes = [2, 1, 72], strides = [1, 1, 1]} : vector<2x16x72xf32> to vector<2x1x72xf32>
      %42 = vector.extract_strided_slice %16 {offsets = [0, 1, 0], sizes = [2, 1, 72], strides = [1, 1, 1]} : vector<2x16x72xf32> to vector<2x1x72xf32>
      %43 = vector.extract_strided_slice %17 {offsets = [1, 0, 0], sizes = [1, 16, 72], strides = [1, 1, 1]} : vector<16x16x72xf32> to vector<1x16x72xf32>
      %44 = vector.extract_strided_slice %18 {offsets = [1, 0, 0], sizes = [1, 16, 72], strides = [1, 1, 1]} : vector<16x16x72xf32> to vector<1x16x72xf32>
      %45 = vector.broadcast %41 : vector<2x1x72xf32> to vector<2x16x72xf32>
      %46 = vector.broadcast %43 : vector<1x16x72xf32> to vector<2x16x72xf32>
      %47 = arith.mulf %45, %46 : vector<2x16x72xf32>
      %48 = arith.addf %32, %47 : vector<2x16x72xf32>
      %49 = vector.broadcast %42 : vector<2x1x72xf32> to vector<2x16x72xf32>
      %50 = vector.broadcast %44 : vector<1x16x72xf32> to vector<2x16x72xf32>
      %51 = arith.mulf %49, %50 : vector<2x16x72xf32>
      %52 = arith.subf %48, %51 : vector<2x16x72xf32>
      %53 = vector.broadcast %41 : vector<2x1x72xf32> to vector<2x16x72xf32>
      %54 = vector.broadcast %44 : vector<1x16x72xf32> to vector<2x16x72xf32>
      %55 = arith.mulf %53, %54 : vector<2x16x72xf32>
      %56 = arith.addf %40, %55 : vector<2x16x72xf32>
      %57 = vector.broadcast %42 : vector<2x1x72xf32> to vector<2x16x72xf32>
      %58 = vector.broadcast %43 : vector<1x16x72xf32> to vector<2x16x72xf32>
      %59 = arith.mulf %57, %58 : vector<2x16x72xf32>
      %60 = arith.addf %56, %59 : vector<2x16x72xf32>
      %61 = vector.extract_strided_slice %15 {offsets = [0, 2, 0], sizes = [2, 1, 72], strides = [1, 1, 1]} : vector<2x16x72xf32> to vector<2x1x72xf32>
      %62 = vector.extract_strided_slice %16 {offsets = [0, 2, 0], sizes = [2, 1, 72], strides = [1, 1, 1]} : vector<2x16x72xf32> to vector<2x1x72xf32>
      %63 = vector.extract_strided_slice %17 {offsets = [2, 0, 0], sizes = [1, 16, 72], strides = [1, 1, 1]} : vector<16x16x72xf32> to vector<1x16x72xf32>
      %64 = vector.extract_strided_slice %18 {offsets = [2, 0, 0], sizes = [1, 16, 72], strides = [1, 1, 1]} : vector<16x16x72xf32> to vector<1x16x72xf32>
      %65 = vector.broadcast %61 : vector<2x1x72xf32> to vector<2x16x72xf32>
      %66 = vector.broadcast %63 : vector<1x16x72xf32> to vector<2x16x72xf32>
      %67 = arith.mulf %65, %66 : vector<2x16x72xf32>
      %68 = arith.addf %52, %67 : vector<2x16x72xf32>
      %69 = vector.broadcast %62 : vector<2x1x72xf32> to vector<2x16x72xf32>
      %70 = vector.broadcast %64 : vector<1x16x72xf32> to vector<2x16x72xf32>
      %71 = arith.mulf %69, %70 : vector<2x16x72xf32>
      %72 = arith.subf %68, %71 : vector<2x16x72xf32>
      %73 = vector.broadcast %61 : vector<2x1x72xf32> to vector<2x16x72xf32>
      %74 = vector.broadcast %64 : vector<1x16x72xf32> to vector<2x16x72xf32>
      %75 = arith.mulf %73, %74 : vector<2x16x72xf32>
      %76 = arith.addf %60, %75 : vector<2x16x72xf32>
      %77 = vector.broadcast %62 : vector<2x1x72xf32> to vector<2x16x72xf32>
      %78 = vector.broadcast %63 : vector<1x16x72xf32> to vector<2x16x72xf32>
      %79 = arith.mulf %77, %78 : vector<2x16x72xf32>
      %80 = arith.addf %76, %79 : vector<2x16x72xf32>
      %81 = vector.extract_strided_slice %15 {offsets = [0, 3, 0], sizes = [2, 1, 72], strides = [1, 1, 1]} : vector<2x16x72xf32> to vector<2x1x72xf32>
      %82 = vector.extract_strided_slice %16 {offsets = [0, 3, 0], sizes = [2, 1, 72], strides = [1, 1, 1]} : vector<2x16x72xf32> to vector<2x1x72xf32>
      %83 = vector.extract_strided_slice %17 {offsets = [3, 0, 0], sizes = [1, 16, 72], strides = [1, 1, 1]} : vector<16x16x72xf32> to vector<1x16x72xf32>
      %84 = vector.extract_strided_slice %18 {offsets = [3, 0, 0], sizes = [1, 16, 72], strides = [1, 1, 1]} : vector<16x16x72xf32> to vector<1x16x72xf32>
      %85 = vector.broadcast %81 : vector<2x1x72xf32> to vector<2x16x72xf32>
      %86 = vector.broadcast %83 : vector<1x16x72xf32> to vector<2x16x72xf32>
      %87 = arith.mulf %85, %86 : vector<2x16x72xf32>
      %88 = arith.addf %72, %87 : vector<2x16x72xf32>
      %89 = vector.broadcast %82 : vector<2x1x72xf32> to vector<2x16x72xf32>
      %90 = vector.broadcast %84 : vector<1x16x72xf32> to vector<2x16x72xf32>
      %91 = arith.mulf %89, %90 : vector<2x16x72xf32>
      %92 = arith.subf %88, %91 : vector<2x16x72xf32>
      %93 = vector.broadcast %81 : vector<2x1x72xf32> to vector<2x16x72xf32>
      %94 = vector.broadcast %84 : vector<1x16x72xf32> to vector<2x16x72xf32>
      %95 = arith.mulf %93, %94 : vector<2x16x72xf32>
      %96 = arith.addf %80, %95 : vector<2x16x72xf32>
      %97 = vector.broadcast %82 : vector<2x1x72xf32> to vector<2x16x72xf32>
      %98 = vector.broadcast %83 : vector<1x16x72xf32> to vector<2x16x72xf32>
      %99 = arith.mulf %97, %98 : vector<2x16x72xf32>
      %100 = arith.addf %96, %99 : vector<2x16x72xf32>
      %101 = vector.extract_strided_slice %15 {offsets = [0, 4, 0], sizes = [2, 1, 72], strides = [1, 1, 1]} : vector<2x16x72xf32> to vector<2x1x72xf32>
      %102 = vector.extract_strided_slice %16 {offsets = [0, 4, 0], sizes = [2, 1, 72], strides = [1, 1, 1]} : vector<2x16x72xf32> to vector<2x1x72xf32>
      %103 = vector.extract_strided_slice %17 {offsets = [4, 0, 0], sizes = [1, 16, 72], strides = [1, 1, 1]} : vector<16x16x72xf32> to vector<1x16x72xf32>
      %104 = vector.extract_strided_slice %18 {offsets = [4, 0, 0], sizes = [1, 16, 72], strides = [1, 1, 1]} : vector<16x16x72xf32> to vector<1x16x72xf32>
      %105 = vector.broadcast %101 : vector<2x1x72xf32> to vector<2x16x72xf32>
      %106 = vector.broadcast %103 : vector<1x16x72xf32> to vector<2x16x72xf32>
      %107 = arith.mulf %105, %106 : vector<2x16x72xf32>
      %108 = arith.addf %92, %107 : vector<2x16x72xf32>
      %109 = vector.broadcast %102 : vector<2x1x72xf32> to vector<2x16x72xf32>
      %110 = vector.broadcast %104 : vector<1x16x72xf32> to vector<2x16x72xf32>
      %111 = arith.mulf %109, %110 : vector<2x16x72xf32>
      %112 = arith.subf %108, %111 : vector<2x16x72xf32>
      %113 = vector.broadcast %101 : vector<2x1x72xf32> to vector<2x16x72xf32>
      %114 = vector.broadcast %104 : vector<1x16x72xf32> to vector<2x16x72xf32>
      %115 = arith.mulf %113, %114 : vector<2x16x72xf32>
      %116 = arith.addf %100, %115 : vector<2x16x72xf32>
      %117 = vector.broadcast %102 : vector<2x1x72xf32> to vector<2x16x72xf32>
      %118 = vector.broadcast %103 : vector<1x16x72xf32> to vector<2x16x72xf32>
      %119 = arith.mulf %117, %118 : vector<2x16x72xf32>
      %120 = arith.addf %116, %119 : vector<2x16x72xf32>
      %121 = vector.extract_strided_slice %15 {offsets = [0, 5, 0], sizes = [2, 1, 72], strides = [1, 1, 1]} : vector<2x16x72xf32> to vector<2x1x72xf32>
      %122 = vector.extract_strided_slice %16 {offsets = [0, 5, 0], sizes = [2, 1, 72], strides = [1, 1, 1]} : vector<2x16x72xf32> to vector<2x1x72xf32>
      %123 = vector.extract_strided_slice %17 {offsets = [5, 0, 0], sizes = [1, 16, 72], strides = [1, 1, 1]} : vector<16x16x72xf32> to vector<1x16x72xf32>
      %124 = vector.extract_strided_slice %18 {offsets = [5, 0, 0], sizes = [1, 16, 72], strides = [1, 1, 1]} : vector<16x16x72xf32> to vector<1x16x72xf32>
      %125 = vector.broadcast %121 : vector<2x1x72xf32> to vector<2x16x72xf32>
      %126 = vector.broadcast %123 : vector<1x16x72xf32> to vector<2x16x72xf32>
      %127 = arith.mulf %125, %126 : vector<2x16x72xf32>
      %128 = arith.addf %112, %127 : vector<2x16x72xf32>
      %129 = vector.broadcast %122 : vector<2x1x72xf32> to vector<2x16x72xf32>
      %130 = vector.broadcast %124 : vector<1x16x72xf32> to vector<2x16x72xf32>
      %131 = arith.mulf %129, %130 : vector<2x16x72xf32>
      %132 = arith.subf %128, %131 : vector<2x16x72xf32>
      %133 = vector.broadcast %121 : vector<2x1x72xf32> to vector<2x16x72xf32>
      %134 = vector.broadcast %124 : vector<1x16x72xf32> to vector<2x16x72xf32>
      %135 = arith.mulf %133, %134 : vector<2x16x72xf32>
      %136 = arith.addf %120, %135 : vector<2x16x72xf32>
      %137 = vector.broadcast %122 : vector<2x1x72xf32> to vector<2x16x72xf32>
      %138 = vector.broadcast %123 : vector<1x16x72xf32> to vector<2x16x72xf32>
      %139 = arith.mulf %137, %138 : vector<2x16x72xf32>
      %140 = arith.addf %136, %139 : vector<2x16x72xf32>
      %141 = vector.extract_strided_slice %15 {offsets = [0, 6, 0], sizes = [2, 1, 72], strides = [1, 1, 1]} : vector<2x16x72xf32> to vector<2x1x72xf32>
      %142 = vector.extract_strided_slice %16 {offsets = [0, 6, 0], sizes = [2, 1, 72], strides = [1, 1, 1]} : vector<2x16x72xf32> to vector<2x1x72xf32>
      %143 = vector.extract_strided_slice %17 {offsets = [6, 0, 0], sizes = [1, 16, 72], strides = [1, 1, 1]} : vector<16x16x72xf32> to vector<1x16x72xf32>
      %144 = vector.extract_strided_slice %18 {offsets = [6, 0, 0], sizes = [1, 16, 72], strides = [1, 1, 1]} : vector<16x16x72xf32> to vector<1x16x72xf32>
      %145 = vector.broadcast %141 : vector<2x1x72xf32> to vector<2x16x72xf32>
      %146 = vector.broadcast %143 : vector<1x16x72xf32> to vector<2x16x72xf32>
      %147 = arith.mulf %145, %146 : vector<2x16x72xf32>
      %148 = arith.addf %132, %147 : vector<2x16x72xf32>
      %149 = vector.broadcast %142 : vector<2x1x72xf32> to vector<2x16x72xf32>
      %150 = vector.broadcast %144 : vector<1x16x72xf32> to vector<2x16x72xf32>
      %151 = arith.mulf %149, %150 : vector<2x16x72xf32>
      %152 = arith.subf %148, %151 : vector<2x16x72xf32>
      %153 = vector.broadcast %141 : vector<2x1x72xf32> to vector<2x16x72xf32>
      %154 = vector.broadcast %144 : vector<1x16x72xf32> to vector<2x16x72xf32>
      %155 = arith.mulf %153, %154 : vector<2x16x72xf32>
      %156 = arith.addf %140, %155 : vector<2x16x72xf32>
      %157 = vector.broadcast %142 : vector<2x1x72xf32> to vector<2x16x72xf32>
      %158 = vector.broadcast %143 : vector<1x16x72xf32> to vector<2x16x72xf32>
      %159 = arith.mulf %157, %158 : vector<2x16x72xf32>
      %160 = arith.addf %156, %159 : vector<2x16x72xf32>
      %161 = vector.extract_strided_slice %15 {offsets = [0, 7, 0], sizes = [2, 1, 72], strides = [1, 1, 1]} : vector<2x16x72xf32> to vector<2x1x72xf32>
      %162 = vector.extract_strided_slice %16 {offsets = [0, 7, 0], sizes = [2, 1, 72], strides = [1, 1, 1]} : vector<2x16x72xf32> to vector<2x1x72xf32>
      %163 = vector.extract_strided_slice %17 {offsets = [7, 0, 0], sizes = [1, 16, 72], strides = [1, 1, 1]} : vector<16x16x72xf32> to vector<1x16x72xf32>
      %164 = vector.extract_strided_slice %18 {offsets = [7, 0, 0], sizes = [1, 16, 72], strides = [1, 1, 1]} : vector<16x16x72xf32> to vector<1x16x72xf32>
      %165 = vector.broadcast %161 : vector<2x1x72xf32> to vector<2x16x72xf32>
      %166 = vector.broadcast %163 : vector<1x16x72xf32> to vector<2x16x72xf32>
      %167 = arith.mulf %165, %166 : vector<2x16x72xf32>
      %168 = arith.addf %152, %167 : vector<2x16x72xf32>
      %169 = vector.broadcast %162 : vector<2x1x72xf32> to vector<2x16x72xf32>
      %170 = vector.broadcast %164 : vector<1x16x72xf32> to vector<2x16x72xf32>
      %171 = arith.mulf %169, %170 : vector<2x16x72xf32>
      %172 = arith.subf %168, %171 : vector<2x16x72xf32>
      %173 = vector.broadcast %161 : vector<2x1x72xf32> to vector<2x16x72xf32>
      %174 = vector.broadcast %164 : vector<1x16x72xf32> to vector<2x16x72xf32>
      %175 = arith.mulf %173, %174 : vector<2x16x72xf32>
      %176 = arith.addf %160, %175 : vector<2x16x72xf32>
      %177 = vector.broadcast %162 : vector<2x1x72xf32> to vector<2x16x72xf32>
      %178 = vector.broadcast %163 : vector<1x16x72xf32> to vector<2x16x72xf32>
      %179 = arith.mulf %177, %178 : vector<2x16x72xf32>
      %180 = arith.addf %176, %179 : vector<2x16x72xf32>
      %181 = vector.extract_strided_slice %15 {offsets = [0, 8, 0], sizes = [2, 1, 72], strides = [1, 1, 1]} : vector<2x16x72xf32> to vector<2x1x72xf32>
      %182 = vector.extract_strided_slice %16 {offsets = [0, 8, 0], sizes = [2, 1, 72], strides = [1, 1, 1]} : vector<2x16x72xf32> to vector<2x1x72xf32>
      %183 = vector.extract_strided_slice %17 {offsets = [8, 0, 0], sizes = [1, 16, 72], strides = [1, 1, 1]} : vector<16x16x72xf32> to vector<1x16x72xf32>
      %184 = vector.extract_strided_slice %18 {offsets = [8, 0, 0], sizes = [1, 16, 72], strides = [1, 1, 1]} : vector<16x16x72xf32> to vector<1x16x72xf32>
      %185 = vector.broadcast %181 : vector<2x1x72xf32> to vector<2x16x72xf32>
      %186 = vector.broadcast %183 : vector<1x16x72xf32> to vector<2x16x72xf32>
      %187 = arith.mulf %185, %186 : vector<2x16x72xf32>
      %188 = arith.addf %172, %187 : vector<2x16x72xf32>
      %189 = vector.broadcast %182 : vector<2x1x72xf32> to vector<2x16x72xf32>
      %190 = vector.broadcast %184 : vector<1x16x72xf32> to vector<2x16x72xf32>
      %191 = arith.mulf %189, %190 : vector<2x16x72xf32>
      %192 = arith.subf %188, %191 : vector<2x16x72xf32>
      %193 = vector.broadcast %181 : vector<2x1x72xf32> to vector<2x16x72xf32>
      %194 = vector.broadcast %184 : vector<1x16x72xf32> to vector<2x16x72xf32>
      %195 = arith.mulf %193, %194 : vector<2x16x72xf32>
      %196 = arith.addf %180, %195 : vector<2x16x72xf32>
      %197 = vector.broadcast %182 : vector<2x1x72xf32> to vector<2x16x72xf32>
      %198 = vector.broadcast %183 : vector<1x16x72xf32> to vector<2x16x72xf32>
      %199 = arith.mulf %197, %198 : vector<2x16x72xf32>
      %200 = arith.addf %196, %199 : vector<2x16x72xf32>
      %201 = vector.extract_strided_slice %15 {offsets = [0, 9, 0], sizes = [2, 1, 72], strides = [1, 1, 1]} : vector<2x16x72xf32> to vector<2x1x72xf32>
      %202 = vector.extract_strided_slice %16 {offsets = [0, 9, 0], sizes = [2, 1, 72], strides = [1, 1, 1]} : vector<2x16x72xf32> to vector<2x1x72xf32>
      %203 = vector.extract_strided_slice %17 {offsets = [9, 0, 0], sizes = [1, 16, 72], strides = [1, 1, 1]} : vector<16x16x72xf32> to vector<1x16x72xf32>
      %204 = vector.extract_strided_slice %18 {offsets = [9, 0, 0], sizes = [1, 16, 72], strides = [1, 1, 1]} : vector<16x16x72xf32> to vector<1x16x72xf32>
      %205 = vector.broadcast %201 : vector<2x1x72xf32> to vector<2x16x72xf32>
      %206 = vector.broadcast %203 : vector<1x16x72xf32> to vector<2x16x72xf32>
      %207 = arith.mulf %205, %206 : vector<2x16x72xf32>
      %208 = arith.addf %192, %207 : vector<2x16x72xf32>
      %209 = vector.broadcast %202 : vector<2x1x72xf32> to vector<2x16x72xf32>
      %210 = vector.broadcast %204 : vector<1x16x72xf32> to vector<2x16x72xf32>
      %211 = arith.mulf %209, %210 : vector<2x16x72xf32>
      %212 = arith.subf %208, %211 : vector<2x16x72xf32>
      %213 = vector.broadcast %201 : vector<2x1x72xf32> to vector<2x16x72xf32>
      %214 = vector.broadcast %204 : vector<1x16x72xf32> to vector<2x16x72xf32>
      %215 = arith.mulf %213, %214 : vector<2x16x72xf32>
      %216 = arith.addf %200, %215 : vector<2x16x72xf32>
      %217 = vector.broadcast %202 : vector<2x1x72xf32> to vector<2x16x72xf32>
      %218 = vector.broadcast %203 : vector<1x16x72xf32> to vector<2x16x72xf32>
      %219 = arith.mulf %217, %218 : vector<2x16x72xf32>
      %220 = arith.addf %216, %219 : vector<2x16x72xf32>
      %221 = vector.extract_strided_slice %15 {offsets = [0, 10, 0], sizes = [2, 1, 72], strides = [1, 1, 1]} : vector<2x16x72xf32> to vector<2x1x72xf32>
      %222 = vector.extract_strided_slice %16 {offsets = [0, 10, 0], sizes = [2, 1, 72], strides = [1, 1, 1]} : vector<2x16x72xf32> to vector<2x1x72xf32>
      %223 = vector.extract_strided_slice %17 {offsets = [10, 0, 0], sizes = [1, 16, 72], strides = [1, 1, 1]} : vector<16x16x72xf32> to vector<1x16x72xf32>
      %224 = vector.extract_strided_slice %18 {offsets = [10, 0, 0], sizes = [1, 16, 72], strides = [1, 1, 1]} : vector<16x16x72xf32> to vector<1x16x72xf32>
      %225 = vector.broadcast %221 : vector<2x1x72xf32> to vector<2x16x72xf32>
      %226 = vector.broadcast %223 : vector<1x16x72xf32> to vector<2x16x72xf32>
      %227 = arith.mulf %225, %226 : vector<2x16x72xf32>
      %228 = arith.addf %212, %227 : vector<2x16x72xf32>
      %229 = vector.broadcast %222 : vector<2x1x72xf32> to vector<2x16x72xf32>
      %230 = vector.broadcast %224 : vector<1x16x72xf32> to vector<2x16x72xf32>
      %231 = arith.mulf %229, %230 : vector<2x16x72xf32>
      %232 = arith.subf %228, %231 : vector<2x16x72xf32>
      %233 = vector.broadcast %221 : vector<2x1x72xf32> to vector<2x16x72xf32>
      %234 = vector.broadcast %224 : vector<1x16x72xf32> to vector<2x16x72xf32>
      %235 = arith.mulf %233, %234 : vector<2x16x72xf32>
      %236 = arith.addf %220, %235 : vector<2x16x72xf32>
      %237 = vector.broadcast %222 : vector<2x1x72xf32> to vector<2x16x72xf32>
      %238 = vector.broadcast %223 : vector<1x16x72xf32> to vector<2x16x72xf32>
      %239 = arith.mulf %237, %238 : vector<2x16x72xf32>
      %240 = arith.addf %236, %239 : vector<2x16x72xf32>
      %241 = vector.extract_strided_slice %15 {offsets = [0, 11, 0], sizes = [2, 1, 72], strides = [1, 1, 1]} : vector<2x16x72xf32> to vector<2x1x72xf32>
      %242 = vector.extract_strided_slice %16 {offsets = [0, 11, 0], sizes = [2, 1, 72], strides = [1, 1, 1]} : vector<2x16x72xf32> to vector<2x1x72xf32>
      %243 = vector.extract_strided_slice %17 {offsets = [11, 0, 0], sizes = [1, 16, 72], strides = [1, 1, 1]} : vector<16x16x72xf32> to vector<1x16x72xf32>
      %244 = vector.extract_strided_slice %18 {offsets = [11, 0, 0], sizes = [1, 16, 72], strides = [1, 1, 1]} : vector<16x16x72xf32> to vector<1x16x72xf32>
      %245 = vector.broadcast %241 : vector<2x1x72xf32> to vector<2x16x72xf32>
      %246 = vector.broadcast %243 : vector<1x16x72xf32> to vector<2x16x72xf32>
      %247 = arith.mulf %245, %246 : vector<2x16x72xf32>
      %248 = arith.addf %232, %247 : vector<2x16x72xf32>
      %249 = vector.broadcast %242 : vector<2x1x72xf32> to vector<2x16x72xf32>
      %250 = vector.broadcast %244 : vector<1x16x72xf32> to vector<2x16x72xf32>
      %251 = arith.mulf %249, %250 : vector<2x16x72xf32>
      %252 = arith.subf %248, %251 : vector<2x16x72xf32>
      %253 = vector.broadcast %241 : vector<2x1x72xf32> to vector<2x16x72xf32>
      %254 = vector.broadcast %244 : vector<1x16x72xf32> to vector<2x16x72xf32>
      %255 = arith.mulf %253, %254 : vector<2x16x72xf32>
      %256 = arith.addf %240, %255 : vector<2x16x72xf32>
      %257 = vector.broadcast %242 : vector<2x1x72xf32> to vector<2x16x72xf32>
      %258 = vector.broadcast %243 : vector<1x16x72xf32> to vector<2x16x72xf32>
      %259 = arith.mulf %257, %258 : vector<2x16x72xf32>
      %260 = arith.addf %256, %259 : vector<2x16x72xf32>
      %261 = vector.extract_strided_slice %15 {offsets = [0, 12, 0], sizes = [2, 1, 72], strides = [1, 1, 1]} : vector<2x16x72xf32> to vector<2x1x72xf32>
      %262 = vector.extract_strided_slice %16 {offsets = [0, 12, 0], sizes = [2, 1, 72], strides = [1, 1, 1]} : vector<2x16x72xf32> to vector<2x1x72xf32>
      %263 = vector.extract_strided_slice %17 {offsets = [12, 0, 0], sizes = [1, 16, 72], strides = [1, 1, 1]} : vector<16x16x72xf32> to vector<1x16x72xf32>
      %264 = vector.extract_strided_slice %18 {offsets = [12, 0, 0], sizes = [1, 16, 72], strides = [1, 1, 1]} : vector<16x16x72xf32> to vector<1x16x72xf32>
      %265 = vector.broadcast %261 : vector<2x1x72xf32> to vector<2x16x72xf32>
      %266 = vector.broadcast %263 : vector<1x16x72xf32> to vector<2x16x72xf32>
      %267 = arith.mulf %265, %266 : vector<2x16x72xf32>
      %268 = arith.addf %252, %267 : vector<2x16x72xf32>
      %269 = vector.broadcast %262 : vector<2x1x72xf32> to vector<2x16x72xf32>
      %270 = vector.broadcast %264 : vector<1x16x72xf32> to vector<2x16x72xf32>
      %271 = arith.mulf %269, %270 : vector<2x16x72xf32>
      %272 = arith.subf %268, %271 : vector<2x16x72xf32>
      %273 = vector.broadcast %261 : vector<2x1x72xf32> to vector<2x16x72xf32>
      %274 = vector.broadcast %264 : vector<1x16x72xf32> to vector<2x16x72xf32>
      %275 = arith.mulf %273, %274 : vector<2x16x72xf32>
      %276 = arith.addf %260, %275 : vector<2x16x72xf32>
      %277 = vector.broadcast %262 : vector<2x1x72xf32> to vector<2x16x72xf32>
      %278 = vector.broadcast %263 : vector<1x16x72xf32> to vector<2x16x72xf32>
      %279 = arith.mulf %277, %278 : vector<2x16x72xf32>
      %280 = arith.addf %276, %279 : vector<2x16x72xf32>
      %281 = vector.extract_strided_slice %15 {offsets = [0, 13, 0], sizes = [2, 1, 72], strides = [1, 1, 1]} : vector<2x16x72xf32> to vector<2x1x72xf32>
      %282 = vector.extract_strided_slice %16 {offsets = [0, 13, 0], sizes = [2, 1, 72], strides = [1, 1, 1]} : vector<2x16x72xf32> to vector<2x1x72xf32>
      %283 = vector.extract_strided_slice %17 {offsets = [13, 0, 0], sizes = [1, 16, 72], strides = [1, 1, 1]} : vector<16x16x72xf32> to vector<1x16x72xf32>
      %284 = vector.extract_strided_slice %18 {offsets = [13, 0, 0], sizes = [1, 16, 72], strides = [1, 1, 1]} : vector<16x16x72xf32> to vector<1x16x72xf32>
      %285 = vector.broadcast %281 : vector<2x1x72xf32> to vector<2x16x72xf32>
      %286 = vector.broadcast %283 : vector<1x16x72xf32> to vector<2x16x72xf32>
      %287 = arith.mulf %285, %286 : vector<2x16x72xf32>
      %288 = arith.addf %272, %287 : vector<2x16x72xf32>
      %289 = vector.broadcast %282 : vector<2x1x72xf32> to vector<2x16x72xf32>
      %290 = vector.broadcast %284 : vector<1x16x72xf32> to vector<2x16x72xf32>
      %291 = arith.mulf %289, %290 : vector<2x16x72xf32>
      %292 = arith.subf %288, %291 : vector<2x16x72xf32>
      %293 = vector.broadcast %281 : vector<2x1x72xf32> to vector<2x16x72xf32>
      %294 = vector.broadcast %284 : vector<1x16x72xf32> to vector<2x16x72xf32>
      %295 = arith.mulf %293, %294 : vector<2x16x72xf32>
      %296 = arith.addf %280, %295 : vector<2x16x72xf32>
      %297 = vector.broadcast %282 : vector<2x1x72xf32> to vector<2x16x72xf32>
      %298 = vector.broadcast %283 : vector<1x16x72xf32> to vector<2x16x72xf32>
      %299 = arith.mulf %297, %298 : vector<2x16x72xf32>
      %300 = arith.addf %296, %299 : vector<2x16x72xf32>
      %301 = vector.extract_strided_slice %15 {offsets = [0, 14, 0], sizes = [2, 1, 72], strides = [1, 1, 1]} : vector<2x16x72xf32> to vector<2x1x72xf32>
      %302 = vector.extract_strided_slice %16 {offsets = [0, 14, 0], sizes = [2, 1, 72], strides = [1, 1, 1]} : vector<2x16x72xf32> to vector<2x1x72xf32>
      %303 = vector.extract_strided_slice %17 {offsets = [14, 0, 0], sizes = [1, 16, 72], strides = [1, 1, 1]} : vector<16x16x72xf32> to vector<1x16x72xf32>
      %304 = vector.extract_strided_slice %18 {offsets = [14, 0, 0], sizes = [1, 16, 72], strides = [1, 1, 1]} : vector<16x16x72xf32> to vector<1x16x72xf32>
      %305 = vector.broadcast %301 : vector<2x1x72xf32> to vector<2x16x72xf32>
      %306 = vector.broadcast %303 : vector<1x16x72xf32> to vector<2x16x72xf32>
      %307 = arith.mulf %305, %306 : vector<2x16x72xf32>
      %308 = arith.addf %292, %307 : vector<2x16x72xf32>
      %309 = vector.broadcast %302 : vector<2x1x72xf32> to vector<2x16x72xf32>
      %310 = vector.broadcast %304 : vector<1x16x72xf32> to vector<2x16x72xf32>
      %311 = arith.mulf %309, %310 : vector<2x16x72xf32>
      %312 = arith.subf %308, %311 : vector<2x16x72xf32>
      %313 = vector.broadcast %301 : vector<2x1x72xf32> to vector<2x16x72xf32>
      %314 = vector.broadcast %304 : vector<1x16x72xf32> to vector<2x16x72xf32>
      %315 = arith.mulf %313, %314 : vector<2x16x72xf32>
      %316 = arith.addf %300, %315 : vector<2x16x72xf32>
      %317 = vector.broadcast %302 : vector<2x1x72xf32> to vector<2x16x72xf32>
      %318 = vector.broadcast %303 : vector<1x16x72xf32> to vector<2x16x72xf32>
      %319 = arith.mulf %317, %318 : vector<2x16x72xf32>
      %320 = arith.addf %316, %319 : vector<2x16x72xf32>
      %321 = vector.extract_strided_slice %15 {offsets = [0, 15, 0], sizes = [2, 1, 72], strides = [1, 1, 1]} : vector<2x16x72xf32> to vector<2x1x72xf32>
      %322 = vector.extract_strided_slice %16 {offsets = [0, 15, 0], sizes = [2, 1, 72], strides = [1, 1, 1]} : vector<2x16x72xf32> to vector<2x1x72xf32>
      %323 = vector.extract_strided_slice %17 {offsets = [15, 0, 0], sizes = [1, 16, 72], strides = [1, 1, 1]} : vector<16x16x72xf32> to vector<1x16x72xf32>
      %324 = vector.extract_strided_slice %18 {offsets = [15, 0, 0], sizes = [1, 16, 72], strides = [1, 1, 1]} : vector<16x16x72xf32> to vector<1x16x72xf32>
      %325 = vector.broadcast %321 : vector<2x1x72xf32> to vector<2x16x72xf32>
      %326 = vector.broadcast %323 : vector<1x16x72xf32> to vector<2x16x72xf32>
      %327 = arith.mulf %325, %326 : vector<2x16x72xf32>
      %328 = arith.addf %312, %327 : vector<2x16x72xf32>
      %329 = vector.broadcast %322 : vector<2x1x72xf32> to vector<2x16x72xf32>
      %330 = vector.broadcast %324 : vector<1x16x72xf32> to vector<2x16x72xf32>
      %331 = arith.mulf %329, %330 : vector<2x16x72xf32>
      %332 = arith.subf %328, %331 : vector<2x16x72xf32>
      %333 = vector.broadcast %321 : vector<2x1x72xf32> to vector<2x16x72xf32>
      %334 = vector.broadcast %324 : vector<1x16x72xf32> to vector<2x16x72xf32>
      %335 = arith.mulf %333, %334 : vector<2x16x72xf32>
      %336 = arith.addf %320, %335 : vector<2x16x72xf32>
      %337 = vector.broadcast %322 : vector<2x1x72xf32> to vector<2x16x72xf32>
      %338 = vector.broadcast %323 : vector<1x16x72xf32> to vector<2x16x72xf32>
      %339 = arith.mulf %337, %338 : vector<2x16x72xf32>
      %340 = arith.addf %336, %339 : vector<2x16x72xf32>
      %341 = tpu.concatenate %332, %340 in 2 : vector<2x16x72xf32>, vector<2x16x72xf32> -> vector<2x16x144xf32>
      %c0_20 = arith.constant 0 : index
      %c0_21 = arith.constant 0 : index
      %c0_22 = arith.constant 0 : index
      %342 = vector.load %arg5[%c0_20, %c0_21, %c0_22] : memref<2x16x144xf32, #tpu.memory_space<vmem>>, vector<2x16x144xf32>
      tpu.vector_store %arg5[%c0_20, %c0_21, %c0_22], %341 {strides = array<i32>} : memref<2x16x144xf32, #tpu.memory_space<vmem>>, vector<2x16x144xf32>,
    } else {
    }
    return
  }
  func.func @transform_0(%arg0: i32) -> (i32, i32) {
    %c0_i32 = arith.constant 0 : i32
    %c0_i32_0 = arith.constant 0 : i32
    return %c0_i32, %arg0 : i32, i32
  }
  func.func @transform_1(%arg0: i32) -> (i32, i32) {
    %c0_i32 = arith.constant 0 : i32
    %c0_i32_0 = arith.constant 0 : i32
    return %arg0, %c0_i32 : i32, i32
  }
  func.func @transform_2(%arg0: i32) -> (i32, i32, i32) {
    %c0_i32 = arith.constant 0 : i32
    %c0_i32_0 = arith.constant 0 : i32
    %c0_i32_1 = arith.constant 0 : i32
    %c0_i32_2 = arith.constant 0 : i32
    return %c0_i32, %c0_i32_0, %c0_i32_1 : i32, i32, i32
  }
  func.func @transform_3(%arg0: i32) -> (i32, i32, i32) {
    %c0_i32 = arith.constant 0 : i32
    %c0_i32_0 = arith.constant 0 : i32
    %c0_i32_1 = arith.constant 0 : i32
    %c0_i32_2 = arith.constant 0 : i32
    return %c0_i32, %c0_i32_0, %c0_i32_1 : i32, i32, i32
  }
  func.func @transform_4(%arg0: i32) -> (i32, i32, i32) {
    %c0_i32 = arith.constant 0 : i32
    %c0_i32_0 = arith.constant 0 : i32
    %c0_i32_1 = arith.constant 0 : i32
    %c0_i32_2 = arith.constant 0 : i32
    return %c0_i32, %c0_i32_0, %c0_i32_1 : i32, i32, i32
  }
}

module attributes {stable_mosaic.version = 11 : i64} {
  func.func @_fourier_layer_kernel(%arg0: i32, %arg1: i32, %arg2: memref<1x16x144xf32, #tpu.memory_space<vmem>>, %arg3: memref<144x640xbf16, #tpu.memory_space<vmem>>, %arg4: memref<16x640xf32, #tpu.memory_space<vmem>>, %arg5: memref<32x32xf32, #tpu.memory_space<vmem>>, %arg6: memref<32x1xf32, #tpu.memory_space<vmem>>, %arg7: memref<16x16xf32, #tpu.memory_space<vmem>>, %arg8: memref<16x1xf32, #tpu.memory_space<vmem>>, %arg9: memref<16x640xf32, #tpu.memory_space<vmem>>) attributes {dimension_semantics = [#tpu.dimension_semantics<parallel>, #tpu.dimension_semantics<parallel>], iteration_bounds = array<i64: 2, 1>, scalar_prefetch = 0 : i64, scratch_operands = 0 : i64, tpu.core_type = #tpu.core_type<tc>, window_params = [{transform_indices = @transform_0, window_bounds = array<i64: 1, 16, 144>}, {transform_indices = @transform_1, window_bounds = array<i64: 144, 640>}, {transform_indices = @transform_2, window_bounds = array<i64: 16, 640>}, {pipeline_mode = #tpu.pipeline_mode<synchronous>, transform_indices = @transform_3, window_bounds = array<i64: 32, 32>}, {pipeline_mode = #tpu.pipeline_mode<synchronous>, transform_indices = @transform_4, window_bounds = array<i64: 32, 1>}, {pipeline_mode = #tpu.pipeline_mode<synchronous>, transform_indices = @transform_5, window_bounds = array<i64: 16, 16>}, {pipeline_mode = #tpu.pipeline_mode<synchronous>, transform_indices = @transform_6, window_bounds = array<i64: 16, 1>}, {transform_indices = @transform_7, window_bounds = array<i64: 16, 640>}]} {
    %c0 = arith.constant 0 : index
    %c0_0 = arith.constant 0 : index
    %c0_1 = arith.constant 0 : index
    %0 = vector.load %arg2[%c0, %c0_0, %c0_1] : memref<1x16x144xf32, #tpu.memory_space<vmem>>, vector<1x16x144xf32>
    %1 = vector.shape_cast %0 : vector<1x16x144xf32> to vector<16x144xf32>
    %2 = arith.truncf %1 : vector<16x144xf32> to vector<16x144xbf16>
    %c0_2 = arith.constant 0 : index
    %c0_3 = arith.constant 0 : index
    %3 = vector.load %arg3[%c0_2, %c0_3] : memref<144x640xbf16, #tpu.memory_space<vmem>>, vector<144x640xbf16>
    %cst = arith.constant dense<0.000000e+00> : vector<16x640xf32>
    %4 = tpu.matmul %2, %3, %cst {dimension_numbers = #tpu.dot_dimension_numbers<[1], [0], [0], [1], [0, 0, 1, 1], [], []>} : vector<16x144xbf16>, vector<144x640xbf16>, vector<16x640xf32> -> vector<16x640xf32>
    %c0_4 = arith.constant 0 : index
    %c0_5 = arith.constant 0 : index
    %5 = vector.load %arg4[%c0_4, %c0_5] : memref<16x640xf32, #tpu.memory_space<vmem>>, vector<16x640xf32>
    %6 = tpu.concatenate %4, %5 in 0 : vector<16x640xf32>, vector<16x640xf32> -> vector<32x640xf32>
    %c0_6 = arith.constant 0 : index
    %c0_7 = arith.constant 0 : index
    %7 = vector.load %arg5[%c0_6, %c0_7] : memref<32x32xf32, #tpu.memory_space<vmem>>, vector<32x32xf32>
    %cst_8 = arith.constant dense<0.000000e+00> : vector<32x640xf32>
    %8 = tpu.matmul %7, %6, %cst_8 {dimension_numbers = #tpu.dot_dimension_numbers<[1], [0], [0], [1], [0, 0, 1, 1], [], []>} : vector<32x32xf32>, vector<32x640xf32>, vector<32x640xf32> -> vector<32x640xf32>
    %c0_9 = arith.constant 0 : index
    %c0_10 = arith.constant 0 : index
    %9 = vector.load %arg6[%c0_9, %c0_10] : memref<32x1xf32, #tpu.memory_space<vmem>>, vector<32x1xf32>
    %10 = vector.broadcast %9 : vector<32x1xf32> to vector<32x640xf32>
    %11 = arith.addf %8, %10 : vector<32x640xf32>
    %c0_11 = arith.constant 0 : index
    %c0_12 = arith.constant 0 : index
    %12 = vector.load %arg7[%c0_11, %c0_12] : memref<16x16xf32, #tpu.memory_space<vmem>>, vector<16x16xf32>
    %13 = vector.extract_strided_slice %11 {offsets = [0, 0], sizes = [16, 640], strides = [1, 1]} : vector<32x640xf32> to vector<16x640xf32>
    %cst_13 = arith.constant 5.000000e-01 : f32
    %14 = vector.broadcast %cst_13 : f32 to vector<16x640xf32>
    %15 = arith.mulf %14, %13 : vector<16x640xf32>
    %cst_14 = arith.constant 4.471500e-02 : f32
    %16 = vector.broadcast %cst_14 : f32 to vector<16x640xf32>
    %17 = arith.mulf %16, %13 : vector<16x640xf32>
    %18 = arith.mulf %17, %13 : vector<16x640xf32>
    %19 = arith.mulf %18, %13 : vector<16x640xf32>
    %20 = arith.addf %13, %19 : vector<16x640xf32>
    %cst_15 = arith.constant 0.797884583 : f32
    %21 = vector.broadcast %cst_15 : f32 to vector<16x640xf32>
    %22 = arith.mulf %21, %20 : vector<16x640xf32>
    %23 = math.tanh %22 : vector<16x640xf32>
    %cst_16 = arith.constant 1.000000e+00 : f32
    %24 = vector.broadcast %cst_16 : f32 to vector<16x640xf32>
    %25 = arith.addf %24, %23 : vector<16x640xf32>
    %26 = arith.mulf %15, %25 : vector<16x640xf32>
    %cst_17 = arith.constant dense<0.000000e+00> : vector<16x640xf32>
    %27 = tpu.matmul %12, %26, %cst_17 {dimension_numbers = #tpu.dot_dimension_numbers<[1], [0], [0], [1], [0, 0, 1, 1], [], []>} : vector<16x16xf32>, vector<16x640xf32>, vector<16x640xf32> -> vector<16x640xf32>
    %c0_18 = arith.constant 0 : index
    %c0_19 = arith.constant 0 : index
    %28 = vector.load %arg8[%c0_18, %c0_19] : memref<16x1xf32, #tpu.memory_space<vmem>>, vector<16x1xf32>
    %29 = vector.broadcast %28 : vector<16x1xf32> to vector<16x640xf32>
    %30 = arith.addf %27, %29 : vector<16x640xf32>
    %31 = vector.extract_strided_slice %11 {offsets = [16, 0], sizes = [16, 640], strides = [1, 1]} : vector<32x640xf32> to vector<16x640xf32>
    %32 = arith.addf %30, %31 : vector<16x640xf32>
    %cst_20 = arith.constant 5.000000e-01 : f32
    %33 = vector.broadcast %cst_20 : f32 to vector<16x640xf32>
    %34 = arith.mulf %33, %32 : vector<16x640xf32>
    %cst_21 = arith.constant 4.471500e-02 : f32
    %35 = vector.broadcast %cst_21 : f32 to vector<16x640xf32>
    %36 = arith.mulf %35, %32 : vector<16x640xf32>
    %37 = arith.mulf %36, %32 : vector<16x640xf32>
    %38 = arith.mulf %37, %32 : vector<16x640xf32>
    %39 = arith.addf %32, %38 : vector<16x640xf32>
    %cst_22 = arith.constant 0.797884583 : f32
    %40 = vector.broadcast %cst_22 : f32 to vector<16x640xf32>
    %41 = arith.mulf %40, %39 : vector<16x640xf32>
    %42 = math.tanh %41 : vector<16x640xf32>
    %cst_23 = arith.constant 1.000000e+00 : f32
    %43 = vector.broadcast %cst_23 : f32 to vector<16x640xf32>
    %44 = arith.addf %43, %42 : vector<16x640xf32>
    %45 = arith.mulf %34, %44 : vector<16x640xf32>
    %c0_24 = arith.constant 0 : index
    %c0_25 = arith.constant 0 : index
    %46 = vector.load %arg9[%c0_24, %c0_25] : memref<16x640xf32, #tpu.memory_space<vmem>>, vector<16x640xf32>
    tpu.vector_store %arg9[%c0_24, %c0_25], %45 {strides = array<i32>} : memref<16x640xf32, #tpu.memory_space<vmem>>, vector<16x640xf32>,
    return
  }
  func.func @transform_0(%arg0: i32, %arg1: i32) -> (i32, i32, i32) {
    %c0_i32 = arith.constant 0 : i32
    %c0_i32_0 = arith.constant 0 : i32
    %c0_i32_1 = arith.constant 0 : i32
    return %arg0, %c0_i32, %c0_i32_0 : i32, i32, i32
  }
  func.func @transform_1(%arg0: i32, %arg1: i32) -> (i32, i32) {
    %c0_i32 = arith.constant 0 : i32
    %c0_i32_0 = arith.constant 0 : i32
    return %c0_i32, %arg1 : i32, i32
  }
  func.func @transform_2(%arg0: i32, %arg1: i32) -> (i32, i32) {
    %c0_i32 = arith.constant 0 : i32
    return %arg0, %arg1 : i32, i32
  }
  func.func @transform_3(%arg0: i32, %arg1: i32) -> (i32, i32) {
    %c0_i32 = arith.constant 0 : i32
    %c0_i32_0 = arith.constant 0 : i32
    %c0_i32_1 = arith.constant 0 : i32
    return %c0_i32, %c0_i32_0 : i32, i32
  }
  func.func @transform_4(%arg0: i32, %arg1: i32) -> (i32, i32) {
    %c0_i32 = arith.constant 0 : i32
    %c0_i32_0 = arith.constant 0 : i32
    %c0_i32_1 = arith.constant 0 : i32
    return %c0_i32, %c0_i32_0 : i32, i32
  }
  func.func @transform_5(%arg0: i32, %arg1: i32) -> (i32, i32) {
    %c0_i32 = arith.constant 0 : i32
    %c0_i32_0 = arith.constant 0 : i32
    %c0_i32_1 = arith.constant 0 : i32
    return %c0_i32, %c0_i32_0 : i32, i32
  }
  func.func @transform_6(%arg0: i32, %arg1: i32) -> (i32, i32) {
    %c0_i32 = arith.constant 0 : i32
    %c0_i32_0 = arith.constant 0 : i32
    %c0_i32_1 = arith.constant 0 : i32
    return %c0_i32, %c0_i32_0 : i32, i32
  }
  func.func @transform_7(%arg0: i32, %arg1: i32) -> (i32, i32) {
    %c0_i32 = arith.constant 0 : i32
    return %arg0, %arg1 : i32, i32
  }
}

module attributes {stable_mosaic.version = 11 : i64} {
  func.func @_fourier_layer_kernel(%arg0: i32, %arg1: i32, %arg2: memref<1x16x144xf32, #tpu.memory_space<vmem>>, %arg3: memref<144x640xbf16, #tpu.memory_space<vmem>>, %arg4: memref<16x640xf32, #tpu.memory_space<vmem>>, %arg5: memref<32x32xf32, #tpu.memory_space<vmem>>, %arg6: memref<32x1xf32, #tpu.memory_space<vmem>>, %arg7: memref<16x16xf32, #tpu.memory_space<vmem>>, %arg8: memref<16x1xf32, #tpu.memory_space<vmem>>, %arg9: memref<16x640xf32, #tpu.memory_space<vmem>>) attributes {dimension_semantics = [#tpu.dimension_semantics<parallel>, #tpu.dimension_semantics<parallel>], iteration_bounds = array<i64: 2, 1>, scalar_prefetch = 0 : i64, scratch_operands = 0 : i64, tpu.core_type = #tpu.core_type<tc>, window_params = [{transform_indices = @transform_0, window_bounds = array<i64: 1, 16, 144>}, {transform_indices = @transform_1, window_bounds = array<i64: 144, 640>}, {transform_indices = @transform_2, window_bounds = array<i64: 16, 640>}, {pipeline_mode = #tpu.pipeline_mode<synchronous>, transform_indices = @transform_3, window_bounds = array<i64: 32, 32>}, {pipeline_mode = #tpu.pipeline_mode<synchronous>, transform_indices = @transform_4, window_bounds = array<i64: 32, 1>}, {pipeline_mode = #tpu.pipeline_mode<synchronous>, transform_indices = @transform_5, window_bounds = array<i64: 16, 16>}, {pipeline_mode = #tpu.pipeline_mode<synchronous>, transform_indices = @transform_6, window_bounds = array<i64: 16, 1>}, {transform_indices = @transform_7, window_bounds = array<i64: 16, 640>}]} {
    %c0 = arith.constant 0 : index
    %c0_0 = arith.constant 0 : index
    %c0_1 = arith.constant 0 : index
    %0 = vector.load %arg2[%c0, %c0_0, %c0_1] : memref<1x16x144xf32, #tpu.memory_space<vmem>>, vector<1x16x144xf32>
    %1 = vector.shape_cast %0 : vector<1x16x144xf32> to vector<16x144xf32>
    %2 = arith.truncf %1 : vector<16x144xf32> to vector<16x144xbf16>
    %c0_2 = arith.constant 0 : index
    %c0_3 = arith.constant 0 : index
    %3 = vector.load %arg3[%c0_2, %c0_3] : memref<144x640xbf16, #tpu.memory_space<vmem>>, vector<144x640xbf16>
    %cst = arith.constant dense<0.000000e+00> : vector<16x640xf32>
    %4 = tpu.matmul %2, %3, %cst {dimension_numbers = #tpu.dot_dimension_numbers<[1], [0], [0], [1], [0, 0, 1, 1], [], []>} : vector<16x144xbf16>, vector<144x640xbf16>, vector<16x640xf32> -> vector<16x640xf32>
    %c0_4 = arith.constant 0 : index
    %c0_5 = arith.constant 0 : index
    %5 = vector.load %arg4[%c0_4, %c0_5] : memref<16x640xf32, #tpu.memory_space<vmem>>, vector<16x640xf32>
    %6 = tpu.concatenate %4, %5 in 0 : vector<16x640xf32>, vector<16x640xf32> -> vector<32x640xf32>
    %c0_6 = arith.constant 0 : index
    %c0_7 = arith.constant 0 : index
    %7 = vector.load %arg5[%c0_6, %c0_7] : memref<32x32xf32, #tpu.memory_space<vmem>>, vector<32x32xf32>
    %cst_8 = arith.constant dense<0.000000e+00> : vector<32x640xf32>
    %8 = tpu.matmul %7, %6, %cst_8 {dimension_numbers = #tpu.dot_dimension_numbers<[1], [0], [0], [1], [0, 0, 1, 1], [], []>} : vector<32x32xf32>, vector<32x640xf32>, vector<32x640xf32> -> vector<32x640xf32>
    %c0_9 = arith.constant 0 : index
    %c0_10 = arith.constant 0 : index
    %9 = vector.load %arg6[%c0_9, %c0_10] : memref<32x1xf32, #tpu.memory_space<vmem>>, vector<32x1xf32>
    %10 = vector.broadcast %9 : vector<32x1xf32> to vector<32x640xf32>
    %11 = arith.addf %8, %10 : vector<32x640xf32>
    %c0_11 = arith.constant 0 : index
    %c0_12 = arith.constant 0 : index
    %12 = vector.load %arg7[%c0_11, %c0_12] : memref<16x16xf32, #tpu.memory_space<vmem>>, vector<16x16xf32>
    %13 = vector.extract_strided_slice %11 {offsets = [0, 0], sizes = [16, 640], strides = [1, 1]} : vector<32x640xf32> to vector<16x640xf32>
    %cst_13 = arith.constant 5.000000e-01 : f32
    %14 = vector.broadcast %cst_13 : f32 to vector<16x640xf32>
    %15 = arith.mulf %14, %13 : vector<16x640xf32>
    %cst_14 = arith.constant 4.471500e-02 : f32
    %16 = vector.broadcast %cst_14 : f32 to vector<16x640xf32>
    %17 = arith.mulf %16, %13 : vector<16x640xf32>
    %18 = arith.mulf %17, %13 : vector<16x640xf32>
    %19 = arith.mulf %18, %13 : vector<16x640xf32>
    %20 = arith.addf %13, %19 : vector<16x640xf32>
    %cst_15 = arith.constant 0.797884583 : f32
    %21 = vector.broadcast %cst_15 : f32 to vector<16x640xf32>
    %22 = arith.mulf %21, %20 : vector<16x640xf32>
    %23 = math.tanh %22 : vector<16x640xf32>
    %cst_16 = arith.constant 1.000000e+00 : f32
    %24 = vector.broadcast %cst_16 : f32 to vector<16x640xf32>
    %25 = arith.addf %24, %23 : vector<16x640xf32>
    %26 = arith.mulf %15, %25 : vector<16x640xf32>
    %cst_17 = arith.constant dense<0.000000e+00> : vector<16x640xf32>
    %27 = tpu.matmul %12, %26, %cst_17 {dimension_numbers = #tpu.dot_dimension_numbers<[1], [0], [0], [1], [0, 0, 1, 1], [], []>} : vector<16x16xf32>, vector<16x640xf32>, vector<16x640xf32> -> vector<16x640xf32>
    %c0_18 = arith.constant 0 : index
    %c0_19 = arith.constant 0 : index
    %28 = vector.load %arg8[%c0_18, %c0_19] : memref<16x1xf32, #tpu.memory_space<vmem>>, vector<16x1xf32>
    %29 = vector.broadcast %28 : vector<16x1xf32> to vector<16x640xf32>
    %30 = arith.addf %27, %29 : vector<16x640xf32>
    %31 = vector.extract_strided_slice %11 {offsets = [16, 0], sizes = [16, 640], strides = [1, 1]} : vector<32x640xf32> to vector<16x640xf32>
    %32 = arith.addf %30, %31 : vector<16x640xf32>
    %c0_20 = arith.constant 0 : index
    %c0_21 = arith.constant 0 : index
    %33 = vector.load %arg9[%c0_20, %c0_21] : memref<16x640xf32, #tpu.memory_space<vmem>>, vector<16x640xf32>
    tpu.vector_store %arg9[%c0_20, %c0_21], %32 {strides = array<i32>} : memref<16x640xf32, #tpu.memory_space<vmem>>, vector<16x640xf32>,
    return
  }
  func.func @transform_0(%arg0: i32, %arg1: i32) -> (i32, i32, i32) {
    %c0_i32 = arith.constant 0 : i32
    %c0_i32_0 = arith.constant 0 : i32
    %c0_i32_1 = arith.constant 0 : i32
    return %arg0, %c0_i32, %c0_i32_0 : i32, i32, i32
  }
  func.func @transform_1(%arg0: i32, %arg1: i32) -> (i32, i32) {
    %c0_i32 = arith.constant 0 : i32
    %c0_i32_0 = arith.constant 0 : i32
    return %c0_i32, %arg1 : i32, i32
  }
  func.func @transform_2(%arg0: i32, %arg1: i32) -> (i32, i32) {
    %c0_i32 = arith.constant 0 : i32
    return %arg0, %arg1 : i32, i32
  }
  func.func @transform_3(%arg0: i32, %arg1: i32) -> (i32, i32) {
    %c0_i32 = arith.constant 0 : i32
    %c0_i32_0 = arith.constant 0 : i32
    %c0_i32_1 = arith.constant 0 : i32
    return %c0_i32, %c0_i32_0 : i32, i32
  }
  func.func @transform_4(%arg0: i32, %arg1: i32) -> (i32, i32) {
    %c0_i32 = arith.constant 0 : i32
    %c0_i32_0 = arith.constant 0 : i32
    %c0_i32_1 = arith.constant 0 : i32
    return %c0_i32, %c0_i32_0 : i32, i32
  }
  func.func @transform_5(%arg0: i32, %arg1: i32) -> (i32, i32) {
    %c0_i32 = arith.constant 0 : i32
    %c0_i32_0 = arith.constant 0 : i32
    %c0_i32_1 = arith.constant 0 : i32
    return %c0_i32, %c0_i32_0 : i32, i32
  }
  func.func @transform_6(%arg0: i32, %arg1: i32) -> (i32, i32) {
    %c0_i32 = arith.constant 0 : i32
    %c0_i32_0 = arith.constant 0 : i32
    %c0_i32_1 = arith.constant 0 : i32
    return %c0_i32, %c0_i32_0 : i32, i32
  }
  func.func @transform_7(%arg0: i32, %arg1: i32) -> (i32, i32) {
    %c0_i32 = arith.constant 0 : i32
    return %arg0, %arg1 : i32, i32
  }
}

module attributes {stable_mosaic.version = 11 : i64} {
  func.func @_q_kernel(%arg0: i32, %arg1: i32, %arg2: memref<1x16x256xf32, #tpu.memory_space<vmem>>, %arg3: memref<64x16xf32, #tpu.memory_space<vmem>>, %arg4: memref<64x1xf32, #tpu.memory_space<vmem>>, %arg5: memref<1x64xf32, #tpu.memory_space<vmem>>, %arg6: memref<1x1xf32, #tpu.memory_space<vmem>>, %arg7: memref<1x1x256xf32, #tpu.memory_space<vmem>>) attributes {dimension_semantics = [#tpu.dimension_semantics<parallel>, #tpu.dimension_semantics<parallel>], iteration_bounds = array<i64: 2, 1>, scalar_prefetch = 0 : i64, scratch_operands = 0 : i64, tpu.core_type = #tpu.core_type<tc>, window_params = [{transform_indices = @transform_0, window_bounds = array<i64: 1, 16, 256>}, {pipeline_mode = #tpu.pipeline_mode<synchronous>, transform_indices = @transform_1, window_bounds = array<i64: 64, 16>}, {pipeline_mode = #tpu.pipeline_mode<synchronous>, transform_indices = @transform_2, window_bounds = array<i64: 64, 1>}, {pipeline_mode = #tpu.pipeline_mode<synchronous>, transform_indices = @transform_3, window_bounds = array<i64: 1, 64>}, {pipeline_mode = #tpu.pipeline_mode<synchronous>, transform_indices = @transform_4, window_bounds = array<i64: 1, 1>}, {transform_indices = @transform_5, window_bounds = array<i64: 1, 1, 256>}]} {
    %c0 = arith.constant 0 : index
    %c0_0 = arith.constant 0 : index
    %0 = vector.load %arg3[%c0, %c0_0] : memref<64x16xf32, #tpu.memory_space<vmem>>, vector<64x16xf32>
    %c0_1 = arith.constant 0 : index
    %c0_2 = arith.constant 0 : index
    %c0_3 = arith.constant 0 : index
    %1 = vector.load %arg2[%c0_1, %c0_2, %c0_3] : memref<1x16x256xf32, #tpu.memory_space<vmem>>, vector<1x16x256xf32>
    %2 = vector.shape_cast %1 : vector<1x16x256xf32> to vector<16x256xf32>
    %cst = arith.constant dense<0.000000e+00> : vector<64x256xf32>
    %3 = tpu.matmul %0, %2, %cst {dimension_numbers = #tpu.dot_dimension_numbers<[1], [0], [0], [1], [0, 0, 1, 1], [], []>} : vector<64x16xf32>, vector<16x256xf32>, vector<64x256xf32> -> vector<64x256xf32>
    %c0_4 = arith.constant 0 : index
    %c0_5 = arith.constant 0 : index
    %4 = vector.load %arg4[%c0_4, %c0_5] : memref<64x1xf32, #tpu.memory_space<vmem>>, vector<64x1xf32>
    %5 = vector.broadcast %4 : vector<64x1xf32> to vector<64x256xf32>
    %6 = arith.addf %3, %5 : vector<64x256xf32>
    %cst_6 = arith.constant 5.000000e-01 : f32
    %7 = vector.broadcast %cst_6 : f32 to vector<64x256xf32>
    %8 = arith.mulf %7, %6 : vector<64x256xf32>
    %cst_7 = arith.constant 4.471500e-02 : f32
    %9 = vector.broadcast %cst_7 : f32 to vector<64x256xf32>
    %10 = arith.mulf %9, %6 : vector<64x256xf32>
    %11 = arith.mulf %10, %6 : vector<64x256xf32>
    %12 = arith.mulf %11, %6 : vector<64x256xf32>
    %13 = arith.addf %6, %12 : vector<64x256xf32>
    %cst_8 = arith.constant 0.797884583 : f32
    %14 = vector.broadcast %cst_8 : f32 to vector<64x256xf32>
    %15 = arith.mulf %14, %13 : vector<64x256xf32>
    %16 = math.tanh %15 : vector<64x256xf32>
    %cst_9 = arith.constant 1.000000e+00 : f32
    %17 = vector.broadcast %cst_9 : f32 to vector<64x256xf32>
    %18 = arith.addf %17, %16 : vector<64x256xf32>
    %19 = arith.mulf %8, %18 : vector<64x256xf32>
    %c0_10 = arith.constant 0 : index
    %c0_11 = arith.constant 0 : index
    %20 = vector.load %arg5[%c0_10, %c0_11] : memref<1x64xf32, #tpu.memory_space<vmem>>, vector<1x64xf32>
    %cst_12 = arith.constant dense<0.000000e+00> : vector<1x256xf32>
    %21 = tpu.matmul %20, %19, %cst_12 {dimension_numbers = #tpu.dot_dimension_numbers<[1], [0], [0], [1], [0, 0, 1, 1], [], []>} : vector<1x64xf32>, vector<64x256xf32>, vector<1x256xf32> -> vector<1x256xf32>
    %c0_13 = arith.constant 0 : index
    %c0_14 = arith.constant 0 : index
    %22 = vector.load %arg6[%c0_13, %c0_14] : memref<1x1xf32, #tpu.memory_space<vmem>>, vector<1x1xf32>
    %23 = vector.broadcast %22 : vector<1x1xf32> to vector<1x256xf32>
    %24 = arith.addf %21, %23 : vector<1x256xf32>
    %c0_15 = arith.constant 0 : index
    %c0_16 = arith.constant 0 : index
    %c0_17 = arith.constant 0 : index
    %25 = vector.load %arg7[%c0_15, %c0_16, %c0_17] : memref<1x1x256xf32, #tpu.memory_space<vmem>>, vector<1x1x256xf32>
    %26 = vector.shape_cast %25 : vector<1x1x256xf32> to vector<1x256xf32>
    %27 = vector.shape_cast %24 : vector<1x256xf32> to vector<1x1x256xf32>
    tpu.vector_store %arg7[%c0_15, %c0_16, %c0_17], %27 {strides = array<i32>} : memref<1x1x256xf32, #tpu.memory_space<vmem>>, vector<1x1x256xf32>,
    return
  }
  func.func @transform_0(%arg0: i32, %arg1: i32) -> (i32, i32, i32) {
    %c0_i32 = arith.constant 0 : i32
    %c0_i32_0 = arith.constant 0 : i32
    return %arg0, %c0_i32, %arg1 : i32, i32, i32
  }
  func.func @transform_1(%arg0: i32, %arg1: i32) -> (i32, i32) {
    %c0_i32 = arith.constant 0 : i32
    %c0_i32_0 = arith.constant 0 : i32
    %c0_i32_1 = arith.constant 0 : i32
    return %c0_i32, %c0_i32_0 : i32, i32
  }
  func.func @transform_2(%arg0: i32, %arg1: i32) -> (i32, i32) {
    %c0_i32 = arith.constant 0 : i32
    %c0_i32_0 = arith.constant 0 : i32
    %c0_i32_1 = arith.constant 0 : i32
    return %c0_i32, %c0_i32_0 : i32, i32
  }
  func.func @transform_3(%arg0: i32, %arg1: i32) -> (i32, i32) {
    %c0_i32 = arith.constant 0 : i32
    %c0_i32_0 = arith.constant 0 : i32
    %c0_i32_1 = arith.constant 0 : i32
    return %c0_i32, %c0_i32_0 : i32, i32
  }
  func.func @transform_4(%arg0: i32, %arg1: i32) -> (i32, i32) {
    %c0_i32 = arith.constant 0 : i32
    %c0_i32_0 = arith.constant 0 : i32
    %c0_i32_1 = arith.constant 0 : i32
    return %c0_i32, %c0_i32_0 : i32, i32
  }
  func.func @transform_5(%arg0: i32, %arg1: i32) -> (i32, i32, i32) {
    %c0_i32 = arith.constant 0 : i32
    %c0_i32_0 = arith.constant 0 : i32
    return %arg0, %c0_i32, %arg1 : i32, i32, i32
  }
}

</mosaic_0001>

<bundles_post_ra>
// kernel: fno2d_forward.10
= control target key start
LH: loop header
LB: loop body
LE: loop exit
PB: predicated region body
PF: predicated region fallthrough
CT: control target
= control target key end

     0   :  { %s570_s15 = smov 0   ;;  %s572_s16 = smov 0   ;;  %s626_s0 = inlined_call_operand.vmem [shape: f32[2,1,256], index: 0, kind: input, shape index: {}]   ;;  %s627_s1 = inlined_call_operand.vmem [shape: f32[2,256], index: 1, kind: input, shape index: {}]   ;;  %s628_s2 = inlined_call_operand.vmem [shape: f32[16,3], index: 2, kind: input, shape index: {}]   ;;  %s629_s3 = inlined_call_operand.vmem [shape: f32[16,1], index: 3, kind: input, shape index: {}]   ;;  %s630_s4 = inlined_call_operand.vmem [shape: f32[2,16,256], index: 4, kind: output, shape index: {}]  }
   0x1   :  { %s574_s17 = smov 0  }
   0x2 LB: > { %s26_s18 = sadd.s32 1, %s536_s16  ;;  %p478_p0 = scmp.ge.s32.totalorder %s540_s17, 1  ;;  %s540_s17 = sphi %s574_s17, %s14_s17   ;;  %s536_s16 = sphi %s572_s16, %s632_s16   ;;  %s532_s15 = sphi %s570_s15, %s631_s15  }
   0x3   : > { %p28_p1 = scmp.ge.s32.totalorder %s26_s18, 2  ;;  %p193_p2 = scmp.lt.s32.totalorder %s540_s17, 3 }
   0x5   : > { %s634_s18 = smov (%p28_p1, %s26_s18), 0  ;;  %p194_p3 = pnand %p478_p0, %p193_p2 }
   0x6   : > { %v258_v0 = vld [vmem:[%s628_s2] sm:$0xff] (!%p194_p3)  ;;  %v542_v1 = vmov (!%p194_p3), 1   ;;  %v543_v2 = vmov (!%p194_p3), 0   ;;  %v259_v3 = vld [vmem:[%s628_s2 + $0x8] sm:$0xff] (!%p194_p3)  ;;  %v544_v4 = vmov (!%p194_p3), 2   ;;  %p232_p4 = scmp.lt.s32.totalorder (!%p194_p3), %s532_s15, 1  ;;  %v271_v7 = vlaneseq (!%p194_p3) }
   0x7   : > { %197 = sbr.rel (%p194_p3) target bundleno = 154 (0x9a), region = 36  ;;  %513 = vset.pattern.permute.xlu1 (!%p194_p3), %v542_v1  ;;  %512 = vset.pattern.permute.xlu0 (!%p194_p3), %v543_v2  ;;  %v354_v5 = vld [vmem:[%s629_s3] sm:$0xff] (!%p194_p3)  ;;  %v355_v6 = vld [vmem:[%s629_s3 + $0x8] sm:$0xff] (!%p194_p3) }
   0x8   : > { %286 = vperm.xlu1 (!%p194_p3), %513, %v258_v0   ;;  %262 = vperm.xlu0 (!%p194_p3), %512, %v258_v0   ;;  %v272_v8 = vshrl.u32 (!%p194_p3), %v271_v7, 7  ;;  %v257_v11 = vld [vmem:[%s627_s1] sm:$0xf] (!%p194_p3) }
   0xa   : > { %v273_v9 = vsub.s32 (!%p194_p3), 0, %v272_v8  ;;  %v300_v10 = vsub.s32 (!%p194_p3), 2, %v272_v8  ;;  %v277_v14 = vsub.s32 (!%p194_p3), 1, %v272_v8  ;;  %v334_v16 = vsub.s32 (!%p194_p3), 3, %v272_v8 }
   0xc   : > { %290 = vperm.xlu1 (!%p194_p3), %513, %v259_v3   ;;  %267 = vperm.xlu0 (!%p194_p3), %512, %v259_v3   ;;  %v297_v12 = vrot.slane (!%p194_p3), %v257_v11, %v273_v9  ;;  %v301_v13 = vrot.slane (!%p194_p3), %v257_v11, %v300_v10  ;;  %v331_v23 = vrot.slane (!%p194_p3), %v257_v11, %v277_v14 }
   0xd   : > { %v335_v24 = vrot.slane (!%p194_p3), %v257_v11, %v334_v16 }
   0xe   : > { %s636_s15 = smov (!%p232_p4, %s532_s15), 1  ;;  %v307_v18 = vrot.slane %v297_v12, %v273_v9  ;;  %v311_v19 = vrot.slane %v301_v13, %v273_v9  ;;  %v341_v35 = vrot.slane %v331_v23, %v277_v14 }
   0xf   : > { %s479_s27 = sshll.u32 %s636_s15, 1  ;;  %v345_v36 = vrot.slane %v335_v24, %v277_v14  ;;  %s484_s7 = sshll.u32 %s636_s15, 5 }
  0x10   : > { %515 = vset.pattern.permute.xlu1 %v544_v4  ;;  %514 = vset.pattern.permute.xlu0 %v544_v4  ;;  %s238_s6 = scalar_lea.vmem %s626_s0, %s479_s27  ;;  %s254_s10 = scalar_lea.vmem %s630_s4, %s484_s7 }
  0x11   : > { %325 = vperm.xlu1 %515, %v259_v3   ;;  %321 = vperm.xlu0 %514, %v258_v0   ;;  %v256_v15 = vld [vmem:[%s238_s6] sm:$0x3] }
  0x12   : > { %v274_v21 = vrot.slane %v256_v15, %v273_v9  ;;  %v278_v22 = vrot.slane %v256_v15, %v277_v14 }
  0x15   : > { %516 = vset.pattern.permute.xlu1 %v543_v2  ;;  %517 = vset.pattern.permute.xlu0 %v543_v2 }
  0x16   : > { %358 = vperm.xlu1 %516, %v354_v5   ;;  %363 = vperm.xlu0 %517, %v355_v6  }
  0x87   : > { %v287_v17 = vpop.permute.xlu1 %286  ;;  %v263_v20 = vpop.permute.xlu0 %262 }
  0x88   : > { %v312_v25 = vmul.f32 %v307_v18, %v287_v17  ;;  %v313_v26 = vmul.f32 %v311_v19, %v287_v17  ;;  %v281_v27 = vmul.f32 %v274_v21, %v263_v20  ;;  %v282_v28 = vmul.f32 %v278_v22, %v263_v20 }
  0x8a   : > { %v316_v37 = vadd.f32 %v312_v25, %v281_v27  ;;  %v317_v38 = vadd.f32 %v313_v26, %v282_v28 }
  0x8b   : > { %v291_v29 = vpop.permute.xlu1 %290  ;;  %v268_v30 = vpop.permute.xlu0 %267 }
  0x8c   : > { %v314_v31 = vmul.f32 %v307_v18, %v291_v29  ;;  %v315_v32 = vmul.f32 %v311_v19, %v291_v29  ;;  %v283_v33 = vmul.f32 %v274_v21, %v268_v30  ;;  %v284_v34 = vmul.f32 %v278_v22, %v268_v30 }
  0x8e   : > { %v318_v39 = vadd.f32 %v314_v31, %v283_v33  ;;  %v319_v40 = vadd.f32 %v315_v32, %v284_v34 }
  0x90   : > { %v326_v41 = vpop.permute.xlu1 %325  ;;  %v322_v42 = vpop.permute.xlu0 %321 }
  0x91   : > { %v348_v43 = vmul.f32 %v341_v35, %v326_v41  ;;  %v349_v44 = vmul.f32 %v345_v36, %v326_v41  ;;  %v346_v45 = vmul.f32 %v341_v35, %v322_v42  ;;  %v347_v46 = vmul.f32 %v345_v36, %v322_v42 }
  0x93   : > { %v350_v47 = vadd.f32 %v346_v45, %v316_v37  ;;  %v351_v48 = vadd.f32 %v347_v46, %v317_v38  ;;  %v352_v49 = vadd.f32 %v348_v43, %v318_v39  ;;  %v353_v50 = vadd.f32 %v349_v44, %v319_v40 }
  0x95   : > { %v359_v51 = vpop.permute.xlu1 %358  ;;  %v364_v52 = vpop.permute.xlu0 %363 }
  0x96   : > { %v366_v53 = vadd.f32 %v359_v51, %v350_v47  ;;  %v367_v54 = vadd.f32 %v359_v51, %v351_v48  ;;  %v368_v55 = vadd.f32 %v364_v52, %v352_v49  ;;  %v369_v56 = vadd.f32 %v364_v52, %v353_v50 }
  0x98   : > { %370 = vst [vmem:[%s254_s10] sm:$0xff] %v366_v53  ;;  %371 = vst [vmem:[%s254_s10 + $0x8] sm:$0xff] %v367_v54 }
  0x99   : > { %372 = vst [vmem:[%s254_s10 + $0x10] sm:$0xff] %v368_v55  ;;  %373 = vst [vmem:[%s254_s10 + $0x18] sm:$0xff] %v369_v56 }
  0x9a PF: > { %s14_s17 = sadd.s32 1, %s540_s17   ;;  %s631_s15 = smov %s536_s16 }
  0x9b   : > { %p11_p5 = scmp.ge.s32.totalorder %s14_s17, 4   ;;  %s632_s16 = smov %s634_s18 }
  0x9d   :  { %13 = sbr.rel (!%p11_p5) target bundleno = 2 (0x2), region = 69 }

// kernel: fno2d_forward.12
= control target key start
LH: loop header
LB: loop body
LE: loop exit
PB: predicated region body
PF: predicated region fallthrough
CT: control target
= control target key end

     0   :  { %s2052_s24 = smov 0   ;;  %s2054_s25 = smov 0   ;;  %s2467_s0 = inlined_call_operand.vmem [shape: f32[2,16,144], index: 0, kind: input, shape index: {}]   ;;  %s2468_s1 = inlined_call_operand.vmem [shape: bf16[144,640], index: 1, kind: input, shape index: {}]   ;;  %s2469_s2 = inlined_call_operand.vmem [shape: f32[32,640], index: 2, kind: input, shape index: {}]   ;;  %s2470_s3 = inlined_call_operand.vmem [shape: f32[32,32], index: 3, kind: input, shape index: {}]   ;;  %s2471_s4 = inlined_call_operand.vmem [shape: f32[32,1], index: 4, kind: input, shape index: {}]   ;;  %s2472_s5 = inlined_call_operand.vmem [shape: f32[16,16], index: 5, kind: input, shape index: {}]   ;;  %s2473_s6 = inlined_call_operand.vmem [shape: f32[16,1], index: 6, kind: input, shape index: {}]   ;;  %s2474_s7 = inlined_call_operand.vmem [shape: f32[32,640], index: 7, kind: output, shape index: {}]  }
   0x1   :  { %s2056_s26 = smov 0  }
   0x2 LB: > { %s29_s27 = sadd.s32 1, %s2004_s25  ;;  %p1679_p0 = scmp.ge.s32.totalorder %s2008_s26, 1  ;;  %s2008_s26 = sphi %s2056_s26, %s17_s26   ;;  %s2004_s25 = sphi %s2054_s25, %s2476_s25   ;;  %s2000_s24 = sphi %s2052_s24, %s2475_s24  }
   0x3   : > { %p31_p1 = scmp.ge.s32.totalorder %s29_s27, 2  ;;  %p281_p2 = scmp.lt.s32.totalorder %s2008_s26, 3 }
   0x5   : > { %s2478_s27 = smov (%p31_p1, %s29_s27), 0  ;;  %p282_p3 = pnand %p1679_p0, %p281_p2 }
   0x6   : > { %v1883_v0 = vld [vmem:[%s2468_s1 + $0x4] ss:$20 sps:$4 sm:$0xff] (!%p282_p3)   ;;  %v1885_v1 = vld [vmem:[%s2468_s1 + $0xc] ss:$20 sps:$4 sm:$0xff] (!%p282_p3)   ;;  %v1888_v3 = vld [vmem:[%s2468_s1 + $0x8] ss:$20 sps:$4 sm:$0xff] (!%p282_p3)  }
   0x7   : > { %285 = sbr.rel (%p282_p3) target bundleno = 791 (0x317), region = 48  ;;  %667 = vmatprep.subr.bf16.mxu0 (!%p282_p3), %v1883_v0  ;;  %v1887_v2 = vld [vmem:[%s2468_s1] ss:$20 sps:$4 sm:$0xff] (!%p282_p3)   ;;  %v2010_v4 = vmov (!%p282_p3), 0   ;;  %710 = vmatprep.subr.bf16.mxu1 (!%p282_p3), %v1885_v1  ;;  %v1893_v7 = vld [vmem:[%s2468_s1 + $0x28] ss:$20 sps:$4 sm:$0xff] (!%p282_p3)  }
   0x8   : > { %1881 = vset.pattern.permute.xlu0 (!%p282_p3), %v2010_v4  ;;  %v1889_v5 = vld [vmem:[%s2468_s1 + $0x2c] ss:$20 sps:$4 sm:$0xff] (!%p282_p3)   ;;  %1882 = vset.pattern.permute.xlu1 (!%p282_p3), %v2010_v4  ;;  %v1891_v6 = vld [vmem:[%s2468_s1 + $0x34] ss:$20 sps:$4 sm:$0xff] (!%p282_p3)   ;;  %v1894_v8 = vld [vmem:[%s2468_s1 + $0x30] ss:$20 sps:$4 sm:$0xff] (!%p282_p3)  }
   0x9   : > { %668 = vmatpush1.bf16.msra.mxu0 (!%p282_p3), %v1887_v2  ;;  %711 = vmatpush1.bf16.msra.mxu1 (!%p282_p3), %v1888_v3  ;;  %v1895_v9 = vld [vmem:[%s2468_s1 + $0x54] ss:$20 sps:$4 sm:$0xff] (!%p282_p3)   ;;  %v1897_v10 = vld [vmem:[%s2468_s1 + $0x5c] ss:$20 sps:$4 sm:$0xff] (!%p282_p3)   ;;  %v1900_v12 = vld [vmem:[%s2468_s1 + $0x58] ss:$20 sps:$4 sm:$0xff] (!%p282_p3)  }
   0xa   : > { %669 = vmatprep.subr.bf16.mxu0 (!%p282_p3), %v1889_v5  ;;  %712 = vmatprep.subr.bf16.mxu1 (!%p282_p3), %v1891_v6  ;;  %v1899_v11 = vld [vmem:[%s2468_s1 + $0x50] ss:$20 sps:$4 sm:$0xff] (!%p282_p3)   ;;  %p333_p4 = scmp.lt.s32.totalorder (!%p282_p3), %s2000_s24, 1  ;;  %v1905_v15 = vld [vmem:[%s2468_s1 + $0x78] ss:$20 sps:$4 sm:$0xff] (!%p282_p3)   ;;  %vm663_vm0 = vcmask (!%p282_p3), 130048  }
   0xb   : > { %v1901_v13 = vld [vmem:[%s2468_s1 + $0x7c] ss:$20 sps:$4 sm:$0xff] (!%p282_p3)   ;;  %v1903_v14 = vld [vmem:[%s2468_s1 + $0x84] ss:$20 sps:$4 sm:$0xff] (!%p282_p3)   ;;  %v1906_v16 = vld [vmem:[%s2468_s1 + $0x80] ss:$20 sps:$4 sm:$0xff] (!%p282_p3)  }
   0xc   : > { %v1907_v17 = vld [vmem:[%s2468_s1 + $0xa4] ss:$20 sps:$4 sm:$0xff] (!%p282_p3)   ;;  %v1909_v18 = vld [vmem:[%s2468_s1 + $0xac] ss:$20 sps:$4 sm:$0xff] (!%p282_p3)   ;;  %v1912_v20 = vld [vmem:[%s2468_s1 + $0xa8] ss:$20 sps:$4 sm:$0xff] (!%p282_p3)  }
   0xd   : > { %670 = vmatpush1.bf16.msra.mxu0 (!%p282_p3), %v1893_v7  ;;  %713 = vmatpush1.bf16.msra.mxu1 (!%p282_p3), %v1894_v8  ;;  %v1911_v19 = vld [vmem:[%s2468_s1 + $0xa0] ss:$20 sps:$4 sm:$0xff] (!%p282_p3)   ;;  %v1917_v23 = vld [vmem:[%s2468_s1 + $0xc8] ss:$20 sps:$4 sm:$0xff] (!%p282_p3)   ;;  %v1918_v24 = vld [vmem:[%s2468_s1 + $0xd0] ss:$20 sps:$4 sm:$0xff] (!%p282_p3)  }
   0xe   : > { %671 = vmatprep.subr.bf16.mxu0 %v1895_v9  ;;  %714 = vmatprep.subr.bf16.mxu1 %v1897_v10  ;;  %s334_s22 = scalar_select %p333_p4, %s2000_s24, 1  ;;  %v1913_v21 = vld [vmem:[%s2468_s1 + $0xcc] ss:$20 sps:$4 sm:$0xff]   ;;  %v1915_v22 = vld [vmem:[%s2468_s1 + $0xd4] ss:$20 sps:$4 sm:$0xff]   ;;  %v2011_v52 = vmov 0.0  }
   0xf   : > { %v1919_v25 = vld [vmem:[%s2468_s1 + $0xf4] ss:$20 sps:$4 sm:$0xff]   ;;  %v1921_v26 = vld [vmem:[%s2468_s1 + $0xfc] ss:$20 sps:$4 sm:$0xff]   ;;  %v1924_v28 = vld [vmem:[%s2468_s1 + $0xf8] ss:$20 sps:$4 sm:$0xff]  }
  0x10   : > { %s1754_s12 = sshll.u32 %s334_s22, 5  ;;  %v1923_v27 = vld [vmem:[%s2468_s1 + $0xf0] ss:$20 sps:$4 sm:$0xff]   ;;  %v1929_v34 = vld [vmem:[%s2468_s1 + $0x118] ss:$20 sps:$4 sm:$0xff]   ;;  %s1682_s13 = sshll.u32 %s2000_s24, 1 }
  0x11   : > { %672 = vmatpush1.bf16.msra.mxu0 %v1899_v11  ;;  %715 = vmatpush1.bf16.msra.mxu1 %v1900_v12  ;;  %s337_s23 = scalar_lea.vmem %s2467_s0, %s1754_s12  ;;  %v1925_v29 = vld [vmem:[%s2468_s1 + $0x11c] ss:$20 sps:$4 sm:$0xff]   ;;  %v1927_v32 = vld [vmem:[%s2468_s1 + $0x124] ss:$20 sps:$4 sm:$0xff]   ;;  %v1930_v35 = vld [vmem:[%s2468_s1 + $0x120] ss:$20 sps:$4 sm:$0xff]  }
  0x12   : > { %673 = vmatprep.subr.bf16.mxu0 %v1901_v13  ;;  %716 = vmatprep.subr.bf16.mxu1 %v1903_v14  ;;  %v370_v30 = vld [vmem:[%s337_s23 + $0x8] sm:$0xff]  ;;  %v372_v31 = vld [vmem:[%s337_s23 + $0x18] sm:$0xff]  ;;  %v1935_v38 = vld [vmem:[%s2468_s1 + $0x140] ss:$20 sps:$4 sm:$0xff]   ;;  %p346_p5 = scmp.lt.s32.totalorder %s1682_s13, 3  ;;  %vm832_vm1 = vcmask 261120  }
  0x13   : > { %v374_v33 = vpack.c.bf16 %v372_v31, %v370_v30  ;;  %v1931_v36 = vld [vmem:[%s2468_s1 + $0x144] ss:$20 sps:$4 sm:$0xff]   ;;  %v1933_v37 = vld [vmem:[%s2468_s1 + $0x14c] ss:$20 sps:$4 sm:$0xff]   ;;  %v1936_v39 = vld [vmem:[%s2468_s1 + $0x148] ss:$20 sps:$4 sm:$0xff]  }
  0x14   : > { %v369_v40 = vld [vmem:[%s337_s23] sm:$0xff]  ;;  %v371_v41 = vld [vmem:[%s337_s23 + $0x10] sm:$0xff]  ;;  %v1938_v44 = vld [vmem:[%s2468_s1 + $0x38] ss:$20 sps:$4 sm:$0xff]   ;;  %s2480_s13 = smov (!%p346_p5, %s1682_s13), 3 }
  0x15   : > { %674 = vmatpush1.bf16.msra.mxu0 %v1905_v15  ;;  %717 = vmatpush1.bf16.msra.mxu1 %v1906_v16  ;;  %v373_v42 = vpack.c.bf16 %v371_v41, %v369_v40  ;;  %v1937_v43 = vld [vmem:[%s2468_s1 + $0x10] ss:$20 sps:$4 sm:$0xff]   ;;  %v1939_v45 = vld [vmem:[%s2468_s1 + $0x60] ss:$20 sps:$4 sm:$0xff]   ;;  %v1940_v46 = vld [vmem:[%s2468_s1 + $0x88] ss:$20 sps:$4 sm:$0xff]  }
  0x16   : > { %675 = vmatprep.subr.bf16.mxu0 %v1907_v17  ;;  %718 = vmatprep.subr.bf16.mxu1 %v1909_v18  ;;  %v1941_v47 = vld [vmem:[%s2468_s1 + $0xb0] ss:$20 sps:$4 sm:$0xff]   ;;  %v1942_v48 = vld [vmem:[%s2468_s1 + $0xd8] ss:$20 sps:$4 sm:$0xff]   ;;  %v1943_v49 = vld [vmem:[%s2468_s1 + $0x100] ss:$20 sps:$4 sm:$0xff]  }
  0x17   : > { %1731 = vmatprep.mubr.msk.bf16.mxu0 %vm663_vm0, %v374_v33  ;;  %1732 = vmatprep.mubr.msk.bf16.mxu1 %vm663_vm0, %v374_v33  ;;  %v1944_v50 = vld [vmem:[%s2468_s1 + $0x128] ss:$20 sps:$4 sm:$0xff]   ;;  %v1945_v51 = vld [vmem:[%s2468_s1 + $0x150] ss:$20 sps:$4 sm:$0xff]   ;;  %s1854_s14 = smul.u32 40, %s2480_s13 }
  0x18   : > { %v808_v53 = vld [vmem:[%s2471_s4] sm:$0xff]  ;;  %v810_v54 = vld [vmem:[%s2471_s4 + $0x10] sm:$0xff]  ;;  %v809_v55 = vld [vmem:[%s2471_s4 + $0x8] sm:$0xff] }
  0x19   : > { %676 = vmatpush1.bf16.msra.mxu0 %v1911_v19  ;;  %719 = vmatpush1.bf16.msra.mxu1 %v1912_v20  ;;  %v1200_v56 = vld [vmem:[%s2473_s6] sm:$0xff]  ;;  %s2249_s17 = scalar_lea.vmem %s2469_s2, %s1854_s14  ;;  %v805_v18 = vld [vmem:[%s2470_s3 + $0x8] sm:$0xff]  ;;  %v806_v19 = vld [vmem:[%s2470_s3 + $0x10] sm:$0xff]  ;;  %s2437_s24 = scalar_lea.vmem %s2474_s7, %s1854_s14 }
  0x1a   : > { %677 = vmatprep.subr.bf16.mxu0 %v1913_v21  ;;  %720 = vmatprep.subr.bf16.mxu1 %v1915_v22  ;;  %v795_v59 = vld [vmem:[%s2249_s17 + $0x8] sm:$0xff]  ;;  %v800_v62 = vld [vmem:[%s2249_s17 + $0x30] sm:$0xff]  ;;  %v797_v63 = vld [vmem:[%s2249_s17 + $0x18] sm:$0xff] }
  0x1b   : > { %814 = vperm.xlu0 %1881, %v808_v53   ;;  %824 = vperm.xlu1 %1882, %v810_v54   ;;  %v802_v0 = vld [vmem:[%s2249_s17 + $0x40] sm:$0xff]  ;;  %v1792_v10 = vpack.c.bf16 %v800_v62, %v795_v59  ;;  %v799_v12 = vld [vmem:[%s2249_s17 + $0x28] sm:$0xff]  ;;  %v796_v13 = vld [vmem:[%s2249_s17 + $0x10] sm:$0xff] }
  0x1c   : > { %v794_v7 = vld [vmem:[%s2249_s17] sm:$0xff]  ;;  %v1800_v11 = vpack.c.bf16 %v802_v0, %v797_v63  ;;  %v801_v14 = vld [vmem:[%s2249_s17 + $0x38] sm:$0xff]  ;;  %v1201_v30 = vld [vmem:[%s2473_s6 + $0x8] sm:$0xff] }
  0x1d   : > { %678 = vmatpush1.bf16.msra.mxu0 %v1917_v23  ;;  %721 = vmatpush1.bf16.msra.mxu1 %v1918_v24  ;;  %v1794_v15 = vpack.c.bf16 %v799_v12, %v794_v7  ;;  %v1802_v16 = vpack.c.bf16 %v801_v14, %v796_v13  ;;  %v804_v17 = vld [vmem:[%s2470_s3] sm:$0xff]  ;;  %v807_v20 = vld [vmem:[%s2470_s3 + $0x18] sm:$0xff]  ;;  %v803_v23 = vld [vmem:[%s2249_s17 + $0x48] sm:$0xff] }
  0x1e   : > { %679 = vmatprep.subr.bf16.mxu0 %v1919_v25  ;;  %722 = vmatprep.subr.bf16.mxu1 %v1921_v26  ;;  %v798_v22 = vld [vmem:[%s2249_s17 + $0x20] sm:$0xff] }
  0x1f   : > { %819 = vperm.xlu0 %1881, %v809_v55  }
  0x21   : > { %680 = vmatpush1.bf16.msra.mxu0 %v1923_v27  ;;  %723 = vmatpush1.bf16.msra.mxu1 %v1924_v28  ;;  %v1808_v28 = vpack.c.bf16 %v803_v23, %v798_v22 }
  0x22   : > { %681 = vmatprep.subr.bf16.mxu0 %v1925_v29  ;;  %724 = vmatprep.subr.bf16.mxu1 %v1927_v32  ;;  %v811_v29 = vld [vmem:[%s2471_s4 + $0x18] sm:$0xff] }
  0x23   : > { %1204 = vperm.xlu0 %1881, %v1200_v56   ;;  %829 = vperm.xlu1 %1882, %v811_v29  }
  0x25   : > { %682 = vmatpush1.bf16.msra.mxu0 %v1929_v34  ;;  %725 = vmatpush1.bf16.msra.mxu1 %v1930_v35 }
  0x26   : > { %683 = vmatprep.subr.bf16.mxu0 %v1931_v36  ;;  %726 = vmatprep.subr.bf16.mxu1 %v1933_v37 }
  0x27   : > { %1209 = vperm.xlu1 %1882, %v1201_v30  }
  0x29   : > { %684 = vmatpush1.bf16.msra.mxu0 %v1935_v38  ;;  %727 = vmatpush1.bf16.msra.mxu1 %v1936_v39 }
  0x2a   : > { %753 = vmatprep.subr.bf16.mxu0 %v2010_v4 }
  0x2c   : > { %700 = vmatmul.mubr.bf16.vlgmr.msra.gmra.mrb[0].mxu0 %v373_v42  ;;  %743 = vmatmul.mubr.bf16.vlgmr.msra.gmra.mrb[0].mxu1 %v373_v42 }
  0x2d   : > { %754 = vmatpush1.bf16.msra.mxu0 %v1937_v43  ;;  %1733 = vmatprep.mubr.msk.bf16.mxu0 %vm663_vm0, %v374_v33 }
  0x2e   : > { %755 = vmatprep.subr.bf16.mxu0 %v2010_v4  ;;  %998 = vmatprep.mubr.f32.mxu1 %v2011_v52 }
  0x31   : > { %756 = vmatpush1.bf16.msra.mxu0 %v1938_v44 }
  0x32   : > { %757 = vmatprep.subr.bf16.mxu0 %v2010_v4 }
  0x35   : > { %758 = vmatpush1.bf16.msra.mxu0 %v1939_v45 }
  0x36   : > { %759 = vmatprep.subr.bf16.mxu0 %v2010_v4 }
  0x39   : > { %760 = vmatpush1.bf16.msra.mxu0 %v1940_v46 }
  0x3a   : > { %761 = vmatprep.subr.bf16.mxu0 %v2010_v4 }
  0x3d   : > { %762 = vmatpush1.bf16.msra.mxu0 %v1941_v47 }
  0x3e   : > { %763 = vmatprep.subr.bf16.mxu0 %v2010_v4 }
  0x41   : > { %764 = vmatpush1.bf16.msra.mxu0 %v1942_v48 }
  0x42   : > { %765 = vmatprep.subr.bf16.mxu0 %v2010_v4 }
  0x45   : > { %766 = vmatpush1.bf16.msra.mxu0 %v1943_v49 }
  0x46   : > { %767 = vmatprep.subr.bf16.mxu0 %v2010_v4 }
  0x49   : > { %768 = vmatpush1.bf16.msra.mxu0 %v1944_v50 }
  0x4a   : > { %769 = vmatprep.subr.bf16.mxu0 %v2010_v4 }
  0x4d   : > { %770 = vmatpush1.bf16.msra.mxu0 %v1945_v51 }
  0x50   : > { %786 = vmatmul.mubr.bf16.vlgmr.msra.gmra.mrb[4].mxu0 %v373_v42 }
  0x51   : > { %909 = vmatprep.mubr.f32.mxu0 %v2011_v52 }
  0x9a   : > { %v2298_v31 = vpop.permute.xlu0 %814 }
  0x9e   : > { %v2312_v40 = vpop.permute.xlu0 %819 }
  0xff   : > { %v701_v57 = vpop.f32.mrb[0].mxu0  ;;  %v744_v58 = vpop.f32.mrb[0].mxu1 }
 0x100   : > { %v703_v60 = vpop.f32.mrb[1].mxu0  ;;  %v746_v61 = vpop.f32.mrb[1].mxu1 }
 0x101   : > { %v705_v1 = vpop.f32.mrb[2].mxu0  ;;  %v748_v2 = vpop.f32.mrb[2].mxu1 }
 0x102   : > { %v1790_v3 = vpack.c.bf16 %v705_v1, %v701_v57  ;;  %v1798_v4 = vpack.c.bf16 %v748_v2, %v744_v58  ;;  %v707_v5 = vpop.f32.mrb[3].mxu0  ;;  %v750_v6 = vpop.f32.mrb[3].mxu1 }
 0x103   : > { %v1788_v8 = vpack.c.bf16 %v707_v5, %v703_v60  ;;  %v1796_v9 = vpack.c.bf16 %v750_v6, %v746_v61 }
 0x105   : > { %1789 = vmatprep.subr.bf16.mxu0 %v1788_v8  ;;  %1797 = vmatprep.subr.bf16.mxu1 %v1796_v9 }
 0x106   : > { %1791 = vmatpush1.bf16.msra.mxu0 %v1790_v3  ;;  %1799 = vmatpush1.bf16.msra.mxu1 %v1798_v4 }
 0x107   : > { %1793 = vmatprep.subr.bf16.mxu0 %v1792_v10  ;;  %1801 = vmatprep.subr.bf16.mxu1 %v1800_v11 }
 0x10a   : > { %1795 = vmatpush1.bf16.msra.mxu0 %v1794_v15  ;;  %1803 = vmatpush1.bf16.msra.mxu1 %v1802_v16 }
 0x10d   : > { %1734 = vmatmul.mubr.msk.f32.vlgmr.msra.gmra.mrb[8].mxu0 %vm832_vm1, %v804_v17  ;;  %1738 = vmatmul.mubr.msk.f32.vlgmr.msra.gmra.mrb[4].mxu1 %vm832_vm1, %v804_v17 }
 0x10e   : > { %915 = vmatprep.mubr.f32.mxu0 %v2011_v52  ;;  %1004 = vmatprep.mubr.f32.mxu1 %v2011_v52 }
 0x111   : > { %1735 = vmatmul.mubr.msk.f32.gmra.mrb[10].mxu0 %vm832_vm1, %v805_v18  ;;  %1739 = vmatmul.mubr.msk.f32.gmra.mrb[6].mxu1 %vm832_vm1, %v805_v18 }
 0x112   : > { %921 = vmatprep.mubr.f32.mxu0 %v2011_v52  ;;  %1010 = vmatprep.mubr.f32.mxu1 %v2011_v52 }
 0x115   : > { %1736 = vmatmul.mubr.msk.f32.gmra.mrb[12].mxu0 %vm832_vm1, %v806_v19  ;;  %1740 = vmatmul.mubr.msk.f32.gmra.mrb[8].mxu1 %vm832_vm1, %v806_v19 }
 0x116   : > { %1016 = vmatprep.mubr.f32.mxu1 %v2011_v52  ;;  %927 = vmatprep.mubr.f32.mxu0 %v2011_v52 }
 0x119   : > { %1741 = vmatmul.mubr.msk.f32.gmra.mrb[10].mxu1 %vm832_vm1, %v807_v20  ;;  %1737 = vmatmul.mubr.msk.f32.gmra.mrb[14].mxu0 %vm832_vm1, %v807_v20 }
 0x11a   : > { %1775 = vmatprep.mubr.msk.f32.mxu1 %vm832_vm1, %v804_v17 }
 0x123   : > { %v787_v21 = vpop.f32.mrb[4].mxu0 }
 0x124   : > { %v789_v24 = vpop.f32.mrb[5].mxu0 }
 0x125   : > { %v790_v25 = vpop.f32.mrb[6].mxu0 }
 0x126   : > { %v1804_v26 = vpack.c.bf16 %v790_v25, %v787_v21  ;;  %v792_v27 = vpop.f32.mrb[7].mxu0 }
 0x128   : > { %1805 = vmatprep.subr.bf16.mxu1 %v1804_v26 }
 0x129   : > { %1807 = vmatpush3.bf16.msra.mxu1 %v1804_v26 }
 0x12a   : > { %1809 = vmatprep.subr.bf16.mxu1 %v1808_v28 }
 0x12d   : > { %1811 = vmatpush3.bf16.msra.mxu1 %v1808_v28 }
 0x130   : > { %1776 = vmatmul.mubr.msk.f32.vlgmr.msra.gmra.mrb[12].mxu1 %vm832_vm1, %v805_v18 }
 0x131   : > { %1778 = vmatprep.mubr.msk.f32.mxu1 %vm832_vm1, %v806_v19 }
 0x134   : > { %1779 = vmatmul.mubr.msk.f32.gmra.mrb[14].mxu1 %vm832_vm1, %v807_v20 }
 0x135   : > { %1282 = vmatprep.mubr.f32.mxu1 %v2011_v52 }
 0x1e0   : > { %v911_v32 = vpop.f32.mrb[8].mxu0  ;;  %v1000_v33 = vpop.f32.mrb[4].mxu1 }
 0x1e1   : > { %v2301_v34 = vadd.f32 %v911_v32, %v2298_v31  ;;  %v2304_v35 = vadd.f32 %v1000_v33, %v2298_v31  ;;  %v913_v36 = vpop.f32.mrb[9].mxu0  ;;  %v1002_v37 = vpop.f32.mrb[5].mxu1 }
 0x1e2   : > { %v2307_v38 = vadd.f32 %v913_v36, %v2298_v31  ;;  %v2310_v39 = vadd.f32 %v1002_v37, %v2298_v31 }
 0x1e3   : > { %v1120_v41 = vmul.f32 0.044715, %v2301_v34  ;;  %v1122_v42 = vmul.f32 0.044715, %v2304_v35  ;;  %v1110_v37 = vmul.f32 0.5, %v2301_v34 }
 0x1e4   : > { %v1121_v43 = vmul.f32 0.044715, %v2307_v38  ;;  %v1123_v44 = vmul.f32 0.044715, %v2310_v39  ;;  %v917_v45 = vpop.f32.mrb[10].mxu0  ;;  %v1006_v46 = vpop.f32.mrb[6].mxu1 }
 0x1e5   : > { %v1130_v47 = vmul.f32 %v1120_v41, %v2301_v34  ;;  %v1132_v48 = vmul.f32 %v1122_v42, %v2304_v35  ;;  %v918_v49 = vadd.f32 %v917_v45, %v2312_v40  ;;  %v1007_v50 = vadd.f32 %v1006_v46, %v2312_v40  ;;  %v919_v51 = vpop.f32.mrb[11].mxu0  ;;  %v1008_v53 = vpop.f32.mrb[7].mxu1 }
 0x1e6   : > { %v1131_v54 = vmul.f32 %v1121_v43, %v2307_v38  ;;  %v2324_v55 = vadd.f32 %v919_v51, %v2312_v40  ;;  %v2327_v56 = vadd.f32 %v1008_v53, %v2312_v40  ;;  %v1133_v61 = vmul.f32 %v1123_v44, %v2310_v39 }
 0x1e7   : > { %v1140_v57 = vmul.f32 %v1130_v47, %v2301_v34  ;;  %v1142_v58 = vmul.f32 %v1132_v48, %v2304_v35  ;;  %v1125_v59 = vmul.f32 0.044715, %v918_v49  ;;  %v1127_v60 = vmul.f32 0.044715, %v1007_v50 }
 0x1e8   : > { %v1126_v62 = vmul.f32 0.044715, %v2324_v55  ;;  %v1128_v63 = vmul.f32 0.044715, %v2327_v56  ;;  %v2334_v0 = vpop.f32.mrb[12].mxu0  ;;  %v1141_v6 = vmul.f32 %v1131_v54, %v2307_v38  ;;  %v1143_v13 = vmul.f32 %v1133_v61, %v2310_v39 }
 0x1e9   : > { %v1150_v1 = vadd.f32 %v1140_v57, %v2301_v34  ;;  %v1152_v2 = vadd.f32 %v1142_v58, %v2304_v35  ;;  %v1135_v3 = vmul.f32 %v1125_v59, %v918_v49  ;;  %v1137_v4 = vmul.f32 %v1127_v60, %v1007_v50  ;;  %v2338_v5 = vpop.f32.mrb[13].mxu0 }
 0x1ea   : > { %v1136_v7 = vmul.f32 %v1126_v62, %v2324_v55  ;;  %v1138_v8 = vmul.f32 %v1128_v63, %v2327_v56  ;;  %v1151_v18 = vadd.f32 %v1141_v6, %v2307_v38  ;;  %v1153_v24 = vadd.f32 %v1143_v13, %v2310_v39 }
 0x1eb   : > { %v1160_v9 = vmul.f32 0.7978846, %v1150_v1  ;;  %v1162_v10 = vmul.f32 0.7978846, %v1152_v2  ;;  %v1145_v11 = vmul.f32 %v1135_v3, %v918_v49  ;;  %v1147_v12 = vmul.f32 %v1137_v4, %v1007_v50 }
 0x1ec   : > { %v1146_v14 = vmul.f32 %v1136_v7, %v2324_v55  ;;  %v1148_v17 = vmul.f32 %v1138_v8, %v2327_v56  ;;  %v1161_v22 = vmul.f32 0.7978846, %v1151_v18  ;;  %v1163_v26 = vmul.f32 0.7978846, %v1153_v24 }
 0x1ed   : > { %1946 = vtanh.f32 %v1160_v9  ;;  %v1155_v15 = vadd.f32 %v1145_v11, %v918_v49  ;;  %v1157_v16 = vadd.f32 %v1147_v12, %v1007_v50  ;;  %v1115_v41 = vmul.f32 0.5, %v918_v49 }
 0x1ee   : > { %1948 = vtanh.f32 %v1162_v10  ;;  %v1156_v19 = vadd.f32 %v1146_v14, %v2324_v55  ;;  %v1158_v25 = vadd.f32 %v1148_v17, %v2327_v56  ;;  %v1112_v44 = vmul.f32 0.5, %v2304_v35 }
 0x1ef   : > { %v1165_v20 = vmul.f32 0.7978846, %v1155_v15  ;;  %v1167_v21 = vmul.f32 0.7978846, %v1157_v16  ;;  %v1117_v45 = vmul.f32 0.5, %v1007_v50  ;;  %v1111_v48 = vmul.f32 0.5, %v2307_v38 }
 0x1f0   : > { %v1166_v23 = vmul.f32 0.7978846, %v1156_v19  ;;  %v1168_v27 = vmul.f32 0.7978846, %v1158_v25  ;;  %v1116_v58 = vmul.f32 0.5, %v2324_v55  ;;  %v1113_v62 = vmul.f32 0.5, %v2310_v39 }
 0x1f1   : > { %1950 = vtanh.f32 %v1165_v20  ;;  %v1118_v35 = vmul.f32 0.5, %v2327_v56  ;;  %v1108_v39 = vld [vmem:[%s2472_s5] sm:$0xff] }
 0x1f2   : > { %1952 = vtanh.f32 %v1167_v21 }
 0x1f3   : > { %1954 = vtanh.f32 %v1161_v22 }
 0x1f4   : > { %1956 = vtanh.f32 %v1166_v23 }
 0x1f5   : > { %1958 = vtanh.f32 %v1163_v26 }
 0x1f6   : > { %1960 = vtanh.f32 %v1168_v27 }
 0x1f7   : > { %v1947_v28 = vpop.eup %1946 }
 0x1f8   : > { %v1949_v29 = vpop.eup %1948  ;;  %v1180_v30 = vadd.f32 1.0, %v1947_v28  ;;  %v929_v28 = vpop.f32.mrb[14].mxu0 }
 0x1f9   : > { %v1182_v33 = vadd.f32 1.0, %v1949_v29  ;;  %v931_v29 = vpop.f32.mrb[15].mxu0 }
 0x1fa   : > { %v1190_v53 = vmul.f32 %v1180_v30, %v1110_v37 }
 0x1fb   : > { %v1951_v32 = vpop.eup %1950  ;;  %v1192_v60 = vmul.f32 %v1182_v33, %v1112_v44 }
 0x1fc   : > { %v1953_v36 = vpop.eup %1952  ;;  %v1185_v42 = vadd.f32 1.0, %v1951_v32 }
 0x1fd   : > { %v1955_v43 = vpop.eup %1954  ;;  %v1187_v46 = vadd.f32 1.0, %v1953_v36  ;;  %v1205_v36 = vpop.permute.xlu0 %1204 }
 0x1fe   : > { %v1957_v47 = vpop.eup %1956  ;;  %v1181_v51 = vadd.f32 1.0, %v1955_v43  ;;  %v1195_v54 = vmul.f32 %v1185_v42, %v1115_v41 }
 0x1ff   : > { %v1959_v57 = vpop.eup %1958  ;;  %v1186_v59 = vadd.f32 1.0, %v1957_v47  ;;  %v1197_v61 = vmul.f32 %v1187_v46, %v1117_v45 }
 0x200   : > { %v1961_v34 = vpop.eup %1960  ;;  %v1814_v49 = vpack.c.bf16 %v1195_v54, %v1190_v53  ;;  %v1183_v50 = vadd.f32 1.0, %v1959_v57  ;;  %v1191_v63 = vmul.f32 %v1181_v51, %v1111_v48 }
 0x201   : > { %v1196_v1 = vmul.f32 %v1186_v59, %v1116_v58  ;;  %v1188_v2 = vadd.f32 1.0, %v1961_v34  ;;  %v1818_v38 = vpack.c.bf16 %v1197_v61, %v1192_v60 }
 0x202   : > { %v1193_v6 = vmul.f32 %v1183_v50, %v1113_v62 }
 0x203   : > { %v1777_v3 = vpop.f32.mrb[12].mxu1  ;;  %v1812_v4 = vpack.c.bf16 %v1196_v1, %v1191_v63  ;;  %v1198_v7 = vmul.f32 %v1188_v2, %v1118_v35 }
 0x204   : > { %v1095_v55 = vadd.f32 %v1777_v3, %v2312_v40  ;;  %v1089_v8 = vpop.f32.mrb[13].mxu1 }
 0x205   : > { %1813 = vmatprep.subr.bf16.mxu1 %v1812_v4  ;;  %v1090_v9 = vadd.f32 %v1089_v8, %v2298_v31  ;;  %v1816_v10 = vpack.c.bf16 %v1198_v7, %v1193_v6  ;;  %v1109_v31 = vld [vmem:[%s2472_s5 + $0x8] sm:$0xff] }
 0x206   : > { %v1129_v11 = vmul.f32 0.044715, %v1095_v55  ;;  %1815 = vmatpush1.bf16.msra.mxu1 %v1814_v49  ;;  %v1119_v21 = vmul.f32 0.5, %v1095_v55 }
 0x207   : > { %v1124_v56 = vmul.f32 0.044715, %v1090_v9  ;;  %1817 = vmatprep.subr.bf16.mxu1 %v1816_v10  ;;  %v1114_v23 = vmul.f32 0.5, %v1090_v9 }
 0x208   : > { %v1139_v12 = vmul.f32 %v1129_v11, %v1095_v55 }
 0x209   : > { %v1134_v13 = vmul.f32 %v1124_v56, %v1090_v9  ;;  %1746 = vmatmul.mubr.msk.f32.vlgmr.msra.gmra.mrb[16].mxu1 %vm663_vm0, %v1108_v39 }
 0x20a   : > { %v1149_v14 = vmul.f32 %v1139_v12, %v1095_v55  ;;  %1819 = vmatpush1.bf16.msra.mxu1 %v1818_v38  ;;  %1288 = vmatprep.mubr.f32.mxu1 %v2011_v52 }
 0x20b   : > { %v1144_v40 = vmul.f32 %v1134_v13, %v1090_v9 }
 0x20c   : > { %v1159_v15 = vadd.f32 %v1149_v14, %v1095_v55 }
 0x20d   : > { %1747 = vmatmul.mubr.msk.f32.gmra.mrb[18].mxu1 %vm663_vm0, %v1109_v31  ;;  %v1154_v16 = vadd.f32 %v1144_v40, %v1090_v9 }
 0x20e   : > { %1359 = vmatprep.mubr.f32.mxu1 %v2011_v52  ;;  %v1169_v17 = vmul.f32 0.7978846, %v1159_v15 }
 0x20f   : > { %v1164_v18 = vmul.f32 0.7978846, %v1154_v16 }
 0x210   : > { %1962 = vtanh.f32 %v1169_v17 }
 0x211   : > { %1748 = vmatmul.mubr.msk.f32.vlgmr.msra.gmra.mrb[8].mxu1 %vm663_vm0, %v1108_v39  ;;  %1964 = vtanh.f32 %v1164_v18 }
 0x212   : > { %1365 = vmatprep.mubr.f32.mxu1 %v2011_v52  ;;  %v825_v52 = vpop.permute.xlu1 %824 }
 0x213   : > { %v924_v32 = vadd.f32 %v2334_v0, %v825_v52  ;;  %v926_v33 = vadd.f32 %v2338_v5, %v825_v52  ;;  %v2387_v34 = vadd.f32 %v1205_v36, %v825_v52 }
 0x215   : > { %1749 = vmatmul.mubr.msk.f32.gmra.mrb[10].mxu1 %vm663_vm0, %v1109_v31  ;;  %v1825_v43 = vadd.f32 %v1205_v36, %v924_v32  ;;  %v1828_v44 = vadd.f32 %v1205_v36, %v926_v33 }
 0x216   : > { %1785 = vmatprep.mubr.msk.f32.mxu1 %vm663_vm0, %v1108_v39  ;;  %v830_v30 = vpop.permute.xlu1 %829 }
 0x217   : > { %v930_v37 = vadd.f32 %v929_v28, %v830_v30  ;;  %v932_v41 = vadd.f32 %v931_v29, %v830_v30 }
 0x21a   : > { %v1963_v19 = vpop.eup %1962  ;;  %v1210_v42 = vpop.permute.xlu1 %1209 }
 0x21b   : > { %v1965_v20 = vpop.eup %1964  ;;  %v1189_v22 = vadd.f32 1.0, %v1963_v19  ;;  %v1831_v48 = vadd.f32 %v1210_v42, %v930_v37  ;;  %v1834_v53 = vadd.f32 %v1210_v42, %v932_v41  ;;  %v2394_v2 = vadd.f32 %v1210_v42, %v830_v30 }
 0x21c   : > { %v1184_v24 = vadd.f32 1.0, %v1965_v20 }
 0x21d   : > { %v1199_v25 = vmul.f32 %v1189_v22, %v1119_v21 }
 0x21e   : > { %v1194_v26 = vmul.f32 %v1184_v24, %v1114_v23 }
 0x220   : > { %v1820_v27 = vpack.c.bf16 %v1199_v25, %v1194_v26 }
 0x222   : > { %1821 = vmatprep.subr.bf16.mxu1 %v1820_v27 }
 0x223   : > { %1823 = vmatpush3.bf16.msra.mxu1 %v1820_v27 }
 0x226   : > { %1786 = vmatmul.mubr.msk.f32.vlgmr.msra.gmra.mrb[14].mxu1 %vm663_vm0, %v1109_v31 }
 0x2dc   : > { %v1284_v45 = vpop.f32.mrb[16].mxu1 }
 0x2dd   : > { %v2375_v46 = vadd.f32 %v1825_v43, %v1284_v45  ;;  %v1286_v47 = vpop.f32.mrb[17].mxu1 }
 0x2de   : > { %v2377_v51 = vadd.f32 %v1828_v44, %v1286_v47 }
 0x2df   : > { %v1467_v54 = vmul.f32 0.044715, %v2375_v46  ;;  %v1457_v42 = vmul.f32 0.5, %v2375_v46 }
 0x2e0   : > { %v1468_v0 = vmul.f32 0.044715, %v2377_v51  ;;  %v1290_v57 = vpop.f32.mrb[18].mxu1  ;;  %v1458_v45 = vmul.f32 0.5, %v2377_v51 }
 0x2e1   : > { %v1477_v5 = vmul.f32 %v2375_v46, %v1467_v54  ;;  %v2382_v58 = vadd.f32 %v1831_v48, %v1290_v57  ;;  %v1292_v59 = vpop.f32.mrb[19].mxu1 }
 0x2e2   : > { %v1478_v60 = vmul.f32 %v2377_v51, %v1468_v0  ;;  %v2385_v61 = vadd.f32 %v1834_v53, %v1292_v59 }
 0x2e3   : > { %v1487_v49 = vmul.f32 %v2375_v46, %v1477_v5  ;;  %v1472_v62 = vmul.f32 0.044715, %v2382_v58  ;;  %v1462_v0 = vmul.f32 0.5, %v2382_v58 }
 0x2e4   : > { %v1488_v35 = vmul.f32 %v2377_v51, %v1478_v60  ;;  %v1473_v50 = vmul.f32 0.044715, %v2385_v61  ;;  %v1361_v63 = vpop.f32.mrb[8].mxu1  ;;  %v1463_v5 = vmul.f32 0.5, %v2385_v61 }
 0x2e5   : > { %v1497_v1 = vadd.f32 %v2375_v46, %v1487_v49  ;;  %v1482_v38 = vmul.f32 %v2382_v58, %v1472_v62  ;;  %v2398_v3 = vadd.f32 %v2387_v34, %v1361_v63  ;;  %v1363_v4 = vpop.f32.mrb[9].mxu1 }
 0x2e6   : > { %v1498_v6 = vadd.f32 %v2377_v51, %v1488_v35  ;;  %v1483_v7 = vmul.f32 %v2385_v61, %v1473_v50  ;;  %v2403_v55 = vadd.f32 %v2387_v34, %v1363_v4 }
 0x2e7   : > { %v1507_v8 = vmul.f32 0.7978846, %v1497_v1  ;;  %v1492_v9 = vmul.f32 %v2382_v58, %v1482_v38  ;;  %v1469_v10 = vmul.f32 0.044715, %v2398_v3 }
 0x2e8   : > { %v1508_v11 = vmul.f32 0.7978846, %v1498_v6  ;;  %v1493_v39 = vmul.f32 %v2385_v61, %v1483_v7  ;;  %v1470_v56 = vmul.f32 0.044715, %v2403_v55  ;;  %v1367_v12 = vpop.f32.mrb[10].mxu1 }
 0x2e9   : > { %1966 = vtanh.f32 %v1507_v8  ;;  %v1502_v13 = vadd.f32 %v2382_v58, %v1492_v9  ;;  %v1479_v14 = vmul.f32 %v2398_v3, %v1469_v10  ;;  %v2412_v31 = vadd.f32 %v2394_v2, %v1367_v12  ;;  %v1369_v40 = vpop.f32.mrb[11].mxu1 }
 0x2ea   : > { %1968 = vtanh.f32 %v1508_v11  ;;  %v1503_v15 = vadd.f32 %v2385_v61, %v1493_v39  ;;  %v1480_v16 = vmul.f32 %v2403_v55, %v1470_v56  ;;  %v2417_v17 = vadd.f32 %v2394_v2, %v1369_v40 }
 0x2eb   : > { %v1512_v18 = vmul.f32 0.7978846, %v1502_v13  ;;  %v1489_v19 = vmul.f32 %v2398_v3, %v1479_v14  ;;  %v1474_v20 = vmul.f32 0.044715, %v2412_v31  ;;  %v1459_v58 = vmul.f32 0.5, %v2398_v3 }
 0x2ec   : > { %v1513_v21 = vmul.f32 0.7978846, %v1503_v15  ;;  %v1490_v22 = vmul.f32 %v2403_v55, %v1480_v16  ;;  %v1475_v23 = vmul.f32 0.044715, %v2417_v17  ;;  %v1460_v61 = vmul.f32 0.5, %v2403_v55 }
 0x2ed   : > { %1970 = vtanh.f32 %v1512_v18  ;;  %v1499_v24 = vadd.f32 %v2398_v3, %v1489_v19  ;;  %v1484_v25 = vmul.f32 %v2412_v31, %v1474_v20  ;;  %v1464_v39 = vmul.f32 0.5, %v2412_v31 }
 0x2ee   : > { %1972 = vtanh.f32 %v1513_v21  ;;  %v1500_v26 = vadd.f32 %v2403_v55, %v1490_v22  ;;  %v1485_v27 = vmul.f32 %v2417_v17, %v1475_v23  ;;  %v1465_v12 = vmul.f32 0.5, %v2417_v17 }
 0x2ef   : > { %v1509_v28 = vmul.f32 0.7978846, %v1499_v24  ;;  %v1494_v29 = vmul.f32 %v2412_v31, %v1484_v25 }
 0x2f0   : > { %v1510_v52 = vmul.f32 0.7978846, %v1500_v26  ;;  %v1495_v30 = vmul.f32 %v2417_v17, %v1485_v27 }
 0x2f1   : > { %1974 = vtanh.f32 %v1509_v28  ;;  %v1504_v32 = vadd.f32 %v2412_v31, %v1494_v29 }
 0x2f2   : > { %1976 = vtanh.f32 %v1510_v52  ;;  %v1505_v33 = vadd.f32 %v2417_v17, %v1495_v30 }
 0x2f3   : > { %v1967_v36 = vpop.eup %1966  ;;  %v1514_v37 = vmul.f32 0.7978846, %v1504_v32 }
 0x2f4   : > { %v1969_v41 = vpop.eup %1968  ;;  %v1527_v43 = vadd.f32 1.0, %v1967_v36  ;;  %v1515_v44 = vmul.f32 0.7978846, %v1505_v33 }
 0x2f5   : > { %v1528_v47 = vadd.f32 1.0, %v1969_v41  ;;  %1978 = vtanh.f32 %v1514_v37 }
 0x2f6   : > { %v1537_v48 = vmul.f32 %v1527_v43, %v1457_v42  ;;  %1980 = vtanh.f32 %v1515_v44 }
 0x2f7   : > { %v1971_v53 = vpop.eup %1970  ;;  %v1538_v54 = vmul.f32 %v1528_v47, %v1458_v45 }
 0x2f8   : > { %v1973_v46 = vpop.eup %1972  ;;  %1547 = vst [vmem:[%s2437_s24] sm:$0xff] %v1537_v48  ;;  %v1532_v57 = vadd.f32 1.0, %v1971_v53 }
 0x2f9   : > { %1548 = vst [vmem:[%s2437_s24 + $0x8] sm:$0xff] %v1538_v54  ;;  %v1533_v59 = vadd.f32 1.0, %v1973_v46  ;;  %v1787_v60 = vpop.f32.mrb[14].mxu1 }
 0x2fa   : > { %v1542_v49 = vmul.f32 %v1532_v57, %v1462_v0  ;;  %v1845_v51 = vadd.f32 %v2394_v2, %v1787_v60  ;;  %v1438_v62 = vpop.f32.mrb[15].mxu1 }
 0x2fb   : > { %v1975_v35 = vpop.eup %1974  ;;  %v1543_v50 = vmul.f32 %v1533_v59, %v1463_v5  ;;  %v1847_v63 = vadd.f32 %v2387_v34, %v1438_v62 }
 0x2fc   : > { %v1977_v1 = vpop.eup %1976  ;;  %1552 = vst [vmem:[%s2437_s24 + $0x28] sm:$0xff] %v1542_v49  ;;  %v1529_v38 = vadd.f32 1.0, %v1975_v35  ;;  %v1476_v4 = vmul.f32 0.044715, %v1845_v51  ;;  %v1466_v17 = vmul.f32 0.5, %v1845_v51 }
 0x2fd   : > { %1553 = vst [vmem:[%s2437_s24 + $0x30] sm:$0xff] %v1543_v50  ;;  %v1530_v6 = vadd.f32 1.0, %v1977_v1  ;;  %v1471_v7 = vmul.f32 0.044715, %v1847_v63  ;;  %v1461_v22 = vmul.f32 0.5, %v1847_v63 }
 0x2fe   : > { %v1539_v8 = vmul.f32 %v1529_v38, %v1459_v58  ;;  %v1486_v2 = vmul.f32 %v1845_v51, %v1476_v4 }
 0x2ff   : > { %v1979_v9 = vpop.eup %1978  ;;  %v1540_v10 = vmul.f32 %v1530_v6, %v1460_v61  ;;  %v1481_v11 = vmul.f32 %v1847_v63, %v1471_v7 }
 0x300   : > { %v1981_v34 = vpop.eup %1980  ;;  %1549 = vst [vmem:[%s2437_s24 + $0x10] sm:$0xff] %v1539_v8  ;;  %v1534_v3 = vadd.f32 1.0, %v1979_v9  ;;  %v1496_v56 = vmul.f32 %v1845_v51, %v1486_v2 }
 0x301   : > { %1550 = vst [vmem:[%s2437_s24 + $0x18] sm:$0xff] %v1540_v10  ;;  %v1535_v13 = vadd.f32 1.0, %v1981_v34  ;;  %v1491_v55 = vmul.f32 %v1847_v63, %v1481_v11 }
 0x302   : > { %v1544_v14 = vmul.f32 %v1534_v3, %v1464_v39  ;;  %v1506_v40 = vadd.f32 %v1845_v51, %v1496_v56 }
 0x303   : > { %v1545_v15 = vmul.f32 %v1535_v13, %v1465_v12  ;;  %v1501_v16 = vadd.f32 %v1847_v63, %v1491_v55 }
 0x304   : > { %1554 = vst [vmem:[%s2437_s24 + $0x38] sm:$0xff] %v1544_v14  ;;  %v1516_v18 = vmul.f32 0.7978846, %v1506_v40 }
 0x305   : > { %1555 = vst [vmem:[%s2437_s24 + $0x40] sm:$0xff] %v1545_v15  ;;  %v1511_v19 = vmul.f32 0.7978846, %v1501_v16 }
 0x306   : > { %1982 = vtanh.f32 %v1516_v18 }
 0x307   : > { %1984 = vtanh.f32 %v1511_v19 }
 0x310   : > { %v1983_v31 = vpop.eup %1982 }
 0x311   : > { %v1985_v20 = vpop.eup %1984  ;;  %v1536_v21 = vadd.f32 1.0, %v1983_v31 }
 0x312   : > { %v1531_v23 = vadd.f32 1.0, %v1985_v20 }
 0x313   : > { %v1546_v25 = vmul.f32 %v1536_v21, %v1466_v17 }
 0x314   : > { %v1541_v24 = vmul.f32 %v1531_v23, %v1461_v22 }
 0x315   : > { %1556 = vst [vmem:[%s2437_s24 + $0x48] sm:$0xff] %v1546_v25 }
 0x316   : > { %1551 = vst [vmem:[%s2437_s24 + $0x20] sm:$0xff] %v1541_v24 }
 0x317 PF: > { %s17_s26 = sadd.s32 1, %s2008_s26   ;;  %s2475_s24 = smov %s2004_s25 }
 0x318   : > { %p14_p6 = scmp.ge.s32.totalorder %s17_s26, 4   ;;  %s2476_s25 = smov %s2478_s27 }
 0x31a   :  { %16 = sbr.rel (!%p14_p6) target bundleno = 2 (0x2), region = 84 }

// kernel: fno2d_forward.11
= control target key start
LH: loop header
LB: loop body
LE: loop exit
PB: predicated region body
PF: predicated region fallthrough
CT: control target
= control target key end

     0   :  { %s3282_s15 = smov 72   ;;  %vm23_vm0 = vcmask 130048   ;;  %s3285_s24 = smov 56   ;;  %vm864_vm1 = vcmask 457728   ;;  %vm2993_vm2 = vcmask 588800   ;;  %s5832_s1 = inlined_call_operand.vmem [shape: bf16[640,144], index: 1, kind: input, shape index: {}]   ;;  %s5833_s0 = inlined_call_operand.vmem [shape: f32[32,640], index: 0, kind: input, shape index: {}]   ;;  %s5834_s3 = inlined_call_operand.vmem [shape: f32[16,16,72], index: 3, kind: input, shape index: {}]   ;;  %s5835_s2 = inlined_call_operand.vmem [shape: f32[16,16,72], index: 2, kind: input, shape index: {}]   ;;  %s5836_s4 = inlined_call_operand.vmem [shape: f32[2,16,144], index: 4, kind: output, shape index: {}]  }
   0x1   :  { %v3126_v0 = vld [vmem:[%s5832_s1 + $0x4] ss:$8 sps:$4 sm:$0xff]   ;;  %v3130_v2 = vld [vmem:[%s5832_s1] ss:$8 sps:$4 sm:$0xff]   ;;  %v3132_v4 = vld [vmem:[%s5832_s1 + $0x14] ss:$8 sps:$4 sm:$0xff]  }
   0x2   :  { %v3128_v1 = vld [vmem:[%s5832_s1 + $0x104] ss:$8 sps:$4 sm:$0xff]   ;;  %549 = vmatprep.subr.bf16.mxu1 %v3126_v0  ;;  %v3131_v3 = vld [vmem:[%s5832_s1 + $0x100] ss:$8 sps:$4 sm:$0xff]   ;;  %v3134_v5 = vld [vmem:[%s5832_s1 + $0x114] ss:$8 sps:$4 sm:$0xff]  }
   0x3   :  { %602 = vmatprep.subr.bf16.mxu0 %v3128_v1  ;;  %550 = vmatpush1.bf16.msra.mxu1 %v3130_v2  ;;  %v3136_v6 = vld [vmem:[%s5832_s1 + $0x10] ss:$8 sps:$4 sm:$0xff]   ;;  %v3138_v8 = vld [vmem:[%s5832_s1 + $0x24] ss:$8 sps:$4 sm:$0xff]   ;;  %v3142_v10 = vld [vmem:[%s5832_s1 + $0x20] ss:$8 sps:$4 sm:$0xff]  }
   0x4   :  { %603 = vmatpush1.bf16.msra.mxu0 %v3131_v3  ;;  %551 = vmatprep.subr.bf16.mxu1 %v3132_v4  ;;  %v3137_v7 = vld [vmem:[%s5832_s1 + $0x110] ss:$8 sps:$4 sm:$0xff]   ;;  %v3140_v9 = vld [vmem:[%s5832_s1 + $0x124] ss:$8 sps:$4 sm:$0xff]   ;;  %v3143_v11 = vld [vmem:[%s5832_s1 + $0x120] ss:$8 sps:$4 sm:$0xff]  }
   0x5   :  { %604 = vmatprep.subr.bf16.mxu0 %v3134_v5  ;;  %v3144_v12 = vld [vmem:[%s5832_s1 + $0x34] ss:$8 sps:$4 sm:$0xff]   ;;  %v3148_v14 = vld [vmem:[%s5832_s1 + $0x30] ss:$8 sps:$4 sm:$0xff]   ;;  %v3150_v16 = vld [vmem:[%s5832_s1 + $0x44] ss:$8 sps:$4 sm:$0xff]  }
   0x6   :  { %v3146_v13 = vld [vmem:[%s5832_s1 + $0x134] ss:$8 sps:$4 sm:$0xff]   ;;  %v3149_v15 = vld [vmem:[%s5832_s1 + $0x130] ss:$8 sps:$4 sm:$0xff]   ;;  %v3152_v17 = vld [vmem:[%s5832_s1 + $0x144] ss:$8 sps:$4 sm:$0xff]  }
   0x7   :  { %552 = vmatpush1.bf16.msra.mxu1 %v3136_v6  ;;  %v3154_v18 = vld [vmem:[%s5832_s1 + $0x40] ss:$8 sps:$4 sm:$0xff]   ;;  %v3156_v20 = vld [vmem:[%s5832_s1 + $0x54] ss:$8 sps:$4 sm:$0xff]   ;;  %v3160_v22 = vld [vmem:[%s5832_s1 + $0x50] ss:$8 sps:$4 sm:$0xff]  }
   0x8   :  { %605 = vmatpush1.bf16.msra.mxu0 %v3137_v7  ;;  %553 = vmatprep.subr.bf16.mxu1 %v3138_v8  ;;  %v3155_v19 = vld [vmem:[%s5832_s1 + $0x140] ss:$8 sps:$4 sm:$0xff]   ;;  %v3158_v21 = vld [vmem:[%s5832_s1 + $0x154] ss:$8 sps:$4 sm:$0xff]   ;;  %v3161_v23 = vld [vmem:[%s5832_s1 + $0x150] ss:$8 sps:$4 sm:$0xff]  }
   0x9   :  { %606 = vmatprep.subr.bf16.mxu0 %v3140_v9  ;;  %v3162_v24 = vld [vmem:[%s5832_s1 + $0x64] ss:$8 sps:$4 sm:$0xff]   ;;  %v3166_v26 = vld [vmem:[%s5832_s1 + $0x60] ss:$8 sps:$4 sm:$0xff]   ;;  %v3168_v28 = vld [vmem:[%s5832_s1 + $0x74] ss:$8 sps:$4 sm:$0xff]  }
   0xa   :  { %v3164_v25 = vld [vmem:[%s5832_s1 + $0x164] ss:$8 sps:$4 sm:$0xff]   ;;  %v3167_v27 = vld [vmem:[%s5832_s1 + $0x160] ss:$8 sps:$4 sm:$0xff]   ;;  %v3170_v29 = vld [vmem:[%s5832_s1 + $0x174] ss:$8 sps:$4 sm:$0xff]  }
   0xb   :  { %554 = vmatpush1.bf16.msra.mxu1 %v3142_v10  ;;  %v3172_v30 = vld [vmem:[%s5832_s1 + $0x70] ss:$8 sps:$4 sm:$0xff]   ;;  %v3174_v32 = vld [vmem:[%s5832_s1 + $0x84] ss:$8 sps:$4 sm:$0xff]   ;;  %v3178_v34 = vld [vmem:[%s5832_s1 + $0x80] ss:$8 sps:$4 sm:$0xff]  }
   0xc   :  { %607 = vmatpush1.bf16.msra.mxu0 %v3143_v11  ;;  %555 = vmatprep.subr.bf16.mxu1 %v3144_v12  ;;  %v3173_v31 = vld [vmem:[%s5832_s1 + $0x170] ss:$8 sps:$4 sm:$0xff]   ;;  %v3176_v33 = vld [vmem:[%s5832_s1 + $0x184] ss:$8 sps:$4 sm:$0xff]   ;;  %v3179_v35 = vld [vmem:[%s5832_s1 + $0x180] ss:$8 sps:$4 sm:$0xff]  }
   0xd   :  { %608 = vmatprep.subr.bf16.mxu0 %v3146_v13  ;;  %v3180_v36 = vld [vmem:[%s5832_s1 + $0x94] ss:$8 sps:$4 sm:$0xff]   ;;  %v3184_v38 = vld [vmem:[%s5832_s1 + $0x90] ss:$8 sps:$4 sm:$0xff]   ;;  %v3186_v40 = vld [vmem:[%s5832_s1 + $0xa4] ss:$8 sps:$4 sm:$0xff]  }
   0xe   :  { %v3182_v37 = vld [vmem:[%s5832_s1 + $0x194] ss:$8 sps:$4 sm:$0xff]   ;;  %v3185_v39 = vld [vmem:[%s5832_s1 + $0x190] ss:$8 sps:$4 sm:$0xff]   ;;  %v3188_v41 = vld [vmem:[%s5832_s1 + $0x1a4] ss:$8 sps:$4 sm:$0xff]  }
   0xf   :  { %556 = vmatpush1.bf16.msra.mxu1 %v3148_v14  ;;  %v3190_v42 = vld [vmem:[%s5832_s1 + $0xa0] ss:$8 sps:$4 sm:$0xff]   ;;  %v3192_v44 = vld [vmem:[%s5832_s1 + $0xb4] ss:$8 sps:$4 sm:$0xff]   ;;  %v3196_v46 = vld [vmem:[%s5832_s1 + $0xb0] ss:$8 sps:$4 sm:$0xff]  }
  0x10   :  { %609 = vmatpush1.bf16.msra.mxu0 %v3149_v15  ;;  %557 = vmatprep.subr.bf16.mxu1 %v3150_v16  ;;  %v3191_v43 = vld [vmem:[%s5832_s1 + $0x1a0] ss:$8 sps:$4 sm:$0xff]   ;;  %v3194_v45 = vld [vmem:[%s5832_s1 + $0x1b4] ss:$8 sps:$4 sm:$0xff]   ;;  %v3197_v51 = vld [vmem:[%s5832_s1 + $0x1b0] ss:$8 sps:$4 sm:$0xff]  }
  0x11   :  { %610 = vmatprep.subr.bf16.mxu0 %v3152_v17  ;;  %v40_v47 = vld [vmem:[%s5833_s0 + $0x8] sm:$0xff]  ;;  %v45_v48 = vld [vmem:[%s5833_s0 + $0x30] sm:$0xff]  ;;  %v42_v49 = vld [vmem:[%s5833_s0 + $0x18] sm:$0xff] }
  0x12   :  { %v47_v50 = vld [vmem:[%s5833_s0 + $0x40] sm:$0xff]  ;;  %v60_v52 = vpack.c.bf16 %v45_v48, %v40_v47  ;;  %v3204_v58 = vld [vmem:[%s5832_s1 + $0xd4] ss:$8 sps:$4 sm:$0xff]   ;;  %v3208_v60 = vld [vmem:[%s5832_s1 + $0xd0] ss:$8 sps:$4 sm:$0xff]  }
  0x13   :  { %558 = vmatpush1.bf16.msra.mxu1 %v3154_v18  ;;  %v62_v53 = vpack.c.bf16 %v47_v50, %v42_v49  ;;  %v3198_v54 = vld [vmem:[%s5832_s1 + $0xc4] ss:$8 sps:$4 sm:$0xff]   ;;  %v3202_v56 = vld [vmem:[%s5832_s1 + $0xc0] ss:$8 sps:$4 sm:$0xff]   ;;  %v3206_v59 = vld [vmem:[%s5832_s1 + $0x1d4] ss:$8 sps:$4 sm:$0xff]  }
  0x14   :  { %611 = vmatpush1.bf16.msra.mxu0 %v3155_v19  ;;  %559 = vmatprep.subr.bf16.mxu1 %v3156_v20  ;;  %v3200_v55 = vld [vmem:[%s5832_s1 + $0x1c4] ss:$8 sps:$4 sm:$0xff]   ;;  %v3203_v57 = vld [vmem:[%s5832_s1 + $0x1c0] ss:$8 sps:$4 sm:$0xff]   ;;  %v3209_v61 = vld [vmem:[%s5832_s1 + $0x1d0] ss:$8 sps:$4 sm:$0xff]  }
  0x15   :  { %612 = vmatprep.subr.bf16.mxu0 %v3158_v21  ;;  %581 = vmatprep.mubr.bf16.mxu1 %v60_v52  ;;  %v3210_v62 = vld [vmem:[%s5832_s1 + $0xe4] ss:$8 sps:$4 sm:$0xff]   ;;  %v3214_v0 = vld [vmem:[%s5832_s1 + $0xe0] ss:$8 sps:$4 sm:$0xff]   ;;  %v3216_v2 = vld [vmem:[%s5832_s1 + $0xf4] ss:$8 sps:$4 sm:$0xff]  }
  0x16   :  { %634 = vmatprep.mubr.bf16.mxu0 %v62_v53  ;;  %v3212_v63 = vld [vmem:[%s5832_s1 + $0x1e4] ss:$8 sps:$4 sm:$0xff]   ;;  %v3215_v1 = vld [vmem:[%s5832_s1 + $0x1e0] ss:$8 sps:$4 sm:$0xff]   ;;  %v3218_v3 = vld [vmem:[%s5832_s1 + $0x1f4] ss:$8 sps:$4 sm:$0xff]  }
  0x17   :  { %560 = vmatpush1.bf16.msra.mxu1 %v3160_v22  ;;  %v3220_v4 = vld [vmem:[%s5832_s1 + $0xf0] ss:$8 sps:$4 sm:$0xff]   ;;  %v39_v6 = vld [vmem:[%s5833_s0] sm:$0xff]  ;;  %v44_v7 = vld [vmem:[%s5833_s0 + $0x28] sm:$0xff] }
  0x18   :  { %613 = vmatpush1.bf16.msra.mxu0 %v3161_v23  ;;  %561 = vmatprep.subr.bf16.mxu1 %v3162_v24  ;;  %v3221_v5 = vld [vmem:[%s5832_s1 + $0x1f0] ss:$8 sps:$4 sm:$0xff]   ;;  %v3530_v10 = vld [vmem:[%s5834_s3] sm:$0xff]  ;;  %v3535_v11 = vld [vmem:[%s5835_s2 + $0x8] sm:$0xff]  ;;  %v59_v16 = vpack.c.bf16 %v44_v7, %v39_v6 }
  0x19   :  { %614 = vmatprep.subr.bf16.mxu0 %v3164_v25  ;;  %v41_v8 = vld [vmem:[%s5833_s0 + $0x10] sm:$0xff]  ;;  %v46_v9 = vld [vmem:[%s5833_s0 + $0x38] sm:$0xff]  ;;  %v3224_v12 = vld [vmem:[%s5832_s1 + $0x204] ss:$8 sps:$4 sm:$0xff]   ;;  %826 = vrot.lane.b32.xlu0 %v3530_v10, %s3282_s15 }
  0x1a   :  { %v50_v13 = vld [vmem:[%s5833_s0 + $0x58] sm:$0xff]  ;;  %v55_v14 = vld [vmem:[%s5833_s0 + $0x80] sm:$0xff]  ;;  %v52_v15 = vld [vmem:[%s5833_s0 + $0x68] sm:$0xff]  ;;  %889 = vrot.lane.b32.xlu1 %v3535_v11, %s3282_s15  ;;  %v61_v17 = vpack.c.bf16 %v46_v9, %v41_v8 }
  0x1b   :  { %562 = vmatpush1.bf16.msra.mxu1 %v3166_v26  ;;  %v57_v18 = vld [vmem:[%s5833_s0 + $0x90] sm:$0xff]  ;;  %v3559_v19 = vld [vmem:[%s5834_s3 + $0x8] sm:$0xff]  ;;  %v3564_v20 = vld [vmem:[%s5834_s3 + $0x18] sm:$0xff]  ;;  %v65_v24 = vpack.c.bf16 %v55_v14, %v50_v13 }
  0x1c   :  { %615 = vmatpush1.bf16.msra.mxu0 %v3167_v27  ;;  %563 = vmatprep.subr.bf16.mxu1 %v3168_v28  ;;  %v3222_v21 = vld [vmem:[%s5832_s1 + $0x200] ss:$8 sps:$4 sm:$0xff]   ;;  %v3227_v22 = vld [vmem:[%s5832_s1 + $0x214] ss:$8 sps:$4 sm:$0xff]   ;;  %v3225_v23 = vld [vmem:[%s5832_s1 + $0x210] ss:$8 sps:$4 sm:$0xff]   ;;  %v67_v25 = vpack.c.bf16 %v57_v18, %v52_v15 }
  0x1d   :  { %616 = vmatprep.subr.bf16.mxu0 %v3170_v29  ;;  %828 = vrot.lane.b32.xlu0 %v3559_v19, %s3282_s15  ;;  %v49_v26 = vld [vmem:[%s5833_s0 + $0x50] sm:$0xff]  ;;  %v54_v27 = vld [vmem:[%s5833_s0 + $0x78] sm:$0xff]  ;;  %v51_v28 = vld [vmem:[%s5833_s0 + $0x60] sm:$0xff] }
  0x1e   :  { %965 = vrot.lane.b32.xlu1 %v3564_v20, %s3282_s15  ;;  %v56_v29 = vld [vmem:[%s5833_s0 + $0x88] sm:$0xff]  ;;  %v3657_v47 = vld [vmem:[%s5834_s3 + $0x20] sm:$0xff]  ;;  %v775_v48 = vld [vmem:[%s5834_s3 + $0x38] sm:$0xff] }
  0x1f   :  { %564 = vmatpush1.bf16.msra.mxu1 %v3172_v30  ;;  %v3594_v30 = vld [vmem:[%s5835_s2] sm:$0xff]  ;;  %v743_v52 = vld [vmem:[%s5835_s2 + $0x38] sm:$0xff]  ;;  %v781_v6 = vld [vmem:[%s5834_s3 + $0x68] sm:$0xff] }
  0x20   :  { %617 = vmatpush1.bf16.msra.mxu0 %v3173_v31  ;;  %565 = vmatprep.subr.bf16.mxu1 %v3174_v32  ;;  %v3599_v31 = vld [vmem:[%s5835_s2 + $0x18] sm:$0xff]  ;;  %v3230_v32 = vld [vmem:[%s5832_s1 + $0x224] ss:$8 sps:$4 sm:$0xff]   ;;  %v3240_v50 = vld [vmem:[%s5832_s1 + $0x260] ss:$8 sps:$4 sm:$0xff]  }
  0x21   :  { %618 = vmatprep.subr.bf16.mxu0 %v3176_v33  ;;  %v64_v33 = vpack.c.bf16 %v54_v27, %v49_v26  ;;  %887 = vrot.lane.b32.xlu0 %v3594_v30, %s3282_s15  ;;  %v3242_v49 = vld [vmem:[%s5832_s1 + $0x264] ss:$8 sps:$4 sm:$0xff]   ;;  %v3245_v53 = vld [vmem:[%s5832_s1 + $0x274] ss:$8 sps:$4 sm:$0xff]  }
  0x22   :  { %1025 = vrot.lane.b32.xlu1 %v3599_v31, %s3282_s15  ;;  %v746_v7 = vld [vmem:[%s5835_s2 + $0x50] sm:$0xff]  ;;  %v749_v8 = vld [vmem:[%s5835_s2 + $0x68] sm:$0xff]  ;;  %v780_v9 = vld [vmem:[%s5834_s3 + $0x60] sm:$0xff] }
  0x23   :  { %566 = vmatpush1.bf16.msra.mxu1 %v3178_v34  ;;  %v66_v34 = vpack.c.bf16 %v56_v29, %v51_v28  ;;  %v748_v13 = vld [vmem:[%s5835_s2 + $0x60] sm:$0xff]  ;;  %v751_v14 = vld [vmem:[%s5835_s2 + $0x78] sm:$0xff]  ;;  %v782_v15 = vld [vmem:[%s5834_s3 + $0x70] sm:$0xff] }
  0x24   :  { %619 = vmatpush1.bf16.msra.mxu0 %v3179_v35  ;;  %567 = vmatprep.subr.bf16.mxu1 %v3180_v36  ;;  %v3228_v35 = vld [vmem:[%s5832_s1 + $0x220] ss:$8 sps:$4 sm:$0xff]   ;;  %v3233_v36 = vld [vmem:[%s5832_s1 + $0x234] ss:$8 sps:$4 sm:$0xff]  }
  0x25   :  { %620 = vmatprep.subr.bf16.mxu0 %v3182_v37  ;;  %v3231_v37 = vld [vmem:[%s5832_s1 + $0x230] ss:$8 sps:$4 sm:$0xff]   ;;  %v784_v18 = vld [vmem:[%s5834_s3 + $0x80] sm:$0xff] }
  0x27   :  { %568 = vmatpush1.bf16.msra.mxu1 %v3184_v38  ;;  %v3620_v38 = vld [vmem:[%s5834_s3 + $0x10] sm:$0xff] }
  0x28   :  { %621 = vmatpush1.bf16.msra.mxu0 %v3185_v39  ;;  %569 = vmatprep.subr.bf16.mxu1 %v3186_v40  ;;  %v773_v39 = vld [vmem:[%s5834_s3 + $0x28] sm:$0xff] }
  0x29   :  { %622 = vmatprep.subr.bf16.mxu0 %v3188_v41  ;;  %v3236_v40 = vld [vmem:[%s5832_s1 + $0x244] ss:$8 sps:$4 sm:$0xff]   ;;  %v3283_v41 = vmov 0   ;;  %963 = vrot.lane.b32.xlu0 %v3620_v38, %s3282_s15 }
  0x2a   :  { %1101 = vrot.lane.b32.xlu1 %v773_v39, %s3282_s15 }
  0x2b   :  { %570 = vmatpush1.bf16.msra.mxu1 %v3190_v42  ;;  %v3234_v42 = vld [vmem:[%s5832_s1 + $0x240] ss:$8 sps:$4 sm:$0xff]  }
  0x2c   :  { %623 = vmatpush1.bf16.msra.mxu0 %v3191_v43  ;;  %571 = vmatprep.subr.bf16.mxu1 %v3192_v44  ;;  %v3637_v43 = vld [vmem:[%s5835_s2 + $0x10] sm:$0xff]  ;;  %v3642_v44 = vld [vmem:[%s5835_s2 + $0x28] sm:$0xff] }
  0x2d   :  { %624 = vmatprep.subr.bf16.mxu0 %v3194_v45  ;;  %v3239_v45 = vld [vmem:[%s5832_s1 + $0x254] ss:$8 sps:$4 sm:$0xff]   ;;  %1023 = vrot.lane.b32.xlu0 %v3637_v43, %s3282_s15 }
  0x2e   :  { %1161 = vrot.lane.b32.xlu1 %v3642_v44, %s3282_s15 }
  0x2f   :  { %572 = vmatpush1.bf16.msra.mxu1 %v3196_v46  ;;  %v3237_v46 = vld [vmem:[%s5832_s1 + $0x250] ss:$8 sps:$4 sm:$0xff]  }
  0x30   :  { %625 = vmatpush1.bf16.msra.mxu0 %v3197_v51  ;;  %573 = vmatprep.subr.bf16.mxu1 %v3198_v54  ;;  %v3674_v51 = vld [vmem:[%s5835_s2 + $0x20] sm:$0xff]  ;;  %v3243_v54 = vld [vmem:[%s5832_s1 + $0x270] ss:$8 sps:$4 sm:$0xff]  }
  0x31   :  { %626 = vmatprep.subr.bf16.mxu0 %v3200_v55  ;;  %1099 = vrot.lane.b32.xlu0 %v3657_v47, %s3282_s15  ;;  %v43_v55 = vld [vmem:[%s5833_s0 + $0x20] sm:$0xff] }
  0x32   :  { %1237 = vrot.lane.b32.xlu1 %v775_v48, %s3282_s15 }
  0x33   :  { %574 = vmatpush1.bf16.msra.mxu1 %v3202_v56  ;;  %v48_v56 = vld [vmem:[%s5833_s0 + $0x48] sm:$0xff] }
  0x34   :  { %627 = vmatpush1.bf16.msra.mxu0 %v3203_v57  ;;  %575 = vmatprep.subr.bf16.mxu1 %v3204_v58  ;;  %v53_v57 = vld [vmem:[%s5833_s0 + $0x70] sm:$0xff]  ;;  %v58_v58 = vld [vmem:[%s5833_s0 + $0x98] sm:$0xff] }
  0x35   :  { %628 = vmatprep.subr.bf16.mxu0 %v3206_v59  ;;  %1159 = vrot.lane.b32.xlu0 %v3674_v51, %s3282_s15  ;;  %v774_v59 = vld [vmem:[%s5834_s3 + $0x30] sm:$0xff] }
  0x36   :  { %1297 = vrot.lane.b32.xlu1 %v743_v52, %s3282_s15 }
  0x37   :  { %576 = vmatpush1.bf16.msra.mxu1 %v3208_v60  ;;  %v777_v60 = vld [vmem:[%s5834_s3 + $0x48] sm:$0xff] }
  0x38   :  { %629 = vmatpush1.bf16.msra.mxu0 %v3209_v61  ;;  %577 = vmatprep.subr.bf16.mxu1 %v3210_v62  ;;  %v63_v61 = vpack.c.bf16 %v48_v56, %v43_v55  ;;  %v68_v62 = vpack.c.bf16 %v58_v58, %v53_v57 }
  0x39   :  { %630 = vmatprep.subr.bf16.mxu0 %v3212_v63  ;;  %1235 = vrot.lane.b32.xlu0 %v774_v59, %s3282_s15  ;;  %v3711_v63 = vld [vmem:[%s5835_s2 + $0x30] sm:$0xff] }
  0x3a   :  { %1373 = vrot.lane.b32.xlu1 %v777_v60, %s3282_s15 }
  0x3b   :  { %578 = vmatpush1.bf16.msra.mxu1 %v3214_v0  ;;  %v745_v0 = vld [vmem:[%s5835_s2 + $0x48] sm:$0xff] }
  0x3c   :  { %631 = vmatpush1.bf16.msra.mxu0 %v3215_v1  ;;  %579 = vmatprep.subr.bf16.mxu1 %v3216_v2  ;;  %v776_v1 = vld [vmem:[%s5834_s3 + $0x40] sm:$0xff]  ;;  %v779_v2 = vld [vmem:[%s5834_s3 + $0x58] sm:$0xff] }
  0x3d   :  { %632 = vmatprep.subr.bf16.mxu0 %v3218_v3  ;;  %1295 = vrot.lane.b32.xlu0 %v3711_v63, %s3282_s15  ;;  %v744_v3 = vld [vmem:[%s5835_s2 + $0x40] sm:$0xff] }
  0x3e   :  { %1433 = vrot.lane.b32.xlu1 %v745_v0, %s3282_s15 }
  0x3f   :  { %580 = vmatpush1.bf16.msra.mxu1 %v3220_v4  ;;  %v747_v4 = vld [vmem:[%s5835_s2 + $0x58] sm:$0xff] }
  0x40   :  { %633 = vmatpush1.bf16.msra.mxu0 %v3221_v5  ;;  %3090 = vmatprep.subr.bf16.mxu1 %v3224_v12  ;;  %v778_v5 = vld [vmem:[%s5834_s3 + $0x50] sm:$0xff] }
  0x41   :  { %655 = vmatprep.subr.bf16.mxu0 %v3224_v12  ;;  %1371 = vrot.lane.b32.xlu0 %v776_v1, %s3282_s15  ;;  %v783_v12 = vld [vmem:[%s5834_s3 + $0x78] sm:$0xff] }
  0x42   :  { %582 = vmatmul.mubr.bf16.vlgmr.msra.gmra.mrb[0].mxu1 %v59_v16  ;;  %1509 = vrot.lane.b32.xlu1 %v779_v2, %s3282_s15  ;;  %v785_v16 = vld [vmem:[%s5834_s3 + $0x88] sm:$0xff] }
  0x43   :  { %635 = vmatmul.mubr.bf16.vlgmr.msra.gmra.mrb[0].mxu0 %v61_v17  ;;  %3098 = vmatpush1.bf16.msra.mxu1 %v3222_v21  ;;  %v750_v17 = vld [vmem:[%s5835_s2 + $0x70] sm:$0xff] }
  0x44   :  { %656 = vmatpush1.bf16.msra.mxu0 %v3222_v21  ;;  %3091 = vmatprep.subr.bf16.mxu1 %v3227_v22  ;;  %v3284_v21 = vmov 0.0  }
  0x45   :  { %657 = vmatprep.subr.bf16.mxu0 %v3227_v22  ;;  %591 = vmatprep.mubr.bf16.mxu1 %v65_v24  ;;  %24 = vst.msk [vmem:[#allocation2 + $0x8] sm:$0xff] %vm23_vm0, %v3284_v21  ;;  %26 = vst.msk [vmem:[#allocation2 + $0x18] sm:$0xff] %vm23_vm0, %v3284_v21 }
  0x46   :  { %644 = vmatprep.mubr.bf16.mxu0 %v67_v25  ;;  %1431 = vrot.lane.b32.xlu0 %v744_v3, %s3282_s15  ;;  %28 = vst.msk [vmem:[#allocation2 + $0x28] sm:$0xff] %vm23_vm0, %v3284_v21  ;;  %30 = vst.msk [vmem:[#allocation2 + $0x38] sm:$0xff] %vm23_vm0, %v3284_v21 }
  0x47   :  { %3099 = vmatpush1.bf16.msra.mxu1 %v3225_v23  ;;  %1569 = vrot.lane.b32.xlu1 %v747_v4, %s3282_s15 }
  0x48   :  { %658 = vmatpush1.bf16.msra.mxu0 %v3225_v23  ;;  %3092 = vmatprep.subr.bf16.mxu1 %v3230_v32 }
  0x49   :  { %659 = vmatprep.subr.bf16.mxu0 %v3230_v32 }
  0x4a   :  { %592 = vmatmul.mubr.bf16.gmra.mrb[4].mxu1 %v64_v33  ;;  %1507 = vrot.lane.b32.xlu0 %v778_v5, %s3282_s15 }
  0x4b   :  { %645 = vmatmul.mubr.bf16.gmra.mrb[4].mxu0 %v66_v34  ;;  %3100 = vmatpush1.bf16.msra.mxu1 %v3228_v35 }
  0x4c   :  { %660 = vmatpush1.bf16.msra.mxu0 %v3228_v35  ;;  %3093 = vmatprep.subr.bf16.mxu1 %v3233_v36  ;;  %v32_v52 = vld [vmem:[#allocation2 + $0x8] sm:$0xff]  ;;  %v34_v0 = vld [vmem:[#allocation2 + $0x18] sm:$0xff] }
  0x4d   :  { %661 = vmatprep.subr.bf16.mxu0 %v3233_v36  ;;  %687 = vmatprep.mubr.bf16.mxu0 %v3283_v41  ;;  %v38_v2 = vld [vmem:[#allocation2 + $0x38] sm:$0xff] }
  0x4e   :  { %697 = vmatprep.mubr.bf16.mxu1 %v3283_v41  ;;  %1645 = vrot.lane.b32.xlu1 %v781_v6, %s3282_s15  ;;  %v800_v41 = vlaneseq }
  0x4f   :  { %3101 = vmatpush1.bf16.msra.mxu1 %v3231_v37  ;;  %1567 = vrot.lane.b32.xlu0 %v746_v7, %s3282_s15 }
  0x50   :  { %662 = vmatpush1.bf16.msra.mxu0 %v3231_v37  ;;  %3094 = vmatprep.subr.bf16.mxu1 %v3236_v40 }
  0x51   :  { %663 = vmatprep.subr.bf16.mxu0 %v3236_v40 }
  0x52   :  { %1705 = vrot.lane.b32.xlu1 %v749_v8, %s3282_s15 }
  0x53   :  { %3102 = vmatpush1.bf16.msra.mxu1 %v3234_v42  ;;  %1643 = vrot.lane.b32.xlu0 %v780_v9, %s3282_s15 }
  0x54   :  { %664 = vmatpush1.bf16.msra.mxu0 %v3234_v42  ;;  %3095 = vmatprep.subr.bf16.mxu1 %v3239_v45  ;;  %v3787_v42 = vshrl.u32 %v800_v41, 7 }
  0x55   :  { %665 = vmatprep.subr.bf16.mxu0 %v3239_v45 }
  0x56   :  { %1781 = vrot.lane.b32.xlu1 %v783_v12, %s3282_s15  ;;  %v3794_v56 = vsub.s32 0, %v3787_v42 }
  0x57   :  { %3103 = vmatpush1.bf16.msra.mxu1 %v3237_v46  ;;  %1703 = vrot.lane.b32.xlu0 %v748_v13, %s3282_s15 }
  0x58   :  { %666 = vmatpush1.bf16.msra.mxu0 %v3237_v46  ;;  %3096 = vmatprep.subr.bf16.mxu1 %v3242_v49  ;;  %5893 = vst [vmem:[#allocation3_spill] sm:$0xff] %v3794_v56 }
  0x59   :  { %667 = vmatprep.subr.bf16.mxu0 %v3242_v49 }
  0x5a   :  { %1841 = vrot.lane.b32.xlu1 %v751_v14, %s3282_s15 }
  0x5b   :  { %3104 = vmatpush1.bf16.msra.mxu1 %v3240_v50  ;;  %1779 = vrot.lane.b32.xlu0 %v782_v15, %s3282_s15 }
  0x5c   :  { %668 = vmatpush1.bf16.msra.mxu0 %v3240_v50  ;;  %3097 = vmatprep.subr.bf16.mxu1 %v3245_v53 }
  0x5d   :  { %669 = vmatprep.subr.bf16.mxu0 %v3245_v53 }
  0x5e   :  { %1917 = vrot.lane.b32.xlu1 %v785_v16, %s3282_s15 }
  0x5f   :  { %3105 = vmatpush1.bf16.msra.mxu1 %v3243_v54  ;;  %1839 = vrot.lane.b32.xlu0 %v750_v17, %s3282_s15 }
  0x60   :  { %670 = vmatpush1.bf16.msra.mxu0 %v3243_v54  ;;  %v36_v54 = vld [vmem:[#allocation2 + $0x28] sm:$0xff] }
  0x62   :  { %698 = vmatmul.mubr.bf16.vlgmr.msra.gmra.mrb[8].mxu1 %v68_v62 }
  0x63   :  { %688 = vmatmul.mubr.bf16.vlgmr.msra.gmra.mrb[0].mxu0 %v63_v61  ;;  %1915 = vrot.lane.b32.xlu0 %v784_v18, %s3282_s15 }
  0x8b   :  { %v827_v45 = vpop.permute.xlu0 %826 }
  0x8f   :  { %v829_v9 = vpop.permute.xlu0 %828 }
 0x115   :  { %v583_v22 = vpop.f32.mrb[0].mxu1 }
 0x116   :  { %v585_v23 = vpop.f32.mrb[1].mxu1 }
 0x117   :  { %v587_v24 = vpop.f32.mrb[2].mxu1 }
 0x118   :  { %v589_v25 = vpop.f32.mrb[3].mxu1 }
 0x11d   :  { %v593_v26 = vpop.f32.mrb[4].mxu1 }
 0x11e   :  { %v646_v27 = vpop.f32.mrb[4].mxu0  ;;  %v595_v29 = vpop.f32.mrb[5].mxu1 }
 0x11f   :  { %v647_v28 = vadd.f32 %v646_v27, %v593_v26  ;;  %v648_v32 = vpop.f32.mrb[5].mxu0  ;;  %v597_v34 = vpop.f32.mrb[6].mxu1 }
 0x120   :  { %v649_v33 = vadd.f32 %v648_v32, %v595_v29  ;;  %v650_v35 = vpop.f32.mrb[6].mxu0  ;;  %v599_v37 = vpop.f32.mrb[7].mxu1 }
 0x121   :  { %v651_v36 = vadd.f32 %v650_v35, %v597_v34  ;;  %v652_v39 = vpop.f32.mrb[7].mxu0  ;;  %v890_v29 = vpop.permute.xlu1 %889  ;;  %v3833_v35 = vsub.s32 1, %v3787_v42 }
 0x122   :  { %v653_v40 = vadd.f32 %v652_v39, %v599_v37  ;;  %v3837_v37 = vsub.s32 5, %v3787_v42 }
 0x123   :  { %5894 = vst [vmem:[#allocation4_spill] sm:$0xff] %v3833_v35 }
 0x124   :  { %5895 = vst [vmem:[#allocation5_spill] sm:$0xff] %v3837_v37 }
 0x135   :  { %v699_v48 = vpop.f32.mrb[8].mxu1 }
 0x136   :  { %v689_v46 = vpop.f32.mrb[0].mxu0  ;;  %v3791_v50 = vadd.f32 %v699_v48, %v647_v28  ;;  %v701_v55 = vpop.f32.mrb[9].mxu1 }
 0x137   :  { %v3789_v49 = vadd.f32 %v689_v46, %v583_v22  ;;  %v691_v53 = vpop.f32.mrb[1].mxu0  ;;  %v702_v58 = vadd.f32 %v701_v55, %v649_v33  ;;  %v703_v60 = vpop.f32.mrb[10].mxu1  ;;  %v3861_v55 = vsub.s32 6, %v3787_v42 }
 0x138   :  { %v3107_v57 = vadd.f32 %v691_v53, %v585_v23  ;;  %v693_v59 = vpop.f32.mrb[2].mxu0  ;;  %v704_v62 = vadd.f32 %v703_v60, %v651_v36  ;;  %v705_v3 = vpop.f32.mrb[11].mxu1  ;;  %v3806_v16 = vrot.slane %v3791_v50, %v3794_v56  ;;  %v3872_v60 = vrot.slane %v3791_v50, %v3833_v35 }
 0x139   :  { %v3108_v61 = vadd.f32 %v693_v59, %v587_v24  ;;  %v695_v1 = vpop.f32.mrb[3].mxu0  ;;  %v713_v5 = vadd.f32 %v702_v58, %v36_v54  ;;  %v706_v7 = vadd.f32 %v705_v3, %v653_v40  ;;  %v3798_v8 = vrot.slane %v3789_v49, %v3794_v56  ;;  %5896 = vst [vmem:[#allocation6_spill] sm:$0xff] %v3861_v55  ;;  %v966_v58 = vpop.permute.xlu1 %965 }
 0x13a   :  { %v709_v4 = vadd.f32 %v3107_v57, %v32_v52  ;;  %v3109_v6 = vadd.f32 %v695_v1, %v589_v25  ;;  %723 = vst [vmem:[#allocation2 + $0x30] sm:$0xff] %v704_v62  ;;  %v836_v17 = vmul.f32 %v827_v45, %v3806_v16  ;;  %v838_v22 = vmul.f32 %v829_v9, %v3806_v16  ;;  %v888_v25 = vpop.permute.xlu0 %887 }
 0x13b   :  { %722 = vst.msk [vmem:[#allocation2 + $0x28] sm:$0xff] %vm23_vm0, %v713_v5  ;;  %v715_v13 = vadd.f32 %v706_v7, %v38_v2  ;;  %719 = vst [vmem:[#allocation2 + $0x10] sm:$0xff] %v3108_v61  ;;  %v834_v14 = vmul.f32 %v829_v9, %v3798_v8  ;;  %v832_v15 = vmul.f32 %v827_v45, %v3798_v8 }
 0x13c   :  { %718 = vst.msk [vmem:[#allocation2 + $0x8] sm:$0xff] %vm23_vm0, %v709_v4  ;;  %v711_v12 = vadd.f32 %v3109_v6, %v34_v0  ;;  %v893_v26 = vmul.f32 %v888_v25, %v3798_v8  ;;  %v895_v32 = vmul.f32 %v890_v29, %v3798_v8  ;;  %v897_v34 = vmul.f32 %v888_v25, %v3806_v16 }
 0x13d   :  { %724 = vst.msk [vmem:[#allocation2 + $0x38] sm:$0xff] %vm23_vm0, %v715_v13  ;;  %852 = vrot.lane.b32.xlu0 %v834_v14, %s3285_s24  ;;  %848 = vrot.lane.b32.xlu1 %v832_v15, %s3285_s24  ;;  %v899_v39 = vmul.f32 %v890_v29, %v3806_v16  ;;  %v3843_v40 = vrot.slane %v3789_v49, %v3833_v35  ;;  %v3890_v4 = vsub.s32 7, %v3787_v42 }
 0x13e   :  { %720 = vst.msk [vmem:[#allocation2 + $0x18] sm:$0xff] %vm23_vm0, %v711_v12  ;;  %v964_v46 = vpop.permute.xlu0 %963  ;;  %v3857_v52 = vrot.slane %v3791_v50, %v3837_v37  ;;  %v3876_v62 = vrot.slane %v3789_v49, %v3861_v55  ;;  %v3885_v2 = vrot.slane %v3791_v50, %v3861_v55  ;;  %v975_v13 = vmul.f32 %v966_v58, %v3872_v60 }
 0x13f   :  { %v969_v53 = vmul.f32 %v964_v46, %v3843_v40  ;;  %v971_v59 = vmul.f32 %v966_v58, %v3843_v40  ;;  %v973_v3 = vmul.f32 %v964_v46, %v3872_v60  ;;  %5897 = vst [vmem:[#allocation7_spill] sm:$0xff] %v3890_v4  ;;  %v3905_v14 = vrot.slane %v3789_v49, %v3890_v4 }
 0x141   :  { %856 = vrot.lane.b32.xlu0 %v836_v17, %s3285_s24  ;;  %5899 = vst [vmem:[#allocation9_spill] sm:$0xff] %v3905_v14 }
 0x142   :  { %v3820_v24 = vld [vmem:[#allocation2 + $0x28] sm:$0xff]  ;;  %v1024_v0 = vpop.permute.xlu0 %1023 }
 0x143   :  { %v3813_v18 = vld [vmem:[#allocation2 + $0x8] sm:$0xff]  ;;  %v823_v28 = vrot.slane %v3820_v24, %v3794_v56  ;;  %v3866_v57 = vrot.slane %v3820_v24, %v3837_v37  ;;  %v3896_v7 = vrot.slane %v3820_v24, %v3861_v55 }
 0x144   :  { %v819_v21 = vrot.slane %v3813_v18, %v3794_v56  ;;  %v3853_v48 = vrot.slane %v3813_v18, %v3837_v37  ;;  %v3881_v1 = vrot.slane %v3813_v18, %v3861_v55  ;;  %v956_v6 = vrot.slane %v3813_v18, %v3833_v35 }
 0x145   :  { %860 = vrot.lane.b32.xlu0 %v838_v22, %s3285_s24  ;;  %v837_v33 = vmul.f32 %v827_v45, %v823_v28  ;;  %v839_v36 = vmul.f32 %v829_v9, %v823_v28  ;;  %v898_v61 = vmul.f32 %v888_v25, %v823_v28  ;;  %v900_v5 = vmul.f32 %v890_v29, %v823_v28 }
 0x146   :  { %v833_v23 = vmul.f32 %v827_v45, %v819_v21  ;;  %v835_v27 = vmul.f32 %v829_v9, %v819_v21  ;;  %v894_v41 = vmul.f32 %v888_v25, %v819_v21  ;;  %v3848_v45 = vrot.slane %v3789_v49, %v3837_v37  ;;  %5898 = vst [vmem:[#allocation8_spill] sm:$0xff] %v3896_v7  ;;  %v1026_v9 = vpop.permute.xlu1 %1025  ;;  %v3900_v12 = vpop.permute.xlu0 %1099 }
 0x147   :  { %v896_v54 = vmul.f32 %v890_v29, %v819_v21  ;;  %v970_v15 = vmul.f32 %v964_v46, %v956_v6  ;;  %v3909_v17 = vrot.slane %v3813_v18, %v3890_v4  ;;  %v3913_v21 = vrot.slane %v3791_v50, %v3890_v4 }
 0x148   :  { %850 = vrot.lane.b32.xlu1 %v833_v23, %s3285_s24  ;;  %v1029_v22 = vmul.f32 %v1024_v0, %v3843_v40  ;;  %v3920_v23 = vrot.slane %v3820_v24, %v3890_v4  ;;  %v1031_v29 = vmul.f32 %v1026_v9, %v3843_v40 }
 0x149   :  { %909 = vrot.lane.b32.xlu0 %v893_v26, %s3285_s24  ;;  %5900 = vst [vmem:[#allocation10_spill] sm:$0xff] %v3909_v17  ;;  %5901 = vst [vmem:[#allocation11_spill] sm:$0xff] %v3913_v21  ;;  %v972_v26 = vmul.f32 %v966_v58, %v956_v6 }
 0x14a   :  { %5902 = vst [vmem:[#allocation12_spill] sm:$0xff] %v3920_v23  ;;  %v3922_v25 = vpop.permute.xlu1 %1101  ;;  %v3926_v28 = vpop.permute.xlu0 %1159 }
 0x14c   :  { %854 = vrot.lane.b32.xlu1 %v835_v27, %s3285_s24  ;;  %v960_v27 = vrot.slane %v3820_v24, %v3833_v35 }
 0x14d   :  { %913 = vrot.lane.b32.xlu0 %v895_v32, %s3285_s24 }
 0x14e   :  { %v974_v32 = vmul.f32 %v964_v46, %v960_v27  ;;  %v1035_v46 = vmul.f32 %v1026_v9, %v3872_v60 }
 0x150   :  { %858 = vrot.lane.b32.xlu1 %v837_v33, %s3285_s24  ;;  %v3932_v33 = vpop.permute.xlu1 %1161 }
 0x151   :  { %917 = vrot.lane.b32.xlu0 %v897_v34, %s3285_s24  ;;  %v3935_v34 = vpop.permute.xlu0 %1235 }
 0x154   :  { %862 = vrot.lane.b32.xlu1 %v839_v36, %s3285_s24  ;;  %v1033_v36 = vmul.f32 %v1024_v0, %v3872_v60 }
 0x155   :  { %921 = vrot.lane.b32.xlu0 %v899_v39, %s3285_s24  ;;  %v3939_v39 = vsub.s32 2, %v3787_v42 }
 0x157   :  { %5903 = vst [vmem:[#allocation13_spill] sm:$0xff] %v3939_v39 }
 0x158   :  { %911 = vrot.lane.b32.xlu1 %v894_v41, %s3285_s24  ;;  %v976_v41 = vmul.f32 %v966_v58, %v960_v27  ;;  %v3956_v58 = vld [vmem:[#allocation2 + $0x38] sm:$0xff] }
 0x159   :  { %985 = vrot.lane.b32.xlu0 %v969_v53, %s3285_s24  ;;  %v3946_v53 = vrot.slane %v3789_v49, %v3939_v39  ;;  %5905 = vst [vmem:[#allocation15_spill] sm:$0xff] %v3956_v58 }
 0x15c   :  { %915 = vrot.lane.b32.xlu1 %v896_v54, %s3285_s24  ;;  %v3948_v54 = vpop.permute.xlu1 %1237 }
 0x15d   :  { %989 = vrot.lane.b32.xlu0 %v971_v59, %s3285_s24  ;;  %v1030_v59 = vmul.f32 %v1024_v0, %v956_v6 }
 0x160   :  { %919 = vrot.lane.b32.xlu1 %v898_v61, %s3285_s24  ;;  %v3950_v61 = vld [vmem:[#allocation2 + $0x18] sm:$0xff] }
 0x161   :  { %993 = vrot.lane.b32.xlu0 %v973_v3, %s3285_s24  ;;  %5904 = vst [vmem:[#allocation14_spill] sm:$0xff] %v3950_v61  ;;  %v3952_v3 = vpop.permute.xlu0 %1295 }
 0x164   :  { %923 = vrot.lane.b32.xlu1 %v900_v5, %s3285_s24  ;;  %v1105_v5 = vmul.f32 %v3900_v12, %v3946_v53 }
 0x165   :  { %997 = vrot.lane.b32.xlu0 %v975_v13, %s3285_s24  ;;  %v3962_v13 = vrot.slane %v3950_v61, %v3833_v35 }
 0x167   :  { %5906 = vst [vmem:[#allocation16_spill] sm:$0xff] %v3962_v13  ;;  %v1096_v13 = vrot.slane %v3820_v24, %v3939_v39 }
 0x168   :  { %987 = vrot.lane.b32.xlu1 %v970_v15, %s3285_s24  ;;  %v1032_v15 = vmul.f32 %v1026_v9, %v956_v6  ;;  %v3982_v6 = vrot.slane %v3791_v50, %v3939_v39 }
 0x169   :  { %1045 = vrot.lane.b32.xlu0 %v1029_v22, %s3285_s24  ;;  %v3967_v22 = vrot.slane %v3956_v58, %v3833_v35 }
 0x16b   :  { %5907 = vst [vmem:[#allocation17_spill] sm:$0xff] %v3967_v22 }
 0x16c   :  { %991 = vrot.lane.b32.xlu1 %v972_v26, %s3285_s24  ;;  %v3969_v26 = vpop.permute.xlu1 %1297 }
 0x16d   :  { %1049 = vrot.lane.b32.xlu0 %v1031_v29, %s3285_s24  ;;  %v3974_v29 = vrot.slane %v3950_v61, %v3939_v39 }
 0x16f   :  { %5908 = vst [vmem:[#allocation18_spill] sm:$0xff] %v3974_v29  ;;  %v1092_v29 = vrot.slane %v3813_v18, %v3939_v39 }
 0x170   :  { %995 = vrot.lane.b32.xlu1 %v974_v32, %s3285_s24  ;;  %v3976_v32 = vpop.permute.xlu0 %1371 }
 0x171   :  { %1053 = vrot.lane.b32.xlu0 %v1033_v36, %s3285_s24  ;;  %v1107_v36 = vmul.f32 %v3922_v25, %v3946_v53 }
 0x174   :  { %999 = vrot.lane.b32.xlu1 %v976_v41, %s3285_s24  ;;  %v3986_v41 = vrot.slane %v3956_v58, %v3939_v39  ;;  %v3996_v22 = vpop.permute.xlu0 %1431 }
 0x175   :  { %1057 = vrot.lane.b32.xlu0 %v1035_v46, %s3285_s24  ;;  %v1034_v46 = vmul.f32 %v1024_v0, %v960_v27  ;;  %v1111_v0 = vmul.f32 %v3922_v25, %v3982_v6 }
 0x176   :  { %5909 = vst [vmem:[#allocation19_spill] sm:$0xff] %v3986_v41  ;;  %v4029_v41 = vrot.slane %v3950_v61, %v3890_v4 }
 0x178   :  { %1047 = vrot.lane.b32.xlu1 %v1030_v59, %s3285_s24  ;;  %v1109_v59 = vmul.f32 %v3900_v12, %v3982_v6  ;;  %5914 = vst [vmem:[#allocation24_spill] sm:$0xff] %v4029_v41  ;;  %v1110_v41 = vmul.f32 %v3900_v12, %v1096_v13 }
 0x179   :  { %1121 = vrot.lane.b32.xlu0 %v1105_v5, %s3285_s24  ;;  %v3992_v5 = vpop.permute.xlu1 %1373 }
 0x17c   :  { %1051 = vrot.lane.b32.xlu1 %v1032_v15, %s3285_s24  ;;  %v1036_v15 = vmul.f32 %v1026_v9, %v960_v27  ;;  %v1165_v9 = vmul.f32 %v3926_v28, %v3946_v53  ;;  %v4011_v27 = vrot.slane %v3950_v61, %v3837_v37 }
 0x17d   :  { %1125 = vrot.lane.b32.xlu0 %v1107_v36, %s3285_s24  ;;  %v1106_v36 = vmul.f32 %v3900_v12, %v1092_v29 }
 0x17e   :  { %5910 = vst [vmem:[#allocation20_spill] sm:$0xff] %v4011_v27  ;;  %v1108_v27 = vmul.f32 %v3922_v25, %v1092_v29 }
 0x180   :  { %1055 = vrot.lane.b32.xlu1 %v1034_v46, %s3285_s24  ;;  %v4004_v46 = vpop.permute.xlu1 %1433 }
 0x181   :  { %1129 = vrot.lane.b32.xlu0 %v1109_v59, %s3285_s24  ;;  %v4013_v59 = vpop.permute.xlu0 %1507 }
 0x184   :  { %1059 = vrot.lane.b32.xlu1 %v1036_v15, %s3285_s24  ;;  %v4017_v15 = vrot.slane %v3956_v58, %v3837_v37  ;;  %v1166_v37 = vmul.f32 %v3926_v28, %v1092_v29 }
 0x185   :  { %1133 = vrot.lane.b32.xlu0 %v1111_v0, %s3285_s24  ;;  %v4021_v0 = vrot.slane %v3950_v61, %v3861_v55 }
 0x186   :  { %5911 = vst [vmem:[#allocation21_spill] sm:$0xff] %v4017_v15  ;;  %v4036_v15 = vrot.slane %v3956_v58, %v3890_v4 }
 0x187   :  { %5912 = vst [vmem:[#allocation22_spill] sm:$0xff] %v4021_v0  ;;  %v4042_v0 = vpop.permute.xlu1 %1509 }
 0x188   :  { %1123 = vrot.lane.b32.xlu1 %v1106_v36, %s3285_s24  ;;  %v4025_v36 = vrot.slane %v3956_v58, %v3861_v55  ;;  %5915 = vst [vmem:[#allocation25_spill] sm:$0xff] %v4036_v15  ;;  %v4045_v55 = vpop.permute.xlu0 %1567  ;;  %v1169_v15 = vmul.f32 %v3926_v28, %v3982_v6 }
 0x189   :  { %1181 = vrot.lane.b32.xlu0 %v1165_v9, %s3285_s24  ;;  %v4052_v9 = vsub.s32 3, %v3787_v42 }
 0x18a   :  { %5913 = vst [vmem:[#allocation23_spill] sm:$0xff] %v4025_v36  ;;  %v1167_v36 = vmul.f32 %v3932_v33, %v3946_v53 }
 0x18b   :  { %5916 = vst [vmem:[#allocation26_spill] sm:$0xff] %v4052_v9  ;;  %v4056_v4 = vpop.permute.xlu1 %1569  ;;  %v1228_v61 = vrot.slane %v3813_v18, %v4052_v9 }
 0x18c   :  { %1127 = vrot.lane.b32.xlu1 %v1108_v27, %s3285_s24  ;;  %v1112_v27 = vmul.f32 %v3922_v25, %v1096_v13  ;;  %v4059_v12 = vpop.permute.xlu0 %1643 }
 0x18d   :  { %1185 = vrot.lane.b32.xlu0 %v1167_v36, %s3285_s24  ;;  %v1171_v36 = vmul.f32 %v3932_v33, %v3982_v6  ;;  %v1304_v17 = vmul.f32 %v3969_v26, %v1228_v61 }
 0x190   :  { %1131 = vrot.lane.b32.xlu1 %v1110_v41, %s3285_s24  ;;  %v4065_v41 = vrot.slane %v3789_v49, %v4052_v9  ;;  %v4075_v39 = vpop.permute.xlu0 %1703 }
 0x191   :  { %1189 = vrot.lane.b32.xlu0 %v1169_v15, %s3285_s24  ;;  %v4072_v15 = vpop.permute.xlu1 %1645 }
 0x192   :  { %v1241_v25 = vmul.f32 %v3935_v34, %v4065_v41  ;;  %v1243_v35 = vmul.f32 %v3948_v54, %v4065_v41 }
 0x194   :  { %1135 = vrot.lane.b32.xlu1 %v1112_v27, %s3285_s24  ;;  %v1168_v27 = vmul.f32 %v3932_v33, %v1092_v29  ;;  %v4090_v29 = vpop.permute.xlu0 %1779 }
 0x195   :  { %1193 = vrot.lane.b32.xlu0 %v1171_v36, %s3285_s24  ;;  %v4083_v36 = vrot.slane %v3791_v50, %v4052_v9  ;;  %v4087_v58 = vpop.permute.xlu1 %1705  ;;  %5917 = vst [vmem:[#allocation27_spill] sm:$0xff] %v4090_v29 }
 0x198   :  { %1183 = vrot.lane.b32.xlu1 %v1166_v37, %s3285_s24  ;;  %v1170_v37 = vmul.f32 %v3926_v28, %v1096_v13  ;;  %v4104_v56 = vpop.permute.xlu0 %1839 }
 0x199   :  { %1257 = vrot.lane.b32.xlu0 %v1241_v25, %s3285_s24  ;;  %v1245_v25 = vmul.f32 %v3935_v34, %v4083_v36  ;;  %v4101_v28 = vpop.permute.xlu1 %1781  ;;  %5919 = vst [vmem:[#allocation29_spill] sm:$0xff] %v4104_v56 }
 0x19a   :  { %5918 = vst [vmem:[#allocation28_spill] sm:$0xff] %v4101_v28 }
 0x19c   :  { %1187 = vrot.lane.b32.xlu1 %v1168_v27, %s3285_s24  ;;  %v1172_v27 = vmul.f32 %v3932_v33, %v1096_v13  ;;  %v1301_v33 = vmul.f32 %v3952_v3, %v4065_v41  ;;  %v1244_v13 = vmul.f32 %v3948_v54, %v1228_v61  ;;  %v4117_v23 = vpop.permute.xlu0 %1915 }
 0x19d   :  { %1261 = vrot.lane.b32.xlu0 %v1243_v35, %s3285_s24  ;;  %v1247_v35 = vmul.f32 %v3948_v54, %v4083_v36  ;;  %5921 = vst [vmem:[#allocation31_spill] sm:$0xff] %v4117_v23 }
 0x1a0   :  { %1191 = vrot.lane.b32.xlu1 %v1170_v37, %s3285_s24  ;;  %v1242_v37 = vmul.f32 %v3935_v34, %v1228_v61 }
 0x1a1   :  { %1265 = vrot.lane.b32.xlu0 %v1245_v25, %s3285_s24  ;;  %v1232_v25 = vrot.slane %v3820_v24, %v4052_v9  ;;  %v1305_v9 = vmul.f32 %v3952_v3, %v4083_v36 }
 0x1a4   :  { %1195 = vrot.lane.b32.xlu1 %v1172_v27, %s3285_s24  ;;  %v4114_v27 = vpop.permute.xlu1 %1841 }
 0x1a5   :  { %1269 = vrot.lane.b32.xlu0 %v1247_v35, %s3285_s24  ;;  %5920 = vst [vmem:[#allocation30_spill] sm:$0xff] %v4114_v27  ;;  %v1303_v35 = vmul.f32 %v3969_v26, %v4065_v41 }
 0x1a8   :  { %1259 = vrot.lane.b32.xlu1 %v1242_v37, %s3285_s24  ;;  %v1246_v37 = vmul.f32 %v3935_v34, %v1232_v25  ;;  %v4129_v27 = vpop.permute.xlu1 %1917 }
 0x1a9   :  { %1317 = vrot.lane.b32.xlu0 %v1301_v33, %s3285_s24  ;;  %v4127_v33 = vsub.s32 4, %v3787_v42  ;;  %5922 = vst [vmem:[#allocation32_spill] sm:$0xff] %v4129_v27  ;;  %v1302_v42 = vmul.f32 %v3952_v3, %v1228_v61  ;;  %v809_v61 = vmul.f32 %v3798_v8, %v3535_v11 }
 0x1ab   :  { %v4157_v29 = vrot.slane %v3791_v50, %v4127_v33 }
 0x1ac   :  { %1263 = vrot.lane.b32.xlu1 %v1244_v13, %s3285_s24  ;;  %v1248_v13 = vmul.f32 %v3948_v54, %v1232_v25 }
 0x1ad   :  { %1321 = vrot.lane.b32.xlu0 %v1303_v35, %s3285_s24  ;;  %v1307_v35 = vmul.f32 %v3969_v26, %v4083_v36  ;;  %v1381_v14 = vmul.f32 %v3976_v32, %v4157_v29 }
 0x1af   :  { %v853_v56 = vpop.permute.xlu0 %852  ;;  %v849_v23 = vpop.permute.xlu1 %848 }
 0x1b0   :  { %1267 = vrot.lane.b32.xlu1 %v1246_v37, %s3285_s24  ;;  %v4138_v37 = vrot.slane %v3789_v49, %v4127_v33 }
 0x1b1   :  { %1325 = vrot.lane.b32.xlu0 %v1305_v9, %s3285_s24 }
 0x1b2   :  { %v1377_v9 = vmul.f32 %v3976_v32, %v4138_v37  ;;  %v1379_v28 = vmul.f32 %v3992_v5, %v4138_v37 }
 0x1b3   :  { %v857_v34 = vpop.permute.xlu0 %856 }
 0x1b4   :  { %1271 = vrot.lane.b32.xlu1 %v1248_v13, %s3285_s24  ;;  %v808_v13 = vmul.f32 %v3798_v8, %v3594_v30 }
 0x1b5   :  { %1329 = vrot.lane.b32.xlu0 %v1307_v35, %s3285_s24  ;;  %v945_v35 = vmul.f32 %v3843_v40, %v3637_v43 }
 0x1b7   :  { %v861_v54 = vpop.permute.xlu0 %860 }
 0x1b8   :  { %1319 = vrot.lane.b32.xlu1 %v1302_v42, %s3285_s24 }
 0x1b9   :  { %1393 = vrot.lane.b32.xlu0 %v1377_v9, %s3285_s24 }
 0x1ba   :  { %v851_v27 = vpop.permute.xlu1 %850 }
 0x1bb   :  { %v865_v49 = vsel %vm864_vm1, %v849_v23, %v851_v27  ;;  %v910_v42 = vpop.permute.xlu0 %909  ;;  %v1306_v27 = vmul.f32 %v3952_v3, %v1232_v25  ;;  %v810_v3 = vmul.f32 %v3806_v16, %v3594_v30  ;;  %v1383_v30 = vmul.f32 %v3992_v5, %v4157_v29 }
 0x1bc   :  { %v873_v21 = vsub.f32 %v808_v13, %v865_v49  ;;  %1323 = vrot.lane.b32.xlu1 %v1304_v17, %s3285_s24  ;;  %v946_v49 = vmul.f32 %v3843_v40, %v3599_v31 }
 0x1bd   :  { %1397 = vrot.lane.b32.xlu0 %v1379_v28, %s3285_s24 }
 0x1be   :  { %v855_v23 = vpop.permute.xlu1 %854  ;;  %v4162_v9 = vadd.f32 %v945_v35, %v873_v21  ;;  %v1308_v21 = vmul.f32 %v3969_v26, %v1232_v25 }
 0x1bf   :  { %v866_v17 = vsel %vm864_vm1, %v853_v56, %v855_v23  ;;  %v914_v50 = vpop.permute.xlu0 %913  ;;  %v4176_v56 = vrot.slane %v3813_v18, %v4127_v33  ;;  %v947_v23 = vmul.f32 %v3872_v60, %v3637_v43  ;;  %v811_v18 = vmul.f32 %v3806_v16, %v3535_v11 }
 0x1c0   :  { %v874_v13 = vsub.f32 %v809_v61, %v866_v17  ;;  %1327 = vrot.lane.b32.xlu1 %v1306_v27, %s3285_s24  ;;  %v948_v43 = vmul.f32 %v3872_v60, %v3599_v31  ;;  %v877_v11 = vmul.f32 %v3798_v8, %v3530_v10 }
 0x1c1   :  { %1401 = vrot.lane.b32.xlu0 %v1381_v14, %s3285_s24  ;;  %v1378_v25 = vmul.f32 %v3976_v32, %v4176_v56 }
 0x1c2   :  { %v859_v7 = vpop.permute.xlu1 %858  ;;  %v4178_v28 = vadd.f32 %v946_v49, %v874_v13  ;;  %v1437_v13 = vmul.f32 %v3996_v22, %v4138_v37 }
 0x1c3   :  { %v867_v35 = vsel %vm864_vm1, %v857_v34, %v859_v7  ;;  %v918_v27 = vpop.permute.xlu0 %917 }
 0x1c4   :  { %v875_v61 = vsub.f32 %v810_v3, %v867_v35  ;;  %1331 = vrot.lane.b32.xlu1 %v1308_v21, %s3285_s24  ;;  %v1380_v3 = vmul.f32 %v3992_v5, %v4176_v56 }
 0x1c5   :  { %1405 = vrot.lane.b32.xlu0 %v1383_v30, %s3285_s24  ;;  %v1439_v30 = vmul.f32 %v4004_v46, %v4138_v37 }
 0x1c6   :  { %v863_v26 = vpop.permute.xlu1 %862  ;;  %v4191_v7 = vadd.f32 %v947_v23, %v875_v61  ;;  %v1013_v61 = vmul.f32 %v3843_v40, %v3620_v38 }
 0x1c7   :  { %v868_v14 = vsel %vm864_vm1, %v861_v54, %v863_v26  ;;  %v922_v17 = vpop.permute.xlu0 %921  ;;  %v4206_v54 = vrot.slane %v3820_v24, %v4127_v33  ;;  %v878_v24 = vmul.f32 %v3798_v8, %v3559_v19  ;;  %v1441_v8 = vmul.f32 %v3996_v22, %v4157_v29 }
 0x1c8   :  { %v876_v34 = vsub.f32 %v811_v18, %v868_v14  ;;  %1395 = vrot.lane.b32.xlu1 %v1378_v25, %s3285_s24 }
 0x1c9   :  { %1453 = vrot.lane.b32.xlu0 %v1437_v13, %s3285_s24  ;;  %v1382_v18 = vmul.f32 %v3976_v32, %v4206_v54  ;;  %v879_v32 = vmul.f32 %v3806_v16, %v3530_v10 }
 0x1ca   :  { %v912_v49 = vpop.permute.xlu1 %911  ;;  %v4208_v21 = vadd.f32 %v948_v43, %v876_v34  ;;  %v1014_v34 = vmul.f32 %v3843_v40, %v3564_v20  ;;  %v1015_v40 = vmul.f32 %v3872_v60, %v3620_v38  ;;  %v1016_v38 = vmul.f32 %v3872_v60, %v3564_v20 }
 0x1cb   :  { %v925_v35 = vsel %vm864_vm1, %v910_v42, %v912_v49  ;;  %v986_v23 = vpop.permute.xlu0 %985  ;;  %v1081_v20 = vmul.f32 %v3946_v53, %v3674_v51 }
 0x1cc   :  { %v933_v31 = vadd.f32 %v925_v35, %v877_v11  ;;  %1399 = vrot.lane.b32.xlu1 %v1380_v3, %s3285_s24  ;;  %v1384_v11 = vmul.f32 %v3992_v5, %v4206_v54  ;;  %v880_v5 = vmul.f32 %v3806_v16, %v3559_v19  ;;  %v1440_v16 = vmul.f32 %v4004_v46, %v4176_v56 }
 0x1cd   :  { %1457 = vrot.lane.b32.xlu0 %v1439_v30, %s3285_s24 }
 0x1ce   :  { %v916_v26 = vpop.permute.xlu1 %915  ;;  %v4221_v42 = vadd.f32 %v1013_v61, %v933_v31  ;;  %v1443_v31 = vmul.f32 %v4004_v46, %v4157_v29  ;;  %v1438_v61 = vmul.f32 %v3996_v22, %v4176_v56  ;;  %v1442_v56 = vmul.f32 %v3996_v22, %v4206_v54 }
 0x1cf   :  { %v926_v25 = vsel %vm864_vm1, %v914_v50, %v916_v26  ;;  %v990_v43 = vpop.permute.xlu0 %989  ;;  %v1444_v22 = vmul.f32 %v4004_v46, %v4206_v54  ;;  %v1514_v46 = vmul.f32 %v4013_v59, %v3853_v48 }
 0x1d0   :  { %v934_v14 = vadd.f32 %v926_v25, %v878_v24  ;;  %1403 = vrot.lane.b32.xlu1 %v1382_v18, %s3285_s24  ;;  %v1513_v18 = vmul.f32 %v4013_v59, %v3848_v45 }
 0x1d1   :  { %1461 = vrot.lane.b32.xlu0 %v1441_v8, %s3285_s24 }
 0x1d2   :  { %v920_v13 = vpop.permute.xlu1 %919  ;;  %v4234_v50 = vadd.f32 %v1014_v34, %v934_v14  ;;  %v1515_v34 = vmul.f32 %v4042_v0, %v3848_v45 }
 0x1d3   :  { %v927_v49 = vsel %vm864_vm1, %v918_v27, %v920_v13  ;;  %v994_v35 = vpop.permute.xlu0 %993 }
 0x1d4   :  { %v935_v3 = vadd.f32 %v927_v49, %v879_v32  ;;  %1407 = vrot.lane.b32.xlu1 %v1384_v11, %s3285_s24  ;;  %v1082_v32 = vmul.f32 %v3946_v53, %v3642_v44  ;;  %v1517_v49 = vmul.f32 %v4013_v59, %v3857_v52 }
 0x1d5   :  { %1465 = vrot.lane.b32.xlu0 %v1443_v31, %s3285_s24  ;;  %v1083_v31 = vmul.f32 %v3982_v6, %v3674_v51  ;;  %v1084_v51 = vmul.f32 %v3982_v6, %v3642_v44  ;;  %v1149_v44 = vmul.f32 %v3946_v53, %v3657_v47 }
 0x1d6   :  { %v924_v10 = vpop.permute.xlu1 %923  ;;  %v4247_v27 = vadd.f32 %v1015_v40, %v935_v3 }
 0x1d7   :  { %v928_v30 = vsel %vm864_vm1, %v922_v17, %v924_v10  ;;  %v998_v26 = vpop.permute.xlu0 %997 }
 0x1d8   :  { %v936_v24 = vadd.f32 %v928_v30, %v880_v5  ;;  %1455 = vrot.lane.b32.xlu1 %v1438_v61, %s3285_s24  ;;  %v1519_v5 = vmul.f32 %v4042_v0, %v3857_v52 }
 0x1d9   :  { %1529 = vrot.lane.b32.xlu0 %v1513_v18, %s3285_s24  ;;  %v1516_v18 = vmul.f32 %v4042_v0, %v3853_v48 }
 0x1da   :  { %v988_v19 = vpop.permute.xlu1 %987  ;;  %v4258_v25 = vadd.f32 %v1016_v38, %v936_v24  ;;  %v1573_v24 = vmul.f32 %v4045_v55, %v3848_v45 }
 0x1db   :  { %v1001_v17 = vsel %vm864_vm1, %v986_v23, %v988_v19  ;;  %v1046_v60 = vpop.permute.xlu0 %1045 }
 0x1dc   :  { %v1009_v14 = vsub.f32 %v4162_v9, %v1001_v17  ;;  %1459 = vrot.lane.b32.xlu1 %v1440_v16, %s3285_s24  ;;  %v1575_v17 = vmul.f32 %v4056_v4, %v3848_v45 }
 0x1dd   :  { %1533 = vrot.lane.b32.xlu0 %v1515_v34, %s3285_s24 }
 0x1de   :  { %v992_v8 = vpop.permute.xlu1 %991  ;;  %v4270_v13 = vadd.f32 %v1081_v20, %v1009_v14  ;;  %v1518_v20 = vmul.f32 %v4013_v59, %v3866_v57  ;;  %v1577_v59 = vmul.f32 %v4045_v55, %v3857_v52 }
 0x1df   :  { %v1002_v23 = vsel %vm864_vm1, %v990_v43, %v992_v8  ;;  %v1050_v11 = vpop.permute.xlu0 %1049  ;;  %v3246_v8 = vld [vmem:[%s5834_s3 + $0x28] sm:$0xff] }
 0x1e0   :  { %v1010_v9 = vsub.f32 %v4178_v28, %v1002_v23  ;;  %1463 = vrot.lane.b32.xlu1 %v1442_v56, %s3285_s24  ;;  %v1150_v56 = vmul.f32 %v3246_v8, %v3946_v53  ;;  %v1151_v53 = vmul.f32 %v3982_v6, %v3657_v47  ;;  %v1152_v47 = vmul.f32 %v3246_v8, %v3982_v6 }
 0x1e1   :  { %1537 = vrot.lane.b32.xlu0 %v1517_v49, %s3285_s24  ;;  %v1217_v6 = vmul.f32 %v4065_v41, %v3711_v63  ;;  %v1655_v8 = vmul.f32 %v4072_v15, %v3885_v2 }
 0x1e2   :  { %v996_v3 = vpop.permute.xlu1 %995  ;;  %v4282_v40 = vadd.f32 %v1082_v32, %v1010_v9  ;;  %v1520_v32 = vmul.f32 %v4042_v0, %v3866_v57  ;;  %v1574_v0 = vmul.f32 %v4045_v55, %v3853_v48 }
 0x1e3   :  { %v1003_v43 = vsel %vm864_vm1, %v994_v35, %v996_v3  ;;  %v1054_v10 = vpop.permute.xlu0 %1053 }
 0x1e4   :  { %v1011_v28 = vsub.f32 %v4191_v7, %v1003_v43  ;;  %1467 = vrot.lane.b32.xlu1 %v1444_v22, %s3285_s24  ;;  %v1579_v22 = vmul.f32 %v4056_v4, %v3857_v52 }
 0x1e5   :  { %1541 = vrot.lane.b32.xlu0 %v1519_v5, %s3285_s24  ;;  %v1649_v5 = vmul.f32 %v4059_v12, %v3876_v62 }
 0x1e6   :  { %v1000_v61 = vpop.permute.xlu1 %999  ;;  %v4294_v54 = vadd.f32 %v1083_v31, %v1011_v28 }
 0x1e7   :  { %v1004_v35 = vsel %vm864_vm1, %v998_v26, %v1000_v61  ;;  %v1058_v30 = vpop.permute.xlu0 %1057 }
 0x1e8   :  { %v1012_v7 = vsub.f32 %v4208_v21, %v1004_v35  ;;  %1531 = vrot.lane.b32.xlu1 %v1514_v46, %s3285_s24  ;;  %v1576_v46 = vmul.f32 %v4056_v4, %v3853_v48  ;;  %v1578_v48 = vmul.f32 %v4045_v55, %v3866_v57  ;;  %v1653_v55 = vmul.f32 %v4059_v12, %v3885_v2 }
 0x1e9   :  { %1589 = vrot.lane.b32.xlu0 %v1573_v24, %s3285_s24 }
 0x1ea   :  { %v1048_v38 = vpop.permute.xlu1 %1047  ;;  %v4306_v19 = vadd.f32 %v1084_v51, %v1012_v7 }
 0x1eb   :  { %v1061_v26 = vsel %vm864_vm1, %v1046_v60, %v1048_v38  ;;  %v1122_v16 = vpop.permute.xlu0 %1121 }
 0x1ec   :  { %v1069_v21 = vadd.f32 %v1061_v26, %v4221_v42  ;;  %1535 = vrot.lane.b32.xlu1 %v1516_v18, %s3285_s24  ;;  %v3247_v26 = vld [vmem:[%s5835_s2 + $0x38] sm:$0xff] }
 0x1ed   :  { %1593 = vrot.lane.b32.xlu0 %v1575_v17, %s3285_s24  ;;  %v1580_v17 = vmul.f32 %v4056_v4, %v3866_v57  ;;  %v1650_v57 = vmul.f32 %v4059_v12, %v3881_v1 }
 0x1ee   :  { %v1052_v14 = vpop.permute.xlu1 %1051  ;;  %v4318_v34 = vadd.f32 %v1149_v44, %v1069_v21  ;;  %v1218_v21 = vmul.f32 %v3247_v26, %v4065_v41 }
 0x1ef   :  { %v1062_v60 = vsel %vm864_vm1, %v1050_v11, %v1052_v14  ;;  %v1126_v23 = vpop.permute.xlu0 %1125 }
 0x1f0   :  { %v1070_v42 = vadd.f32 %v1062_v60, %v4234_v50  ;;  %1539 = vrot.lane.b32.xlu1 %v1518_v20, %s3285_s24  ;;  %v1219_v60 = vmul.f32 %v4083_v36, %v3711_v63  ;;  %v1220_v63 = vmul.f32 %v3247_v26, %v4083_v36 }
 0x1f1   :  { %1597 = vrot.lane.b32.xlu0 %v1577_v59, %s3285_s24 }
 0x1f2   :  { %v1056_v9 = vpop.permute.xlu1 %1055  ;;  %v4332_v11 = vadd.f32 %v1150_v56, %v1070_v42 }
 0x1f3   :  { %v1063_v50 = vsel %vm864_vm1, %v1054_v10, %v1056_v9  ;;  %v1130_v3 = vpop.permute.xlu0 %1129  ;;  %v1709_v9 = vmul.f32 %v4075_v39, %v3876_v62 }
 0x1f4   :  { %v1071_v49 = vadd.f32 %v1063_v50, %v4247_v27  ;;  %1543 = vrot.lane.b32.xlu1 %v1520_v32, %s3285_s24  ;;  %v1652_v50 = vmul.f32 %v4072_v15, %v3881_v1 }
 0x1f5   :  { %1601 = vrot.lane.b32.xlu0 %v1579_v22, %s3285_s24 }
 0x1f6   :  { %v1060_v43 = vpop.permute.xlu1 %1059  ;;  %v4344_v28 = vadd.f32 %v1151_v53, %v1071_v49 }
 0x1f7   :  { %v1064_v31 = vsel %vm864_vm1, %v1058_v30, %v1060_v43  ;;  %v1134_v10 = vpop.permute.xlu0 %1133  ;;  %v1651_v30 = vmul.f32 %v4072_v15, %v3876_v62 }
 0x1f8   :  { %v1072_v27 = vadd.f32 %v1064_v31, %v4258_v25  ;;  %1591 = vrot.lane.b32.xlu1 %v1574_v0, %s3285_s24  ;;  %v1711_v0 = vmul.f32 %v4087_v58, %v3876_v62 }
 0x1f9   :  { %1665 = vrot.lane.b32.xlu0 %v1649_v5, %s3285_s24 }
 0x1fa   :  { %v1124_v61 = vpop.permute.xlu1 %1123  ;;  %v4355_v35 = vadd.f32 %v1152_v47, %v1072_v27  ;;  %v5923_v27 = vld [vmem:[#allocation8_spill] sm:$0xff] }
 0x1fb   :  { %v1137_v7 = vsel %vm864_vm1, %v1122_v16, %v1124_v61  ;;  %v1182_v51 = vpop.permute.xlu0 %1181  ;;  %v1654_v47 = vmul.f32 %v4059_v12, %v5923_v27  ;;  %v3249_v61 = vld [vmem:[%s5834_s3 + $0x38] sm:$0xff]  ;;  %v1713_v12 = vmul.f32 %v4075_v39, %v3885_v2 }
 0x1fc   :  { %v1145_v25 = vsub.f32 %v4270_v13, %v1137_v7  ;;  %1595 = vrot.lane.b32.xlu1 %v1576_v46, %s3285_s24  ;;  %v1286_v46 = vmul.f32 %v3249_v61, %v4065_v41 }
 0x1fd   :  { %1669 = vrot.lane.b32.xlu0 %v1651_v30, %s3285_s24 }
 0x1fe   :  { %v1128_v24 = vpop.permute.xlu1 %1127  ;;  %v4367_v38 = vadd.f32 %v1217_v6, %v1145_v25  ;;  %v1656_v6 = vmul.f32 %v4072_v15, %v5923_v27  ;;  %v1710_v15 = vmul.f32 %v4075_v39, %v3881_v1 }
 0x1ff   :  { %v1138_v18 = vsel %vm864_vm1, %v1126_v23, %v1128_v24  ;;  %v1186_v44 = vpop.permute.xlu0 %1185 }
 0x200   :  { %v1146_v13 = vsub.f32 %v4282_v40, %v1138_v18  ;;  %1599 = vrot.lane.b32.xlu1 %v1578_v48, %s3285_s24  ;;  %v1715_v48 = vmul.f32 %v4087_v58, %v3885_v2 }
 0x201   :  { %1673 = vrot.lane.b32.xlu0 %v1653_v55, %s3285_s24  ;;  %v5924_v55 = vld [vmem:[#allocation9_spill] sm:$0xff] }
 0x202   :  { %v1132_v16 = vpop.permute.xlu1 %1131  ;;  %v4381_v14 = vadd.f32 %v1218_v21, %v1146_v13  ;;  %v1288_v21 = vmul.f32 %v3249_v61, %v4083_v36 }
 0x203   :  { %v1139_v40 = vsel %vm864_vm1, %v1130_v3, %v1132_v16  ;;  %v1190_v42 = vpop.permute.xlu0 %1189  ;;  %v3248_v3 = vld [vmem:[%s5834_s3 + $0x30] sm:$0xff]  ;;  %v5925_v16 = vld [vmem:[#allocation27_spill] sm:$0xff] }
 0x204   :  { %v1147_v20 = vsub.f32 %v4294_v54, %v1139_v40  ;;  %1603 = vrot.lane.b32.xlu1 %v1580_v17, %s3285_s24  ;;  %v1285_v22 = vmul.f32 %v3248_v3, %v4065_v41  ;;  %v1287_v41 = vmul.f32 %v3248_v3, %v4083_v36  ;;  %v1785_v17 = vmul.f32 %v5925_v16, %v5924_v55  ;;  %v3250_v36 = vld [vmem:[%s5835_s2 + $0x40] sm:$0xff] }
 0x205   :  { %1677 = vrot.lane.b32.xlu0 %v1655_v8, %s3285_s24  ;;  %v1353_v8 = vmul.f32 %v3250_v36, %v4138_v37  ;;  %v1716_v3 = vmul.f32 %v4087_v58, %v5923_v27 }
 0x206   :  { %v1136_v56 = vpop.permute.xlu1 %1135  ;;  %v4393_v4 = vadd.f32 %v1219_v60, %v1147_v20  ;;  %v1712_v20 = vmul.f32 %v4087_v58, %v3881_v1 }
 0x207   :  { %v1140_v23 = vsel %vm864_vm1, %v1134_v10, %v1136_v56  ;;  %v1194_v59 = vpop.permute.xlu0 %1193 }
 0x208   :  { %v1148_v54 = vsub.f32 %v4306_v19, %v1140_v23  ;;  %1667 = vrot.lane.b32.xlu1 %v1650_v57, %s3285_s24  ;;  %v5926_v57 = vld [vmem:[#allocation28_spill] sm:$0xff] }
 0x209   :  { %1725 = vrot.lane.b32.xlu0 %v1709_v9, %s3285_s24  ;;  %v1787_v1 = vmul.f32 %v5926_v57, %v5924_v55  ;;  %v3251_v9 = vld [vmem:[%s5835_s2 + $0x48] sm:$0xff] }
 0x20a   :  { %v1184_v32 = vpop.permute.xlu1 %1183  ;;  %v4404_v49 = vadd.f32 %v1220_v63, %v1148_v54  ;;  %v1714_v54 = vmul.f32 %v4075_v39, %v5923_v27 }
 0x20b   :  { %v1197_v53 = vsel %vm864_vm1, %v1182_v51, %v1184_v32  ;;  %v1258_v43 = vpop.permute.xlu0 %1257  ;;  %v1354_v32 = vmul.f32 %v3251_v9, %v4138_v37 }
 0x20c   :  { %v1205_v19 = vadd.f32 %v1197_v53, %v4318_v34  ;;  %1671 = vrot.lane.b32.xlu1 %v1652_v50, %s3285_s24  ;;  %v5927_v53 = vld [vmem:[#allocation11_spill] sm:$0xff] }
 0x20d   :  { %1729 = vrot.lane.b32.xlu0 %v1711_v0, %s3285_s24  ;;  %v1789_v39 = vmul.f32 %v5925_v16, %v5927_v53  ;;  %v1355_v0 = vmul.f32 %v3250_v36, %v4157_v29 }
 0x20e   :  { %v1188_v31 = vpop.permute.xlu1 %1187  ;;  %v4418_v10 = vadd.f32 %v1285_v22, %v1205_v19 }
 0x20f   :  { %v1198_v34 = vsel %vm864_vm1, %v1186_v44, %v1188_v31  ;;  %v1262_v7 = vpop.permute.xlu0 %1261 }
 0x210   :  { %v1206_v5 = vadd.f32 %v1198_v34, %v4332_v11  ;;  %1675 = vrot.lane.b32.xlu1 %v1654_v47, %s3285_s24  ;;  %v1791_v47 = vmul.f32 %v5926_v57, %v5927_v53 }
 0x211   :  { %1733 = vrot.lane.b32.xlu0 %v1713_v12, %s3285_s24  ;;  %v5929_v12 = vld [vmem:[#allocation29_spill] sm:$0xff] }
 0x212   :  { %v1192_v25 = vpop.permute.xlu1 %1191  ;;  %v4432_v51 = vadd.f32 %v1286_v46, %v1206_v5  ;;  %v5928_v5 = vld [vmem:[#allocation10_spill] sm:$0xff]  ;;  %v1356_v46 = vmul.f32 %v3251_v9, %v4157_v29 }
 0x213   :  { %v1199_v11 = vsel %vm864_vm1, %v1190_v42, %v1192_v25  ;;  %v1266_v24 = vpop.permute.xlu0 %1265  ;;  %v1786_v58 = vmul.f32 %v5925_v16, %v5928_v5  ;;  %v1845_v25 = vmul.f32 %v5929_v12, %v5924_v55 }
 0x214   :  { %v1207_v30 = vadd.f32 %v1199_v11, %v4344_v28  ;;  %1679 = vrot.lane.b32.xlu1 %v1656_v6, %s3285_s24  ;;  %v1788_v11 = vmul.f32 %v5926_v57, %v5928_v5 }
 0x215   :  { %1737 = vrot.lane.b32.xlu0 %v1715_v48, %s3285_s24 }
 0x216   :  { %v1196_v18 = vpop.permute.xlu1 %1195  ;;  %v4443_v13 = vadd.f32 %v1287_v41, %v1207_v30 }
 0x217   :  { %v1200_v26 = vsel %vm864_vm1, %v1194_v59, %v1196_v18  ;;  %v1270_v44 = vpop.permute.xlu0 %1269 }
 0x218   :  { %v1208_v28 = vadd.f32 %v1200_v26, %v4355_v35  ;;  %1727 = vrot.lane.b32.xlu1 %v1710_v15, %s3285_s24  ;;  %v5930_v15 = vld [vmem:[#allocation30_spill] sm:$0xff] }
 0x219   :  { %1801 = vrot.lane.b32.xlu0 %v1785_v17, %s3285_s24  ;;  %v1847_v26 = vmul.f32 %v5930_v15, %v5924_v55 }
 0x21a   :  { %v1260_v40 = vpop.permute.xlu1 %1259  ;;  %v4454_v60 = vadd.f32 %v1288_v21, %v1208_v28  ;;  %v5931_v21 = vld [vmem:[#allocation12_spill] sm:$0xff] }
 0x21b   :  { %v1273_v42 = vsel %vm864_vm1, %v1258_v43, %v1260_v40  ;;  %v1318_v56 = vpop.permute.xlu0 %1317 }
 0x21c   :  { %v1281_v35 = vsub.f32 %v4367_v38, %v1273_v42  ;;  %1731 = vrot.lane.b32.xlu1 %v1712_v20, %s3285_s24  ;;  %v3253_v20 = vld [vmem:[%s5834_s3 + $0x48] sm:$0xff] }
 0x21d   :  { %1805 = vrot.lane.b32.xlu0 %v1787_v1, %s3285_s24  ;;  %v1422_v42 = vmul.f32 %v3253_v20, %v4138_v37 }
 0x21e   :  { %v1264_v23 = vpop.permute.xlu1 %1263  ;;  %v4468_v63 = vadd.f32 %v1353_v8, %v1281_v35  ;;  %v1792_v8 = vmul.f32 %v5926_v57, %v5931_v21 }
 0x21f   :  { %v1274_v38 = vsel %vm864_vm1, %v1262_v7, %v1264_v23  ;;  %v1322_v50 = vpop.permute.xlu0 %1321 }
 0x220   :  { %v1282_v59 = vsub.f32 %v4381_v14, %v1274_v38  ;;  %1735 = vrot.lane.b32.xlu1 %v1714_v54, %s3285_s24  ;;  %v1851_v54 = vmul.f32 %v5930_v15, %v5927_v53  ;;  %v4541_v38 = vld [vmem:[#allocation2 + $0x10] sm:$0xff] }
 0x221   :  { %1809 = vrot.lane.b32.xlu0 %v1789_v39, %s3285_s24 }
 0x222   :  { %v1268_v19 = vpop.permute.xlu1 %1267  ;;  %v4482_v22 = vadd.f32 %v1354_v32, %v1282_v59  ;;  %v5932_v59 = vld [vmem:[#allocation3_spill] sm:$0xff]  ;;  %v1846_v32 = vmul.f32 %v5929_v12, %v5928_v5 }
 0x223   :  { %v1275_v14 = vsel %vm864_vm1, %v1266_v24, %v1268_v19  ;;  %v1326_v31 = vpop.permute.xlu0 %1325  ;;  %v3252_v24 = vld [vmem:[%s5834_s3 + $0x40] sm:$0xff]  ;;  %v4545_v57 = vrot.slane %v4541_v38, %v5932_v59  ;;  %v1424_v19 = vmul.f32 %v3253_v20, %v4157_v29 }
 0x224   :  { %v1283_v43 = vsub.f32 %v4393_v4, %v1275_v14  ;;  %1739 = vrot.lane.b32.xlu1 %v1716_v3, %s3285_s24  ;;  %v1421_v48 = vmul.f32 %v3252_v24, %v4138_v37  ;;  %v1423_v37 = vmul.f32 %v3252_v24, %v4157_v29  ;;  %v5933_v14 = vld [vmem:[#allocation31_spill] sm:$0xff]  ;;  %v3255_v29 = vld [vmem:[%s5835_s2 + $0x50] sm:$0xff] }
 0x225   :  { %1813 = vrot.lane.b32.xlu0 %v1791_v47, %s3285_s24  ;;  %v1491_v20 = vmul.f32 %v3255_v29, %v3857_v52 }
 0x226   :  { %v1272_v34 = vpop.permute.xlu1 %1271  ;;  %v4493_v27 = vadd.f32 %v1355_v0, %v1283_v43  ;;  %v1921_v43 = vmul.f32 %v5933_v14, %v4545_v57 }
 0x227   :  { %v1276_v61 = vsel %vm864_vm1, %v1270_v44, %v1272_v34  ;;  %v1330_v7 = vpop.permute.xlu0 %1329  ;;  %v1790_v44 = vmul.f32 %v5925_v16, %v5931_v21  ;;  %v1849_v16 = vmul.f32 %v5929_v12, %v5927_v53 }
 0x228   :  { %v1284_v4 = vsub.f32 %v4404_v49, %v1276_v61  ;;  %1803 = vrot.lane.b32.xlu1 %v1786_v58, %s3285_s24  ;;  %v1489_v58 = vmul.f32 %v3255_v29, %v3848_v45 }
 0x229   :  { %1861 = vrot.lane.b32.xlu0 %v1845_v25, %s3285_s24 }
 0x22a   :  { %v1320_v6 = vpop.permute.xlu1 %1319  ;;  %v4504_v30 = vadd.f32 %v1356_v46, %v1284_v4  ;;  %v5934_v4 = vld [vmem:[#allocation32_spill] sm:$0xff]  ;;  %v4572_v46 = vld [vmem:[#allocation2 + $0x30] sm:$0xff] }
 0x22b   :  { %v1333_v41 = vsel %vm864_vm1, %v1318_v56, %v1320_v6  ;;  %v1394_v18 = vpop.permute.xlu0 %1393 }
 0x22c   :  { %v1341_v49 = vadd.f32 %v1333_v41, %v4418_v10  ;;  %1807 = vrot.lane.b32.xlu1 %v1788_v11, %s3285_s24 }
 0x22d   :  { %1865 = vrot.lane.b32.xlu0 %v1847_v26, %s3285_s24  ;;  %v1852_v26 = vmul.f32 %v5930_v15, %v5931_v21 }
 0x22e   :  { %v1324_v28 = vpop.permute.xlu1 %1323  ;;  %v4518_v17 = vadd.f32 %v1421_v48, %v1341_v49  ;;  %v3257_v49 = vld [vmem:[%s5835_s2 + $0x58] sm:$0xff] }
 0x22f   :  { %v1334_v10 = vsel %vm864_vm1, %v1322_v50, %v1324_v28  ;;  %v1398_v35 = vpop.permute.xlu0 %1397  ;;  %v1490_v24 = vmul.f32 %v3257_v49, %v3848_v45  ;;  %v5935_v28 = vld [vmem:[#allocation14_spill] sm:$0xff] }
 0x230   :  { %v1342_v40 = vadd.f32 %v1334_v10, %v4432_v51  ;;  %1811 = vrot.lane.b32.xlu1 %v1790_v44, %s3285_s24  ;;  %v4596_v44 = vrot.slane %v5935_v28, %v5932_v59  ;;  %v3260_v28 = vld [vmem:[%s5835_s2 + $0x60] sm:$0xff] }
 0x231   :  { %1869 = vrot.lane.b32.xlu0 %v1849_v16, %s3285_s24 }
 0x232   :  { %v1328_v36 = vpop.permute.xlu1 %1327  ;;  %v4532_v56 = vadd.f32 %v1422_v42, %v1342_v40 }
 0x233   :  { %v1335_v51 = vsel %vm864_vm1, %v1326_v31, %v1328_v36  ;;  %v1402_v23 = vpop.permute.xlu0 %1401  ;;  %v1848_v31 = vmul.f32 %v5930_v15, %v5928_v5  ;;  %v1923_v5 = vmul.f32 %v5934_v4, %v4545_v57 }
 0x234   :  { %v1343_v1 = vadd.f32 %v1335_v51, %v4443_v13  ;;  %1815 = vrot.lane.b32.xlu1 %v1792_v8, %s3285_s24  ;;  %v1492_v8 = vmul.f32 %v3257_v49, %v3857_v52 }
 0x235   :  { %1873 = vrot.lane.b32.xlu0 %v1851_v54, %s3285_s24  ;;  %v5936_v54 = vld [vmem:[#allocation15_spill] sm:$0xff] }
 0x236   :  { %v1332_v9 = vpop.permute.xlu1 %1331  ;;  %v4549_v50 = vadd.f32 %v1423_v37, %v1343_v1  ;;  %v1924_v37 = vmul.f32 %v5934_v4, %v4596_v44 }
 0x237   :  { %v1336_v13 = vsel %vm864_vm1, %v1330_v7, %v1332_v9  ;;  %v1406_v3 = vpop.permute.xlu0 %1405  ;;  %v4576_v7 = vrot.slane %v4572_v46, %v5932_v59  ;;  %v4625_v9 = vrot.slane %v5936_v54, %v5932_v59 }
 0x238   :  { %v1344_v39 = vadd.f32 %v1336_v13, %v4454_v60  ;;  %1863 = vrot.lane.b32.xlu1 %v1846_v32, %s3285_s24 }
 0x239   :  { %1937 = vrot.lane.b32.xlu0 %v1921_v43, %s3285_s24  ;;  %v1927_v15 = vmul.f32 %v5934_v4, %v4576_v7  ;;  %v1926_v59 = vmul.f32 %v5933_v14, %v4625_v9 }
 0x23a   :  { %v1396_v0 = vpop.permute.xlu1 %1395  ;;  %v4560_v47 = vadd.f32 %v1424_v19, %v1344_v39  ;;  %v3258_v39 = vld [vmem:[%s5834_s3 + $0x50] sm:$0xff] }
 0x23b   :  { %v1409_v34 = vsel %vm864_vm1, %v1394_v18, %v1396_v0  ;;  %v1454_v61 = vpop.permute.xlu0 %1453  ;;  %v1557_v19 = vmul.f32 %v3258_v39, %v3848_v45 }
 0x23c   :  { %v1417_v60 = vsub.f32 %v4468_v63, %v1409_v34  ;;  %1867 = vrot.lane.b32.xlu1 %v1848_v31, %s3285_s24  ;;  %v1850_v63 = vmul.f32 %v5929_v12, %v5931_v21  ;;  %v1925_v12 = vmul.f32 %v5933_v14, %v4576_v7 }
 0x23d   :  { %1941 = vrot.lane.b32.xlu0 %v1923_v5, %s3285_s24 }
 0x23e   :  { %v1400_v25 = vpop.permute.xlu1 %1399  ;;  %v4580_v6 = vadd.f32 %v1489_v58, %v1417_v60 }
 0x23f   :  { %v1410_v11 = vsel %vm864_vm1, %v1398_v35, %v1400_v25  ;;  %v1458_v48 = vpop.permute.xlu0 %1457  ;;  %v1922_v35 = vmul.f32 %v5933_v14, %v4596_v44 }
 0x240   :  { %v1418_v41 = vsub.f32 %v4482_v22, %v1410_v11  ;;  %1871 = vrot.lane.b32.xlu1 %v1850_v63, %s3285_s24 }
 0x241   :  { %1945 = vrot.lane.b32.xlu0 %v1925_v12, %s3285_s24 }
 0x242   :  { %v1404_v18 = vpop.permute.xlu1 %1403  ;;  %v4598_v22 = vadd.f32 %v1490_v24, %v1418_v41 }
 0x243   :  { %v1411_v10 = vsel %vm864_vm1, %v1402_v23, %v1404_v18  ;;  %v1462_v42 = vpop.permute.xlu0 %1461  ;;  %v4621_v23 = vld [vmem:[%s5835_s2 + $0x80] sm:$0xff] }
 0x244   :  { %v1419_v40 = vsub.f32 %v4493_v27, %v1411_v10  ;;  %1875 = vrot.lane.b32.xlu1 %v1852_v26, %s3285_s24  ;;  %v1625_v10 = vmul.f32 %v3260_v28, %v3876_v62 }
 0x245   :  { %1949 = vrot.lane.b32.xlu0 %v1927_v15, %s3285_s24  ;;  %v3261_v15 = vld [vmem:[%s5835_s2 + $0x68] sm:$0xff] }
 0x246   :  { %v1408_v21 = vpop.permute.xlu1 %1407  ;;  %v4609_v16 = vadd.f32 %v1491_v20, %v1419_v40 }
 0x247   :  { %v1412_v36 = vsel %vm864_vm1, %v1406_v3, %v1408_v21  ;;  %v1466_v51 = vpop.permute.xlu0 %1465  ;;  %v1626_v21 = vmul.f32 %v3261_v15, %v3876_v62 }
 0x248   :  { %v1420_v27 = vsub.f32 %v4504_v30, %v1412_v36  ;;  %1939 = vrot.lane.b32.xlu1 %v1922_v35, %s3285_s24 }
 0x249   :  { %1975 = vrot.lane.b32.xlu0 %v4621_v23, %s3282_s15 }
 0x24a   :  { %v1456_v1 = vpop.permute.xlu1 %1455  ;;  %v1496_v32 = vadd.f32 %v1492_v8, %v1420_v27 }
 0x24b   :  { %v1469_v30 = vsel %vm864_vm1, %v1454_v61, %v1456_v1  ;;  %v1530_v3 = vpop.permute.xlu0 %1529  ;;  %v1928_v61 = vmul.f32 %v5934_v4, %v4625_v9 }
 0x24c   :  { %v1477_v13 = vadd.f32 %v1469_v30, %v4518_v17  ;;  %1943 = vrot.lane.b32.xlu1 %v1924_v37, %s3285_s24  ;;  %v3259_v17 = vld [vmem:[%s5834_s3 + $0x58] sm:$0xff] }
 0x24d   :  { %v1558_v60 = vmul.f32 %v3259_v17, %v3848_v45  ;;  %v753_v45 = vld [vmem:[%s5835_s2 + $0x88] sm:$0xff]  ;;  %v1560_v24 = vmul.f32 %v3259_v17, %v3857_v52 }
 0x24e   :  { %v1460_v43 = vpop.permute.xlu1 %1459  ;;  %v1561_v0 = vadd.f32 %v1557_v19, %v1477_v13  ;;  %v1628_v13 = vmul.f32 %v3261_v15, %v3885_v2 }
 0x24f   :  { %v1470_v31 = vsel %vm864_vm1, %v1458_v48, %v1460_v43  ;;  %v1534_v29 = vpop.permute.xlu0 %1533 }
 0x250   :  { %v1478_v34 = vadd.f32 %v1470_v31, %v4532_v56  ;;  %1947 = vrot.lane.b32.xlu1 %v1926_v59, %s3285_s24  ;;  %v1559_v56 = vmul.f32 %v3258_v39, %v3857_v52 }
 0x252   :  { %v1464_v58 = vpop.permute.xlu1 %1463  ;;  %v1562_v5 = vadd.f32 %v1558_v60, %v1478_v34 }
 0x253   :  { %v1471_v14 = vsel %vm864_vm1, %v1462_v42, %v1464_v58  ;;  %v1538_v63 = vpop.permute.xlu0 %1537  ;;  %v3263_v58 = vld [vmem:[%s5834_s3 + $0x68] sm:$0xff] }
 0x254   :  { %v1479_v25 = vadd.f32 %v1471_v14, %v4549_v50  ;;  %1951 = vrot.lane.b32.xlu1 %v1928_v61, %s3285_s24  ;;  %v1694_v61 = vmul.f32 %v3263_v58, %v3876_v62 }
 0x256   :  { %v1468_v11 = vpop.permute.xlu1 %1467  ;;  %v1563_v41 = vadd.f32 %v1559_v56, %v1479_v25 }
 0x257   :  { %v1472_v49 = vsel %vm864_vm1, %v1466_v51, %v1468_v11  ;;  %v1542_v50 = vpop.permute.xlu0 %1541  ;;  %v1627_v51 = vmul.f32 %v3260_v28, %v3885_v2 }
 0x258   :  { %v1480_v4 = vadd.f32 %v1472_v49, %v4560_v47  ;;  %1977 = vrot.lane.b32.xlu1 %v753_v45, %s3282_s15 }
 0x25a   :  { %v1532_v48 = vpop.permute.xlu1 %1531  ;;  %v1564_v12 = vadd.f32 %v1560_v24, %v1480_v4 }
 0x25b   :  { %v1545_v18 = vsel %vm864_vm1, %v1530_v3, %v1532_v48  ;;  %v1590_v40 = vpop.permute.xlu0 %1589 }
 0x25c   :  { %v1553_v26 = vsub.f32 %v4580_v6, %v1545_v18 }
 0x25e   :  { %v1536_v20 = vpop.permute.xlu1 %1535  ;;  %v1629_v47 = vadd.f32 %v1625_v10, %v1553_v26 }
 0x25f   :  { %v1546_v42 = vsel %vm864_vm1, %v1534_v29, %v1536_v20  ;;  %v1594_v6 = vpop.permute.xlu0 %1593 }
 0x260   :  { %v1554_v52 = vsub.f32 %v4598_v22, %v1546_v42 }
 0x262   :  { %v1540_v35 = vpop.permute.xlu1 %1539  ;;  %v1630_v36 = vadd.f32 %v1626_v21, %v1554_v52 }
 0x263   :  { %v1547_v27 = vsel %vm864_vm1, %v1538_v63, %v1540_v35  ;;  %v1598_v1 = vpop.permute.xlu0 %1597 }
 0x264   :  { %v1555_v8 = vsub.f32 %v4609_v16, %v1547_v27  ;;  %v3262_v16 = vld [vmem:[%s5834_s3 + $0x60] sm:$0xff] }
 0x265   :  { %v1693_v31 = vmul.f32 %v3262_v16, %v3876_v62  ;;  %v1695_v11 = vmul.f32 %v3262_v16, %v3885_v2 }
 0x266   :  { %v1544_v37 = vpop.permute.xlu1 %1543  ;;  %v1631_v54 = vadd.f32 %v1627_v51, %v1555_v8 }
 0x267   :  { %v1548_v22 = vsel %vm864_vm1, %v1542_v50, %v1544_v37  ;;  %v1602_v39 = vpop.permute.xlu0 %1601  ;;  %v1696_v50 = vmul.f32 %v3263_v58, %v3885_v2  ;;  %v3265_v2 = vld [vmem:[%s5835_s2 + $0x78] sm:$0xff] }
 0x268   :  { %v1556_v30 = vsub.f32 %v1496_v32, %v1548_v22  ;;  %v1762_v15 = vmul.f32 %v3265_v2, %v5924_v55 }
 0x26a   :  { %v1592_v19 = vpop.permute.xlu1 %1591  ;;  %v1632_v3 = vadd.f32 %v1628_v13, %v1556_v30  ;;  %v1764_v30 = vmul.f32 %v3265_v2, %v5927_v53 }
 0x26b   :  { %v1605_v43 = vsel %vm864_vm1, %v1590_v40, %v1592_v19  ;;  %v1666_v34 = vpop.permute.xlu0 %1665 }
 0x26c   :  { %v1613_v59 = vadd.f32 %v1605_v43, %v1561_v0 }
 0x26e   :  { %v1596_v17 = vpop.permute.xlu1 %1595  ;;  %v1697_v60 = vadd.f32 %v1693_v31, %v1613_v59 }
 0x26f   :  { %v1606_v29 = vsel %vm864_vm1, %v1594_v6, %v1596_v17  ;;  %v1670_v14 = vpop.permute.xlu0 %1669 }
 0x270   :  { %v1614_v32 = vadd.f32 %v1606_v29, %v1562_v5 }
 0x272   :  { %v1600_v0 = vpop.permute.xlu1 %1599  ;;  %v1698_v25 = vadd.f32 %v1694_v61, %v1614_v32  ;;  %v3267_v32 = vld [vmem:[%s5834_s3 + $0x78] sm:$0xff] }
 0x273   :  { %v1607_v56 = vsel %vm864_vm1, %v1598_v1, %v1600_v0  ;;  %v1674_v49 = vpop.permute.xlu0 %1673 }
 0x274   :  { %v1615_v63 = vadd.f32 %v1607_v56, %v1563_v41  ;;  %v3264_v41 = vld [vmem:[%s5835_s2 + $0x70] sm:$0xff] }
 0x275   :  { %v1761_v10 = vmul.f32 %v3264_v41, %v5924_v55  ;;  %v1763_v8 = vmul.f32 %v3264_v41, %v5927_v53 }
 0x276   :  { %v1604_v45 = vpop.permute.xlu1 %1603  ;;  %v1699_v4 = vadd.f32 %v1695_v11, %v1615_v63 }
 0x277   :  { %v1608_v24 = vsel %vm864_vm1, %v1602_v39, %v1604_v45  ;;  %v1678_v48 = vpop.permute.xlu0 %1677 }
 0x278   :  { %v1616_v5 = vadd.f32 %v1608_v24, %v1564_v12 }
 0x27a   :  { %v1668_v18 = vpop.permute.xlu1 %1667  ;;  %v1700_v26 = vadd.f32 %v1696_v50, %v1616_v5 }
 0x27b   :  { %v1681_v62 = vsel %vm864_vm1, %v1666_v34, %v1668_v18  ;;  %v1726_v40 = vpop.permute.xlu0 %1725 }
 0x27c   :  { %v1689_v28 = vsub.f32 %v1629_v47, %v1681_v62 }
 0x27e   :  { %v1672_v20 = vpop.permute.xlu1 %1671  ;;  %v4694_v42 = vadd.f32 %v1761_v10, %v1689_v28 }
 0x27f   :  { %v1682_v12 = vsel %vm864_vm1, %v1670_v14, %v1672_v20  ;;  %v1730_v47 = vpop.permute.xlu0 %1729 }
 0x280   :  { %5937 = vst [vmem:[#allocation8_spill] sm:$0xff] %v4694_v42  ;;  %v1690_v52 = vsub.f32 %v1630_v36, %v1682_v12 }
 0x282   :  { %v1676_v21 = vpop.permute.xlu1 %1675  ;;  %v4701_v6 = vadd.f32 %v1762_v15, %v1690_v52 }
 0x283   :  { %v1683_v35 = vsel %vm864_vm1, %v1674_v49, %v1676_v21  ;;  %v1734_v51 = vpop.permute.xlu0 %1733 }
 0x284   :  { %5938 = vst [vmem:[#allocation9_spill] sm:$0xff] %v4701_v6  ;;  %v1691_v27 = vsub.f32 %v1631_v54, %v1683_v35  ;;  %v3266_v54 = vld [vmem:[%s5834_s3 + $0x70] sm:$0xff] }
 0x285   :  { %v1829_v16 = vmul.f32 %v3266_v54, %v5924_v55  ;;  %v1831_v63 = vmul.f32 %v3266_v54, %v5927_v53 }
 0x286   :  { %v1680_v1 = vpop.permute.xlu1 %1679  ;;  %v4705_v37 = vadd.f32 %v1763_v8, %v1691_v27 }
 0x287   :  { %v1684_v36 = vsel %vm864_vm1, %v1678_v48, %v1680_v1  ;;  %v1738_v13 = vpop.permute.xlu0 %1737 }
 0x288   :  { %v1692_v22 = vsub.f32 %v1632_v3, %v1684_v36 }
 0x28a   :  { %v1728_v39 = vpop.permute.xlu1 %1727  ;;  %v4709_v19 = vadd.f32 %v1764_v30, %v1692_v22 }
 0x28b   :  { %v1741_v43 = vsel %vm864_vm1, %v1726_v40, %v1728_v39  ;;  %v4716_v31 = vpop.permute.xlu0 %1801 }
 0x28c   :  { %5939 = vst [vmem:[#allocation27_spill] sm:$0xff] %v4709_v19  ;;  %v1749_v59 = vadd.f32 %v1741_v43, %v1697_v60  ;;  %5940 = vst [vmem:[#allocation28_spill] sm:$0xff] %v4716_v31  ;;  %v1830_v60 = vmul.f32 %v3267_v32, %v5924_v55  ;;  %v1832_v55 = vmul.f32 %v3267_v32, %v5927_v53 }
 0x28e   :  { %v1732_v34 = vpop.permute.xlu1 %1731  ;;  %v4718_v17 = vadd.f32 %v1829_v16, %v1749_v59  ;;  %v4805_v16 = vld [vmem:[%s5834_s3 + $0x90] sm:$0xff] }
 0x28f   :  { %v1742_v3 = vsel %vm864_vm1, %v1730_v47, %v1732_v34  ;;  %v4725_v58 = vpop.permute.xlu0 %1805 }
 0x290   :  { %v1750_v29 = vadd.f32 %v1742_v3, %v1698_v25  ;;  %5941 = vst [vmem:[#allocation11_spill] sm:$0xff] %v4725_v58 }
 0x292   :  { %v1736_v61 = vpop.permute.xlu1 %1735  ;;  %v4727_v14 = vadd.f32 %v1830_v60, %v1750_v29 }
 0x293   :  { %v1743_v0 = vsel %vm864_vm1, %v1734_v51, %v1736_v61  ;;  %v4731_v11 = vpop.permute.xlu0 %1809 }
 0x294   :  { %v1751_v56 = vadd.f32 %v1743_v0, %v1699_v4 }
 0x296   :  { %v1740_v49 = vpop.permute.xlu1 %1739  ;;  %v4733_v25 = vadd.f32 %v1831_v63, %v1751_v56  ;;  %v5952_v56 = vld [vmem:[#allocation4_spill] sm:$0xff] }
 0x297   :  { %v1744_v45 = vsel %vm864_vm1, %v1738_v13, %v1740_v49  ;;  %v4737_v5 = vpop.permute.xlu0 %1813  ;;  %v4829_v63 = vrot.slane %v4541_v38, %v5952_v56 }
 0x298   :  { %v1752_v24 = vadd.f32 %v1744_v45, %v1700_v26  ;;  %5942 = vst [vmem:[#allocation10_spill] sm:$0xff] %v4737_v5  ;;  %v5953_v45 = vld [vmem:[#allocation16_spill] sm:$0xff] }
 0x29a   :  { %v4739_v50 = vpop.permute.xlu1 %1803  ;;  %v4741_v48 = vadd.f32 %v1832_v55, %v1752_v24 }
 0x29b   :  { %5943 = vst [vmem:[#allocation29_spill] sm:$0xff] %v4739_v50  ;;  %v4743_v18 = vpop.permute.xlu0 %1861 }
 0x29e   :  { %v4745_v4 = vpop.permute.xlu1 %1807 }
 0x29f   :  { %5944 = vst [vmem:[#allocation30_spill] sm:$0xff] %v4745_v4  ;;  %v4747_v62 = vpop.permute.xlu0 %1865 }
 0x2a2   :  { %v4749_v28 = vpop.permute.xlu1 %1811 }
 0x2a3   :  { %v4751_v41 = vpop.permute.xlu0 %1869 }
 0x2a6   :  { %v4753_v10 = vpop.permute.xlu1 %1815 }
 0x2a7   :  { %5945 = vst [vmem:[#allocation12_spill] sm:$0xff] %v4753_v10  ;;  %v4755_v26 = vpop.permute.xlu0 %1873 }
 0x2aa   :  { %v4757_v53 = vpop.permute.xlu1 %1863 }
 0x2ab   :  { %v4759_v40 = vpop.permute.xlu0 %1937 }
 0x2ac   :  { %5946 = vst [vmem:[#allocation3_spill] sm:$0xff] %v4759_v40 }
 0x2ae   :  { %v4761_v20 = vpop.permute.xlu1 %1867 }
 0x2af   :  { %v4763_v12 = vpop.permute.xlu0 %1941 }
 0x2b0   :  { %5947 = vst [vmem:[#allocation31_spill] sm:$0xff] %v4763_v12 }
 0x2b2   :  { %v4765_v52 = vpop.permute.xlu1 %1871 }
 0x2b3   :  { %v4767_v2 = vpop.permute.xlu0 %1945 }
 0x2b6   :  { %v4769_v15 = vpop.permute.xlu1 %1875 }
 0x2b7   :  { %v4771_v47 = vpop.permute.xlu0 %1949 }
 0x2b8   :  { %5948 = vst [vmem:[#allocation32_spill] sm:$0xff] %v4771_v47 }
 0x2ba   :  { %v4773_v21 = vpop.permute.xlu1 %1939 }
 0x2bb   :  { %5949 = vst [vmem:[#allocation14_spill] sm:$0xff] %v4773_v21  ;;  %v1976_v35 = vpop.permute.xlu0 %1975  ;;  %v5969_v21 = vld [vmem:[#allocation19_spill] sm:$0xff] }
 0x2bc   :  { %v1981_v8 = vmul.f32 %v1976_v35, %v4545_v57  ;;  %v1982_v51 = vmul.f32 %v1976_v35, %v4596_v44  ;;  %v1986_v39 = vmul.f32 %v1976_v35, %v4625_v9  ;;  %v1985_v43 = vmul.f32 %v1976_v35, %v4576_v7 }
 0x2be   :  { %v4775_v27 = vpop.permute.xlu1 %1943  ;;  %1997 = vrot.lane.b32.xlu0 %v1981_v8, %s3285_s24  ;;  %1999 = vrot.lane.b32.xlu1 %v1982_v51, %s3285_s24 }
 0x2bf   :  { %5950 = vst [vmem:[#allocation15_spill] sm:$0xff] %v4775_v27 }
 0x2c2   :  { %v4781_v1 = vpop.permute.xlu1 %1947 }
 0x2c6   :  { %v4783_v36 = vpop.permute.xlu1 %1951 }
 0x2c7   :  { %5951 = vst [vmem:[#allocation33_spill] sm:$0xff] %v4783_v36 }
 0x2ca   :  { %v1978_v22 = vpop.permute.xlu1 %1977 }
 0x2cb   :  { %v1984_v30 = vmul.f32 %v1978_v22, %v4596_v44  ;;  %v1983_v13 = vmul.f32 %v1978_v22, %v4545_v57  ;;  %v1988_v59 = vmul.f32 %v1978_v22, %v4625_v9  ;;  %v1987_v54 = vmul.f32 %v1978_v22, %v4576_v7  ;;  %v4800_v44 = vld [vmem:[%s5834_s3 + $0x98] sm:$0xff] }
 0x2cc   :  { %v4839_v22 = vrot.slane %v4572_v46, %v5952_v56  ;;  %v4859_v56 = vld [vmem:[%s5835_s2 + $0x90] sm:$0xff] }
 0x2cd   :  { %2003 = vrot.lane.b32.xlu1 %v1984_v30, %s3285_s24  ;;  %2001 = vrot.lane.b32.xlu0 %v1983_v13, %s3285_s24  ;;  %v5954_v30 = vld [vmem:[#allocation17_spill] sm:$0xff] }
 0x2d1   :  { %2007 = vrot.lane.b32.xlu1 %v1986_v39, %s3285_s24  ;;  %2005 = vrot.lane.b32.xlu0 %v1985_v43, %s3285_s24 }
 0x2d5   :  { %2011 = vrot.lane.b32.xlu1 %v1988_v59, %s3285_s24  ;;  %2009 = vrot.lane.b32.xlu0 %v1987_v54, %s3285_s24  ;;  %v4854_v54 = vld [vmem:[%s5835_s2 + $0x98] sm:$0xff] }
 0x2d6   :  { %5955 = vst [vmem:[#allocation4_spill] sm:$0xff] %v4854_v54 }
 0x2d9   :  { %2053 = vrot.lane.b32.xlu1 %v4800_v44, %s3282_s15  ;;  %2051 = vrot.lane.b32.xlu0 %v4805_v16, %s3282_s15 }
 0x330   :  { %v4811_v9 = vpop.permute.xlu0 %1997  ;;  %v4813_v34 = vpop.permute.xlu1 %1999 }
 0x33f   :  { %v4815_v3 = vpop.permute.xlu0 %2001  ;;  %v4817_v29 = vpop.permute.xlu1 %2003 }
 0x343   :  { %v4819_v32 = vpop.permute.xlu0 %2005  ;;  %v4821_v60 = vpop.permute.xlu1 %2007 }
 0x347   :  { %v4823_v61 = vpop.permute.xlu0 %2009  ;;  %v4825_v0 = vpop.permute.xlu1 %2011 }
 0x34b   :  { %v2052_v49 = vpop.permute.xlu0 %2051  ;;  %v2054_v35 = vpop.permute.xlu1 %2053 }
 0x34c   :  { %v2058_v24 = vmul.f32 %v2052_v49, %v5953_v45  ;;  %v2057_v55 = vmul.f32 %v2052_v49, %v4829_v63  ;;  %v2060_v8 = vmul.f32 %v2054_v35, %v5953_v45  ;;  %v2059_v51 = vmul.f32 %v2054_v35, %v4829_v63 }
 0x34d   :  { %v2062_v13 = vmul.f32 %v2052_v49, %v5954_v30  ;;  %v2061_v39 = vmul.f32 %v2052_v49, %v4839_v22  ;;  %v2064_v43 = vmul.f32 %v2054_v35, %v5954_v30  ;;  %v2063_v59 = vmul.f32 %v2054_v35, %v4839_v22 }
 0x34e   :  { %2075 = vrot.lane.b32.xlu1 %v2058_v24, %s3285_s24  ;;  %2073 = vrot.lane.b32.xlu0 %v2057_v55, %s3285_s24 }
 0x352   :  { %2079 = vrot.lane.b32.xlu1 %v2060_v8, %s3285_s24  ;;  %2077 = vrot.lane.b32.xlu0 %v2059_v51, %s3285_s24 }
 0x356   :  { %2083 = vrot.lane.b32.xlu1 %v2062_v13, %s3285_s24  ;;  %2081 = vrot.lane.b32.xlu0 %v2061_v39, %s3285_s24 }
 0x35a   :  { %2087 = vrot.lane.b32.xlu1 %v2064_v43, %s3285_s24  ;;  %2085 = vrot.lane.b32.xlu0 %v2063_v59, %s3285_s24 }
 0x35e   :  { %2113 = vrot.lane.b32.xlu1 %v4854_v54, %s3282_s15  ;;  %2111 = vrot.lane.b32.xlu0 %v4859_v56, %s3282_s15  ;;  %v5967_v54 = vld [vmem:[#allocation13_spill] sm:$0xff] }
 0x35f   :  { %v4929_v19 = vrot.slane %v4541_v38, %v5967_v54  ;;  %v4939_v40 = vrot.slane %v4572_v46, %v5967_v54 }
 0x3c0   :  { %v4865_v49 = vpop.permute.xlu0 %2073  ;;  %v4867_v24 = vpop.permute.xlu1 %2075 }
 0x3c1   :  { %5956 = vst [vmem:[#allocation16_spill] sm:$0xff] %v4865_v49  ;;  %5957 = vst [vmem:[#allocation17_spill] sm:$0xff] %v4867_v24  ;;  %v5968_v24 = vld [vmem:[#allocation18_spill] sm:$0xff] }
 0x3c4   :  { %v4869_v55 = vpop.permute.xlu0 %2077  ;;  %v4871_v35 = vpop.permute.xlu1 %2079 }
 0x3c5   :  { %5958 = vst [vmem:[#allocation34_spill] sm:$0xff] %v4869_v55  ;;  %5959 = vst [vmem:[#allocation35_spill] sm:$0xff] %v4871_v35 }
 0x3c8   :  { %v4873_v8 = vpop.permute.xlu0 %2081  ;;  %v4875_v51 = vpop.permute.xlu1 %2083 }
 0x3cc   :  { %v4877_v13 = vpop.permute.xlu0 %2085  ;;  %v4879_v39 = vpop.permute.xlu1 %2087 }
 0x3cd   :  { %5960 = vst [vmem:[#allocation36_spill] sm:$0xff] %v4877_v13  ;;  %5961 = vst [vmem:[#allocation37_spill] sm:$0xff] %v4879_v39 }
 0x3d0   :  { %v2112_v43 = vpop.permute.xlu0 %2111  ;;  %v2114_v36 = vpop.permute.xlu1 %2113 }
 0x3d1   :  { %v2118_v59 = vmul.f32 %v2112_v43, %v5953_v45  ;;  %v2117_v47 = vmul.f32 %v2112_v43, %v4829_v63  ;;  %v2120_v55 = vmul.f32 %v2114_v36, %v5953_v45  ;;  %v2119_v35 = vmul.f32 %v2114_v36, %v4829_v63  ;;  %v4900_v45 = vld [vmem:[%s5834_s3 + $0xa8] sm:$0xff] }
 0x3d2   :  { %v2122_v13 = vmul.f32 %v2112_v43, %v5954_v30  ;;  %v2121_v39 = vmul.f32 %v2112_v43, %v4839_v22  ;;  %5962 = vst [vmem:[#allocation38_spill] sm:$0xff] %v4900_v45 }
 0x3d3   :  { %2135 = vrot.lane.b32.xlu1 %v2118_v59, %s3285_s24  ;;  %2133 = vrot.lane.b32.xlu0 %v2117_v47, %s3285_s24  ;;  %v2124_v59 = vmul.f32 %v2114_v36, %v5954_v30  ;;  %v2123_v47 = vmul.f32 %v2114_v36, %v4839_v22 }
 0x3d7   :  { %2139 = vrot.lane.b32.xlu1 %v2120_v55, %s3285_s24  ;;  %2137 = vrot.lane.b32.xlu0 %v2119_v35, %s3285_s24  ;;  %v4905_v55 = vld [vmem:[%s5834_s3 + $0xa0] sm:$0xff] }
 0x3db   :  { %2143 = vrot.lane.b32.xlu1 %v2122_v13, %s3285_s24  ;;  %2141 = vrot.lane.b32.xlu0 %v2121_v39, %s3285_s24 }
 0x3df   :  { %2147 = vrot.lane.b32.xlu1 %v2124_v59, %s3285_s24  ;;  %2145 = vrot.lane.b32.xlu0 %v2123_v47, %s3285_s24 }
 0x3e3   :  { %2189 = vrot.lane.b32.xlu1 %v4900_v45, %s3282_s15  ;;  %2187 = vrot.lane.b32.xlu0 %v4905_v55, %s3282_s15 }
 0x445   :  { %v4911_v36 = vpop.permute.xlu0 %2133  ;;  %v4913_v30 = vpop.permute.xlu1 %2135 }
 0x449   :  { %v4915_v35 = vpop.permute.xlu0 %2137  ;;  %v4917_v13 = vpop.permute.xlu1 %2139 }
 0x44d   :  { %v4919_v39 = vpop.permute.xlu0 %2141  ;;  %v4921_v43 = vpop.permute.xlu1 %2143 }
 0x44e   :  { %5963 = vst [vmem:[#allocation39_spill] sm:$0xff] %v4919_v39  ;;  %5964 = vst [vmem:[#allocation40_spill] sm:$0xff] %v4921_v43 }
 0x451   :  { %v4923_v59 = vpop.permute.xlu0 %2145  ;;  %v4925_v47 = vpop.permute.xlu1 %2147 }
 0x452   :  { %5965 = vst [vmem:[#allocation41_spill] sm:$0xff] %v4923_v59  ;;  %5966 = vst [vmem:[#allocation42_spill] sm:$0xff] %v4925_v47  ;;  %v5031_v59 = vld [vmem:[#allocation2 + $0x18] sm:$0xff] }
 0x455   :  { %v2188_v49 = vpop.permute.xlu0 %2187  ;;  %v2190_v12 = vpop.permute.xlu1 %2189 }
 0x456   :  { %v2194_v5 = vmul.f32 %v2188_v49, %v5968_v24  ;;  %v2193_v10 = vmul.f32 %v2188_v49, %v4929_v19  ;;  %v2196_v27 = vmul.f32 %v2190_v12, %v5968_v24  ;;  %v2195_v6 = vmul.f32 %v2190_v12, %v4929_v19 }
 0x457   :  { %v2198_v58 = vmul.f32 %v2188_v49, %v5969_v21  ;;  %v2197_v4 = vmul.f32 %v2188_v49, %v4939_v40 }
 0x458   :  { %2211 = vrot.lane.b32.xlu1 %v2194_v5, %s3285_s24  ;;  %2209 = vrot.lane.b32.xlu0 %v2193_v10, %s3285_s24  ;;  %v2200_v5 = vmul.f32 %v2190_v12, %v5969_v21  ;;  %v2199_v10 = vmul.f32 %v2190_v12, %v4939_v40 }
 0x45c   :  { %2215 = vrot.lane.b32.xlu1 %v2196_v27, %s3285_s24  ;;  %2213 = vrot.lane.b32.xlu0 %v2195_v6, %s3285_s24  ;;  %v4954_v6 = vld [vmem:[%s5835_s2 + $0xa8] sm:$0xff]  ;;  %v4959_v27 = vld [vmem:[%s5835_s2 + $0xa0] sm:$0xff] }
 0x45d   :  { %5970 = vst [vmem:[#allocation13_spill] sm:$0xff] %v4954_v6 }
 0x460   :  { %2219 = vrot.lane.b32.xlu1 %v2198_v58, %s3285_s24  ;;  %2217 = vrot.lane.b32.xlu0 %v2197_v4, %s3285_s24 }
 0x464   :  { %2223 = vrot.lane.b32.xlu1 %v2200_v5, %s3285_s24  ;;  %2221 = vrot.lane.b32.xlu0 %v2199_v10, %s3285_s24 }
 0x468   :  { %2249 = vrot.lane.b32.xlu1 %v4954_v6, %s3282_s15  ;;  %2247 = vrot.lane.b32.xlu0 %v4959_v27, %s3282_s15 }
 0x4ca   :  { %v4965_v58 = vpop.permute.xlu0 %2209  ;;  %v4967_v4 = vpop.permute.xlu1 %2211 }
 0x4cb   :  { %5971 = vst [vmem:[#allocation18_spill] sm:$0xff] %v4965_v58  ;;  %5972 = vst [vmem:[#allocation19_spill] sm:$0xff] %v4967_v4  ;;  %v5986_v4 = vld [vmem:[#allocation26_spill] sm:$0xff] }
 0x4cc   :  { %5987 = vst [vmem:[#allocation26_spill] sm:$0xff] %v5031_v59  ;;  %v2316_v47 = vrot.slane %v5031_v59, %v5986_v4  ;;  %v5049_v59 = vld [vmem:[%s5835_s2 + $0xb0] sm:$0xff] }
 0x4ce   :  { %v4969_v12 = vpop.permute.xlu0 %2213  ;;  %v4971_v54 = vpop.permute.xlu1 %2215 }
 0x4cf   :  { %5973 = vst [vmem:[#allocation43_spill] sm:$0xff] %v4969_v12  ;;  %5974 = vst [vmem:[#allocation44_spill] sm:$0xff] %v4971_v54 }
 0x4d2   :  { %v4973_v49 = vpop.permute.xlu0 %2217  ;;  %v4975_v5 = vpop.permute.xlu1 %2219 }
 0x4d6   :  { %v4977_v10 = vpop.permute.xlu0 %2221  ;;  %v4979_v42 = vpop.permute.xlu1 %2223 }
 0x4d7   :  { %5975 = vst [vmem:[#allocation45_spill] sm:$0xff] %v4977_v10  ;;  %5976 = vst [vmem:[#allocation46_spill] sm:$0xff] %v4979_v42 }
 0x4da   :  { %v2248_v6 = vpop.permute.xlu0 %2247  ;;  %v2250_v58 = vpop.permute.xlu1 %2249 }
 0x4db   :  { %v2254_v31 = vmul.f32 %v2248_v6, %v5968_v24  ;;  %v2253_v50 = vmul.f32 %v2248_v6, %v4929_v19  ;;  %v2256_v12 = vmul.f32 %v2250_v58, %v5968_v24  ;;  %v2255_v54 = vmul.f32 %v2250_v58, %v4929_v19  ;;  %v5000_v24 = vld [vmem:[%s5834_s3 + $0xb8] sm:$0xff] }
 0x4dc   :  { %v2258_v10 = vmul.f32 %v2248_v6, %v5969_v21  ;;  %v2257_v42 = vmul.f32 %v2248_v6, %v4939_v40  ;;  %5977 = vst [vmem:[#allocation47_spill] sm:$0xff] %v5000_v24  ;;  %v5005_v6 = vld [vmem:[%s5834_s3 + $0xb0] sm:$0xff] }
 0x4dd   :  { %2271 = vrot.lane.b32.xlu1 %v2254_v31, %s3285_s24  ;;  %2269 = vrot.lane.b32.xlu0 %v2253_v50, %s3285_s24  ;;  %v2260_v31 = vmul.f32 %v2250_v58, %v5969_v21  ;;  %v2259_v50 = vmul.f32 %v2250_v58, %v4939_v40  ;;  %5978 = vst [vmem:[#allocation48_spill] sm:$0xff] %v5005_v6 }
 0x4e1   :  { %2275 = vrot.lane.b32.xlu1 %v2256_v12, %s3285_s24  ;;  %2273 = vrot.lane.b32.xlu0 %v2255_v54, %s3285_s24 }
 0x4e5   :  { %2279 = vrot.lane.b32.xlu1 %v2258_v10, %s3285_s24  ;;  %2277 = vrot.lane.b32.xlu0 %v2257_v42, %s3285_s24 }
 0x4e9   :  { %2283 = vrot.lane.b32.xlu1 %v2260_v31, %s3285_s24  ;;  %2281 = vrot.lane.b32.xlu0 %v2259_v50, %s3285_s24 }
 0x4ed   :  { %2325 = vrot.lane.b32.xlu1 %v5000_v24, %s3282_s15  ;;  %2323 = vrot.lane.b32.xlu0 %v5005_v6, %s3282_s15  ;;  %v5029_v24 = vrot.slane %v4541_v38, %v5986_v4  ;;  %v5044_v38 = vld [vmem:[%s5835_s2 + $0xb8] sm:$0xff] }
 0x4ee   :  { %5988 = vst [vmem:[#allocation56_spill] sm:$0xff] %v5044_v38 }
 0x54f   :  { %v5011_v42 = vpop.permute.xlu0 %2269  ;;  %v5013_v21 = vpop.permute.xlu1 %2271 }
 0x550   :  { %5979 = vst [vmem:[#allocation49_spill] sm:$0xff] %v5011_v42 }
 0x553   :  { %v5015_v58 = vpop.permute.xlu0 %2273  ;;  %v5017_v12 = vpop.permute.xlu1 %2275 }
 0x554   :  { %5980 = vst [vmem:[#allocation50_spill] sm:$0xff] %v5015_v58  ;;  %5981 = vst [vmem:[#allocation51_spill] sm:$0xff] %v5017_v12 }
 0x557   :  { %v5019_v54 = vpop.permute.xlu0 %2277  ;;  %v5021_v10 = vpop.permute.xlu1 %2279 }
 0x558   :  { %5982 = vst [vmem:[#allocation52_spill] sm:$0xff] %v5019_v54  ;;  %5983 = vst [vmem:[#allocation53_spill] sm:$0xff] %v5021_v10  ;;  %v3269_v10 = vld [vmem:[#allocation2 + $0x38] sm:$0xff] }
 0x55b   :  { %v5023_v31 = vpop.permute.xlu0 %2281  ;;  %v5025_v50 = vpop.permute.xlu1 %2283 }
 0x55c   :  { %5984 = vst [vmem:[#allocation54_spill] sm:$0xff] %v5023_v31  ;;  %5985 = vst [vmem:[#allocation55_spill] sm:$0xff] %v5025_v50 }
 0x55f   :  { %v2324_v6 = vpop.permute.xlu0 %2323  ;;  %v2326_v54 = vpop.permute.xlu1 %2325 }
 0x560   :  { %v2330_v58 = vmul.f32 %v2324_v6, %v2316_v47  ;;  %v2329_v12 = vmul.f32 %v2324_v6, %v5029_v24  ;;  %v2332_v31 = vmul.f32 %v2326_v54, %v2316_v47  ;;  %v2331_v50 = vmul.f32 %v2326_v54, %v5029_v24 }
 0x562   :  { %2347 = vrot.lane.b32.xlu1 %v2330_v58, %s3285_s24  ;;  %2345 = vrot.lane.b32.xlu0 %v2329_v12, %s3285_s24  ;;  %v5058_v58 = vld [vmem:[%s5835_s2 + $0xc8] sm:$0xff]  ;;  %v5063_v12 = vld [vmem:[%s5835_s2 + $0xc0] sm:$0xff] }
 0x563   :  { %5989 = vst [vmem:[#allocation57_spill] sm:$0xff] %v5058_v58  ;;  %5990 = vst [vmem:[#allocation58_spill] sm:$0xff] %v5063_v12 }
 0x566   :  { %2351 = vrot.lane.b32.xlu1 %v2332_v31, %s3285_s24  ;;  %2349 = vrot.lane.b32.xlu0 %v2331_v50, %s3285_s24  ;;  %v5072_v31 = vld [vmem:[%s5835_s2 + $0xd8] sm:$0xff]  ;;  %v5077_v50 = vld [vmem:[%s5835_s2 + $0xd0] sm:$0xff] }
 0x567   :  { %5991 = vst [vmem:[#allocation59_spill] sm:$0xff] %v5072_v31  ;;  %5992 = vst [vmem:[#allocation60_spill] sm:$0xff] %v5077_v50 }
 0x56a   :  { %2385 = vrot.lane.b32.xlu1 %v5044_v38, %s3282_s15  ;;  %2383 = vrot.lane.b32.xlu0 %v5049_v59, %s3282_s15  ;;  %v767_v38 = vld [vmem:[%s5835_s2 + $0xf8] sm:$0xff] }
 0x56e   :  { %2521 = vrot.lane.b32.xlu1 %v5058_v58, %s3282_s15  ;;  %2519 = vrot.lane.b32.xlu0 %v5063_v12, %s3282_s15  ;;  %v765_v58 = vld [vmem:[%s5835_s2 + $0xe8] sm:$0xff]  ;;  %v764_v12 = vld [vmem:[%s5835_s2 + $0xe0] sm:$0xff] }
 0x572   :  { %2657 = vrot.lane.b32.xlu1 %v5072_v31, %s3282_s15  ;;  %2655 = vrot.lane.b32.xlu0 %v5077_v50, %s3282_s15  ;;  %v766_v50 = vld [vmem:[%s5835_s2 + $0xf0] sm:$0xff]  ;;  %v5099_v31 = vrot.slane %v4572_v46, %v5986_v4 }
 0x574   :  { %v2333_v45 = vmul.f32 %v2324_v6, %v5099_v31  ;;  %v2335_v43 = vmul.f32 %v2326_v54, %v5099_v31 }
 0x576   :  { %2793 = vrot.lane.b32.xlu1 %v765_v58, %s3282_s15  ;;  %2791 = vrot.lane.b32.xlu0 %v764_v12, %s3282_s15  ;;  %v2320_v58 = vrot.slane %v3269_v10, %v5986_v4  ;;  %v1819_v4 = vsel %vm864_vm1, %v4731_v11, %v4749_v28  ;;  %v5131_v11 = vrot.slane %v3269_v10, %v4127_v33 }
 0x578   :  { %v2334_v12 = vmul.f32 %v2324_v6, %v2320_v58  ;;  %v2336_v39 = vmul.f32 %v2326_v54, %v2320_v58  ;;  %v1899_v54 = vmul.f32 %v4576_v7, %v4621_v23 }
 0x57a   :  { %2929 = vrot.lane.b32.xlu1 %v767_v38, %s3282_s15  ;;  %2927 = vrot.lane.b32.xlu0 %v766_v50, %s3282_s15 }
 0x57e   :  { %2355 = vrot.lane.b32.xlu1 %v2334_v12, %s3285_s24  ;;  %2353 = vrot.lane.b32.xlu0 %v2333_v45, %s3285_s24  ;;  %v1827_v45 = vsub.f32 %v4705_v37, %v1819_v4 }
 0x580   :  { %v1903_v42 = vadd.f32 %v1899_v54, %v1827_v45 }
 0x582   :  { %2359 = vrot.lane.b32.xlu1 %v2336_v39, %s3285_s24  ;;  %2357 = vrot.lane.b32.xlu0 %v2335_v43, %s3285_s24  ;;  %v1955_v43 = vsel %vm864_vm1, %v4767_v2, %v4781_v1  ;;  %v2035_v1 = vmul.f32 %v4839_v22, %v4859_v56 }
 0x583   :  { %v1963_v37 = vsub.f32 %v1903_v42, %v1955_v43  ;;  %v2091_v42 = vsel %vm864_vm1, %v4873_v8, %v4875_v51  ;;  %v2171_v8 = vmul.f32 %v4939_v40, %v4959_v27 }
 0x5d4   :  { %v5110_v46 = vpop.permute.xlu0 %2345  ;;  %v5112_v38 = vpop.permute.xlu1 %2347 }
 0x5d5   :  { %5993 = vst [vmem:[#allocation61_spill] sm:$0xff] %v5110_v46  ;;  %5994 = vst [vmem:[#allocation62_spill] sm:$0xff] %v5112_v38 }
 0x5d8   :  { %v5117_v6 = vpop.permute.xlu0 %2349  ;;  %v5119_v50 = vpop.permute.xlu1 %2351 }
 0x5d9   :  { %5995 = vst [vmem:[#allocation63_spill] sm:$0xff] %v5117_v6 }
 0x5dc   :  { %v2384_v39 = vpop.permute.xlu0 %2383  ;;  %v2386_v12 = vpop.permute.xlu1 %2385 }
 0x5dd   :  { %v2389_v46 = vmul.f32 %v2384_v39, %v5029_v24  ;;  %v2390_v38 = vmul.f32 %v2384_v39, %v2316_v47  ;;  %v2391_v4 = vmul.f32 %v2386_v12, %v5029_v24  ;;  %v2392_v6 = vmul.f32 %v2386_v12, %v2316_v47 }
 0x5de   :  { %v2039_v47 = vadd.f32 %v2035_v1, %v1963_v37  ;;  %v2393_v45 = vmul.f32 %v2384_v39, %v5099_v31  ;;  %v2394_v54 = vmul.f32 %v2384_v39, %v2320_v58  ;;  %v2227_v37 = vsel %vm864_vm1, %v4973_v49, %v4975_v5  ;;  %v5181_v49 = vld [vmem:[%s5834_s3 + $0xc8] sm:$0xff]  ;;  %v5186_v5 = vld [vmem:[%s5834_s3 + $0xc0] sm:$0xff] }
 0x5df   :  { %2407 = vrot.lane.b32.xlu1 %v2390_v38, %s3285_s24  ;;  %2405 = vrot.lane.b32.xlu0 %v2389_v46, %s3285_s24  ;;  %v2396_v1 = vmul.f32 %v2386_v12, %v2320_v58 }
 0x5e0   :  { %v5133_v28 = vpop.permute.xlu0 %2519  ;;  %v5135_v23 = vpop.permute.xlu1 %2521  ;;  %v2099_v43 = vsub.f32 %v2039_v47, %v2091_v42 }
 0x5e1   :  { %v5140_v2 = vmul.f32 %v5133_v28, %v5131_v11  ;;  %v5146_v46 = vmul.f32 %v5135_v23, %v5131_v11 }
 0x5e2   :  { %v2175_v39 = vadd.f32 %v2171_v8, %v2099_v43 }
 0x5e3   :  { %2411 = vrot.lane.b32.xlu1 %v2392_v6, %s3285_s24  ;;  %2409 = vrot.lane.b32.xlu0 %v2391_v4, %s3285_s24  ;;  %v2395_v4 = vmul.f32 %v2386_v12, %v5099_v31 }
 0x5e4   :  { %v5153_v10 = vpop.permute.xlu0 %2655  ;;  %v5155_v38 = vpop.permute.xlu1 %2657  ;;  %v2235_v42 = vsub.f32 %v2175_v39, %v2227_v37  ;;  %v1878_v39 = vsel %vm864_vm1, %v4747_v62, %v4761_v20  ;;  %v3271_v62 = vld [vmem:[%s5834_s3 + $0x88] sm:$0xff]  ;;  %v2014_v20 = vsel %vm864_vm1, %v4815_v3, %v4817_v29  ;;  %v2102_v29 = vmul.f32 %v4829_v63, %v4800_v44 }
 0x5e7   :  { %2415 = vrot.lane.b32.xlu1 %v2394_v54, %s3285_s24  ;;  %2413 = vrot.lane.b32.xlu0 %v2393_v45, %s3285_s24  ;;  %v2307_v54 = vmul.f32 %v5099_v31, %v5049_v59 }
 0x5e8   :  { %v5162_v51 = vpop.permute.xlu0 %2791  ;;  %v5164_v6 = vpop.permute.xlu1 %2793 }
 0x5e9   :  { %v5192_v12 = vadd.f32 %v2307_v54, %v2235_v42  ;;  %v3270_v42 = vld [vmem:[%s5834_s3 + $0x80] sm:$0xff] }
 0x5ea   :  { %v1965_v54 = vmul.f32 %v3270_v42, %v4545_v57 }
 0x5eb   :  { %2419 = vrot.lane.b32.xlu1 %v2396_v1, %s3285_s24  ;;  %2417 = vrot.lane.b32.xlu0 %v2395_v4, %s3285_s24  ;;  %v1877_v4 = vsel %vm864_vm1, %v4743_v18, %v4757_v53  ;;  %v1966_v53 = vmul.f32 %v3271_v62, %v4545_v57 }
 0x5ec   :  { %v5172_v47 = vpop.permute.xlu0 %2927  ;;  %v5174_v45 = vpop.permute.xlu1 %2929  ;;  %v1885_v1 = vadd.f32 %v1877_v4, %v4718_v17  ;;  %v1879_v17 = vsel %vm864_vm1, %v4751_v41, %v4765_v52  ;;  %v1880_v41 = vsel %vm864_vm1, %v4755_v26, %v4769_v15  ;;  %v2149_v52 = vsel %vm864_vm1, %v4911_v36, %v4913_v30 }
 0x5ed   :  { %v1967_v4 = vmul.f32 %v3270_v42, %v4576_v7  ;;  %v1888_v3 = vadd.f32 %v1880_v41, %v4741_v48  ;;  %v2150_v26 = vsel %vm864_vm1, %v4915_v35, %v4917_v13  ;;  %v1968_v36 = vmul.f32 %v3271_v62, %v4576_v7  ;;  %v6001_v41 = vld [vmem:[#allocation50_spill] sm:$0xff] }
 0x5ee   :  { %v1969_v37 = vadd.f32 %v1965_v54, %v1885_v1  ;;  %v2237_v30 = vmul.f32 %v4929_v19, %v4905_v55  ;;  %v2016_v48 = vsel %vm864_vm1, %v4823_v61, %v4825_v0 }
 0x5ef   :  { %2461 = vrot.lane.b32.xlu1 %v5181_v49, %s3282_s15  ;;  %2459 = vrot.lane.b32.xlu0 %v5186_v5, %s3282_s15 }
 0x5f0   :  { %v2354_v58 = vpop.permute.xlu0 %2353  ;;  %v2356_v43 = vpop.permute.xlu1 %2355 }
 0x5f1   :  { %v5195_v8 = vsel %vm864_vm1, %v2354_v58, %v2356_v43  ;;  %v2013_v58 = vsel %vm864_vm1, %v4811_v9, %v4813_v34  ;;  %v1886_v43 = vadd.f32 %v1878_v39, %v4727_v14  ;;  %v1887_v9 = vadd.f32 %v1879_v17, %v4733_v25  ;;  %v5997_v17 = vld [vmem:[#allocation40_spill] sm:$0xff] }
 0x5f2   :  { %v2021_v18 = vadd.f32 %v2013_v58, %v1969_v37  ;;  %v2101_v14 = vmul.f32 %v4829_v63, %v4805_v16  ;;  %v2015_v25 = vsel %vm864_vm1, %v4819_v32, %v4821_v60  ;;  %v5996_v32 = vld [vmem:[#allocation49_spill] sm:$0xff]  ;;  %v2103_v58 = vmul.f32 %v4839_v22, %v4805_v16 }
 0x5f3   :  { %v1970_v34 = vadd.f32 %v1966_v53, %v1886_v43  ;;  %v1971_v39 = vadd.f32 %v1967_v4, %v1887_v9  ;;  %v2285_v60 = vsel %vm864_vm1, %v5996_v32, %v5013_v21  ;;  %v1972_v43 = vadd.f32 %v1968_v36, %v1888_v3  ;;  %v6000_v21 = vld [vmem:[#allocation51_spill] sm:$0xff]  ;;  %v6002_v4 = vld [vmem:[#allocation48_spill] sm:$0xff]  ;;  %v6003_v3 = vld [vmem:[#allocation42_spill] sm:$0xff] }
 0x5f4   :  { %v2105_v1 = vadd.f32 %v2101_v14, %v2021_v18  ;;  %v5998_v18 = vld [vmem:[#allocation39_spill] sm:$0xff]  ;;  %v5259_v0 = vpop.permute.xlu0 %2357  ;;  %v2286_v16 = vsel %vm864_vm1, %v6001_v41, %v6000_v21  ;;  %v6006_v32 = vld [vmem:[#allocation52_spill] sm:$0xff] }
 0x5f5   :  { %v2022_v37 = vadd.f32 %v2014_v20, %v1970_v34  ;;  %v2023_v15 = vadd.f32 %v2015_v25, %v1971_v39  ;;  %v2151_v62 = vsel %vm864_vm1, %v5998_v18, %v5997_v17  ;;  %v2024_v53 = vadd.f32 %v2016_v48, %v1972_v43  ;;  %v5999_v20 = vld [vmem:[#allocation38_spill] sm:$0xff]  ;;  %v5261_v34 = vpop.permute.xlu1 %2359  ;;  %v6005_v48 = vld [vmem:[#allocation53_spill] sm:$0xff]  ;;  %v6007_v43 = vld [vmem:[#allocation47_spill] sm:$0xff] }
 0x5f6   :  { %v2157_v54 = vadd.f32 %v2149_v52, %v2105_v1  ;;  %v2238_v9 = vmul.f32 %v4929_v19, %v5999_v20  ;;  %v2104_v52 = vmul.f32 %v4839_v22, %v4800_v44  ;;  %v2373_v1 = vmul.f32 %v5029_v24, %v6002_v4 }
 0x5f7   :  { %v2106_v42 = vadd.f32 %v2102_v29, %v2022_v37  ;;  %v2107_v14 = vadd.f32 %v2103_v58, %v2023_v15  ;;  %v6004_v29 = vld [vmem:[#allocation41_spill] sm:$0xff]  ;;  %v2287_v44 = vsel %vm864_vm1, %v6006_v32, %v6005_v48  ;;  %v6010_v32 = vld [vmem:[#allocation26_spill] sm:$0xff] }
 0x5f8   :  { %v2241_v13 = vadd.f32 %v2237_v30, %v2157_v54  ;;  %v2152_v39 = vsel %vm864_vm1, %v6004_v29, %v6003_v3  ;;  %v2239_v54 = vmul.f32 %v4939_v40, %v4905_v55  ;;  %v2240_v55 = vmul.f32 %v4939_v40, %v5999_v20 }
 0x5f9   :  { %v2158_v35 = vadd.f32 %v2150_v26, %v2106_v42  ;;  %v2159_v37 = vadd.f32 %v2151_v62, %v2107_v14  ;;  %v2108_v26 = vadd.f32 %v2104_v52, %v2024_v53  ;;  %v6008_v14 = vld [vmem:[#allocation55_spill] sm:$0xff] }
 0x5fa   :  { %v2293_v61 = vadd.f32 %v2285_v60, %v2241_v13 }
 0x5fb   :  { %v2242_v25 = vadd.f32 %v2238_v9, %v2158_v35  ;;  %v2160_v58 = vadd.f32 %v2152_v39, %v2108_v26  ;;  %v2374_v35 = vmul.f32 %v5029_v24, %v6007_v43  ;;  %v2243_v13 = vadd.f32 %v2239_v54, %v2159_v37 }
 0x5fc   :  { %v2377_v30 = vadd.f32 %v2373_v1, %v2293_v61  ;;  %v6009_v61 = vld [vmem:[#allocation54_spill] sm:$0xff]  ;;  %v2376_v39 = vmul.f32 %v5099_v31, %v6007_v43 }
 0x5fd   :  { %v2294_v15 = vadd.f32 %v2286_v16, %v2242_v25  ;;  %v2295_v18 = vadd.f32 %v2287_v44, %v2243_v13  ;;  %v2288_v21 = vsel %vm864_vm1, %v6009_v61, %v6008_v14  ;;  %v2375_v16 = vmul.f32 %v5099_v31, %v6002_v4 }
 0x5fe   :  { %v2244_v52 = vadd.f32 %v2240_v55, %v2160_v58  ;;  %v2452_v44 = vrot.slane %v6010_v32, %v4127_v33 }
 0x5ff   :  { %v2378_v53 = vadd.f32 %v2374_v35, %v2294_v15  ;;  %v2379_v3 = vadd.f32 %v2375_v16, %v2295_v18  ;;  %v5313_v18 = vld [vmem:[#allocation2 + $0x30] sm:$0xff] }
 0x600   :  { %v2296_v1 = vadd.f32 %v2288_v21, %v2244_v52  ;;  %v2526_v21 = vmul.f32 %v5133_v28, %v2452_v44  ;;  %v2528_v16 = vmul.f32 %v5135_v23, %v2452_v44 }
 0x602   :  { %v2380_v15 = vadd.f32 %v2376_v39, %v2296_v1  ;;  %v5352_v1 = vld [vmem:[%s5834_s3 + $0xd8] sm:$0xff] }
 0x651   :  { %v2406_v36 = vpop.permute.xlu0 %2405  ;;  %v2408_v42 = vpop.permute.xlu1 %2407 }
 0x652   :  { %v2421_v60 = vsel %vm864_vm1, %v2406_v36, %v2408_v42  ;;  %v5301_v42 = vld [vmem:[#allocation2 + $0x10] sm:$0xff] }
 0x653   :  { %v5281_v17 = vadd.f32 %v2421_v60, %v2377_v30  ;;  %v5305_v48 = vrot.slane %v5301_v42, %v4127_v33 }
 0x655   :  { %v2410_v62 = vpop.permute.xlu0 %2409  ;;  %v2412_v9 = vpop.permute.xlu1 %2411 }
 0x656   :  { %v2422_v41 = vsel %vm864_vm1, %v2410_v62, %v2412_v9  ;;  %v5317_v62 = vrot.slane %v5313_v18, %v4127_v33  ;;  %v2525_v33 = vmul.f32 %v5133_v28, %v5305_v48 }
 0x657   :  { %v5291_v37 = vadd.f32 %v2422_v41, %v2378_v53  ;;  %v2527_v41 = vmul.f32 %v5135_v23, %v5305_v48 }
 0x658   :  { %v2531_v52 = vmul.f32 %v5135_v23, %v5317_v62 }
 0x659   :  { %v2414_v25 = vpop.permute.xlu0 %2413  ;;  %v2416_v20 = vpop.permute.xlu1 %2415 }
 0x65a   :  { %v2423_v29 = vsel %vm864_vm1, %v2414_v25, %v2416_v20 }
 0x65b   :  { %v5296_v54 = vadd.f32 %v2423_v29, %v2379_v3 }
 0x65d   :  { %v2418_v26 = vpop.permute.xlu0 %2417  ;;  %v2420_v36 = vpop.permute.xlu1 %2419 }
 0x65e   :  { %v2424_v30 = vsel %vm864_vm1, %v2418_v26, %v2420_v36 }
 0x65f   :  { %v5299_v4 = vadd.f32 %v2424_v30, %v2380_v15  ;;  %v6013_v15 = vld [vmem:[#allocation21_spill] sm:$0xff] }
 0x660   :  { %v2666_v36 = vmul.f32 %v5153_v10, %v6013_v15  ;;  %v2668_v32 = vmul.f32 %v5155_v38, %v6013_v15 }
 0x661   :  { %v2460_v60 = vpop.permute.xlu0 %2459  ;;  %v2462_v35 = vpop.permute.xlu1 %2461 }
 0x662   :  { %v2465_v58 = vmul.f32 %v2460_v60, %v5305_v48  ;;  %v2466_v43 = vmul.f32 %v2460_v60, %v2452_v44  ;;  %v2467_v13 = vmul.f32 %v2462_v35, %v5305_v48  ;;  %v2468_v55 = vmul.f32 %v2462_v35, %v2452_v44  ;;  %v5398_v44 = vld [vmem:[%s5834_s3 + $0xe8] sm:$0xff] }
 0x663   :  { %v2469_v53 = vmul.f32 %v2460_v60, %v5317_v62  ;;  %v2470_v9 = vmul.f32 %v2460_v60, %v5131_v11  ;;  %v2471_v14 = vmul.f32 %v2462_v35, %v5317_v62  ;;  %v2472_v61 = vmul.f32 %v2462_v35, %v5131_v11  ;;  %v6014_v60 = vld [vmem:[#allocation6_spill] sm:$0xff] }
 0x664   :  { %2483 = vrot.lane.b32.xlu1 %v2466_v43, %s3285_s24  ;;  %2481 = vrot.lane.b32.xlu0 %v2465_v58, %s3285_s24  ;;  %v2529_v11 = vmul.f32 %v5133_v28, %v5317_v62  ;;  %v5357_v28 = vld [vmem:[%s5834_s3 + $0xd0] sm:$0xff]  ;;  %v5407_v58 = vrot.slane %v5301_v42, %v6014_v60  ;;  %v6015_v43 = vld [vmem:[#allocation22_spill] sm:$0xff] }
 0x665   :  { %v2798_v35 = vmul.f32 %v5162_v51, %v6015_v43 }
 0x668   :  { %2487 = vrot.lane.b32.xlu1 %v2468_v55, %s3285_s24  ;;  %2485 = vrot.lane.b32.xlu0 %v2467_v13, %s3285_s24  ;;  %v2799_v13 = vmul.f32 %v5164_v6, %v5407_v58  ;;  %v2800_v55 = vmul.f32 %v5164_v6, %v6015_v43 }
 0x66c   :  { %2491 = vrot.lane.b32.xlu1 %v2470_v9, %s3285_s24  ;;  %2489 = vrot.lane.b32.xlu0 %v2469_v53, %s3285_s24  ;;  %v5425_v53 = vrot.slane %v5313_v18, %v6014_v60 }
 0x66e   :  { %v2801_v9 = vmul.f32 %v5162_v51, %v5425_v53 }
 0x670   :  { %2495 = vrot.lane.b32.xlu1 %v2472_v61, %s3285_s24  ;;  %2493 = vrot.lane.b32.xlu0 %v2471_v14, %s3285_s24  ;;  %v6016_v14 = vld [vmem:[#allocation23_spill] sm:$0xff] }
 0x671   :  { %v2802_v61 = vmul.f32 %v5162_v51, %v6016_v14 }
 0x674   :  { %2543 = vrot.lane.b32.xlu1 %v2526_v21, %s3285_s24  ;;  %2541 = vrot.lane.b32.xlu0 %v2525_v33, %s3285_s24  ;;  %v2803_v33 = vmul.f32 %v5164_v6, %v5425_v53  ;;  %v2804_v21 = vmul.f32 %v5164_v6, %v6016_v14 }
 0x678   :  { %2547 = vrot.lane.b32.xlu1 %v2528_v16, %s3285_s24  ;;  %2545 = vrot.lane.b32.xlu0 %v2527_v41, %s3285_s24  ;;  %v5444_v41 = vld [vmem:[%s5834_s3 + $0xf8] sm:$0xff]  ;;  %v6017_v16 = vld [vmem:[#allocation7_spill] sm:$0xff] }
 0x67c   :  { %2551 = vrot.lane.b32.xlu1 %v5140_v2, %s3285_s24  ;;  %2549 = vrot.lane.b32.xlu0 %v2529_v11, %s3285_s24  ;;  %v6011_v2 = vld [vmem:[#allocation5_spill] sm:$0xff]  ;;  %v5453_v11 = vrot.slane %v5301_v42, %v6017_v16 }
 0x67d   :  { %v5361_v25 = vrot.slane %v5301_v42, %v6011_v2  ;;  %v5379_v39 = vrot.slane %v5313_v18, %v6011_v2 }
 0x67e   :  { %v2933_v6 = vmul.f32 %v5172_v47, %v5453_v11  ;;  %v2935_v42 = vmul.f32 %v5174_v45, %v5453_v11 }
 0x67f   :  { %v2661_v23 = vmul.f32 %v5153_v10, %v5361_v25  ;;  %v2663_v20 = vmul.f32 %v5155_v38, %v5361_v25  ;;  %v2665_v26 = vmul.f32 %v5153_v10, %v5379_v39  ;;  %v2667_v30 = vmul.f32 %v5155_v38, %v5379_v39 }
 0x680   :  { %2555 = vrot.lane.b32.xlu1 %v5146_v46, %s3285_s24  ;;  %2553 = vrot.lane.b32.xlu0 %v2531_v52, %s3285_s24  ;;  %v6012_v46 = vld [vmem:[#allocation20_spill] sm:$0xff] }
 0x681   :  { %v2662_v3 = vmul.f32 %v5153_v10, %v6012_v46  ;;  %v2664_v29 = vmul.f32 %v5155_v38, %v6012_v46  ;;  %v5403_v10 = vld [vmem:[%s5834_s3 + $0xe0] sm:$0xff]  ;;  %v2797_v38 = vmul.f32 %v5162_v51, %v5407_v58  ;;  %v5449_v51 = vld [vmem:[%s5834_s3 + $0xf0] sm:$0xff]  ;;  %v6018_v52 = vld [vmem:[#allocation24_spill] sm:$0xff] }
 0x682   :  { %v2934_v2 = vmul.f32 %v5172_v47, %v6018_v52 }
 0x684   :  { %2597 = vrot.lane.b32.xlu1 %v5352_v1, %s3282_s15  ;;  %2595 = vrot.lane.b32.xlu0 %v5357_v28, %s3282_s15 }
 0x688   :  { %2679 = vrot.lane.b32.xlu1 %v2662_v3, %s3285_s24  ;;  %2677 = vrot.lane.b32.xlu0 %v2661_v23, %s3285_s24  ;;  %v2936_v23 = vmul.f32 %v5174_v45, %v6018_v52  ;;  %v5471_v3 = vrot.slane %v5313_v18, %v6017_v16  ;;  %v6022_v18 = vld [vmem:[#allocation8_spill] sm:$0xff] }
 0x68c   :  { %2683 = vrot.lane.b32.xlu1 %v2664_v29, %s3285_s24  ;;  %2681 = vrot.lane.b32.xlu0 %v2663_v20, %s3285_s24  ;;  %v2937_v20 = vmul.f32 %v5172_v47, %v5471_v3  ;;  %v6019_v29 = vld [vmem:[#allocation25_spill] sm:$0xff] }
 0x690   :  { %2687 = vrot.lane.b32.xlu1 %v2666_v36, %s3285_s24  ;;  %2685 = vrot.lane.b32.xlu0 %v2665_v26, %s3285_s24  ;;  %v2938_v26 = vmul.f32 %v5172_v47, %v6019_v29  ;;  %v6020_v36 = vld [vmem:[#allocation29_spill] sm:$0xff] }
 0x694   :  { %2691 = vrot.lane.b32.xlu1 %v2668_v32, %s3285_s24  ;;  %2689 = vrot.lane.b32.xlu0 %v2667_v30, %s3285_s24  ;;  %v6021_v30 = vld [vmem:[#allocation28_spill] sm:$0xff] }
 0x695   :  { %v1817_v32 = vsel %vm864_vm1, %v6021_v30, %v6020_v36  ;;  %v6029_v36 = vld [vmem:[#allocation31_spill] sm:$0xff] }
 0x696   :  { %v1825_v60 = vsub.f32 %v6022_v18, %v1817_v32  ;;  %v2033_v18 = vmul.f32 %v4829_v63, %v4859_v56 }
 0x698   :  { %2733 = vrot.lane.b32.xlu1 %v5398_v44, %s3282_s15  ;;  %2731 = vrot.lane.b32.xlu0 %v5403_v10, %s3282_s15 }
 0x69c   :  { %2815 = vrot.lane.b32.xlu1 %v2798_v35, %s3285_s24  ;;  %2813 = vrot.lane.b32.xlu0 %v2797_v38, %s3285_s24  ;;  %v2939_v38 = vmul.f32 %v5174_v45, %v5471_v3  ;;  %v2940_v35 = vmul.f32 %v5174_v45, %v6019_v29 }
 0x6a0   :  { %2819 = vrot.lane.b32.xlu1 %v2800_v55, %s3285_s24  ;;  %2817 = vrot.lane.b32.xlu0 %v2799_v13, %s3285_s24  ;;  %v6023_v13 = vld [vmem:[#allocation30_spill] sm:$0xff]  ;;  %v6024_v55 = vld [vmem:[#allocation11_spill] sm:$0xff] }
 0x6a1   :  { %v1818_v47 = vsel %vm864_vm1, %v6024_v55, %v6023_v13  ;;  %v6033_v55 = vld [vmem:[#allocation16_spill] sm:$0xff] }
 0x6a4   :  { %2823 = vrot.lane.b32.xlu1 %v2802_v61, %s3285_s24  ;;  %2821 = vrot.lane.b32.xlu0 %v2801_v9, %s3285_s24  ;;  %v3274_v9 = vld [vmem:[%s5835_s2 + $0x80] sm:$0xff] }
 0x6a5   :  { %v1897_v61 = vmul.f32 %v3274_v9, %v4545_v57 }
 0x6a8   :  { %2827 = vrot.lane.b32.xlu1 %v2804_v21, %s3285_s24  ;;  %2825 = vrot.lane.b32.xlu0 %v2803_v33, %s3285_s24  ;;  %v6025_v33 = vld [vmem:[#allocation14_spill] sm:$0xff]  ;;  %v6026_v21 = vld [vmem:[#allocation3_spill] sm:$0xff] }
 0x6a9   :  { %v1953_v16 = vsel %vm864_vm1, %v6026_v21, %v6025_v33  ;;  %v6035_v21 = vld [vmem:[#allocation4_spill] sm:$0xff] }
 0x6ac   :  { %2869 = vrot.lane.b32.xlu1 %v5444_v41, %s3282_s15  ;;  %2867 = vrot.lane.b32.xlu0 %v5449_v51, %s3282_s15 }
 0x6b0   :  { %2951 = vrot.lane.b32.xlu1 %v2934_v2, %s3285_s24  ;;  %2949 = vrot.lane.b32.xlu0 %v2933_v6, %s3285_s24  ;;  %v6027_v6 = vld [vmem:[#allocation9_spill] sm:$0xff]  ;;  %v1901_v2 = vadd.f32 %v1897_v61, %v1825_v60 }
 0x6b1   :  { %v1826_v45 = vsub.f32 %v6027_v6, %v1818_v47  ;;  %v6032_v60 = vld [vmem:[#allocation17_spill] sm:$0xff] }
 0x6b2   :  { %v2089_v47 = vsel %vm864_vm1, %v6033_v55, %v6032_v60 }
 0x6b4   :  { %2955 = vrot.lane.b32.xlu1 %v2936_v23, %s3285_s24  ;;  %2953 = vrot.lane.b32.xlu0 %v2935_v42, %s3285_s24  ;;  %v3275_v42 = vld [vmem:[%s5835_s2 + $0x88] sm:$0xff] }
 0x6b5   :  { %v1898_v23 = vmul.f32 %v3275_v42, %v4545_v57  ;;  %v6034_v57 = vld [vmem:[#allocation27_spill] sm:$0xff] }
 0x6b7   :  { %v1902_v32 = vadd.f32 %v1898_v23, %v1826_v45  ;;  %v6036_v45 = vld [vmem:[#allocation35_spill] sm:$0xff]  ;;  %v1900_v23 = vmul.f32 %v3275_v42, %v4576_v7  ;;  %v6043_v42 = vld [vmem:[#allocation44_spill] sm:$0xff] }
 0x6b8   :  { %2959 = vrot.lane.b32.xlu1 %v2938_v26, %s3285_s24  ;;  %2957 = vrot.lane.b32.xlu0 %v2937_v20, %s3285_s24  ;;  %v1961_v20 = vsub.f32 %v1901_v2, %v1953_v16  ;;  %v6028_v26 = vld [vmem:[#allocation15_spill] sm:$0xff]  ;;  %v2034_v16 = vmul.f32 %v4829_v63, %v6035_v21  ;;  %v6037_v2 = vld [vmem:[#allocation34_spill] sm:$0xff] }
 0x6b9   :  { %v1954_v30 = vsel %vm864_vm1, %v6029_v36, %v6028_v26  ;;  %v2090_v56 = vsel %vm864_vm1, %v6037_v2, %v6036_v45  ;;  %v2169_v36 = vmul.f32 %v4929_v19, %v4959_v27  ;;  %v2305_v45 = vmul.f32 %v5029_v24, %v5049_v59  ;;  %v6045_v2 = vld [vmem:[#allocation37_spill] sm:$0xff] }
 0x6ba   :  { %v1962_v9 = vsub.f32 %v1902_v32, %v1954_v30  ;;  %v2037_v61 = vadd.f32 %v2033_v18, %v1961_v20  ;;  %v6040_v30 = vld [vmem:[#allocation19_spill] sm:$0xff]  ;;  %v6041_v32 = vld [vmem:[#allocation18_spill] sm:$0xff] }
 0x6bb   :  { %v2225_v18 = vsel %vm864_vm1, %v6041_v32, %v6040_v30 }
 0x6bc   :  { %2963 = vrot.lane.b32.xlu1 %v2940_v35, %s3285_s24  ;;  %2961 = vrot.lane.b32.xlu0 %v2939_v38, %s3285_s24  ;;  %v6030_v38 = vld [vmem:[#allocation12_spill] sm:$0xff]  ;;  %v6031_v35 = vld [vmem:[#allocation10_spill] sm:$0xff]  ;;  %v2097_v6 = vsub.f32 %v2037_v61, %v2089_v47  ;;  %v2038_v26 = vadd.f32 %v2034_v16, %v1962_v9  ;;  %v6042_v47 = vld [vmem:[#allocation13_spill] sm:$0xff] }
 0x6bd   :  { %v1820_v13 = vsel %vm864_vm1, %v6031_v35, %v6030_v38  ;;  %v6038_v38 = vld [vmem:[#allocation33_spill] sm:$0xff]  ;;  %v6039_v35 = vld [vmem:[#allocation32_spill] sm:$0xff]  ;;  %v2170_v61 = vmul.f32 %v4929_v19, %v6042_v47  ;;  %v6044_v9 = vld [vmem:[#allocation43_spill] sm:$0xff]  ;;  %v2172_v32 = vmul.f32 %v4939_v40, %v6042_v47 }
 0x6be   :  { %v1828_v33 = vsub.f32 %v6034_v57, %v1820_v13  ;;  %v1956_v20 = vsel %vm864_vm1, %v6039_v35, %v6038_v38  ;;  %v2098_v13 = vsub.f32 %v2038_v26, %v2090_v56  ;;  %v2173_v60 = vadd.f32 %v2169_v36, %v2097_v6  ;;  %v6047_v56 = vld [vmem:[#allocation62_spill] sm:$0xff] }
 0x6bf   :  { %v2226_v27 = vsel %vm864_vm1, %v6044_v9, %v6043_v42  ;;  %v2036_v57 = vmul.f32 %v4839_v22, %v6035_v21  ;;  %v6050_v21 = vld [vmem:[#allocation63_spill] sm:$0xff] }
 0x6c0   :  { %v1904_v63 = vadd.f32 %v1900_v23, %v1828_v33  ;;  %v2233_v7 = vsub.f32 %v2173_v60, %v2225_v18  ;;  %v2174_v16 = vadd.f32 %v2170_v61, %v2098_v13  ;;  %v6046_v33 = vld [vmem:[#allocation36_spill] sm:$0xff]  ;;  %v6048_v23 = vld [vmem:[#allocation61_spill] sm:$0xff]  ;;  %v2362_v59 = vsel %vm864_vm1, %v6050_v21, %v5119_v50  ;;  %v6051_v18 = vld [vmem:[#allocation58_spill] sm:$0xff] }
 0x6c1   :  { %v2092_v6 = vsel %vm864_vm1, %v6046_v33, %v6045_v2  ;;  %v2361_v19 = vsel %vm864_vm1, %v6048_v23, %v6047_v56  ;;  %v6052_v60 = vld [vmem:[#allocation46_spill] sm:$0xff]  ;;  %v2364_v56 = vsel %vm864_vm1, %v5259_v0, %v5261_v34 }
 0x6c2   :  { %v1964_v55 = vsub.f32 %v1904_v63, %v1956_v20  ;;  %v2234_v36 = vsub.f32 %v2174_v16, %v2226_v27  ;;  %v2309_v38 = vadd.f32 %v2305_v45, %v2233_v7  ;;  %v6049_v20 = vld [vmem:[#allocation56_spill] sm:$0xff]  ;;  %v2441_v63 = vmul.f32 %v5305_v48, %v6051_v18  ;;  %v6054_v16 = vld [vmem:[#allocation57_spill] sm:$0xff] }
 0x6c3   :  { %v2306_v30 = vmul.f32 %v5029_v24, %v6049_v20  ;;  %v2442_v40 = vmul.f32 %v5305_v48, %v6054_v16  ;;  %v2308_v45 = vmul.f32 %v5099_v31, %v6049_v20  ;;  %v2444_v34 = vmul.f32 %v5317_v62, %v6054_v16 }
 0x6c4   :  { %v2040_v26 = vadd.f32 %v2036_v57, %v1964_v55  ;;  %v2369_v22 = vsub.f32 %v2309_v38, %v2361_v19  ;;  %v6053_v55 = vld [vmem:[#allocation45_spill] sm:$0xff]  ;;  %v2443_v19 = vmul.f32 %v5317_v62, %v6051_v18 }
 0x6c5   :  { %v2310_v13 = vadd.f32 %v2306_v30, %v2234_v36  ;;  %v2228_v61 = vsel %vm864_vm1, %v6053_v55, %v6052_v60 }
 0x6c6   :  { %v2100_v35 = vsub.f32 %v2040_v26, %v2092_v6  ;;  %v5559_v24 = vadd.f32 %v2441_v63, %v2369_v22 }
 0x6c7   :  { %v2370_v42 = vsub.f32 %v2310_v13, %v2362_v59 }
 0x6c8   :  { %v2176_v7 = vadd.f32 %v2172_v32, %v2100_v35  ;;  %v6055_v35 = vsub.f32 %v5192_v12, %v5195_v8  ;;  %v2509_v12 = vmul.f32 %v5305_v48, %v5186_v5 }
 0x6c9   :  { %v5570_v33 = vadd.f32 %v2442_v40, %v2370_v42 }
 0x6ca   :  { %v2236_v50 = vsub.f32 %v2176_v7, %v2228_v61  ;;  %v5585_v20 = vadd.f32 %v2443_v19, %v6055_v35 }
 0x6cc   :  { %v2312_v26 = vadd.f32 %v2308_v45, %v2236_v50 }
 0x6ce   :  { %v2372_v38 = vsub.f32 %v2312_v26, %v2364_v56 }
 0x6d0   :  { %v5594_v59 = vadd.f32 %v2444_v34, %v2372_v38 }
 0x6d6   :  { %v2482_v9 = vpop.permute.xlu0 %2481  ;;  %v2484_v27 = vpop.permute.xlu1 %2483 }
 0x6d7   :  { %v5562_v57 = vsel %vm864_vm1, %v2482_v9, %v2484_v27 }
 0x6da   :  { %v2486_v2 = vpop.permute.xlu0 %2485  ;;  %v2488_v6 = vpop.permute.xlu1 %2487 }
 0x6db   :  { %v5576_v23 = vsel %vm864_vm1, %v2486_v2, %v2488_v6 }
 0x6de   :  { %v2490_v31 = vpop.permute.xlu0 %2489  ;;  %v2492_v30 = vpop.permute.xlu1 %2491 }
 0x6df   :  { %v5588_v0 = vsel %vm864_vm1, %v2490_v31, %v2492_v30 }
 0x6e2   :  { %v2494_v21 = vpop.permute.xlu0 %2493  ;;  %v2496_v32 = vpop.permute.xlu1 %2495 }
 0x6e3   :  { %v5597_v18 = vsel %vm864_vm1, %v2494_v21, %v2496_v32 }
 0x6e6   :  { %v2542_v8 = vpop.permute.xlu0 %2541  ;;  %v2544_v63 = vpop.permute.xlu1 %2543 }
 0x6ea   :  { %v2546_v13 = vpop.permute.xlu0 %2545  ;;  %v2548_v60 = vpop.permute.xlu1 %2547 }
 0x6ee   :  { %v5601_v55 = vpop.permute.xlu0 %2549  ;;  %v5603_v61 = vpop.permute.xlu1 %2551 }
 0x6f2   :  { %v5605_v7 = vpop.permute.xlu0 %2553  ;;  %v5607_v42 = vpop.permute.xlu1 %2555 }
 0x6f6   :  { %v2596_v9 = vpop.permute.xlu0 %2595  ;;  %v2598_v27 = vpop.permute.xlu1 %2597 }
 0x6f7   :  { %v2601_v50 = vmul.f32 %v2596_v9, %v5361_v25  ;;  %v2602_v16 = vmul.f32 %v2596_v9, %v6012_v46  ;;  %v2603_v2 = vmul.f32 %v2598_v27, %v5361_v25  ;;  %v2604_v6 = vmul.f32 %v2598_v27, %v6012_v46 }
 0x6f8   :  { %v2605_v26 = vmul.f32 %v2596_v9, %v5379_v39  ;;  %v2606_v38 = vmul.f32 %v2596_v9, %v6013_v15  ;;  %v2607_v46 = vmul.f32 %v2598_v27, %v5379_v39  ;;  %v2608_v30 = vmul.f32 %v2598_v27, %v6013_v15 }
 0x6f9   :  { %2619 = vrot.lane.b32.xlu1 %v2602_v16, %s3285_s24  ;;  %2617 = vrot.lane.b32.xlu0 %v2601_v50, %s3285_s24 }
 0x6fa   :  { %v5613_v40 = vpop.permute.xlu0 %2677  ;;  %v5615_v45 = vpop.permute.xlu1 %2679 }
 0x6fd   :  { %2623 = vrot.lane.b32.xlu1 %v2604_v6, %s3285_s24  ;;  %2621 = vrot.lane.b32.xlu0 %v2603_v2, %s3285_s24 }
 0x6fe   :  { %v2682_v56 = vpop.permute.xlu0 %2681  ;;  %v2684_v19 = vpop.permute.xlu1 %2683 }
 0x701   :  { %2627 = vrot.lane.b32.xlu1 %v2606_v38, %s3285_s24  ;;  %2625 = vrot.lane.b32.xlu0 %v2605_v26, %s3285_s24 }
 0x702   :  { %v5625_v31 = vpop.permute.xlu0 %2685  ;;  %v5627_v35 = vpop.permute.xlu1 %2687 }
 0x705   :  { %2631 = vrot.lane.b32.xlu1 %v2608_v30, %s3285_s24  ;;  %2629 = vrot.lane.b32.xlu0 %v2607_v46, %s3285_s24 }
 0x706   :  { %v5633_v34 = vpop.permute.xlu0 %2689  ;;  %v5635_v21 = vpop.permute.xlu1 %2691 }
 0x70a   :  { %v2732_v32 = vpop.permute.xlu0 %2731  ;;  %v2734_v9 = vpop.permute.xlu1 %2733 }
 0x70b   :  { %v2737_v50 = vmul.f32 %v2732_v32, %v5407_v58  ;;  %v2738_v16 = vmul.f32 %v2732_v32, %v6015_v43  ;;  %v2739_v27 = vmul.f32 %v2734_v9, %v5407_v58  ;;  %v2740_v6 = vmul.f32 %v2734_v9, %v6015_v43 }
 0x70c   :  { %v2741_v46 = vmul.f32 %v2732_v32, %v5425_v53  ;;  %v2742_v30 = vmul.f32 %v2732_v32, %v6016_v14  ;;  %v2743_v43 = vmul.f32 %v2734_v9, %v5425_v53  ;;  %v2557_v32 = vsel %vm864_vm1, %v2542_v8, %v2544_v63 }
 0x70d   :  { %2755 = vrot.lane.b32.xlu1 %v2738_v16, %s3285_s24  ;;  %2753 = vrot.lane.b32.xlu0 %v2737_v50, %s3285_s24  ;;  %v2646_v63 = vmul.f32 %v5361_v25, %v5352_v1 }
 0x70e   :  { %v5641_v2 = vpop.permute.xlu0 %2813  ;;  %v2816_v15 = vpop.permute.xlu1 %2815 }
 0x711   :  { %2759 = vrot.lane.b32.xlu1 %v2740_v6, %s3285_s24  ;;  %2757 = vrot.lane.b32.xlu0 %v2739_v27, %s3285_s24  ;;  %v2744_v6 = vmul.f32 %v2734_v9, %v6016_v14  ;;  %v2510_v27 = vmul.f32 %v5305_v48, %v5181_v49  ;;  %v2512_v9 = vmul.f32 %v5317_v62, %v5181_v49 }
 0x712   :  { %v2818_v26 = vpop.permute.xlu0 %2817  ;;  %v2820_v38 = vpop.permute.xlu1 %2819  ;;  %v2511_v48 = vmul.f32 %v5317_v62, %v5186_v5  ;;  %v2560_v49 = vsel %vm864_vm1, %v5605_v7, %v5607_v42 }
 0x713   :  { %v2514_v22 = vadd.f32 %v2510_v27, %v5291_v37  ;;  %v2559_v37 = vsel %vm864_vm1, %v5601_v55, %v5603_v61 }
 0x715   :  { %2763 = vrot.lane.b32.xlu1 %v2742_v30, %s3285_s24  ;;  %2761 = vrot.lane.b32.xlu0 %v2741_v46, %s3285_s24  ;;  %v2558_v30 = vsel %vm864_vm1, %v2546_v13, %v2548_v60  ;;  %v2513_v46 = vadd.f32 %v2509_v12, %v5281_v17  ;;  %v2645_v13 = vmul.f32 %v5361_v25, %v5357_v28 }
 0x716   :  { %v5651_v50 = vpop.permute.xlu0 %2821  ;;  %v5653_v16 = vpop.permute.xlu1 %2823  ;;  %v2566_v8 = vadd.f32 %v2558_v30, %v2514_v22  ;;  %v2515_v17 = vadd.f32 %v2511_v48, %v5296_v54  ;;  %v2516_v12 = vadd.f32 %v2512_v9, %v5299_v4  ;;  %v2693_v22 = vsel %vm864_vm1, %v5613_v40, %v5615_v45 }
 0x717   :  { %v2565_v47 = vadd.f32 %v2557_v32, %v2513_v46  ;;  %v2694_v60 = vsel %vm864_vm1, %v2682_v56, %v2684_v19  ;;  %v2648_v40 = vmul.f32 %v5379_v39, %v5352_v1  ;;  %v2647_v45 = vmul.f32 %v5379_v39, %v5357_v28 }
 0x718   :  { %v2650_v55 = vadd.f32 %v2646_v63, %v2566_v8  ;;  %v2567_v61 = vadd.f32 %v2559_v37, %v2515_v17  ;;  %v2568_v4 = vadd.f32 %v2560_v49, %v2516_v12  ;;  %v2782_v19 = vmul.f32 %v5407_v58, %v5398_v44 }
 0x719   :  { %2767 = vrot.lane.b32.xlu1 %v2744_v6, %s3285_s24  ;;  %2765 = vrot.lane.b32.xlu0 %v2743_v43, %s3285_s24  ;;  %v2649_v6 = vadd.f32 %v2645_v13, %v2565_v47  ;;  %v2781_v30 = vmul.f32 %v5407_v58, %v5403_v10  ;;  %v2695_v46 = vsel %vm864_vm1, %v5625_v31, %v5627_v35 }
 0x71a   :  { %v2826_v36 = vpop.permute.xlu0 %2825  ;;  %v2828_v14 = vpop.permute.xlu1 %2827  ;;  %v2702_v42 = vadd.f32 %v2694_v60, %v2650_v55  ;;  %v2696_v1 = vsel %vm864_vm1, %v5633_v34, %v5635_v21  ;;  %v2651_v9 = vadd.f32 %v2647_v45, %v2567_v61  ;;  %v2652_v28 = vadd.f32 %v2648_v40, %v2568_v4 }
 0x71b   :  { %v2701_v7 = vadd.f32 %v2693_v22, %v2649_v6  ;;  %v2829_v48 = vsel %vm864_vm1, %v5641_v2, %v2816_v15  ;;  %v2830_v63 = vsel %vm864_vm1, %v2818_v26, %v2820_v38  ;;  %v2784_v2 = vmul.f32 %v5425_v53, %v5398_v44 }
 0x71c   :  { %v2786_v8 = vadd.f32 %v2782_v19, %v2702_v42  ;;  %v2703_v31 = vadd.f32 %v2695_v46, %v2651_v9  ;;  %v2704_v35 = vadd.f32 %v2696_v1, %v2652_v28  ;;  %v2783_v15 = vmul.f32 %v5425_v53, %v5403_v10 }
 0x71d   :  { %v2918_v26 = vmul.f32 %v5453_v11, %v5444_v41  ;;  %v2917_v38 = vmul.f32 %v5453_v11, %v5449_v51  ;;  %v2831_v49 = vsel %vm864_vm1, %v5651_v50, %v5653_v16  ;;  %v2832_v44 = vsel %vm864_vm1, %v2826_v36, %v2828_v14 }
 0x71e   :  { %v2868_v5 = vpop.permute.xlu0 %2867  ;;  %v2870_v62 = vpop.permute.xlu1 %2869  ;;  %v2838_v12 = vadd.f32 %v2830_v63, %v2786_v8  ;;  %v2787_v10 = vadd.f32 %v2783_v15, %v2703_v31  ;;  %v2788_v60 = vadd.f32 %v2784_v2, %v2704_v35  ;;  %v2920_v16 = vmul.f32 %v5471_v3, %v5444_v41 }
 0x71f   :  { %v2873_v54 = vmul.f32 %v2868_v5, %v5453_v11  ;;  %v2874_v43 = vmul.f32 %v2868_v5, %v6018_v52  ;;  %v2875_v56 = vmul.f32 %v2870_v62, %v5453_v11  ;;  %v2876_v47 = vmul.f32 %v2870_v62, %v6018_v52 }
 0x720   :  { %v2785_v52 = vadd.f32 %v2781_v30, %v2701_v7  ;;  %v2877_v37 = vmul.f32 %v2868_v5, %v5471_v3  ;;  %v2878_v34 = vmul.f32 %v2868_v5, %v6019_v29  ;;  %v2839_v4 = vadd.f32 %v2831_v49, %v2787_v10  ;;  %v3276_v10 = vld [vmem:[%s5835_s2 + $0xd8] sm:$0xff] }
 0x721   :  { %2891 = vrot.lane.b32.xlu1 %v2874_v43, %s3285_s24  ;;  %2889 = vrot.lane.b32.xlu0 %v2873_v54, %s3285_s24  ;;  %v2879_v54 = vmul.f32 %v2870_v62, %v5471_v3  ;;  %v2880_v43 = vmul.f32 %v2870_v62, %v6019_v29  ;;  %v2840_v7 = vadd.f32 %v2832_v44, %v2788_v60  ;;  %v3277_v60 = vld [vmem:[%s5835_s2 + $0xd0] sm:$0xff] }
 0x722   :  { %v2950_v27 = vpop.permute.xlu0 %2949  ;;  %v2952_v32 = vpop.permute.xlu1 %2951  ;;  %v2837_v21 = vadd.f32 %v2829_v48, %v2785_v52  ;;  %v2922_v42 = vadd.f32 %v2918_v26, %v2838_v12  ;;  %v2919_v29 = vmul.f32 %v5471_v3, %v5449_v51  ;;  %v6058_v49 = vsub.f32 %v5559_v24, %v5562_v57 }
 0x723   :  { %v2965_v55 = vsel %vm864_vm1, %v2950_v27, %v2952_v32  ;;  %v2924_v45 = vadd.f32 %v2920_v16, %v2840_v7  ;;  %v6060_v7 = vsub.f32 %v5585_v20, %v5588_v0 }
 0x724   :  { %v2921_v6 = vadd.f32 %v2917_v38, %v2837_v21  ;;  %v2923_v40 = vadd.f32 %v2919_v29, %v2839_v4  ;;  %v6057_v21 = vld [vmem:[#allocation60_spill] sm:$0xff]  ;;  %v3279_v4 = vld [vmem:[%s5835_s2 + $0xe0] sm:$0xff] }
 0x725   :  { %2895 = vrot.lane.b32.xlu1 %v2876_v47, %s3285_s24  ;;  %2893 = vrot.lane.b32.xlu0 %v2875_v56, %s3285_s24  ;;  %v2577_v2 = vmul.f32 %v5361_v25, %v6057_v21 }
 0x726   :  { %v2954_v13 = vpop.permute.xlu0 %2953  ;;  %v2956_v17 = vpop.permute.xlu1 %2955  ;;  %v2973_v14 = vadd.f32 %v2965_v55, %v2921_v6  ;;  %v3278_v55 = vld [vmem:[%s5835_s2 + $0xe8] sm:$0xff] }
 0x727   :  { %v2966_v61 = vsel %vm864_vm1, %v2954_v13, %v2956_v17  ;;  %v2581_v44 = vadd.f32 %v2577_v2, %v6058_v49 }
 0x728   :  { %v2974_v62 = vadd.f32 %v2966_v61, %v2922_v42  ;;  %v2714_v61 = vmul.f32 %v3278_v55, %v5407_v58 }
 0x729   :  { %2899 = vrot.lane.b32.xlu1 %v2878_v34, %s3285_s24  ;;  %2897 = vrot.lane.b32.xlu0 %v2877_v37, %s3285_s24  ;;  %v6056_v37 = vld [vmem:[#allocation59_spill] sm:$0xff] }
 0x72a   :  { %v2958_v5 = vpop.permute.xlu0 %2957  ;;  %v2960_v22 = vpop.permute.xlu1 %2959  ;;  %v2578_v34 = vmul.f32 %v5361_v25, %v6056_v37  ;;  %v2580_v25 = vmul.f32 %v3276_v10, %v5379_v39 }
 0x72b   :  { %v2967_v27 = vsel %vm864_vm1, %v2958_v5, %v2960_v22  ;;  %v6059_v5 = vsub.f32 %v5570_v33, %v5576_v23 }
 0x72c   :  { %v2975_v56 = vadd.f32 %v2967_v27, %v2923_v40 }
 0x72d   :  { %2903 = vrot.lane.b32.xlu1 %v2880_v43, %s3285_s24  ;;  %2901 = vrot.lane.b32.xlu0 %v2879_v54, %s3285_s24  ;;  %v2582_v22 = vadd.f32 %v2578_v34, %v6059_v5  ;;  %v2579_v54 = vmul.f32 %v3277_v60, %v5379_v39  ;;  %v2713_v39 = vmul.f32 %v3279_v4, %v5407_v58 }
 0x72e   :  { %v2962_v36 = vpop.permute.xlu0 %2961  ;;  %v2964_v50 = vpop.permute.xlu1 %2963  ;;  %v2716_v58 = vmul.f32 %v3278_v55, %v5425_v53 }
 0x72f   :  { %v2968_v32 = vsel %vm864_vm1, %v2962_v36, %v2964_v50  ;;  %v2583_v42 = vadd.f32 %v2579_v54, %v6060_v7  ;;  %v6061_v36 = vsub.f32 %v5594_v59, %v5597_v18  ;;  %v3280_v18 = vld [vmem:[%s5835_s2 + $0xf8] sm:$0xff] }
 0x730   :  { %v2976_v47 = vadd.f32 %v2968_v32, %v2924_v45 }
 0x731   :  { %2981 = vrot.lane.b32.xlu0 %v2973_v14, %s3282_s15  ;;  %2983 = vrot.lane.b32.xlu1 %v2974_v62, %s3282_s15  ;;  %v2584_v50 = vadd.f32 %v2580_v25, %v6061_v36 }
 0x735   :  { %2985 = vrot.lane.b32.xlu0 %v2975_v56, %s3282_s15  ;;  %2987 = vrot.lane.b32.xlu1 %v2976_v47, %s3282_s15  ;;  %v2715_v56 = vmul.f32 %v3279_v4, %v5425_v53 }
 0x76b   :  { %v2618_v41 = vpop.permute.xlu0 %2617  ;;  %v2620_v51 = vpop.permute.xlu1 %2619 }
 0x76c   :  { %v2633_v15 = vsel %vm864_vm1, %v2618_v41, %v2620_v51  ;;  %v2850_v41 = vmul.f32 %v3280_v18, %v5453_v11  ;;  %v3281_v51 = vld [vmem:[%s5835_s2 + $0xf0] sm:$0xff] }
 0x76d   :  { %v2641_v43 = vsub.f32 %v2581_v44, %v2633_v15 }
 0x76f   :  { %v2622_v19 = vpop.permute.xlu0 %2621  ;;  %v2624_v30 = vpop.permute.xlu1 %2623  ;;  %v2717_v27 = vadd.f32 %v2713_v39, %v2641_v43 }
 0x770   :  { %v2634_v12 = vsel %vm864_vm1, %v2622_v19, %v2624_v30  ;;  %v2849_v19 = vmul.f32 %v3281_v51, %v5453_v11 }
 0x771   :  { %v2642_v6 = vsub.f32 %v2582_v22, %v2634_v12 }
 0x773   :  { %v2626_v46 = vpop.permute.xlu0 %2625  ;;  %v2628_v1 = vpop.permute.xlu1 %2627  ;;  %v2718_v32 = vadd.f32 %v2714_v61, %v2642_v6 }
 0x774   :  { %v2635_v24 = vsel %vm864_vm1, %v2626_v46, %v2628_v1 }
 0x775   :  { %v2643_v14 = vsub.f32 %v2583_v42, %v2635_v24 }
 0x777   :  { %v2630_v9 = vpop.permute.xlu0 %2629  ;;  %v2632_v28 = vpop.permute.xlu1 %2631  ;;  %v2719_v30 = vadd.f32 %v2715_v56, %v2643_v14 }
 0x778   :  { %v2636_v57 = vsel %vm864_vm1, %v2630_v9, %v2632_v28 }
 0x779   :  { %v2644_v62 = vsub.f32 %v2584_v50, %v2636_v57 }
 0x77b   :  { %v2720_v53 = vadd.f32 %v2716_v58, %v2644_v62 }
 0x77f   :  { %v2754_v48 = vpop.permute.xlu0 %2753  ;;  %v2756_v52 = vpop.permute.xlu1 %2755 }
 0x780   :  { %v2769_v16 = vsel %vm864_vm1, %v2754_v48, %v2756_v52 }
 0x781   :  { %v2777_v20 = vsub.f32 %v2717_v27, %v2769_v16 }
 0x783   :  { %v2758_v8 = vpop.permute.xlu0 %2757  ;;  %v2760_v63 = vpop.permute.xlu1 %2759 }
 0x784   :  { %v2770_v29 = vsel %vm864_vm1, %v2758_v8, %v2760_v63  ;;  %v2853_v8 = vadd.f32 %v2849_v19, %v2777_v20 }
 0x785   :  { %v2778_v0 = vsub.f32 %v2718_v32, %v2770_v29 }
 0x787   :  { %v2762_v13 = vpop.permute.xlu0 %2761  ;;  %v2764_v17 = vpop.permute.xlu1 %2763  ;;  %v2854_v63 = vadd.f32 %v2850_v41, %v2778_v0 }
 0x788   :  { %v2771_v47 = vsel %vm864_vm1, %v2762_v13, %v2764_v17  ;;  %v2852_v13 = vmul.f32 %v3280_v18, %v5471_v3  ;;  %v2851_v17 = vmul.f32 %v3281_v51, %v5471_v3 }
 0x789   :  { %v2779_v48 = vsub.f32 %v2719_v30, %v2771_v47 }
 0x78b   :  { %v2766_v31 = vpop.permute.xlu0 %2765  ;;  %v2768_v35 = vpop.permute.xlu1 %2767  ;;  %v2855_v2 = vadd.f32 %v2851_v17, %v2779_v48 }
 0x78c   :  { %v2772_v59 = vsel %vm864_vm1, %v2766_v31, %v2768_v35 }
 0x78d   :  { %v2780_v52 = vsub.f32 %v2720_v53, %v2772_v59 }
 0x78f   :  { %v2856_v15 = vadd.f32 %v2852_v13, %v2780_v52 }
 0x793   :  { %v2890_v26 = vpop.permute.xlu0 %2889  ;;  %v2892_v38 = vpop.permute.xlu1 %2891 }
 0x794   :  { %v2905_v46 = vsel %vm864_vm1, %v2890_v26, %v2892_v38 }
 0x795   :  { %v2913_v31 = vsub.f32 %v2853_v8, %v2905_v46 }
 0x797   :  { %v2894_v33 = vpop.permute.xlu0 %2893  ;;  %v2896_v23 = vpop.permute.xlu1 %2895 }
 0x798   :  { %v2906_v1 = vsel %vm864_vm1, %v2894_v33, %v2896_v23 }
 0x799   :  { %v2914_v35 = vsub.f32 %v2854_v63, %v2906_v1 }
 0x79b   :  { %v2898_v40 = vpop.permute.xlu0 %2897  ;;  %v2900_v45 = vpop.permute.xlu1 %2899 }
 0x79c   :  { %v2907_v11 = vsel %vm864_vm1, %v2898_v40, %v2900_v45 }
 0x79d   :  { %v2915_v3 = vsub.f32 %v2855_v2, %v2907_v11 }
 0x79f   :  { %v2902_v9 = vpop.permute.xlu0 %2901  ;;  %v2904_v28 = vpop.permute.xlu1 %2903 }
 0x7a0   :  { %v2908_v37 = vsel %vm864_vm1, %v2902_v9, %v2904_v28 }
 0x7a1   :  { %v2916_v38 = vsub.f32 %v2856_v15, %v2908_v37 }
 0x7a3   :  { %v2982_v34 = vpop.permute.xlu0 %2981  ;;  %v2984_v21 = vpop.permute.xlu1 %2983 }
 0x7a4   :  { %v2994_v12 = vsel %vm2993_vm2, %v2913_v31, %v2982_v34  ;;  %2999 = vst.msk [vmem:[%s5836_s4 + $0x8] sm:$0xff] %vm23_vm0, %v2982_v34  ;;  %v2995_v26 = vsel %vm2993_vm2, %v2914_v35, %v2984_v21  ;;  %3001 = vst.msk [vmem:[%s5836_s4 + $0x18] sm:$0xff] %vm23_vm0, %v2984_v21 }
 0x7a5   :  { %2998 = vst [vmem:[%s5836_s4] sm:$0xff] %v2994_v12  ;;  %3000 = vst [vmem:[%s5836_s4 + $0x10] sm:$0xff] %v2995_v26 }
 0x7a7   :  { %v2986_v49 = vpop.permute.xlu0 %2985  ;;  %v2988_v44 = vpop.permute.xlu1 %2987 }
 0x7a8   :  { %v2996_v5 = vsel %vm2993_vm2, %v2915_v3, %v2986_v49  ;;  %3003 = vst.msk [vmem:[%s5836_s4 + $0x28] sm:$0xff] %vm23_vm0, %v2986_v49  ;;  %v2997_v22 = vsel %vm2993_vm2, %v2916_v38, %v2988_v44  ;;  %3005 = vst.msk [vmem:[%s5836_s4 + $0x38] sm:$0xff] %vm23_vm0, %v2988_v44 }
 0x7a9   :  { %3002 = vst [vmem:[%s5836_s4 + $0x20] sm:$0xff] %v2996_v5  ;;  %3004 = vst [vmem:[%s5836_s4 + $0x30] sm:$0xff] %v2997_v22 }

// kernel: fno2d_forward.18
= control target key start
LH: loop header
LB: loop body
LE: loop exit
PB: predicated region body
PF: predicated region fallthrough
CT: control target
= control target key end

     0   :  { %s1942_s24 = smov 0   ;;  %s1944_s25 = smov 0   ;;  %s2291_s0 = inlined_call_operand.vmem [shape: f32[2,16,144], index: 0, kind: input, shape index: {}]   ;;  %s2292_s1 = inlined_call_operand.vmem [shape: bf16[144,640], index: 1, kind: input, shape index: {}]   ;;  %s2293_s2 = inlined_call_operand.vmem [shape: f32[32,640], index: 2, kind: input, shape index: {}]   ;;  %s2294_s3 = inlined_call_operand.vmem [shape: f32[32,32], index: 3, kind: input, shape index: {}]   ;;  %s2295_s4 = inlined_call_operand.vmem [shape: f32[32,1], index: 4, kind: input, shape index: {}]   ;;  %s2296_s5 = inlined_call_operand.vmem [shape: f32[16,16], index: 5, kind: input, shape index: {}]   ;;  %s2297_s6 = inlined_call_operand.vmem [shape: f32[16,1], index: 6, kind: input, shape index: {}]   ;;  %s2298_s7 = inlined_call_operand.vmem [shape: f32[32,640], index: 7, kind: output, shape index: {}]  }
   0x1   :  { %s1946_s26 = smov 0  }
   0x2 LB: > { %s29_s27 = sadd.s32 1, %s1894_s25  ;;  %p1589_p0 = scmp.ge.s32.totalorder %s1898_s26, 1  ;;  %s1898_s26 = sphi %s1946_s26, %s17_s26   ;;  %s1894_s25 = sphi %s1944_s25, %s2300_s25   ;;  %s1890_s24 = sphi %s1942_s24, %s2299_s24  }
   0x3   : > { %p31_p1 = scmp.ge.s32.totalorder %s29_s27, 2  ;;  %p281_p2 = scmp.lt.s32.totalorder %s1898_s26, 3 }
   0x5   : > { %s2302_s27 = smov (%p31_p1, %s29_s27), 0  ;;  %p282_p3 = pnand %p1589_p0, %p281_p2 }
   0x6   : > { %v1793_v0 = vld [vmem:[%s2292_s1 + $0x4] ss:$20 sps:$4 sm:$0xff] (!%p282_p3)   ;;  %v1795_v1 = vld [vmem:[%s2292_s1 + $0xc] ss:$20 sps:$4 sm:$0xff] (!%p282_p3)   ;;  %v1798_v3 = vld [vmem:[%s2292_s1 + $0x8] ss:$20 sps:$4 sm:$0xff] (!%p282_p3)  }
   0x7   : > { %285 = sbr.rel (%p282_p3) target bundleno = 766 (0x2fe), region = 48  ;;  %667 = vmatprep.subr.bf16.mxu0 (!%p282_p3), %v1793_v0  ;;  %v1797_v2 = vld [vmem:[%s2292_s1] ss:$20 sps:$4 sm:$0xff] (!%p282_p3)   ;;  %v1900_v4 = vmov (!%p282_p3), 0   ;;  %710 = vmatprep.subr.bf16.mxu1 (!%p282_p3), %v1795_v1  ;;  %v1803_v7 = vld [vmem:[%s2292_s1 + $0x28] ss:$20 sps:$4 sm:$0xff] (!%p282_p3)  }
   0x8   : > { %1791 = vset.pattern.permute.xlu0 (!%p282_p3), %v1900_v4  ;;  %v1799_v5 = vld [vmem:[%s2292_s1 + $0x2c] ss:$20 sps:$4 sm:$0xff] (!%p282_p3)   ;;  %1792 = vset.pattern.permute.xlu1 (!%p282_p3), %v1900_v4  ;;  %v1801_v6 = vld [vmem:[%s2292_s1 + $0x34] ss:$20 sps:$4 sm:$0xff] (!%p282_p3)   ;;  %v1804_v8 = vld [vmem:[%s2292_s1 + $0x30] ss:$20 sps:$4 sm:$0xff] (!%p282_p3)  }
   0x9   : > { %668 = vmatpush1.bf16.msra.mxu0 (!%p282_p3), %v1797_v2  ;;  %711 = vmatpush1.bf16.msra.mxu1 (!%p282_p3), %v1798_v3  ;;  %v1805_v9 = vld [vmem:[%s2292_s1 + $0x54] ss:$20 sps:$4 sm:$0xff] (!%p282_p3)   ;;  %v1807_v10 = vld [vmem:[%s2292_s1 + $0x5c] ss:$20 sps:$4 sm:$0xff] (!%p282_p3)   ;;  %v1810_v12 = vld [vmem:[%s2292_s1 + $0x58] ss:$20 sps:$4 sm:$0xff] (!%p282_p3)  }
   0xa   : > { %669 = vmatprep.subr.bf16.mxu0 (!%p282_p3), %v1799_v5  ;;  %712 = vmatprep.subr.bf16.mxu1 (!%p282_p3), %v1801_v6  ;;  %v1809_v11 = vld [vmem:[%s2292_s1 + $0x50] ss:$20 sps:$4 sm:$0xff] (!%p282_p3)   ;;  %p333_p4 = scmp.lt.s32.totalorder (!%p282_p3), %s1890_s24, 1  ;;  %v1815_v15 = vld [vmem:[%s2292_s1 + $0x78] ss:$20 sps:$4 sm:$0xff] (!%p282_p3)   ;;  %vm663_vm0 = vcmask (!%p282_p3), 130048  }
   0xb   : > { %v1811_v13 = vld [vmem:[%s2292_s1 + $0x7c] ss:$20 sps:$4 sm:$0xff] (!%p282_p3)   ;;  %v1813_v14 = vld [vmem:[%s2292_s1 + $0x84] ss:$20 sps:$4 sm:$0xff] (!%p282_p3)   ;;  %v1816_v16 = vld [vmem:[%s2292_s1 + $0x80] ss:$20 sps:$4 sm:$0xff] (!%p282_p3)  }
   0xc   : > { %v1817_v17 = vld [vmem:[%s2292_s1 + $0xa4] ss:$20 sps:$4 sm:$0xff] (!%p282_p3)   ;;  %v1819_v18 = vld [vmem:[%s2292_s1 + $0xac] ss:$20 sps:$4 sm:$0xff] (!%p282_p3)   ;;  %v1822_v20 = vld [vmem:[%s2292_s1 + $0xa8] ss:$20 sps:$4 sm:$0xff] (!%p282_p3)  }
   0xd   : > { %670 = vmatpush1.bf16.msra.mxu0 (!%p282_p3), %v1803_v7  ;;  %713 = vmatpush1.bf16.msra.mxu1 (!%p282_p3), %v1804_v8  ;;  %v1821_v19 = vld [vmem:[%s2292_s1 + $0xa0] ss:$20 sps:$4 sm:$0xff] (!%p282_p3)   ;;  %v1827_v23 = vld [vmem:[%s2292_s1 + $0xc8] ss:$20 sps:$4 sm:$0xff] (!%p282_p3)   ;;  %v1828_v24 = vld [vmem:[%s2292_s1 + $0xd0] ss:$20 sps:$4 sm:$0xff] (!%p282_p3)  }
   0xe   : > { %671 = vmatprep.subr.bf16.mxu0 %v1805_v9  ;;  %714 = vmatprep.subr.bf16.mxu1 %v1807_v10  ;;  %s334_s22 = scalar_select %p333_p4, %s1890_s24, 1  ;;  %v1823_v21 = vld [vmem:[%s2292_s1 + $0xcc] ss:$20 sps:$4 sm:$0xff]   ;;  %v1825_v22 = vld [vmem:[%s2292_s1 + $0xd4] ss:$20 sps:$4 sm:$0xff]   ;;  %v1901_v52 = vmov 0.0  }
   0xf   : > { %v1829_v25 = vld [vmem:[%s2292_s1 + $0xf4] ss:$20 sps:$4 sm:$0xff]   ;;  %v1831_v26 = vld [vmem:[%s2292_s1 + $0xfc] ss:$20 sps:$4 sm:$0xff]   ;;  %v1834_v28 = vld [vmem:[%s2292_s1 + $0xf8] ss:$20 sps:$4 sm:$0xff]  }
  0x10   : > { %s1664_s12 = sshll.u32 %s334_s22, 5  ;;  %v1833_v27 = vld [vmem:[%s2292_s1 + $0xf0] ss:$20 sps:$4 sm:$0xff]   ;;  %v1839_v34 = vld [vmem:[%s2292_s1 + $0x118] ss:$20 sps:$4 sm:$0xff]   ;;  %s1592_s13 = sshll.u32 %s1890_s24, 1 }
  0x11   : > { %672 = vmatpush1.bf16.msra.mxu0 %v1809_v11  ;;  %715 = vmatpush1.bf16.msra.mxu1 %v1810_v12  ;;  %s337_s23 = scalar_lea.vmem %s2291_s0, %s1664_s12  ;;  %v1835_v29 = vld [vmem:[%s2292_s1 + $0x11c] ss:$20 sps:$4 sm:$0xff]   ;;  %v1837_v32 = vld [vmem:[%s2292_s1 + $0x124] ss:$20 sps:$4 sm:$0xff]   ;;  %v1840_v35 = vld [vmem:[%s2292_s1 + $0x120] ss:$20 sps:$4 sm:$0xff]  }
  0x12   : > { %673 = vmatprep.subr.bf16.mxu0 %v1811_v13  ;;  %716 = vmatprep.subr.bf16.mxu1 %v1813_v14  ;;  %v370_v30 = vld [vmem:[%s337_s23 + $0x8] sm:$0xff]  ;;  %v372_v31 = vld [vmem:[%s337_s23 + $0x18] sm:$0xff]  ;;  %v1845_v38 = vld [vmem:[%s2292_s1 + $0x140] ss:$20 sps:$4 sm:$0xff]   ;;  %p346_p5 = scmp.lt.s32.totalorder %s1592_s13, 3  ;;  %vm832_vm1 = vcmask 261120  }
  0x13   : > { %v374_v33 = vpack.c.bf16 %v372_v31, %v370_v30  ;;  %v1841_v36 = vld [vmem:[%s2292_s1 + $0x144] ss:$20 sps:$4 sm:$0xff]   ;;  %v1843_v37 = vld [vmem:[%s2292_s1 + $0x14c] ss:$20 sps:$4 sm:$0xff]   ;;  %v1846_v39 = vld [vmem:[%s2292_s1 + $0x148] ss:$20 sps:$4 sm:$0xff]  }
  0x14   : > { %v369_v40 = vld [vmem:[%s337_s23] sm:$0xff]  ;;  %v371_v41 = vld [vmem:[%s337_s23 + $0x10] sm:$0xff]  ;;  %v1848_v44 = vld [vmem:[%s2292_s1 + $0x38] ss:$20 sps:$4 sm:$0xff]   ;;  %s2304_s13 = smov (!%p346_p5, %s1592_s13), 3 }
  0x15   : > { %674 = vmatpush1.bf16.msra.mxu0 %v1815_v15  ;;  %717 = vmatpush1.bf16.msra.mxu1 %v1816_v16  ;;  %v373_v42 = vpack.c.bf16 %v371_v41, %v369_v40  ;;  %v1847_v43 = vld [vmem:[%s2292_s1 + $0x10] ss:$20 sps:$4 sm:$0xff]   ;;  %v1849_v45 = vld [vmem:[%s2292_s1 + $0x60] ss:$20 sps:$4 sm:$0xff]   ;;  %v1850_v46 = vld [vmem:[%s2292_s1 + $0x88] ss:$20 sps:$4 sm:$0xff]  }
  0x16   : > { %675 = vmatprep.subr.bf16.mxu0 %v1817_v17  ;;  %718 = vmatprep.subr.bf16.mxu1 %v1819_v18  ;;  %v1851_v47 = vld [vmem:[%s2292_s1 + $0xb0] ss:$20 sps:$4 sm:$0xff]   ;;  %v1852_v48 = vld [vmem:[%s2292_s1 + $0xd8] ss:$20 sps:$4 sm:$0xff]   ;;  %v1853_v49 = vld [vmem:[%s2292_s1 + $0x100] ss:$20 sps:$4 sm:$0xff]  }
  0x17   : > { %1641 = vmatprep.mubr.msk.bf16.mxu0 %vm663_vm0, %v374_v33  ;;  %1642 = vmatprep.mubr.msk.bf16.mxu1 %vm663_vm0, %v374_v33  ;;  %v1854_v50 = vld [vmem:[%s2292_s1 + $0x128] ss:$20 sps:$4 sm:$0xff]   ;;  %v1855_v51 = vld [vmem:[%s2292_s1 + $0x150] ss:$20 sps:$4 sm:$0xff]   ;;  %s1764_s14 = smul.u32 40, %s2304_s13 }
  0x18   : > { %v808_v53 = vld [vmem:[%s2295_s4] sm:$0xff]  ;;  %v810_v54 = vld [vmem:[%s2295_s4 + $0x10] sm:$0xff]  ;;  %v809_v55 = vld [vmem:[%s2295_s4 + $0x8] sm:$0xff] }
  0x19   : > { %676 = vmatpush1.bf16.msra.mxu0 %v1821_v19  ;;  %719 = vmatpush1.bf16.msra.mxu1 %v1822_v20  ;;  %v1200_v56 = vld [vmem:[%s2297_s6] sm:$0xff]  ;;  %s2139_s17 = scalar_lea.vmem %s2293_s2, %s1764_s14  ;;  %v805_v18 = vld [vmem:[%s2294_s3 + $0x8] sm:$0xff]  ;;  %v806_v19 = vld [vmem:[%s2294_s3 + $0x10] sm:$0xff]  ;;  %s2270_s24 = scalar_lea.vmem %s2298_s7, %s1764_s14 }
  0x1a   : > { %677 = vmatprep.subr.bf16.mxu0 %v1823_v21  ;;  %720 = vmatprep.subr.bf16.mxu1 %v1825_v22  ;;  %v795_v59 = vld [vmem:[%s2139_s17 + $0x8] sm:$0xff]  ;;  %v800_v62 = vld [vmem:[%s2139_s17 + $0x30] sm:$0xff]  ;;  %v797_v63 = vld [vmem:[%s2139_s17 + $0x18] sm:$0xff] }
  0x1b   : > { %814 = vperm.xlu0 %1791, %v808_v53   ;;  %824 = vperm.xlu1 %1792, %v810_v54   ;;  %v802_v0 = vld [vmem:[%s2139_s17 + $0x40] sm:$0xff]  ;;  %v1702_v10 = vpack.c.bf16 %v800_v62, %v795_v59  ;;  %v799_v12 = vld [vmem:[%s2139_s17 + $0x28] sm:$0xff]  ;;  %v796_v13 = vld [vmem:[%s2139_s17 + $0x10] sm:$0xff] }
  0x1c   : > { %v794_v7 = vld [vmem:[%s2139_s17] sm:$0xff]  ;;  %v1710_v11 = vpack.c.bf16 %v802_v0, %v797_v63  ;;  %v801_v14 = vld [vmem:[%s2139_s17 + $0x38] sm:$0xff]  ;;  %v1201_v30 = vld [vmem:[%s2297_s6 + $0x8] sm:$0xff] }
  0x1d   : > { %678 = vmatpush1.bf16.msra.mxu0 %v1827_v23  ;;  %721 = vmatpush1.bf16.msra.mxu1 %v1828_v24  ;;  %v1704_v15 = vpack.c.bf16 %v799_v12, %v794_v7  ;;  %v1712_v16 = vpack.c.bf16 %v801_v14, %v796_v13  ;;  %v804_v17 = vld [vmem:[%s2294_s3] sm:$0xff]  ;;  %v807_v20 = vld [vmem:[%s2294_s3 + $0x18] sm:$0xff]  ;;  %v803_v23 = vld [vmem:[%s2139_s17 + $0x48] sm:$0xff] }
  0x1e   : > { %679 = vmatprep.subr.bf16.mxu0 %v1829_v25  ;;  %722 = vmatprep.subr.bf16.mxu1 %v1831_v26  ;;  %v798_v22 = vld [vmem:[%s2139_s17 + $0x20] sm:$0xff] }
  0x1f   : > { %819 = vperm.xlu0 %1791, %v809_v55  }
  0x21   : > { %680 = vmatpush1.bf16.msra.mxu0 %v1833_v27  ;;  %723 = vmatpush1.bf16.msra.mxu1 %v1834_v28  ;;  %v1718_v28 = vpack.c.bf16 %v803_v23, %v798_v22 }
  0x22   : > { %681 = vmatprep.subr.bf16.mxu0 %v1835_v29  ;;  %724 = vmatprep.subr.bf16.mxu1 %v1837_v32  ;;  %v811_v29 = vld [vmem:[%s2295_s4 + $0x18] sm:$0xff] }
  0x23   : > { %1204 = vperm.xlu0 %1791, %v1200_v56   ;;  %829 = vperm.xlu1 %1792, %v811_v29  }
  0x25   : > { %682 = vmatpush1.bf16.msra.mxu0 %v1839_v34  ;;  %725 = vmatpush1.bf16.msra.mxu1 %v1840_v35 }
  0x26   : > { %683 = vmatprep.subr.bf16.mxu0 %v1841_v36  ;;  %726 = vmatprep.subr.bf16.mxu1 %v1843_v37 }
  0x27   : > { %1209 = vperm.xlu1 %1792, %v1201_v30  }
  0x29   : > { %684 = vmatpush1.bf16.msra.mxu0 %v1845_v38  ;;  %727 = vmatpush1.bf16.msra.mxu1 %v1846_v39 }
  0x2a   : > { %753 = vmatprep.subr.bf16.mxu0 %v1900_v4 }
  0x2c   : > { %700 = vmatmul.mubr.bf16.vlgmr.msra.gmra.mrb[0].mxu0 %v373_v42  ;;  %743 = vmatmul.mubr.bf16.vlgmr.msra.gmra.mrb[0].mxu1 %v373_v42 }
  0x2d   : > { %754 = vmatpush1.bf16.msra.mxu0 %v1847_v43  ;;  %1643 = vmatprep.mubr.msk.bf16.mxu0 %vm663_vm0, %v374_v33 }
  0x2e   : > { %755 = vmatprep.subr.bf16.mxu0 %v1900_v4  ;;  %998 = vmatprep.mubr.f32.mxu1 %v1901_v52 }
  0x31   : > { %756 = vmatpush1.bf16.msra.mxu0 %v1848_v44 }
  0x32   : > { %757 = vmatprep.subr.bf16.mxu0 %v1900_v4 }
  0x35   : > { %758 = vmatpush1.bf16.msra.mxu0 %v1849_v45 }
  0x36   : > { %759 = vmatprep.subr.bf16.mxu0 %v1900_v4 }
  0x39   : > { %760 = vmatpush1.bf16.msra.mxu0 %v1850_v46 }
  0x3a   : > { %761 = vmatprep.subr.bf16.mxu0 %v1900_v4 }
  0x3d   : > { %762 = vmatpush1.bf16.msra.mxu0 %v1851_v47 }
  0x3e   : > { %763 = vmatprep.subr.bf16.mxu0 %v1900_v4 }
  0x41   : > { %764 = vmatpush1.bf16.msra.mxu0 %v1852_v48 }
  0x42   : > { %765 = vmatprep.subr.bf16.mxu0 %v1900_v4 }
  0x45   : > { %766 = vmatpush1.bf16.msra.mxu0 %v1853_v49 }
  0x46   : > { %767 = vmatprep.subr.bf16.mxu0 %v1900_v4 }
  0x49   : > { %768 = vmatpush1.bf16.msra.mxu0 %v1854_v50 }
  0x4a   : > { %769 = vmatprep.subr.bf16.mxu0 %v1900_v4 }
  0x4d   : > { %770 = vmatpush1.bf16.msra.mxu0 %v1855_v51 }
  0x50   : > { %786 = vmatmul.mubr.bf16.vlgmr.msra.gmra.mrb[4].mxu0 %v373_v42 }
  0x51   : > { %909 = vmatprep.mubr.f32.mxu0 %v1901_v52 }
  0x9a   : > { %v2188_v31 = vpop.permute.xlu0 %814 }
  0x9e   : > { %v2202_v40 = vpop.permute.xlu0 %819 }
  0xff   : > { %v701_v57 = vpop.f32.mrb[0].mxu0  ;;  %v744_v58 = vpop.f32.mrb[0].mxu1 }
 0x100   : > { %v703_v60 = vpop.f32.mrb[1].mxu0  ;;  %v746_v61 = vpop.f32.mrb[1].mxu1 }
 0x101   : > { %v705_v1 = vpop.f32.mrb[2].mxu0  ;;  %v748_v2 = vpop.f32.mrb[2].mxu1 }
 0x102   : > { %v1700_v3 = vpack.c.bf16 %v705_v1, %v701_v57  ;;  %v1708_v4 = vpack.c.bf16 %v748_v2, %v744_v58  ;;  %v707_v5 = vpop.f32.mrb[3].mxu0  ;;  %v750_v6 = vpop.f32.mrb[3].mxu1 }
 0x103   : > { %v1698_v8 = vpack.c.bf16 %v707_v5, %v703_v60  ;;  %v1706_v9 = vpack.c.bf16 %v750_v6, %v746_v61 }
 0x105   : > { %1699 = vmatprep.subr.bf16.mxu0 %v1698_v8  ;;  %1707 = vmatprep.subr.bf16.mxu1 %v1706_v9 }
 0x106   : > { %1701 = vmatpush1.bf16.msra.mxu0 %v1700_v3  ;;  %1709 = vmatpush1.bf16.msra.mxu1 %v1708_v4 }
 0x107   : > { %1703 = vmatprep.subr.bf16.mxu0 %v1702_v10  ;;  %1711 = vmatprep.subr.bf16.mxu1 %v1710_v11 }
 0x10a   : > { %1705 = vmatpush1.bf16.msra.mxu0 %v1704_v15  ;;  %1713 = vmatpush1.bf16.msra.mxu1 %v1712_v16 }
 0x10d   : > { %1644 = vmatmul.mubr.msk.f32.vlgmr.msra.gmra.mrb[8].mxu0 %vm832_vm1, %v804_v17  ;;  %1648 = vmatmul.mubr.msk.f32.vlgmr.msra.gmra.mrb[4].mxu1 %vm832_vm1, %v804_v17 }
 0x10e   : > { %915 = vmatprep.mubr.f32.mxu0 %v1901_v52  ;;  %1004 = vmatprep.mubr.f32.mxu1 %v1901_v52 }
 0x111   : > { %1645 = vmatmul.mubr.msk.f32.gmra.mrb[10].mxu0 %vm832_vm1, %v805_v18  ;;  %1649 = vmatmul.mubr.msk.f32.gmra.mrb[6].mxu1 %vm832_vm1, %v805_v18 }
 0x112   : > { %921 = vmatprep.mubr.f32.mxu0 %v1901_v52  ;;  %1010 = vmatprep.mubr.f32.mxu1 %v1901_v52 }
 0x115   : > { %1646 = vmatmul.mubr.msk.f32.gmra.mrb[12].mxu0 %vm832_vm1, %v806_v19  ;;  %1650 = vmatmul.mubr.msk.f32.gmra.mrb[8].mxu1 %vm832_vm1, %v806_v19 }
 0x116   : > { %1016 = vmatprep.mubr.f32.mxu1 %v1901_v52  ;;  %927 = vmatprep.mubr.f32.mxu0 %v1901_v52 }
 0x119   : > { %1651 = vmatmul.mubr.msk.f32.gmra.mrb[10].mxu1 %vm832_vm1, %v807_v20  ;;  %1647 = vmatmul.mubr.msk.f32.gmra.mrb[14].mxu0 %vm832_vm1, %v807_v20 }
 0x11a   : > { %1685 = vmatprep.mubr.msk.f32.mxu1 %vm832_vm1, %v804_v17 }
 0x123   : > { %v787_v21 = vpop.f32.mrb[4].mxu0 }
 0x124   : > { %v789_v24 = vpop.f32.mrb[5].mxu0 }
 0x125   : > { %v790_v25 = vpop.f32.mrb[6].mxu0 }
 0x126   : > { %v1714_v26 = vpack.c.bf16 %v790_v25, %v787_v21  ;;  %v792_v27 = vpop.f32.mrb[7].mxu0 }
 0x128   : > { %1715 = vmatprep.subr.bf16.mxu1 %v1714_v26 }
 0x129   : > { %1717 = vmatpush3.bf16.msra.mxu1 %v1714_v26 }
 0x12a   : > { %1719 = vmatprep.subr.bf16.mxu1 %v1718_v28 }
 0x12d   : > { %1721 = vmatpush3.bf16.msra.mxu1 %v1718_v28 }
 0x130   : > { %1686 = vmatmul.mubr.msk.f32.vlgmr.msra.gmra.mrb[12].mxu1 %vm832_vm1, %v805_v18 }
 0x131   : > { %1688 = vmatprep.mubr.msk.f32.mxu1 %vm832_vm1, %v806_v19 }
 0x134   : > { %1689 = vmatmul.mubr.msk.f32.gmra.mrb[14].mxu1 %vm832_vm1, %v807_v20 }
 0x135   : > { %1282 = vmatprep.mubr.f32.mxu1 %v1901_v52 }
 0x1e0   : > { %v911_v32 = vpop.f32.mrb[8].mxu0  ;;  %v1000_v33 = vpop.f32.mrb[4].mxu1 }
 0x1e1   : > { %v2191_v34 = vadd.f32 %v911_v32, %v2188_v31  ;;  %v2194_v35 = vadd.f32 %v1000_v33, %v2188_v31  ;;  %v913_v36 = vpop.f32.mrb[9].mxu0  ;;  %v1002_v37 = vpop.f32.mrb[5].mxu1 }
 0x1e2   : > { %v2197_v38 = vadd.f32 %v913_v36, %v2188_v31  ;;  %v2200_v39 = vadd.f32 %v1002_v37, %v2188_v31 }
 0x1e3   : > { %v1120_v41 = vmul.f32 0.044715, %v2191_v34  ;;  %v1122_v42 = vmul.f32 0.044715, %v2194_v35  ;;  %v1110_v37 = vmul.f32 0.5, %v2191_v34 }
 0x1e4   : > { %v1121_v43 = vmul.f32 0.044715, %v2197_v38  ;;  %v1123_v44 = vmul.f32 0.044715, %v2200_v39  ;;  %v917_v45 = vpop.f32.mrb[10].mxu0  ;;  %v1006_v46 = vpop.f32.mrb[6].mxu1 }
 0x1e5   : > { %v1130_v47 = vmul.f32 %v1120_v41, %v2191_v34  ;;  %v1132_v48 = vmul.f32 %v1122_v42, %v2194_v35  ;;  %v918_v49 = vadd.f32 %v917_v45, %v2202_v40  ;;  %v1007_v50 = vadd.f32 %v1006_v46, %v2202_v40  ;;  %v919_v51 = vpop.f32.mrb[11].mxu0  ;;  %v1008_v53 = vpop.f32.mrb[7].mxu1 }
 0x1e6   : > { %v1131_v54 = vmul.f32 %v1121_v43, %v2197_v38  ;;  %v2214_v55 = vadd.f32 %v919_v51, %v2202_v40  ;;  %v2217_v56 = vadd.f32 %v1008_v53, %v2202_v40  ;;  %v1133_v61 = vmul.f32 %v1123_v44, %v2200_v39 }
 0x1e7   : > { %v1140_v57 = vmul.f32 %v1130_v47, %v2191_v34  ;;  %v1142_v58 = vmul.f32 %v1132_v48, %v2194_v35  ;;  %v1125_v59 = vmul.f32 0.044715, %v918_v49  ;;  %v1127_v60 = vmul.f32 0.044715, %v1007_v50 }
 0x1e8   : > { %v1126_v62 = vmul.f32 0.044715, %v2214_v55  ;;  %v1128_v63 = vmul.f32 0.044715, %v2217_v56  ;;  %v2224_v0 = vpop.f32.mrb[12].mxu0  ;;  %v1141_v6 = vmul.f32 %v1131_v54, %v2197_v38  ;;  %v1143_v13 = vmul.f32 %v1133_v61, %v2200_v39 }
 0x1e9   : > { %v1150_v1 = vadd.f32 %v1140_v57, %v2191_v34  ;;  %v1152_v2 = vadd.f32 %v1142_v58, %v2194_v35  ;;  %v1135_v3 = vmul.f32 %v1125_v59, %v918_v49  ;;  %v1137_v4 = vmul.f32 %v1127_v60, %v1007_v50  ;;  %v2228_v5 = vpop.f32.mrb[13].mxu0 }
 0x1ea   : > { %v1136_v7 = vmul.f32 %v1126_v62, %v2214_v55  ;;  %v1138_v8 = vmul.f32 %v1128_v63, %v2217_v56  ;;  %v1151_v18 = vadd.f32 %v1141_v6, %v2197_v38  ;;  %v1153_v24 = vadd.f32 %v1143_v13, %v2200_v39 }
 0x1eb   : > { %v1160_v9 = vmul.f32 0.7978846, %v1150_v1  ;;  %v1162_v10 = vmul.f32 0.7978846, %v1152_v2  ;;  %v1145_v11 = vmul.f32 %v1135_v3, %v918_v49  ;;  %v1147_v12 = vmul.f32 %v1137_v4, %v1007_v50 }
 0x1ec   : > { %v1146_v14 = vmul.f32 %v1136_v7, %v2214_v55  ;;  %v1148_v17 = vmul.f32 %v1138_v8, %v2217_v56  ;;  %v1161_v22 = vmul.f32 0.7978846, %v1151_v18  ;;  %v1163_v26 = vmul.f32 0.7978846, %v1153_v24 }
 0x1ed   : > { %1856 = vtanh.f32 %v1160_v9  ;;  %v1155_v15 = vadd.f32 %v1145_v11, %v918_v49  ;;  %v1157_v16 = vadd.f32 %v1147_v12, %v1007_v50  ;;  %v1115_v41 = vmul.f32 0.5, %v918_v49 }
 0x1ee   : > { %1858 = vtanh.f32 %v1162_v10  ;;  %v1156_v19 = vadd.f32 %v1146_v14, %v2214_v55  ;;  %v1158_v25 = vadd.f32 %v1148_v17, %v2217_v56  ;;  %v1112_v44 = vmul.f32 0.5, %v2194_v35 }
 0x1ef   : > { %v1165_v20 = vmul.f32 0.7978846, %v1155_v15  ;;  %v1167_v21 = vmul.f32 0.7978846, %v1157_v16  ;;  %v1117_v45 = vmul.f32 0.5, %v1007_v50  ;;  %v1111_v48 = vmul.f32 0.5, %v2197_v38 }
 0x1f0   : > { %v1166_v23 = vmul.f32 0.7978846, %v1156_v19  ;;  %v1168_v27 = vmul.f32 0.7978846, %v1158_v25  ;;  %v1116_v58 = vmul.f32 0.5, %v2214_v55  ;;  %v1113_v62 = vmul.f32 0.5, %v2200_v39 }
 0x1f1   : > { %1860 = vtanh.f32 %v1165_v20  ;;  %v1118_v35 = vmul.f32 0.5, %v2217_v56  ;;  %v1108_v39 = vld [vmem:[%s2296_s5] sm:$0xff] }
 0x1f2   : > { %1862 = vtanh.f32 %v1167_v21 }
 0x1f3   : > { %1864 = vtanh.f32 %v1161_v22 }
 0x1f4   : > { %1866 = vtanh.f32 %v1166_v23 }
 0x1f5   : > { %1868 = vtanh.f32 %v1163_v26 }
 0x1f6   : > { %1870 = vtanh.f32 %v1168_v27 }
 0x1f7   : > { %v1857_v28 = vpop.eup %1856 }
 0x1f8   : > { %v1859_v29 = vpop.eup %1858  ;;  %v1180_v30 = vadd.f32 1.0, %v1857_v28  ;;  %v929_v28 = vpop.f32.mrb[14].mxu0 }
 0x1f9   : > { %v1182_v33 = vadd.f32 1.0, %v1859_v29  ;;  %v825_v29 = vpop.permute.xlu1 %824 }
 0x1fa   : > { %v1190_v53 = vmul.f32 %v1180_v30, %v1110_v37 }
 0x1fb   : > { %v1861_v32 = vpop.eup %1860  ;;  %v1192_v60 = vmul.f32 %v1182_v33, %v1112_v44  ;;  %v926_v33 = vadd.f32 %v2228_v5, %v825_v29 }
 0x1fc   : > { %v1863_v36 = vpop.eup %1862  ;;  %v1185_v42 = vadd.f32 1.0, %v1861_v32  ;;  %v924_v32 = vadd.f32 %v2224_v0, %v825_v29 }
 0x1fd   : > { %v1865_v43 = vpop.eup %1864  ;;  %v1187_v46 = vadd.f32 1.0, %v1863_v36  ;;  %v830_v30 = vpop.permute.xlu1 %829 }
 0x1fe   : > { %v1867_v47 = vpop.eup %1866  ;;  %v1181_v51 = vadd.f32 1.0, %v1865_v43  ;;  %v1195_v54 = vmul.f32 %v1185_v42, %v1115_v41  ;;  %v1205_v36 = vpop.permute.xlu0 %1204  ;;  %v930_v37 = vadd.f32 %v929_v28, %v830_v30 }
 0x1ff   : > { %v1869_v57 = vpop.eup %1868  ;;  %v1186_v59 = vadd.f32 1.0, %v1867_v47  ;;  %v1197_v61 = vmul.f32 %v1187_v46, %v1117_v45  ;;  %v1735_v42 = vadd.f32 %v1205_v36, %v924_v32  ;;  %v1738_v43 = vadd.f32 %v1205_v36, %v926_v33 }
 0x200   : > { %v1871_v34 = vpop.eup %1870  ;;  %v1724_v49 = vpack.c.bf16 %v1195_v54, %v1190_v53  ;;  %v1183_v50 = vadd.f32 1.0, %v1869_v57  ;;  %v1191_v63 = vmul.f32 %v1181_v51, %v1111_v48 }
 0x201   : > { %v1196_v1 = vmul.f32 %v1186_v59, %v1116_v58  ;;  %v1188_v2 = vadd.f32 1.0, %v1871_v34  ;;  %v1728_v38 = vpack.c.bf16 %v1197_v61, %v1192_v60  ;;  %v1210_v45 = vpop.permute.xlu1 %1209  ;;  %v1746_v58 = vadd.f32 %v1205_v36, %v825_v29 }
 0x202   : > { %v1193_v6 = vmul.f32 %v1183_v50, %v1113_v62  ;;  %v1741_v5 = vadd.f32 %v1210_v45, %v930_v37  ;;  %v1750_v34 = vadd.f32 %v1210_v45, %v830_v30 }
 0x203   : > { %v1687_v3 = vpop.f32.mrb[12].mxu1  ;;  %v1722_v4 = vpack.c.bf16 %v1196_v1, %v1191_v63  ;;  %v1198_v7 = vmul.f32 %v1188_v2, %v1118_v35 }
 0x204   : > { %v1095_v55 = vadd.f32 %v1687_v3, %v2202_v40  ;;  %v1089_v8 = vpop.f32.mrb[13].mxu1 }
 0x205   : > { %1723 = vmatprep.subr.bf16.mxu1 %v1722_v4  ;;  %v1090_v9 = vadd.f32 %v1089_v8, %v2188_v31  ;;  %v1726_v10 = vpack.c.bf16 %v1198_v7, %v1193_v6  ;;  %v1109_v31 = vld [vmem:[%s2296_s5 + $0x8] sm:$0xff] }
 0x206   : > { %v1129_v11 = vmul.f32 0.044715, %v1095_v55  ;;  %1725 = vmatpush1.bf16.msra.mxu1 %v1724_v49  ;;  %v1119_v21 = vmul.f32 0.5, %v1095_v55 }
 0x207   : > { %v1124_v56 = vmul.f32 0.044715, %v1090_v9  ;;  %1727 = vmatprep.subr.bf16.mxu1 %v1726_v10  ;;  %v1114_v23 = vmul.f32 0.5, %v1090_v9 }
 0x208   : > { %v1139_v12 = vmul.f32 %v1129_v11, %v1095_v55 }
 0x209   : > { %v1134_v13 = vmul.f32 %v1124_v56, %v1090_v9  ;;  %1656 = vmatmul.mubr.msk.f32.vlgmr.msra.gmra.mrb[16].mxu1 %vm663_vm0, %v1108_v39 }
 0x20a   : > { %v1149_v14 = vmul.f32 %v1139_v12, %v1095_v55  ;;  %1729 = vmatpush1.bf16.msra.mxu1 %v1728_v38  ;;  %1288 = vmatprep.mubr.f32.mxu1 %v1901_v52 }
 0x20b   : > { %v1144_v40 = vmul.f32 %v1134_v13, %v1090_v9 }
 0x20c   : > { %v1159_v15 = vadd.f32 %v1149_v14, %v1095_v55 }
 0x20d   : > { %1657 = vmatmul.mubr.msk.f32.gmra.mrb[18].mxu1 %vm663_vm0, %v1109_v31  ;;  %v1154_v16 = vadd.f32 %v1144_v40, %v1090_v9 }
 0x20e   : > { %1359 = vmatprep.mubr.f32.mxu1 %v1901_v52  ;;  %v1169_v17 = vmul.f32 0.7978846, %v1159_v15 }
 0x20f   : > { %v1164_v18 = vmul.f32 0.7978846, %v1154_v16 }
 0x210   : > { %1872 = vtanh.f32 %v1169_v17 }
 0x211   : > { %1658 = vmatmul.mubr.msk.f32.vlgmr.msra.gmra.mrb[8].mxu1 %vm663_vm0, %v1108_v39  ;;  %1874 = vtanh.f32 %v1164_v18 }
 0x212   : > { %1365 = vmatprep.mubr.f32.mxu1 %v1901_v52  ;;  %v931_v52 = vpop.f32.mrb[15].mxu0 }
 0x213   : > { %v932_v41 = vadd.f32 %v931_v52, %v830_v30 }
 0x215   : > { %1659 = vmatmul.mubr.msk.f32.gmra.mrb[10].mxu1 %vm663_vm0, %v1109_v31  ;;  %v1744_v48 = vadd.f32 %v1210_v45, %v932_v41 }
 0x216   : > { %1695 = vmatprep.mubr.msk.f32.mxu1 %vm663_vm0, %v1108_v39 }
 0x21a   : > { %v1873_v19 = vpop.eup %1872 }
 0x21b   : > { %v1875_v20 = vpop.eup %1874  ;;  %v1189_v22 = vadd.f32 1.0, %v1873_v19 }
 0x21c   : > { %v1184_v24 = vadd.f32 1.0, %v1875_v20 }
 0x21d   : > { %v1199_v25 = vmul.f32 %v1189_v22, %v1119_v21 }
 0x21e   : > { %v1194_v26 = vmul.f32 %v1184_v24, %v1114_v23 }
 0x220   : > { %v1730_v27 = vpack.c.bf16 %v1199_v25, %v1194_v26 }
 0x222   : > { %1731 = vmatprep.subr.bf16.mxu1 %v1730_v27 }
 0x223   : > { %1733 = vmatpush3.bf16.msra.mxu1 %v1730_v27 }
 0x226   : > { %1696 = vmatmul.mubr.msk.f32.vlgmr.msra.gmra.mrb[14].mxu1 %vm663_vm0, %v1109_v31 }
 0x2dc   : > { %v1284_v44 = vpop.f32.mrb[16].mxu1 }
 0x2dd   : > { %v1736_v0 = vadd.f32 %v1735_v42, %v1284_v44  ;;  %v1286_v46 = vpop.f32.mrb[17].mxu1 }
 0x2de   : > { %v1739_v47 = vadd.f32 %v1738_v43, %v1286_v46 }
 0x2df   : > { %1457 = vst [vmem:[%s2270_s24] sm:$0xff] %v1736_v0 }
 0x2e0   : > { %1458 = vst [vmem:[%s2270_s24 + $0x8] sm:$0xff] %v1739_v47  ;;  %v1290_v51 = vpop.f32.mrb[18].mxu1 }
 0x2e1   : > { %v1292_v53 = vpop.f32.mrb[19].mxu1  ;;  %v1742_v54 = vadd.f32 %v1741_v5, %v1290_v51 }
 0x2e2   : > { %v1745_v57 = vadd.f32 %v1744_v48, %v1292_v53 }
 0x2e3   : > { %1462 = vst [vmem:[%s2270_s24 + $0x28] sm:$0xff] %v1742_v54 }
 0x2e4   : > { %v1361_v59 = vpop.f32.mrb[8].mxu1  ;;  %1463 = vst [vmem:[%s2270_s24 + $0x30] sm:$0xff] %v1745_v57 }
 0x2e5   : > { %v1747_v60 = vadd.f32 %v1746_v58, %v1361_v59  ;;  %v1363_v61 = vpop.f32.mrb[9].mxu1 }
 0x2e6   : > { %v1749_v49 = vadd.f32 %v1746_v58, %v1363_v61 }
 0x2e7   : > { %1459 = vst [vmem:[%s2270_s24 + $0x10] sm:$0xff] %v1747_v60 }
 0x2e8   : > { %1460 = vst [vmem:[%s2270_s24 + $0x18] sm:$0xff] %v1749_v49  ;;  %v1367_v62 = vpop.f32.mrb[10].mxu1 }
 0x2e9   : > { %v1751_v35 = vadd.f32 %v1750_v34, %v1367_v62  ;;  %v1369_v50 = vpop.f32.mrb[11].mxu1 }
 0x2ea   : > { %v1753_v63 = vadd.f32 %v1750_v34, %v1369_v50 }
 0x2eb   : > { %1464 = vst [vmem:[%s2270_s24 + $0x38] sm:$0xff] %v1751_v35 }
 0x2ec   : > { %1465 = vst [vmem:[%s2270_s24 + $0x40] sm:$0xff] %v1753_v63 }
 0x2f9   : > { %v1697_v1 = vpop.f32.mrb[14].mxu1 }
 0x2fa   : > { %v1438_v2 = vpop.f32.mrb[15].mxu1  ;;  %v1755_v3 = vadd.f32 %v1750_v34, %v1697_v1 }
 0x2fb   : > { %v1757_v38 = vadd.f32 %v1746_v58, %v1438_v2 }
 0x2fc   : > { %1466 = vst [vmem:[%s2270_s24 + $0x48] sm:$0xff] %v1755_v3 }
 0x2fd   : > { %1461 = vst [vmem:[%s2270_s24 + $0x20] sm:$0xff] %v1757_v38 }
 0x2fe PF: > { %s17_s26 = sadd.s32 1, %s1898_s26   ;;  %s2299_s24 = smov %s1894_s25 }
 0x2ff   : > { %p14_p6 = scmp.ge.s32.totalorder %s17_s26, 4   ;;  %s2300_s25 = smov %s2302_s27 }
 0x301   :  { %16 = sbr.rel (!%p14_p6) target bundleno = 2 (0x2), region = 84 }

// kernel: fno2d_forward.19
= control target key start
LH: loop header
LB: loop body
LE: loop exit
PB: predicated region body
PF: predicated region fallthrough
CT: control target
= control target key end

     0   :  { %s957_s20 = smov 0   ;;  %s959_s21 = smov 0   ;;  %s1151_s0 = inlined_call_operand.vmem [shape: f32[2,16,256], index: 0, kind: input, shape index: {}]   ;;  %s1152_s1 = inlined_call_operand.vmem [shape: f32[64,16], index: 1, kind: input, shape index: {}]   ;;  %s1153_s2 = inlined_call_operand.vmem [shape: f32[64,1], index: 2, kind: input, shape index: {}]   ;;  %s1154_s3 = inlined_call_operand.vmem [shape: f32[1,64], index: 3, kind: input, shape index: {}]   ;;  %s1155_s4 = inlined_call_operand.<no memory space> [shape: f32[1,1], index: 4, kind: input, shape index: {}]   ;;  %s1156_s5 = inlined_call_operand.vmem [shape: f32[2,1,256], index: 5, kind: output, shape index: {}]  }
   0x1   :  { %v10_v0 = vstv %s1155_s4  ;;  %s961_s22 = smov 0  }
   0x2   :  { %11 = vst [vmem:[#allocation2] sm:$0x1] %v10_v0 }
   0x3 LB: > { %s29_s4 = sadd.s32 1, %s915_s21  ;;  %p800_p0 = scmp.ge.s32.totalorder %s919_s22, 1  ;;  %s919_s22 = sphi %s961_s22, %s17_s22   ;;  %s915_s21 = sphi %s959_s21, %s1158_s21   ;;  %s911_s20 = sphi %s957_s20, %s1157_s20  }
   0x4   : > { %p31_p1 = scmp.ge.s32.totalorder %s29_s4, 2  ;;  %p210_p2 = scmp.lt.s32.totalorder %s919_s22, 3 }
   0x6   : > { %s1160_s4 = smov (%p31_p1, %s29_s4), 0  ;;  %p211_p3 = pnand %p800_p0, %p210_p2 }
   0x7   : > { %p246_p4 = scmp.lt.s32.totalorder (!%p211_p3), %s911_s20, 1  ;;  %v921_v1 = vmov (!%p211_p3), 0.0   ;;  %v922_v2 = vmov (!%p211_p3), 0   ;;  %v276_v3 = vld [vmem:[%s1153_s2] sm:$0xff] (!%p211_p3)  ;;  %v278_v4 = vld [vmem:[%s1153_s2 + $0x10] sm:$0xff] (!%p211_p3)  ;;  %v277_v5 = vld [vmem:[%s1153_s2 + $0x8] sm:$0xff] (!%p211_p3) }
   0x8   : > { %214 = sbr.rel (%p211_p3) target bundleno = 522 (0x20a), region = 40  ;;  %413 = vmatprep.mubr.f32.mxu0 (!%p211_p3), %v921_v1  ;;  %685 = vmatprep.mubr.f32.mxu1 (!%p211_p3), %v921_v1  ;;  %v279_v6 = vld [vmem:[%s1153_s2 + $0x18] sm:$0xff] (!%p211_p3)  ;;  %v280_v13 = vld [vmem:[%s1153_s2 + $0x20] sm:$0xff] (!%p211_p3)  ;;  %v281_v14 = vld [vmem:[%s1153_s2 + $0x28] sm:$0xff] (!%p211_p3)  ;;  %vm324_vm0 = vcmask (!%p211_p3), 130048   ;;  %vm617_vm1 = vcmask (!%p211_p3), 523264  }
   0x9   : > { %863 = vset.pattern.permute.xlu0 (!%p211_p3), %v922_v2  ;;  %864 = vset.pattern.permute.xlu1 (!%p211_p3), %v922_v2  ;;  %v264_v15 = vld [vmem:[%s1152_s1] sm:$0xff] (!%p211_p3)  ;;  %v282_v16 = vld [vmem:[%s1153_s2 + $0x30] sm:$0xff] (!%p211_p3)  ;;  %v283_v17 = vld [vmem:[%s1153_s2 + $0x38] sm:$0xff] (!%p211_p3) }
   0xa   : > { %286 = vperm.xlu0 (!%p211_p3), %863, %v276_v3   ;;  %296 = vperm.xlu1 (!%p211_p3), %864, %v278_v4   ;;  %v265_v18 = vld [vmem:[%s1152_s1 + $0x8] sm:$0xff] (!%p211_p3)  ;;  %v607_v19 = vld [vmem:[#allocation2] sm:$0x1] (!%p211_p3)  ;;  %v266_v20 = vld [vmem:[%s1152_s1 + $0x10] sm:$0xff] (!%p211_p3) }
   0xb   : > { %v267_v21 = vld [vmem:[%s1152_s1 + $0x18] sm:$0xff] (!%p211_p3)  ;;  %v268_v22 = vld [vmem:[%s1152_s1 + $0x20] sm:$0xff] (!%p211_p3)  ;;  %v269_v23 = vld [vmem:[%s1152_s1 + $0x28] sm:$0xff] (!%p211_p3) }
   0xc   : > { %v270_v24 = vld [vmem:[%s1152_s1 + $0x30] sm:$0xff] (!%p211_p3)  ;;  %v271_v25 = vld [vmem:[%s1152_s1 + $0x38] sm:$0xff] (!%p211_p3) }
   0xe   : > { %291 = vperm.xlu0 (!%p211_p3), %863, %v277_v5   ;;  %301 = vperm.xlu1 (!%p211_p3), %864, %v279_v6  }
   0xf   : > { %s1162_s20 = smov (!%p246_p4, %s911_s20), 1 }
  0x10   : > { %s815_s27 = sshll.u32 %s1162_s20, 5  ;;  %s803_s14 = sshll.u32 %s1162_s20, 1 }
  0x11   : > { %s253_s7 = scalar_lea.vmem %s1151_s0, %s815_s27  ;;  %s262_s17 = scalar_lea.vmem %s1156_s5, %s803_s14 }
  0x12   : > { %v273_v7 = vld [vmem:[%s253_s7 + $0x8] sm:$0xff]  ;;  %v275_v8 = vld [vmem:[%s253_s7 + $0x18] sm:$0xff]  ;;  %v272_v9 = vld [vmem:[%s253_s7] sm:$0xff]  ;;  %306 = vperm.xlu0 %863, %v280_v13   ;;  %311 = vperm.xlu1 %864, %v281_v14  }
  0x13   : > { %v816_v10 = vpack.c.bf16 %v275_v8, %v273_v7  ;;  %v274_v11 = vld [vmem:[%s253_s7 + $0x10] sm:$0xff] }
  0x14   : > { %v818_v12 = vpack.c.bf16 %v274_v11, %v272_v9 }
  0x15   : > { %817 = vmatprep.subr.bf16.mxu0 %v816_v10 }
  0x16   : > { %819 = vmatpush1.bf16.msra.mxu0 %v818_v12  ;;  %316 = vperm.xlu0 %863, %v282_v16  }
  0x17   : > { %321 = vperm.xlu1 %864, %v283_v17  }
  0x19   : > { %804 = vmatmul.mubr.msk.f32.vlgmr.msra.gmra.mrb[0].mxu0 %vm324_vm0, %v264_v15 }
  0x1a   : > { %419 = vmatprep.mubr.f32.mxu0 %v921_v1  ;;  %610 = vperm.xlu0 %863, %v607_v19  }
  0x1d   : > { %805 = vmatmul.mubr.msk.f32.gmra.mrb[2].mxu0 %vm324_vm0, %v265_v18 }
  0x1e   : > { %425 = vmatprep.mubr.f32.mxu0 %v921_v1 }
  0x21   : > { %806 = vmatmul.mubr.msk.f32.gmra.mrb[4].mxu0 %vm324_vm0, %v266_v20 }
  0x22   : > { %431 = vmatprep.mubr.f32.mxu0 %v921_v1 }
  0x25   : > { %807 = vmatmul.mubr.msk.f32.gmra.mrb[6].mxu0 %vm324_vm0, %v267_v21 }
  0x26   : > { %437 = vmatprep.mubr.f32.mxu0 %v921_v1 }
  0x29   : > { %808 = vmatmul.mubr.msk.f32.gmra.mrb[8].mxu0 %vm324_vm0, %v268_v22 }
  0x2a   : > { %443 = vmatprep.mubr.f32.mxu0 %v921_v1 }
  0x2d   : > { %809 = vmatmul.mubr.msk.f32.gmra.mrb[10].mxu0 %vm324_vm0, %v269_v23 }
  0x2e   : > { %449 = vmatprep.mubr.f32.mxu0 %v921_v1 }
  0x31   : > { %810 = vmatmul.mubr.msk.f32.gmra.mrb[12].mxu0 %vm324_vm0, %v270_v24 }
  0x32   : > { %455 = vmatprep.mubr.f32.mxu0 %v921_v1 }
  0x35   : > { %811 = vmatmul.mubr.msk.f32.gmra.mrb[14].mxu0 %vm324_vm0, %v271_v25 }
  0x89   : > { %v287_v26 = vpop.permute.xlu0 %286  ;;  %v297_v38 = vpop.permute.xlu1 %296 }
  0x8d   : > { %v292_v32 = vpop.permute.xlu0 %291  ;;  %v302_v56 = vpop.permute.xlu1 %301 }
  0x91   : > { %v307_v7 = vpop.permute.xlu0 %306  ;;  %v312_v23 = vpop.permute.xlu1 %311 }
  0xec   : > { %v415_v27 = vpop.f32.mrb[0].mxu0 }
  0xed   : > { %v416_v28 = vadd.f32 %v415_v27, %v287_v26  ;;  %v417_v29 = vpop.f32.mrb[1].mxu0 }
  0xee   : > { %v1037_v30 = vadd.f32 %v417_v29, %v287_v26 }
  0xef   : > { %v478_v31 = vmul.f32 0.044715, %v416_v28  ;;  %v462_v21 = vmul.f32 0.5, %v416_v28 }
  0xf0   : > { %v479_v33 = vmul.f32 0.044715, %v1037_v30  ;;  %v421_v34 = vpop.f32.mrb[2].mxu0  ;;  %v463_v27 = vmul.f32 0.5, %v1037_v30 }
  0xf1   : > { %v494_v35 = vmul.f32 %v478_v31, %v416_v28  ;;  %v422_v36 = vadd.f32 %v421_v34, %v292_v32  ;;  %v423_v37 = vpop.f32.mrb[3].mxu0 }
  0xf2   : > { %v1040_v39 = vadd.f32 %v423_v37, %v292_v32  ;;  %v495_v40 = vmul.f32 %v479_v33, %v1037_v30 }
  0xf3   : > { %v480_v41 = vmul.f32 0.044715, %v422_v36  ;;  %v510_v42 = vmul.f32 %v494_v35, %v416_v28  ;;  %v464_v33 = vmul.f32 0.5, %v422_v36 }
  0xf4   : > { %v481_v43 = vmul.f32 0.044715, %v1040_v39  ;;  %v427_v44 = vpop.f32.mrb[4].mxu0  ;;  %v511_v45 = vmul.f32 %v495_v40, %v1037_v30 }
  0xf5   : > { %v496_v46 = vmul.f32 %v480_v41, %v422_v36  ;;  %v1045_v47 = vadd.f32 %v427_v44, %v297_v38  ;;  %v429_v48 = vpop.f32.mrb[5].mxu0  ;;  %v526_v49 = vadd.f32 %v510_v42, %v416_v28  ;;  %v465_v41 = vmul.f32 0.5, %v1040_v39 }
  0xf6   : > { %v1047_v50 = vadd.f32 %v429_v48, %v297_v38  ;;  %v497_v51 = vmul.f32 %v481_v43, %v1040_v39  ;;  %v527_v52 = vadd.f32 %v511_v45, %v1037_v30 }
  0xf7   : > { %v482_v53 = vmul.f32 0.044715, %v1045_v47  ;;  %v512_v54 = vmul.f32 %v496_v46, %v422_v36  ;;  %v542_v55 = vmul.f32 0.7978846, %v526_v49 }
  0xf8   : > { %v483_v57 = vmul.f32 0.044715, %v1047_v50  ;;  %v433_v58 = vpop.f32.mrb[6].mxu0  ;;  %v513_v59 = vmul.f32 %v497_v51, %v1040_v39  ;;  %v543_v60 = vmul.f32 0.7978846, %v527_v52 }
  0xf9   : > { %v498_v61 = vmul.f32 %v482_v53, %v1045_v47  ;;  %v1055_v62 = vadd.f32 %v433_v58, %v302_v56  ;;  %v435_v63 = vpop.f32.mrb[7].mxu0  ;;  %v528_v0 = vadd.f32 %v512_v54, %v422_v36  ;;  %865 = vtanh.f32 %v542_v55  ;;  %v317_v36 = vpop.permute.xlu0 %316 }
  0xfa   : > { %v499_v1 = vmul.f32 %v483_v57, %v1047_v50  ;;  %v1058_v2 = vadd.f32 %v435_v63, %v302_v56  ;;  %v529_v3 = vadd.f32 %v513_v59, %v1040_v39  ;;  %867 = vtanh.f32 %v543_v60 }
  0xfb   : > { %v514_v4 = vmul.f32 %v498_v61, %v1045_v47  ;;  %v484_v5 = vmul.f32 0.044715, %v1055_v62  ;;  %v544_v6 = vmul.f32 0.7978846, %v528_v0  ;;  %v466_v56 = vmul.f32 0.5, %v1045_v47  ;;  %v322_v0 = vpop.permute.xlu1 %321 }
  0xfc   : > { %v515_v8 = vmul.f32 %v499_v1, %v1047_v50  ;;  %v485_v9 = vmul.f32 0.044715, %v1058_v2  ;;  %v439_v10 = vpop.f32.mrb[8].mxu0  ;;  %v545_v11 = vmul.f32 0.7978846, %v529_v3 }
  0xfd   : > { %v500_v12 = vmul.f32 %v484_v5, %v1055_v62  ;;  %v1066_v13 = vadd.f32 %v439_v10, %v307_v7  ;;  %v441_v14 = vpop.f32.mrb[9].mxu0  ;;  %869 = vtanh.f32 %v544_v6  ;;  %v530_v15 = vadd.f32 %v514_v4, %v1045_v47 }
  0xfe   : > { %v501_v16 = vmul.f32 %v485_v9, %v1058_v2  ;;  %v1070_v17 = vadd.f32 %v441_v14, %v307_v7  ;;  %871 = vtanh.f32 %v545_v11  ;;  %v531_v18 = vadd.f32 %v515_v8, %v1047_v50 }
  0xff   : > { %v516_v19 = vmul.f32 %v500_v12, %v1055_v62  ;;  %v486_v20 = vmul.f32 0.044715, %v1066_v13  ;;  %v546_v22 = vmul.f32 0.7978846, %v530_v15 }
 0x100   : > { %v517_v24 = vmul.f32 %v501_v16, %v1058_v2  ;;  %v487_v25 = vmul.f32 0.044715, %v1070_v17  ;;  %v445_v26 = vpop.f32.mrb[10].mxu0  ;;  %v547_v29 = vmul.f32 0.7978846, %v531_v18 }
 0x101   : > { %v1078_v31 = vadd.f32 %v445_v26, %v312_v23  ;;  %v447_v32 = vpop.f32.mrb[11].mxu0  ;;  %v532_v34 = vadd.f32 %v516_v19, %v1055_v62  ;;  %873 = vtanh.f32 %v546_v22  ;;  %v502_v40 = vmul.f32 %v486_v20, %v1066_v13 }
 0x102   : > { %v503_v35 = vmul.f32 %v487_v25, %v1070_v17  ;;  %v1082_v28 = vadd.f32 %v447_v32, %v312_v23  ;;  %v533_v37 = vadd.f32 %v517_v24, %v1058_v2  ;;  %875 = vtanh.f32 %v547_v29 }
 0x103   : > { %v866_v38 = vpop.eup %865  ;;  %v488_v30 = vmul.f32 0.044715, %v1078_v31  ;;  %v548_v42 = vmul.f32 0.7978846, %v532_v34  ;;  %v518_v58 = vmul.f32 %v502_v40, %v1066_v13  ;;  %v467_v25 = vmul.f32 0.5, %v1047_v50 }
 0x104   : > { %v868_v43 = vpop.eup %867  ;;  %v519_v44 = vmul.f32 %v503_v35, %v1070_v17  ;;  %v489_v45 = vmul.f32 0.044715, %v1082_v28  ;;  %v451_v46 = vpop.f32.mrb[12].mxu0  ;;  %v574_v48 = vadd.f32 1.0, %v866_v38  ;;  %v549_v49 = vmul.f32 0.7978846, %v533_v37 }
 0x105   : > { %v504_v51 = vmul.f32 %v488_v30, %v1078_v31  ;;  %v1091_v52 = vadd.f32 %v451_v46, %v317_v36  ;;  %v453_v53 = vpop.f32.mrb[13].mxu0  ;;  %v575_v54 = vadd.f32 1.0, %v868_v43  ;;  %877 = vtanh.f32 %v548_v42 }
 0x106   : > { %v505_v55 = vmul.f32 %v489_v45, %v1082_v28  ;;  %v1094_v39 = vadd.f32 %v453_v53, %v317_v36  ;;  %879 = vtanh.f32 %v549_v49  ;;  %v590_v61 = vmul.f32 %v574_v48, %v462_v21 }
 0x107   : > { %v870_v57 = vpop.eup %869  ;;  %v520_v59 = vmul.f32 %v504_v51, %v1078_v31  ;;  %v490_v60 = vmul.f32 0.044715, %v1091_v52  ;;  %v535_v6 = vadd.f32 %v519_v44, %v1070_v17  ;;  %v591_v10 = vmul.f32 %v575_v54, %v463_v27 }
 0x108   : > { %v872_v63 = vpop.eup %871  ;;  %v521_v1 = vmul.f32 %v505_v55, %v1082_v28  ;;  %v491_v3 = vmul.f32 0.044715, %v1094_v39  ;;  %v457_v4 = vpop.f32.mrb[14].mxu0  ;;  %v576_v5 = vadd.f32 1.0, %v870_v57  ;;  %v534_v21 = vadd.f32 %v518_v58, %v1066_v13 }
 0x109   : > { %v506_v47 = vmul.f32 %v490_v60, %v1091_v52  ;;  %v1104_v7 = vadd.f32 %v457_v4, %v322_v0  ;;  %v459_v8 = vpop.f32.mrb[15].mxu0  ;;  %v577_v9 = vadd.f32 1.0, %v872_v63  ;;  %v551_v20 = vmul.f32 0.7978846, %v535_v6 }
 0x10a   : > { %v507_v11 = vmul.f32 %v491_v3, %v1094_v39  ;;  %v1107_v12 = vadd.f32 %v459_v8, %v322_v0  ;;  %v592_v14 = vmul.f32 %v576_v5, %v464_v33  ;;  %v537_v15 = vadd.f32 %v521_v1, %v1082_v28 }
 0x10b   : > { %v874_v16 = vpop.eup %873  ;;  %v492_v18 = vmul.f32 0.044715, %v1104_v7  ;;  %v593_v19 = vmul.f32 %v577_v9, %v465_v41  ;;  %v468_v26 = vmul.f32 0.5, %v1055_v62  ;;  %881 = vtanh.f32 %v551_v20 }
 0x10c   : > { %v876_v22 = vpop.eup %875  ;;  %v493_v23 = vmul.f32 0.044715, %v1107_v12  ;;  %v822_v24 = vpack.c.bf16 %v592_v14, %v590_v61  ;;  %v523_v27 = vmul.f32 %v507_v11, %v1094_v39  ;;  %v553_v33 = vmul.f32 0.7978846, %v537_v15 }
 0x10d   : > { %v508_v29 = vmul.f32 %v492_v18, %v1104_v7  ;;  %v820_v32 = vpack.c.bf16 %v593_v19, %v591_v10  ;;  %v578_v35 = vadd.f32 1.0, %v874_v16  ;;  %v536_v37 = vadd.f32 %v520_v59, %v1078_v31 }
 0x10e   : > { %v509_v34 = vmul.f32 %v493_v23, %v1107_v12  ;;  %v522_v40 = vmul.f32 %v506_v47, %v1091_v52  ;;  %v579_v30 = vadd.f32 1.0, %v876_v22  ;;  %883 = vtanh.f32 %v553_v33 }
 0x10f   : > { %v878_v38 = vpop.eup %877  ;;  %821 = vmatprep.subr.bf16.mxu1 %v820_v32  ;;  %v550_v50 = vmul.f32 0.7978846, %v534_v21  ;;  %v524_v41 = vmul.f32 %v508_v29, %v1104_v7  ;;  %v552_v36 = vmul.f32 0.7978846, %v536_v37  ;;  %v469_v44 = vmul.f32 0.5, %v1058_v2 }
 0x110   : > { %v880_v62 = vpop.eup %879  ;;  %v525_v42 = vmul.f32 %v509_v34, %v1107_v12  ;;  %823 = vmatpush1.bf16.msra.mxu1 %v822_v24  ;;  %v580_v43 = vadd.f32 1.0, %v878_v38  ;;  %v539_v46 = vadd.f32 %v523_v27, %v1094_v39  ;;  %v594_v48 = vmul.f32 %v578_v35, %v466_v56 }
 0x111   : > { %v581_v45 = vadd.f32 1.0, %v880_v62  ;;  %885 = vtanh.f32 %v550_v50  ;;  %v595_v53 = vmul.f32 %v579_v30, %v467_v25  ;;  %v538_v57 = vadd.f32 %v522_v40, %v1091_v52 }
 0x112   : > { %v596_v49 = vmul.f32 %v580_v43, %v468_v26  ;;  %887 = vtanh.f32 %v552_v36  ;;  %v541_v51 = vadd.f32 %v525_v42, %v1107_v12  ;;  %v555_v55 = vmul.f32 0.7978846, %v539_v46 }
 0x113   : > { %v597_v54 = vmul.f32 %v581_v45, %v469_v44  ;;  %v540_v60 = vadd.f32 %v524_v41, %v1104_v7  ;;  %v554_v2 = vmul.f32 0.7978846, %v538_v57  ;;  %v471_v3 = vmul.f32 0.5, %v1070_v17 }
 0x114   : > { %v826_v58 = vpack.c.bf16 %v596_v49, %v594_v48  ;;  %v557_v59 = vmul.f32 0.7978846, %v541_v51  ;;  %889 = vtanh.f32 %v555_v55  ;;  %v473_v4 = vmul.f32 0.5, %v1082_v28 }
 0x115   : > { %v824_v61 = vpack.c.bf16 %v597_v54, %v595_v53  ;;  %v556_v63 = vmul.f32 0.7978846, %v540_v60  ;;  %v882_v56 = vpop.eup %881  ;;  %v470_v11 = vmul.f32 0.5, %v1066_v13  ;;  %v472_v14 = vmul.f32 0.5, %v1078_v31 }
 0x116   : > { %891 = vtanh.f32 %v557_v59  ;;  %v583_v1 = vadd.f32 1.0, %v882_v56  ;;  %v475_v23 = vmul.f32 0.5, %v1094_v39  ;;  %v477_v24 = vmul.f32 0.5, %v1107_v12  ;;  %v606_v39 = vld [vmem:[%s1154_s3] sm:$0x1] }
 0x117   : > { %825 = vmatprep.subr.bf16.mxu1 %v824_v61  ;;  %893 = vtanh.f32 %v554_v2  ;;  %v474_v13 = vmul.f32 0.5, %v1091_v52  ;;  %v476_v32 = vmul.f32 0.5, %v1104_v7  ;;  %v613_v52 = vlaneseq  ;;  %v611_v7 = vpop.permute.xlu0 %610 }
 0x118   : > { %827 = vmatpush1.bf16.msra.mxu1 %v826_v58  ;;  %895 = vtanh.f32 %v556_v63  ;;  %v884_v0 = vpop.eup %883  ;;  %v599_v8 = vmul.f32 %v583_v1, %v471_v3  ;;  %v923_v40 = vmov 1966171168  }
 0x119   : > { %v585_v5 = vadd.f32 1.0, %v884_v0  ;;  %v614_v12 = vshrl.u32 %v613_v52, 7  ;;  %v696_v30 = vunpack.c.l.s4 %v923_v40  ;;  %vm712_vm2 = vcmp.lt.s32.totalorder %v613_v52, 256 }
 0x11b   : > { %v886_v6 = vpop.eup %885  ;;  %v601_v9 = vmul.f32 %v585_v5, %v473_v4  ;;  %v615_v50 = vsub.s32 0, %v614_v12  ;;  %v697_v62 = vunpack.c.0.s8 %v696_v30 }
 0x11c   : > { %v888_v47 = vpop.eup %887  ;;  %v582_v10 = vadd.f32 1.0, %v886_v6 }
 0x11d   : > { %v584_v15 = vadd.f32 1.0, %v888_v47  ;;  %v828_v16 = vpack.c.bf16 %v601_v9, %v599_v8  ;;  %v616_v41 = vrot.slane %v611_v7, %v615_v50  ;;  %v700_v45 = vsub.s32 %v697_v62, %v614_v12 }
 0x11e   : > { %v890_v18 = vpop.eup %889  ;;  %v598_v19 = vmul.f32 %v582_v10, %v470_v11 }
 0x11f   : > { %v600_v20 = vmul.f32 %v584_v15, %v472_v14  ;;  %829 = vmatprep.subr.bf16.mxu1 %v828_v16  ;;  %v587_v17 = vadd.f32 1.0, %v890_v18 }
 0x120   : > { %v892_v21 = vpop.eup %891 }
 0x121   : > { %v894_v22 = vpop.eup %893  ;;  %v830_v28 = vpack.c.bf16 %v600_v20, %v598_v19  ;;  %v589_v25 = vadd.f32 1.0, %v892_v21  ;;  %v603_v31 = vmul.f32 %v587_v17, %v475_v23 }
 0x122   : > { %v896_v26 = vpop.eup %895  ;;  %v586_v27 = vadd.f32 1.0, %v894_v22 }
 0x123   : > { %831 = vmatpush1.bf16.msra.mxu1 %v830_v28  ;;  %v605_v29 = vmul.f32 %v589_v25, %v477_v24  ;;  %v588_v33 = vadd.f32 1.0, %v896_v26 }
 0x124   : > { %v602_v35 = vmul.f32 %v586_v27, %v474_v13 }
 0x125   : > { %v832_v34 = vpack.c.bf16 %v605_v29, %v603_v31  ;;  %v604_v37 = vmul.f32 %v588_v33, %v476_v32 }
 0x127   : > { %833 = vmatprep.subr.bf16.mxu1 %v832_v34  ;;  %v834_v38 = vpack.c.bf16 %v604_v37, %v602_v35 }
 0x129   : > { %835 = vmatpush1.bf16.msra.mxu1 %v834_v38 }
 0x12c   : > { %812 = vmatmul.mubr.msk.f32.vlgmr.msra.gmra.mrb[0].mxu1 %vm617_vm1, %v606_v39 }
 0x1ff   : > { %v687_v42 = vpop.f32.mrb[0].mxu1 }
 0x200   : > { %v688_v43 = vadd.f32 %v687_v42, %v616_v41  ;;  %v689_v36 = vpop.f32.mrb[1].mxu1 }
 0x201   : > { %v690_v44 = vadd.f32 %v689_v36, %v616_v41 }
 0x203   : > { %v694_v46 = vcombine.low %v688_v43, %v690_v44 }
 0x205   : > { %v701_v48 = vrot.slane %v694_v46, %v700_v45 }
 0x207   : > { %v708_v49 = vrot.slane %v701_v48, %v700_v45 }
 0x209   : > { %714 = vst.msk [vmem:[%s262_s17] sm:$0x3] %vm712_vm2, %v708_v49 }
 0x20a PF: > { %s17_s22 = sadd.s32 1, %s919_s22   ;;  %s1157_s20 = smov %s915_s21 }
 0x20b   : > { %p14_p5 = scmp.ge.s32.totalorder %s17_s22, 4   ;;  %s1158_s21 = smov %s1160_s4 }
 0x20d   :  { %16 = sbr.rel (!%p14_p5) target bundleno = 3 (0x3), region = 70 }

</bundles_post_ra>
